<compile_context>
chip_gen: v7x
topology: tpu7x:2x2x1
jax: 0.10.0
libtpu: 0.0.40
codegen_flags: <defaults>
</compile_context>

<pallas_src>
import jax
import jax.numpy as jnp
import numpy as np
from jax.experimental import pallas as pl
from jax.experimental.pallas import tpu as pltpu

N_OUT_PAD = 128  # lane-dense output block; the 10 logits are lanes 0..9


# ---------------------------------------------------------------------------
# Fused forward kernel: 3 x (matmul + bias + ReLU) + avg-pool matmul.
# Everything for one batch tile is VMEM resident; MXU matmuls with f32
# accumulation, VPU bias/ReLU epilogues.
# ---------------------------------------------------------------------------
def _fused_forward_kernel(x_ref, m1_ref, b1_ref, m2_ref, b2_ref,
                          m3_ref, b3_ref, mp_ref, o_ref):
    x = x_ref[...]                                                    # (TB, 784) bf16

    a1 = jnp.dot(x, m1_ref[...], preferred_element_type=jnp.float32)
    a1 = jnp.maximum(a1 + b1_ref[...], 0.0).astype(jnp.bfloat16)      # (TB, 3136)

    a2 = jnp.dot(a1, m2_ref[...], preferred_element_type=jnp.float32)
    a2 = jnp.maximum(a2 + b2_ref[...], 0.0).astype(jnp.bfloat16)      # (TB, 784)

    a3 = jnp.dot(a2, m3_ref[...], preferred_element_type=jnp.float32)
    a3 = jnp.maximum(a3 + b3_ref[...], 0.0).astype(jnp.bfloat16)      # (TB, 160)

    # Global average pool folded in as a final matmul -> lane-dense output.
    o_ref[...] = jnp.dot(a3, mp_ref[...], preferred_element_type=jnp.float32)


# ---------------------------------------------------------------------------
# Wrapper-side (weight-only) folding of a stride-2 / pad-1 / 3x3 conv into a
# dense matrix acting on flattened NHWC activation vectors.
#   input  vector index: (h  * W  + w ) * Cin  + ci
#   output vector index: (oh * OW + ow) * Cout + co
# ---------------------------------------------------------------------------
def _unrolled_conv(w, b, H, W):
    Cout, Cin, KH, KW = w.shape
    OH = (H + 2 - KH) // 2 + 1
    OW = (W + 2 - KW) // 2 + 1

    oh, ow, ky, kx = np.meshgrid(np.arange(OH), np.arange(OW),
                                 np.arange(KH), np.arange(KW), indexing="ij")
    hh = 2 * oh - 1 + ky            # padding = 1, stride = 2
    ww = 2 * ow - 1 + kx
    valid = (hh >= 0) & (hh < H) & (ww >= 0) & (ww < W)
    oh, ow, ky, kx, hh, ww = (a[valid] for a in (oh, ow, ky, kx, hh, ww))
    P = oh.shape[0]

    in_base = (hh * W + ww) * Cin                                     # (P,)
    out_base = (oh * OW + ow) * Cout                                  # (P,)
    rows = np.broadcast_to(
        in_base[:, None, None] + np.arange(Cin)[None, :, None], (P, Cin, Cout)
    ).reshape(-1)
    cols = np.broadcast_to(
        out_base[:, None, None] + np.arange(Cout)[None, None, :], (P, Cin, Cout)
    ).reshape(-1)

    w_t = jnp.transpose(w, (2, 3, 1, 0))                              # (KH,KW,Cin,Cout)
    vals = w_t[ky, kx].reshape(-1)                                    # (P*Cin*Cout,)

    mat = jnp.zeros((H * W * Cin, OH * OW * Cout), jnp.float32)
    mat = mat.at[rows, cols].set(vals.astype(jnp.float32))
    bias = jnp.tile(b.astype(jnp.float32), OH * OW)                   # (OH*OW*Cout,)
    return mat, bias, OH, OW


def _fold_network(params):
    """Build bf16 unrolled layer matrices, f32 biases, and the pool matrix.

    This is activation-independent weight prep; in a real serving/training
    loop it would be cached once per parameter update.
    """
    m1, b1, oh1, ow1 = _unrolled_conv(params["w1"], params["b1"], 28, 28)   # 784 -> 3136
    m2, b2, oh2, ow2 = _unrolled_conv(params["w2"], params["b2"], oh1, ow1)  # 3136 -> 784
    m3, b3, oh3, ow3 = _unrolled_conv(params["w3"], params["b3"], oh2, ow2)  # 784 -> 160

    cout = params["w3"].shape[0]            # 10
    n_spatial = oh3 * ow3                   # 16 (4x4 map -> F.avg_pool2d(x, 4))
    rows = np.arange(n_spatial * cout)
    cols = rows % cout
    mp = jnp.zeros((n_spatial * cout, N_OUT_PAD), jnp.float32)
    mp = mp.at[rows, cols].set(1.0 / n_spatial)

    cast = lambda a: a.astype(jnp.bfloat16)
    return dict(m1=cast(m1), b1=b1.reshape(1, -1),
                m2=cast(m2), b2=b2.reshape(1, -1),
                m3=cast(m3), b3=b3.reshape(1, -1),
                mp=cast(mp))


def _round_up(x, m):
    return (x + m - 1) // m * m


# ---------------------------------------------------------------------------
# Model: deterministic parameter init + fused forward
# ---------------------------------------------------------------------------
def init_params(key):
    ks = jax.random.split(key, 6)

    def conv_init(kw, kb, cout, cin, kh, kwid):
        fan_in = cin * kh * kwid
        bound = 1.0 / jnp.sqrt(fan_in)
        w = jax.random.uniform(kw, (cout, cin, kh, kwid), jnp.float32, -bound, bound)
        b = jax.random.uniform(kb, (cout,), jnp.float32, -bound, bound)
        return w, b

    w1, b1 = conv_init(ks[0], ks[1], 16, 1, 3, 3)
    w2, b2 = conv_init(ks[2], ks[3], 16, 16, 3, 3)
    w3, b3 = conv_init(ks[4], ks[5], 10, 16, 3, 3)
    return dict(w1=w1, b1=b1, w2=w2, b2=b2, w3=w3, b3=b3)


@jax.jit
def mnist_cnn_forward(params, xb):
    # xb.view(-1, 1, 28, 28): with Cin=1 the flattened (c,h,w) order equals the
    # (h*28 + w) layout that layer-1's unrolled matrix expects.
    x = xb.reshape(-1, 28 * 28)
    B = x.shape[0]

    folded = _fold_network(params)
    k1, n1 = folded["m1"].shape            # 784, 3136
    n2 = folded["m2"].shape[1]             # 784
    n3 = folded["m3"].shape[1]             # 160

    tile_b = min(128, _round_up(B, 8))     # M-tile; 128 rows max keeps VMEM small
    b_pad = _round_up(B, tile_b)

    x = x.astype(jnp.bfloat16)
    if b_pad != B:
        x = jnp.pad(x, ((0, b_pad - B), (0, 0)))

    out = pl.pallas_call(
        _fused_forward_kernel,
        grid=(b_pad // tile_b,),
        in_specs=[
            pl.BlockSpec((tile_b, k1), lambda i: (i, 0)),       # activations
            pl.BlockSpec((k1, n1), lambda i: (0, 0)),           # folded conv1
            pl.BlockSpec((1, n1), lambda i: (0, 0)),
            pl.BlockSpec((n1, n2), lambda i: (0, 0)),           # folded conv2
            pl.BlockSpec((1, n2), lambda i: (0, 0)),
            pl.BlockSpec((n2, n3), lambda i: (0, 0)),           # folded conv3
            pl.BlockSpec((1, n3), lambda i: (0, 0)),
            pl.BlockSpec((n3, N_OUT_PAD), lambda i: (0, 0)),    # avg-pool matrix
        ],
        out_specs=pl.BlockSpec((tile_b, N_OUT_PAD), lambda i: (i, 0)),
        out_shape=jax.ShapeDtypeStruct((b_pad, N_OUT_PAD), jnp.float32),
        compiler_params=pltpu.CompilerParams(
            dimension_semantics=("parallel",),      # shards batch across v7x's 2 TCs
            vmem_limit_bytes=48 * 1024 * 1024,      # > v5e's 16 MiB default, < v7x 64 MiB
        ),
    )(x, folded["m1"], folded["b1"], folded["m2"], folded["b2"],
      folded["m3"], folded["b3"], folded["mp"])

    n_logits = params["w3"].shape[0]
    return out[:B, :n_logits]


# ---------------------------------------------------------------------------
# Pure-JAX reference (mirrors the PyTorch module) for a correctness check.
# ---------------------------------------------------------------------------
def _reference_forward(params, xb):
    x = xb.reshape(-1, 1, 28, 28).astype(jnp.float32)

    def conv_relu(x, w, b):
        y = jax.lax.conv_general_dilated(
            x, w, window_strides=(2, 2), padding=((1, 1), (1, 1)),
            dimension_numbers=("NCHW", "OIHW", "NCHW"))
        return jax.nn.relu(y + b[None, :, None, None])

    x = conv_relu(x, params["w1"], params["b1"])
    x = conv_relu(x, params["w2"], params["b2"])
    x = conv_relu(x, params["w3"], params["b3"])
    return jnp.mean(x, axis=(2, 3))   # == F.avg_pool2d(x, 4).view(-1, 10) on a 4x4 map


if __name__ == "__main__":
    key = jax.random.PRNGKey(0)
    x = jax.random.normal(key, (2, 784), dtype=jnp.float32)

    params = init_params(jax.random.PRNGKey(42))
    out = mnist_cnn_forward(params, x)
    out = jax.block_until_ready(out)

    assert out.shape == (2, 10), out.shape
    assert out.dtype == jnp.float32
    assert bool(jnp.all(jnp.isfinite(out)))

    ref = _reference_forward(params, x)
    max_err = float(jnp.max(jnp.abs(out - ref)))
    assert max_err < 2e-2, f"max abs error vs reference: {max_err}"

    print("KERNEL_OK")
</pallas_src>

<mosaic_0001>
module attributes {stable_mosaic.version = 11 : i64} {
  func.func @_fused_forward_kernel(%arg0: i32, %arg1: memref<8x784xbf16, #tpu.memory_space<vmem>>, %arg2: memref<784x3136xbf16, #tpu.memory_space<vmem>>, %arg3: memref<1x3136xf32, #tpu.memory_space<vmem>>, %arg4: memref<3136x784xbf16, #tpu.memory_space<vmem>>, %arg5: memref<1x784xf32, #tpu.memory_space<vmem>>, %arg6: memref<784x160xbf16, #tpu.memory_space<vmem>>, %arg7: memref<1x160xf32, #tpu.memory_space<vmem>>, %arg8: memref<160x128xbf16, #tpu.memory_space<vmem>>, %arg9: memref<8x128xf32, #tpu.memory_space<vmem>>) attributes {dimension_semantics = [#tpu.dimension_semantics<parallel>], iteration_bounds = array<i64: 1>, scalar_prefetch = 0 : i64, scratch_operands = 0 : i64, tpu.core_type = #tpu.core_type<tc>, window_params = [{transform_indices = @transform_0, window_bounds = array<i64: 8, 784>}, {pipeline_mode = #tpu.pipeline_mode<synchronous>, transform_indices = @transform_1, window_bounds = array<i64: 784, 3136>}, {pipeline_mode = #tpu.pipeline_mode<synchronous>, transform_indices = @transform_2, window_bounds = array<i64: 1, 3136>}, {pipeline_mode = #tpu.pipeline_mode<synchronous>, transform_indices = @transform_3, window_bounds = array<i64: 3136, 784>}, {pipeline_mode = #tpu.pipeline_mode<synchronous>, transform_indices = @transform_4, window_bounds = array<i64: 1, 784>}, {pipeline_mode = #tpu.pipeline_mode<synchronous>, transform_indices = @transform_5, window_bounds = array<i64: 784, 160>}, {pipeline_mode = #tpu.pipeline_mode<synchronous>, transform_indices = @transform_6, window_bounds = array<i64: 1, 160>}, {pipeline_mode = #tpu.pipeline_mode<synchronous>, transform_indices = @transform_7, window_bounds = array<i64: 160, 128>}, {transform_indices = @transform_8, window_bounds = array<i64: 8, 128>}]} {
    %c0 = arith.constant 0 : index
    %c0_0 = arith.constant 0 : index
    %0 = vector.load %arg1[%c0, %c0_0] : memref<8x784xbf16, #tpu.memory_space<vmem>>, vector<8x784xbf16>
    %c0_1 = arith.constant 0 : index
    %c0_2 = arith.constant 0 : index
    %1 = vector.load %arg2[%c0_1, %c0_2] : memref<784x3136xbf16, #tpu.memory_space<vmem>>, vector<784x3136xbf16>
    %cst = arith.constant dense<0.000000e+00> : vector<8x3136xf32>
    %2 = tpu.matmul %0, %1, %cst {dimension_numbers = #tpu.dot_dimension_numbers<[1], [0], [0], [1], [0, 0, 1, 1], [], []>} : vector<8x784xbf16>, vector<784x3136xbf16>, vector<8x3136xf32> -> vector<8x3136xf32>
    %c0_3 = arith.constant 0 : index
    %c0_4 = arith.constant 0 : index
    %3 = vector.load %arg3[%c0_3, %c0_4] : memref<1x3136xf32, #tpu.memory_space<vmem>>, vector<1x3136xf32>
    %4 = vector.broadcast %3 : vector<1x3136xf32> to vector<8x3136xf32>
    %5 = arith.addf %2, %4 : vector<8x3136xf32>
    %cst_5 = arith.constant 0.000000e+00 : f32
    %6 = vector.broadcast %cst_5 : f32 to vector<8x3136xf32>
    %7 = arith.maximumf %5, %6 : vector<8x3136xf32>
    %8 = arith.truncf %7 : vector<8x3136xf32> to vector<8x3136xbf16>
    %c0_6 = arith.constant 0 : index
    %c0_7 = arith.constant 0 : index
    %9 = vector.load %arg4[%c0_6, %c0_7] : memref<3136x784xbf16, #tpu.memory_space<vmem>>, vector<3136x784xbf16>
    %cst_8 = arith.constant dense<0.000000e+00> : vector<8x784xf32>
    %10 = tpu.matmul %8, %9, %cst_8 {dimension_numbers = #tpu.dot_dimension_numbers<[1], [0], [0], [1], [0, 0, 1, 1], [], []>} : vector<8x3136xbf16>, vector<3136x784xbf16>, vector<8x784xf32> -> vector<8x784xf32>
    %c0_9 = arith.constant 0 : index
    %c0_10 = arith.constant 0 : index
    %11 = vector.load %arg5[%c0_9, %c0_10] : memref<1x784xf32, #tpu.memory_space<vmem>>, vector<1x784xf32>
    %12 = vector.broadcast %11 : vector<1x784xf32> to vector<8x784xf32>
    %13 = arith.addf %10, %12 : vector<8x784xf32>
    %cst_11 = arith.constant 0.000000e+00 : f32
    %14 = vector.broadcast %cst_11 : f32 to vector<8x784xf32>
    %15 = arith.maximumf %13, %14 : vector<8x784xf32>
    %16 = arith.truncf %15 : vector<8x784xf32> to vector<8x784xbf16>
    %c0_12 = arith.constant 0 : index
    %c0_13 = arith.constant 0 : index
    %17 = vector.load %arg6[%c0_12, %c0_13] : memref<784x160xbf16, #tpu.memory_space<vmem>>, vector<784x160xbf16>
    %cst_14 = arith.constant dense<0.000000e+00> : vector<8x160xf32>
    %18 = tpu.matmul %16, %17, %cst_14 {dimension_numbers = #tpu.dot_dimension_numbers<[1], [0], [0], [1], [0, 0, 1, 1], [], []>} : vector<8x784xbf16>, vector<784x160xbf16>, vector<8x160xf32> -> vector<8x160xf32>
    %c0_15 = arith.constant 0 : index
    %c0_16 = arith.constant 0 : index
    %19 = vector.load %arg7[%c0_15, %c0_16] : memref<1x160xf32, #tpu.memory_space<vmem>>, vector<1x160xf32>
    %20 = vector.broadcast %19 : vector<1x160xf32> to vector<8x160xf32>
    %21 = arith.addf %18, %20 : vector<8x160xf32>
    %cst_17 = arith.constant 0.000000e+00 : f32
    %22 = vector.broadcast %cst_17 : f32 to vector<8x160xf32>
    %23 = arith.maximumf %21, %22 : vector<8x160xf32>
    %24 = arith.truncf %23 : vector<8x160xf32> to vector<8x160xbf16>
    %c0_18 = arith.constant 0 : index
    %c0_19 = arith.constant 0 : index
    %25 = vector.load %arg8[%c0_18, %c0_19] : memref<160x128xbf16, #tpu.memory_space<vmem>>, vector<160x128xbf16>
    %cst_20 = arith.constant dense<0.000000e+00> : vector<8x128xf32>
    %26 = tpu.matmul %24, %25, %cst_20 {dimension_numbers = #tpu.dot_dimension_numbers<[1], [0], [0], [1], [0, 0, 1, 1], [], []>} : vector<8x160xbf16>, vector<160x128xbf16>, vector<8x128xf32> -> vector<8x128xf32>
    %c0_21 = arith.constant 0 : index
    %c0_22 = arith.constant 0 : index
    %27 = vector.load %arg9[%c0_21, %c0_22] : memref<8x128xf32, #tpu.memory_space<vmem>>, vector<8x128xf32>
    tpu.vector_store %arg9[%c0_21, %c0_22], %26 {strides = array<i32>} : memref<8x128xf32, #tpu.memory_space<vmem>>, vector<8x128xf32>,
    return
  }
  func.func @transform_0(%arg0: i32) -> (i32, i32) {
    %c0_i32 = arith.constant 0 : i32
    %c0_i32_0 = arith.constant 0 : i32
    return %arg0, %c0_i32 : i32, i32
  }
  func.func @transform_1(%arg0: i32) -> (i32, i32) {
    %c0_i32 = arith.constant 0 : i32
    %c0_i32_0 = arith.constant 0 : i32
    %c0_i32_1 = arith.constant 0 : i32
    return %c0_i32, %c0_i32_0 : i32, i32
  }
  func.func @transform_2(%arg0: i32) -> (i32, i32) {
    %c0_i32 = arith.constant 0 : i32
    %c0_i32_0 = arith.constant 0 : i32
    %c0_i32_1 = arith.constant 0 : i32
    return %c0_i32, %c0_i32_0 : i32, i32
  }
  func.func @transform_3(%arg0: i32) -> (i32, i32) {
    %c0_i32 = arith.constant 0 : i32
    %c0_i32_0 = arith.constant 0 : i32
    %c0_i32_1 = arith.constant 0 : i32
    return %c0_i32, %c0_i32_0 : i32, i32
  }
  func.func @transform_4(%arg0: i32) -> (i32, i32) {
    %c0_i32 = arith.constant 0 : i32
    %c0_i32_0 = arith.constant 0 : i32
    %c0_i32_1 = arith.constant 0 : i32
    return %c0_i32, %c0_i32_0 : i32, i32
  }
  func.func @transform_5(%arg0: i32) -> (i32, i32) {
    %c0_i32 = arith.constant 0 : i32
    %c0_i32_0 = arith.constant 0 : i32
    %c0_i32_1 = arith.constant 0 : i32
    return %c0_i32, %c0_i32_0 : i32, i32
  }
  func.func @transform_6(%arg0: i32) -> (i32, i32) {
    %c0_i32 = arith.constant 0 : i32
    %c0_i32_0 = arith.constant 0 : i32
    %c0_i32_1 = arith.constant 0 : i32
    return %c0_i32, %c0_i32_0 : i32, i32
  }
  func.func @transform_7(%arg0: i32) -> (i32, i32) {
    %c0_i32 = arith.constant 0 : i32
    %c0_i32_0 = arith.constant 0 : i32
    %c0_i32_1 = arith.constant 0 : i32
    return %c0_i32, %c0_i32_0 : i32, i32
  }
  func.func @transform_8(%arg0: i32) -> (i32, i32) {
    %c0_i32 = arith.constant 0 : i32
    %c0_i32_0 = arith.constant 0 : i32
    return %arg0, %c0_i32 : i32, i32
  }
}

</mosaic_0001>

<bundles_post_ra>
// kernel: tile.18
= control target key start
LH: loop header
LB: loop body
LE: loop exit
PB: predicated region body
PF: predicated region fallthrough
CT: control target
= control target key end

     0   :  { %s166_s0 = inlined_call_operand.vmem [shape: f32[16], index: 0, kind: input, shape index: {}]   ;;  %s167_s1 = inlined_call_operand.vmem [shape: f32[196,16], index: 1, kind: output, shape index: {}]  }
   0x1   :  { %v4_v0 = vld [vmem:[%s166_s0] ss:$0 sm:$0xff] }
   0x2   :  { %5 = vst [vmem:[%s167_s1] sm:$0xff] %v4_v0  ;;  %54 = vst [vmem:[%s167_s1 + $0x8] sm:$0xff] %v4_v0 }
   0x3   :  { %55 = vst [vmem:[%s167_s1 + $0x10] sm:$0xff] %v4_v0  ;;  %56 = vst [vmem:[%s167_s1 + $0x18] sm:$0xff] %v4_v0 }
   0x4   :  { %57 = vst [vmem:[%s167_s1 + $0x20] sm:$0xff] %v4_v0  ;;  %58 = vst [vmem:[%s167_s1 + $0x28] sm:$0xff] %v4_v0 }
   0x5   :  { %59 = vst [vmem:[%s167_s1 + $0x30] sm:$0xff] %v4_v0  ;;  %60 = vst [vmem:[%s167_s1 + $0x38] sm:$0xff] %v4_v0 }
   0x6   :  { %61 = vst [vmem:[%s167_s1 + $0x40] sm:$0xff] %v4_v0  ;;  %62 = vst [vmem:[%s167_s1 + $0x48] sm:$0xff] %v4_v0 }
   0x7   :  { %63 = vst [vmem:[%s167_s1 + $0x50] sm:$0xff] %v4_v0  ;;  %64 = vst [vmem:[%s167_s1 + $0x58] sm:$0xff] %v4_v0 }
   0x8   :  { %65 = vst [vmem:[%s167_s1 + $0x60] sm:$0xff] %v4_v0  ;;  %66 = vst [vmem:[%s167_s1 + $0x68] sm:$0xff] %v4_v0 }
   0x9   :  { %67 = vst [vmem:[%s167_s1 + $0x70] sm:$0xff] %v4_v0  ;;  %68 = vst [vmem:[%s167_s1 + $0x78] sm:$0xff] %v4_v0 }
   0xa   :  { %69 = vst [vmem:[%s167_s1 + $0x80] sm:$0xff] %v4_v0  ;;  %70 = vst [vmem:[%s167_s1 + $0x88] sm:$0xff] %v4_v0 }
   0xb   :  { %71 = vst [vmem:[%s167_s1 + $0x90] sm:$0xff] %v4_v0  ;;  %72 = vst [vmem:[%s167_s1 + $0x98] sm:$0xff] %v4_v0 }
   0xc   :  { %73 = vst [vmem:[%s167_s1 + $0xa0] sm:$0xff] %v4_v0  ;;  %74 = vst [vmem:[%s167_s1 + $0xa8] sm:$0xff] %v4_v0 }
   0xd   :  { %75 = vst [vmem:[%s167_s1 + $0xb0] sm:$0xff] %v4_v0  ;;  %76 = vst [vmem:[%s167_s1 + $0xb8] sm:$0xff] %v4_v0 }
   0xe   :  { %77 = vst [vmem:[%s167_s1 + $0xc0] sm:$0xff] %v4_v0 }

// kernel: tile.27
= control target key start
LH: loop header
LB: loop body
LE: loop exit
PB: predicated region body
PF: predicated region fallthrough
CT: control target
= control target key end

     0   :  { %vm4_vm0 = vcmask 1047556   ;;  %s569_s16 = smov 112   ;;  %s570_s2 = smov 96   ;;  %vm6_vm1 = vcmask 130048   ;;  %vm44_vm2 = vcmask 1048448   ;;  %vm81_vm3 = vcmask 917248   ;;  %s848_s0 = inlined_call_operand.vmem [shape: f32[196,16], index: 0, kind: input, shape index: {}]   ;;  %s849_s1 = inlined_call_operand.vmem [shape: f32[1,3136], index: 1, kind: output, shape index: {}]  }
   0x1   :  { %v497_v0 = vld [vmem:[%s848_s0 + $0x87] ss:$8 sm:$0xf]   ;;  %v499_v5 = vld [vmem:[%s848_s0 + $0x6] ss:$8 sm:$0xf]  }
   0x2   :  { %v498_v1 = vld [vmem:[%s848_s0 + $0x87] ss:$8 sm:$0xf0]   ;;  %v500_v7 = vld [vmem:[%s848_s0 + $0x6] ss:$8 sm:$0xf0]  }
   0x3   :  { %v493_v2 = vld [vmem:[%s848_s0 + $0x7] ss:$8 sm:$0xf]   ;;  %v65_v3 = vsel %vm4_vm0, %v498_v1, %v497_v0  ;;  %v78_v9 = vsel %vm4_vm0, %v500_v7, %v499_v5  ;;  %v503_v12 = vld [vmem:[%s848_s0 + $0x86] ss:$8 sm:$0xf]  }
   0x4   :  { %v494_v4 = vld [vmem:[%s848_s0 + $0x7] ss:$8 sm:$0xf0]   ;;  %66 = vrot.lane.b32.xlu1 %v65_v3, %s569_s16  ;;  %v504_v13 = vld [vmem:[%s848_s0 + $0x86] ss:$8 sm:$0xf0]  }
   0x5   :  { %v41_v6 = vsel %vm4_vm0, %v494_v4, %v493_v2  ;;  %v495_v8 = vld [vmem:[%s848_s0 + $0x47] ss:$8 sm:$0xf]   ;;  %v501_v14 = vld [vmem:[%s848_s0 + $0x46] ss:$8 sm:$0xf]   ;;  %v102_v16 = vsel %vm4_vm0, %v504_v13, %v503_v12 }
   0x6   :  { %42 = vrot.lane.b32.xlu0 %v41_v6, %s569_s16  ;;  %v496_v10 = vld [vmem:[%s848_s0 + $0x47] ss:$8 sm:$0xf0]   ;;  %v502_v15 = vld [vmem:[%s848_s0 + $0x46] ss:$8 sm:$0xf0]  }
   0x7   :  { %v52_v11 = vsel %vm4_vm0, %v496_v10, %v495_v8  ;;  %v89_v17 = vsel %vm4_vm0, %v502_v15, %v501_v14  ;;  %v507_v18 = vld [vmem:[%s848_s0 + $0x45] ss:$8 sm:$0xf]   ;;  %v511_v24 = vld [vmem:[%s848_s0 + $0x4] ss:$8 sm:$0xf]  }
   0x8   :  { %79 = vrot.lane.b32.xlu1 %v78_v9, %s570_s2  ;;  %v508_v19 = vld [vmem:[%s848_s0 + $0x45] ss:$8 sm:$0xf0]   ;;  %v512_v25 = vld [vmem:[%s848_s0 + $0x4] ss:$8 sm:$0xf0]  }
   0x9   :  { %v505_v20 = vld [vmem:[%s848_s0 + $0x5] ss:$8 sm:$0xf]   ;;  %v126_v22 = vsel %vm4_vm0, %v508_v19, %v507_v18  ;;  %s571_s19 = smov 80   ;;  %v152_v28 = vsel %vm4_vm0, %v512_v25, %v511_v24  ;;  %s572_s28 = smov 64   ;;  %vm118_vm4 = vcmask 786048  }
   0xa   :  { %53 = vrot.lane.b32.xlu0 %v52_v11, %s569_s16  ;;  %v506_v21 = vld [vmem:[%s848_s0 + $0x5] ss:$8 sm:$0xf0]   ;;  %v515_v30 = vld [vmem:[%s848_s0 + $0x84] ss:$8 sm:$0xf]  }
   0xb   :  { %v115_v23 = vsel %vm4_vm0, %v506_v21, %v505_v20  ;;  %v509_v26 = vld [vmem:[%s848_s0 + $0x85] ss:$8 sm:$0xf]   ;;  %v516_v31 = vld [vmem:[%s848_s0 + $0x84] ss:$8 sm:$0xf0]  }
   0xc   :  { %103 = vrot.lane.b32.xlu1 %v102_v16, %s570_s2  ;;  %v510_v27 = vld [vmem:[%s848_s0 + $0x85] ss:$8 sm:$0xf0]   ;;  %v513_v32 = vld [vmem:[%s848_s0 + $0x44] ss:$8 sm:$0xf]   ;;  %v176_v34 = vsel %vm4_vm0, %v516_v31, %v515_v30 }
   0xd   :  { %v139_v29 = vsel %vm4_vm0, %v510_v27, %v509_v26  ;;  %v514_v33 = vld [vmem:[%s848_s0 + $0x44] ss:$8 sm:$0xf0]   ;;  %v519_v36 = vld [vmem:[%s848_s0 + $0x43] ss:$8 sm:$0xf]  }
   0xe   :  { %90 = vrot.lane.b32.xlu0 %v89_v17, %s570_s2  ;;  %v163_v35 = vsel %vm4_vm0, %v514_v33, %v513_v32  ;;  %v520_v37 = vld [vmem:[%s848_s0 + $0x43] ss:$8 sm:$0xf0]   ;;  %v490_v40 = vld [vmem:[%s848_s0 + $0x80] ss:$8 sm:$0xf]  }
   0xf   :  { %v517_v38 = vld [vmem:[%s848_s0 + $0x3] ss:$8 sm:$0xf]   ;;  %v200_v41 = vsel %vm4_vm0, %v520_v37, %v519_v36  ;;  %v491_v44 = vld [vmem:[%s848_s0 + $0x80] ss:$8 sm:$0xf0]  }
  0x10   :  { %127 = vrot.lane.b32.xlu1 %v126_v22, %s571_s19  ;;  %v518_v39 = vld [vmem:[%s848_s0 + $0x3] ss:$8 sm:$0xf0]   ;;  %v25_v46 = vsel %vm4_vm0, %v491_v44, %v490_v40  ;;  %v2_v47 = vld [vmem:[%s848_s0] ss:$8 sm:$0xf]  }
  0x11   :  { %v521_v42 = vld [vmem:[%s848_s0 + $0x83] ss:$8 sm:$0xf]   ;;  %v189_v45 = vsel %vm4_vm0, %v518_v39, %v517_v38  ;;  %v3_v48 = vld [vmem:[%s848_s0] ss:$8 sm:$0xf0]  }
  0x12   :  { %116 = vrot.lane.b32.xlu0 %v115_v23, %s571_s19  ;;  %v522_v43 = vld [vmem:[%s848_s0 + $0x83] ss:$8 sm:$0xf0]   ;;  %28 = vst.msk [vmem:[#allocation0 + $0x80] ss:$8 sm:$0xf] %vm6_vm1, %v25_v46   ;;  %v5_v49 = vsel %vm4_vm0, %v3_v48, %v2_v47 }
  0x13   :  { %30 = vst.msk [vmem:[#allocation0 + $0x80] ss:$8 sm:$0xf0] %vm6_vm1, %v25_v46   ;;  %v488_v50 = vld [vmem:[%s848_s0 + $0x40] ss:$8 sm:$0xf]   ;;  %v213_v55 = vsel %vm4_vm0, %v522_v43, %v521_v42 }
  0x14   :  { %153 = vrot.lane.b32.xlu1 %v152_v28, %s572_s28  ;;  %v489_v51 = vld [vmem:[%s848_s0 + $0x40] ss:$8 sm:$0xf0]   ;;  %s573_s24 = smov 48   ;;  %v523_v54 = vld [vmem:[%s848_s0 + $0xc3] sm:$0x1]  }
  0x15   :  { %7 = vst.msk [vmem:[#allocation0] ss:$8 sm:$0xf] %vm6_vm1, %v5_v49   ;;  %8 = vst.msk [vmem:[#allocation0] ss:$8 sm:$0xf0] %vm6_vm1, %v5_v49   ;;  %v14_v52 = vsel %vm4_vm0, %v489_v51, %v488_v50 }
  0x16   :  { %140 = vrot.lane.b32.xlu0 %v139_v29, %s571_s19  ;;  %v492_v53 = vld [vmem:[%s848_s0 + $0xc0] sm:$0x1]   ;;  %17 = vst.msk [vmem:[#allocation0 + $0x40] ss:$8 sm:$0xf] %vm6_vm1, %v14_v52   ;;  %s574_s12 = smov 32  }
  0x17   :  { %19 = vst.msk [vmem:[#allocation0 + $0x40] ss:$8 sm:$0xf0] %vm6_vm1, %v14_v52   ;;  %35 = vst.msk [vmem:[#allocation0 + $0xc0] sm:$0x1] %vm6_vm1, %v492_v53   ;;  %s575_s27 = smov 16  }
  0x18   :  { %177 = vrot.lane.b32.xlu1 %v176_v34, %s572_s28  ;;  %v526_v56 = vld [vmem:[%s848_s0 + $0x42] ss:$8 sm:$0xf]   ;;  %v533_v2 = vld [vmem:[%s848_s0 + $0x41] ss:$8 sm:$0xf]  }
  0x19   :  { %v527_v57 = vld [vmem:[%s848_s0 + $0x42] ss:$8 sm:$0xf0]   ;;  %v534_v3 = vld [vmem:[%s848_s0 + $0x41] ss:$8 sm:$0xf0]  }
  0x1a   :  { %164 = vrot.lane.b32.xlu0 %v163_v35, %s572_s28  ;;  %v524_v58 = vld [vmem:[%s848_s0 + $0x2] ss:$8 sm:$0xf]   ;;  %v244_v60 = vsel %vm4_vm0, %v527_v57, %v526_v56  ;;  %v531_v4 = vld [vmem:[%s848_s0 + $0x1] ss:$8 sm:$0xf]   ;;  %v288_v6 = vsel %vm4_vm0, %v534_v3, %v533_v2 }
  0x1b   :  { %v525_v59 = vld [vmem:[%s848_s0 + $0x2] ss:$8 sm:$0xf0]   ;;  %v532_v5 = vld [vmem:[%s848_s0 + $0x1] ss:$8 sm:$0xf0]  }
  0x1c   :  { %201 = vrot.lane.b32.xlu1 %v200_v41, %s573_s24  ;;  %v233_v61 = vsel %vm4_vm0, %v525_v59, %v524_v58  ;;  %v528_v62 = vld [vmem:[%s848_s0 + $0x82] ss:$8 sm:$0xf]   ;;  %v277_v7 = vsel %vm4_vm0, %v532_v5, %v531_v4  ;;  %v535_v8 = vld [vmem:[%s848_s0 + $0x81] ss:$8 sm:$0xf]  }
  0x1d   :  { %v529_v63 = vld [vmem:[%s848_s0 + $0x82] ss:$8 sm:$0xf0]   ;;  %v536_v9 = vld [vmem:[%s848_s0 + $0x81] ss:$8 sm:$0xf0]  }
  0x1e   :  { %190 = vrot.lane.b32.xlu0 %v189_v45, %s573_s24  ;;  %v530_v0 = vld [vmem:[%s848_s0 + $0xc2] sm:$0x1]   ;;  %v257_v1 = vsel %vm4_vm0, %v529_v63, %v528_v62  ;;  %v537_v10 = vld [vmem:[%s848_s0 + $0xc1] sm:$0x1]   ;;  %v301_v11 = vsel %vm4_vm0, %v536_v9, %v535_v8  ;;  %vm155_vm5 = vcmask 654848   ;;  %vm192_vm6 = vcmask 523648  }
  0x1f   :  { %vm236_vm7 = vcmask 392448   ;;  %vm280_vm8 = vcmask 261248  }
  0x20   :  { %223 = vrot.lane.b32.xlu1 %v523_v54, %s573_s24 }
  0x22   :  { %214 = vrot.lane.b32.xlu0 %v213_v55, %s573_s24 }
  0x24   :  { %245 = vrot.lane.b32.xlu1 %v244_v60, %s574_s12 }
  0x26   :  { %234 = vrot.lane.b32.xlu0 %v233_v61, %s574_s12 }
  0x28   :  { %267 = vrot.lane.b32.xlu1 %v530_v0, %s574_s12 }
  0x2a   :  { %258 = vrot.lane.b32.xlu0 %v257_v1, %s574_s12 }
  0x2c   :  { %289 = vrot.lane.b32.xlu1 %v288_v6, %s575_s27 }
  0x2e   :  { %278 = vrot.lane.b32.xlu0 %v277_v7, %s575_s27 }
  0x30   :  { %311 = vrot.lane.b32.xlu1 %v537_v10, %s575_s27 }
  0x32   :  { %302 = vrot.lane.b32.xlu0 %v301_v11, %s575_s27 }
  0x76   :  { %v67_v12 = vpop.permute.xlu1 %66  }
  0x77   :  { %70 = vst.msk [vmem:[#allocation0 + $0x80] ss:$8 sm:$0xf] %vm44_vm2, %v67_v12   ;;  %72 = vst.msk [vmem:[#allocation0 + $0x80] ss:$8 sm:$0xf0] %vm44_vm2, %v67_v12  }
  0x78   :  { %v43_v13 = vpop.permute.xlu0 %42  }
  0x79   :  { %45 = vst.msk [vmem:[#allocation0] ss:$8 sm:$0xf] %vm44_vm2, %v43_v13   ;;  %46 = vst.msk [vmem:[#allocation0] ss:$8 sm:$0xf0] %vm44_vm2, %v43_v13  }
  0x7a   :  { %v80_v14 = vpop.permute.xlu1 %79  }
  0x7b   :  { %82 = vst.msk [vmem:[#allocation0] ss:$8 sm:$0xf] %vm81_vm3, %v80_v14   ;;  %83 = vst.msk [vmem:[#allocation0] ss:$8 sm:$0xf0] %vm81_vm3, %v80_v14  }
  0x7c   :  { %v54_v15 = vpop.permute.xlu0 %53  }
  0x7d   :  { %57 = vst.msk [vmem:[#allocation0 + $0x40] ss:$8 sm:$0xf] %vm44_vm2, %v54_v15   ;;  %59 = vst.msk [vmem:[#allocation0 + $0x40] ss:$8 sm:$0xf0] %vm44_vm2, %v54_v15  }
  0x7e   :  { %v104_v16 = vpop.permute.xlu1 %103  }
  0x7f   :  { %107 = vst.msk [vmem:[#allocation0 + $0x80] ss:$8 sm:$0xf] %vm81_vm3, %v104_v16   ;;  %109 = vst.msk [vmem:[#allocation0 + $0x80] ss:$8 sm:$0xf0] %vm81_vm3, %v104_v16  }
  0x80   :  { %v91_v17 = vpop.permute.xlu0 %90  }
  0x81   :  { %94 = vst.msk [vmem:[#allocation0 + $0x40] ss:$8 sm:$0xf] %vm81_vm3, %v91_v17   ;;  %96 = vst.msk [vmem:[#allocation0 + $0x40] ss:$8 sm:$0xf0] %vm81_vm3, %v91_v17  }
  0x82   :  { %v128_v18 = vpop.permute.xlu1 %127  }
  0x83   :  { %131 = vst.msk [vmem:[#allocation0 + $0x40] ss:$8 sm:$0xf] %vm118_vm4, %v128_v18   ;;  %133 = vst.msk [vmem:[#allocation0 + $0x40] ss:$8 sm:$0xf0] %vm118_vm4, %v128_v18  }
  0x84   :  { %v117_v19 = vpop.permute.xlu0 %116  }
  0x85   :  { %119 = vst.msk [vmem:[#allocation0] ss:$8 sm:$0xf] %vm118_vm4, %v117_v19   ;;  %120 = vst.msk [vmem:[#allocation0] ss:$8 sm:$0xf0] %vm118_vm4, %v117_v19  }
  0x86   :  { %v154_v20 = vpop.permute.xlu1 %153  }
  0x87   :  { %156 = vst.msk [vmem:[#allocation0] ss:$8 sm:$0xf] %vm155_vm5, %v154_v20   ;;  %157 = vst.msk [vmem:[#allocation0] ss:$8 sm:$0xf0] %vm155_vm5, %v154_v20  }
  0x88   :  { %v141_v21 = vpop.permute.xlu0 %140  }
  0x89   :  { %144 = vst.msk [vmem:[#allocation0 + $0x80] ss:$8 sm:$0xf] %vm118_vm4, %v141_v21   ;;  %146 = vst.msk [vmem:[#allocation0 + $0x80] ss:$8 sm:$0xf0] %vm118_vm4, %v141_v21  }
  0x8a   :  { %v178_v22 = vpop.permute.xlu1 %177  }
  0x8b   :  { %181 = vst.msk [vmem:[#allocation0 + $0x80] ss:$8 sm:$0xf] %vm155_vm5, %v178_v22   ;;  %183 = vst.msk [vmem:[#allocation0 + $0x80] ss:$8 sm:$0xf0] %vm155_vm5, %v178_v22  }
  0x8c   :  { %v165_v23 = vpop.permute.xlu0 %164  }
  0x8d   :  { %168 = vst.msk [vmem:[#allocation0 + $0x40] ss:$8 sm:$0xf] %vm155_vm5, %v165_v23   ;;  %170 = vst.msk [vmem:[#allocation0 + $0x40] ss:$8 sm:$0xf0] %vm155_vm5, %v165_v23  }
  0x8e   :  { %v202_v24 = vpop.permute.xlu1 %201  }
  0x8f   :  { %205 = vst.msk [vmem:[#allocation0 + $0x40] ss:$8 sm:$0xf] %vm192_vm6, %v202_v24   ;;  %207 = vst.msk [vmem:[#allocation0 + $0x40] ss:$8 sm:$0xf0] %vm192_vm6, %v202_v24  }
  0x90   :  { %v191_v25 = vpop.permute.xlu0 %190  }
  0x91   :  { %193 = vst.msk [vmem:[#allocation0] ss:$8 sm:$0xf] %vm192_vm6, %v191_v25   ;;  %194 = vst.msk [vmem:[#allocation0] ss:$8 sm:$0xf0] %vm192_vm6, %v191_v25  }
  0x92   :  { %v224_v26 = vpop.permute.xlu1 %223  }
  0x93   :  { %227 = vst.msk [vmem:[#allocation0 + $0xc0] sm:$0x1] %vm192_vm6, %v224_v26  }
  0x94   :  { %v215_v27 = vpop.permute.xlu0 %214  }
  0x95   :  { %218 = vst.msk [vmem:[#allocation0 + $0x80] ss:$8 sm:$0xf] %vm192_vm6, %v215_v27   ;;  %220 = vst.msk [vmem:[#allocation0 + $0x80] ss:$8 sm:$0xf0] %vm192_vm6, %v215_v27  }
  0x96   :  { %v246_v28 = vpop.permute.xlu1 %245  }
  0x97   :  { %249 = vst.msk [vmem:[#allocation0 + $0x40] ss:$8 sm:$0xf] %vm236_vm7, %v246_v28   ;;  %251 = vst.msk [vmem:[#allocation0 + $0x40] ss:$8 sm:$0xf0] %vm236_vm7, %v246_v28  }
  0x98   :  { %v235_v29 = vpop.permute.xlu0 %234  }
  0x99   :  { %237 = vst.msk [vmem:[#allocation0] ss:$8 sm:$0xf] %vm236_vm7, %v235_v29   ;;  %238 = vst.msk [vmem:[#allocation0] ss:$8 sm:$0xf0] %vm236_vm7, %v235_v29  }
  0x9a   :  { %v268_v30 = vpop.permute.xlu1 %267  }
  0x9b   :  { %271 = vst.msk [vmem:[#allocation0 + $0xc0] sm:$0x1] %vm236_vm7, %v268_v30  }
  0x9c   :  { %v259_v31 = vpop.permute.xlu0 %258  }
  0x9d   :  { %262 = vst.msk [vmem:[#allocation0 + $0x80] ss:$8 sm:$0xf] %vm236_vm7, %v259_v31   ;;  %264 = vst.msk [vmem:[#allocation0 + $0x80] ss:$8 sm:$0xf0] %vm236_vm7, %v259_v31  }
  0x9e   :  { %v290_v32 = vpop.permute.xlu1 %289  }
  0x9f   :  { %293 = vst.msk [vmem:[#allocation0 + $0x40] ss:$8 sm:$0xf] %vm280_vm8, %v290_v32   ;;  %295 = vst.msk [vmem:[#allocation0 + $0x40] ss:$8 sm:$0xf0] %vm280_vm8, %v290_v32  }
  0xa0   :  { %v279_v33 = vpop.permute.xlu0 %278  }
  0xa1   :  { %281 = vst.msk [vmem:[#allocation0] ss:$8 sm:$0xf] %vm280_vm8, %v279_v33   ;;  %282 = vst.msk [vmem:[#allocation0] ss:$8 sm:$0xf0] %vm280_vm8, %v279_v33  }
  0xa2   :  { %v312_v34 = vpop.permute.xlu1 %311  }
  0xa3   :  { %315 = vst.msk [vmem:[#allocation0 + $0xc0] sm:$0x1] %vm280_vm8, %v312_v34  }
  0xa4   :  { %v303_v35 = vpop.permute.xlu0 %302  }
  0xa5   :  { %306 = vst.msk [vmem:[#allocation0 + $0x80] ss:$8 sm:$0xf] %vm280_vm8, %v303_v35   ;;  %308 = vst.msk [vmem:[#allocation0 + $0x80] ss:$8 sm:$0xf0] %vm280_vm8, %v303_v35  }
  0xa6   :  { %v364_v36 = vld [vmem:[#allocation0 + $0x40] sm:$0x1]  ;;  %v370_v37 = vld [vmem:[#allocation0 + $0x48] sm:$0x1]  ;;  %v376_v38 = vld [vmem:[#allocation0 + $0x50] sm:$0x1] }
  0xa7   :  { %545 = vst [vmem:[%s849_s1 + $0x8] sm:$0x1] %v364_v36  ;;  %546 = vst [vmem:[%s849_s1 + $0x9] sm:$0x1] %v370_v37  ;;  %v382_v39 = vld [vmem:[#allocation0 + $0x58] sm:$0x1] }
  0xa8   :  { %547 = vst [vmem:[%s849_s1 + $0xa] sm:$0x1] %v376_v38  ;;  %v388_v40 = vld [vmem:[#allocation0 + $0x60] sm:$0x1]  ;;  %v394_v41 = vld [vmem:[#allocation0 + $0x68] sm:$0x1] }
  0xa9   :  { %548 = vst [vmem:[%s849_s1 + $0xb] sm:$0x1] %v382_v39  ;;  %549 = vst [vmem:[%s849_s1 + $0xc] sm:$0x1] %v388_v40  ;;  %v400_v42 = vld [vmem:[#allocation0 + $0x70] sm:$0x1] }
  0xaa   :  { %550 = vst [vmem:[%s849_s1 + $0xd] sm:$0x1] %v394_v41  ;;  %v406_v43 = vld [vmem:[#allocation0 + $0x78] sm:$0x1]  ;;  %v319_v44 = vld [vmem:[#allocation0] sm:$0x1] }
  0xab   :  { %551 = vst [vmem:[%s849_s1 + $0xe] sm:$0x1] %v400_v42  ;;  %552 = vst [vmem:[%s849_s1 + $0xf] sm:$0x1] %v406_v43  ;;  %v323_v45 = vld [vmem:[#allocation0 + $0x8] sm:$0x1] }
  0xac   :  { %321 = vst [vmem:[%s849_s1] sm:$0x1] %v319_v44  ;;  %v328_v46 = vld [vmem:[#allocation0 + $0x10] sm:$0x1]  ;;  %v334_v47 = vld [vmem:[#allocation0 + $0x18] sm:$0x1] }
  0xad   :  { %538 = vst [vmem:[%s849_s1 + $0x1] sm:$0x1] %v323_v45  ;;  %539 = vst [vmem:[%s849_s1 + $0x2] sm:$0x1] %v328_v46  ;;  %v340_v48 = vld [vmem:[#allocation0 + $0x20] sm:$0x1] }
  0xae   :  { %540 = vst [vmem:[%s849_s1 + $0x3] sm:$0x1] %v334_v47  ;;  %v346_v49 = vld [vmem:[#allocation0 + $0x28] sm:$0x1]  ;;  %v352_v50 = vld [vmem:[#allocation0 + $0x30] sm:$0x1] }
  0xaf   :  { %541 = vst [vmem:[%s849_s1 + $0x4] sm:$0x1] %v340_v48  ;;  %542 = vst [vmem:[%s849_s1 + $0x5] sm:$0x1] %v346_v49  ;;  %v358_v51 = vld [vmem:[#allocation0 + $0x38] sm:$0x1] }
  0xb0   :  { %543 = vst [vmem:[%s849_s1 + $0x6] sm:$0x1] %v352_v50  ;;  %v460_v52 = vld [vmem:[#allocation0 + $0xc0] sm:$0x1]  ;;  %544 = vst [vmem:[%s849_s1 + $0x7] sm:$0x1] %v358_v51 }
  0xb1   :  { %v412_v53 = vld [vmem:[#allocation0 + $0x80] sm:$0x1]  ;;  %561 = vst [vmem:[%s849_s1 + $0x18] sm:$0x1] %v460_v52  ;;  %v418_v54 = vld [vmem:[#allocation0 + $0x88] sm:$0x1] }
  0xb2   :  { %553 = vst [vmem:[%s849_s1 + $0x10] sm:$0x1] %v412_v53  ;;  %v424_v55 = vld [vmem:[#allocation0 + $0x90] sm:$0x1]  ;;  %v430_v56 = vld [vmem:[#allocation0 + $0x98] sm:$0x1] }
  0xb3   :  { %554 = vst [vmem:[%s849_s1 + $0x11] sm:$0x1] %v418_v54  ;;  %555 = vst [vmem:[%s849_s1 + $0x12] sm:$0x1] %v424_v55  ;;  %v436_v57 = vld [vmem:[#allocation0 + $0xa0] sm:$0x1] }
  0xb4   :  { %556 = vst [vmem:[%s849_s1 + $0x13] sm:$0x1] %v430_v56  ;;  %v442_v58 = vld [vmem:[#allocation0 + $0xa8] sm:$0x1]  ;;  %v448_v59 = vld [vmem:[#allocation0 + $0xb0] sm:$0x1] }
  0xb5   :  { %557 = vst [vmem:[%s849_s1 + $0x14] sm:$0x1] %v436_v57  ;;  %558 = vst [vmem:[%s849_s1 + $0x15] sm:$0x1] %v442_v58  ;;  %v454_v60 = vld [vmem:[#allocation0 + $0xb8] sm:$0x1] }
  0xb6   :  { %559 = vst [vmem:[%s849_s1 + $0x16] sm:$0x1] %v448_v59  ;;  %560 = vst [vmem:[%s849_s1 + $0x17] sm:$0x1] %v454_v60 }

// kernel: tile.22
= control target key start
LH: loop header
LB: loop body
LE: loop exit
PB: predicated region body
PF: predicated region fallthrough
CT: control target
= control target key end

     0   :  { %s58_s0 = inlined_call_operand.vmem [shape: f32[16], index: 0, kind: input, shape index: {}]   ;;  %s59_s1 = inlined_call_operand.vmem [shape: f32[49,16], index: 1, kind: output, shape index: {}]  }
   0x1   :  { %v4_v0 = vld [vmem:[%s58_s0] ss:$0 sm:$0xff] }
   0x2   :  { %5 = vst [vmem:[%s59_s1] sm:$0xff] %v4_v0  ;;  %18 = vst [vmem:[%s59_s1 + $0x8] sm:$0xff] %v4_v0 }
   0x3   :  { %19 = vst [vmem:[%s59_s1 + $0x10] sm:$0xff] %v4_v0  ;;  %20 = vst [vmem:[%s59_s1 + $0x18] sm:$0xff] %v4_v0 }
   0x4   :  { %21 = vst [vmem:[%s59_s1 + $0x20] sm:$0xff] %v4_v0  ;;  %22 = vst [vmem:[%s59_s1 + $0x28] sm:$0xff] %v4_v0 }
   0x5   :  { %23 = vst [vmem:[%s59_s1 + $0x30] sm:$0xff] %v4_v0 }

// kernel: tile.28
= control target key start
LH: loop header
LB: loop body
LE: loop exit
PB: predicated region body
PF: predicated region fallthrough
CT: control target
= control target key end

     0   :  { %s12_s8 = smov 48  ;;  %vm14_vm0 = vcmask 1045508   ;;  %s36_s13 = smov 48  ;;  %vm4_vm1 = vcmask 1046532   ;;  %vm6_vm2 = vcmask 130048   ;;  %vm18_vm3 = vcmask 1048448   ;;  %s261_s0 = inlined_call_operand.vmem [shape: f32[49,16], index: 0, kind: input, shape index: {}]   ;;  %s262_s1 = inlined_call_operand.vmem [shape: f32[1,784], index: 1, kind: output, shape index: {}]  }
   0x1   :  { %v139_v0 = vld [vmem:[%s261_s0 + $0x7] ss:$8 sm:$0xf]   ;;  %v143_v2 = vld [vmem:[%s261_s0 + $0x5] ss:$8 sm:$0xf]  }
   0x2   :  { %v140_v1 = vld [vmem:[%s261_s0 + $0x7] ss:$8 sm:%s12_s8]   ;;  %v144_v4 = vld [vmem:[%s261_s0 + $0x5] ss:$8 sm:%s36_s13]   ;;  %s166_s18 = smov 112   ;;  %s24_s19 = smov 48 }
   0x3   :  { %v15_v3 = vsel %vm14_vm0, %v140_v1, %v139_v0  ;;  %v141_v5 = vld [vmem:[%s261_s0 + $0x6] ss:$8 sm:$0xf]   ;;  %v39_v6 = vsel %vm14_vm0, %v144_v4, %v143_v2  ;;  %v145_v7 = vld [vmem:[%s261_s0 + $0x4] ss:$8 sm:$0xf]  }
   0x4   :  { %16 = vrot.lane.b32.xlu0 %v15_v3, %s166_s18  ;;  %s167_s22 = smov 80   ;;  %v142_v8 = vld [vmem:[%s261_s0 + $0x6] ss:$8 sm:%s24_s19]   ;;  %s48_s25 = smov 48  ;;  %vm30_vm4 = vcmask 917248   ;;  %vm42_vm5 = vcmask 786048  }
   0x5   :  { %40 = vrot.lane.b32.xlu1 %v39_v6, %s167_s22  ;;  %v27_v9 = vsel %vm14_vm0, %v142_v8, %v141_v5  ;;  %v146_v10 = vld [vmem:[%s261_s0 + $0x4] ss:$8 sm:%s48_s25]   ;;  %v147_v11 = vld [vmem:[%s261_s0 + $0x3] ss:$8 sm:$0xf]   ;;  %s60_s30 = smov 48 }
   0x6   :  { %v51_v12 = vsel %vm14_vm0, %v146_v10, %v145_v7  ;;  %v148_v13 = vld [vmem:[%s261_s0 + $0x3] ss:$8 sm:%s60_s30]   ;;  %v149_v14 = vld [vmem:[%s261_s0 + $0x2] ss:$8 sm:$0xf]   ;;  %s168_s6 = smov 96  }
   0x7   :  { %s72_s7 = smov 48  ;;  %s169_s8 = smov 64   ;;  %v63_v15 = vsel %vm14_vm0, %v148_v13, %v147_v11  ;;  %v151_v17 = vld [vmem:[%s261_s0 + $0x1] ss:$8 sm:$0xf]   ;;  %vm54_vm6 = vcmask 654848  }
   0x8   :  { %28 = vrot.lane.b32.xlu0 %v27_v9, %s168_s6  ;;  %v150_v16 = vld [vmem:[%s261_s0 + $0x2] ss:$8 sm:%s72_s7]   ;;  %s84_s13 = smov 48  ;;  %v2_v20 = vld [vmem:[%s261_s0] ss:$8 sm:$0xf]  }
   0x9   :  { %52 = vrot.lane.b32.xlu1 %v51_v12, %s169_s8  ;;  %v75_v18 = vsel %vm14_vm0, %v150_v16, %v149_v14  ;;  %v152_v19 = vld [vmem:[%s261_s0 + $0x1] ss:$8 sm:%s84_s13]   ;;  %v3_v21 = vld [vmem:[%s261_s0] ss:$8 sm:$0x70]   ;;  %s170_s0 = smov 48  }
   0xa   :  { %v5_v22 = vsel %vm4_vm1, %v3_v21, %v2_v20  ;;  %s171_s20 = smov 32   ;;  %v87_v23 = vsel %vm14_vm0, %v152_v19, %v151_v17  ;;  %s172_s21 = smov 16   ;;  %vm66_vm7 = vcmask 523648   ;;  %vm78_vm8 = vcmask 392448  }
   0xb   :  { %7 = vst.msk [vmem:[#allocation0] ss:$8 sm:$0xf] %vm6_vm2, %v5_v22   ;;  %8 = vst.msk [vmem:[#allocation0] ss:$8 sm:$0x70] %vm6_vm2, %v5_v22  }
   0xc   :  { %64 = vrot.lane.b32.xlu0 %v63_v15, %s170_s0  ;;  %vm90_vm9 = vcmask 261248  }
   0xd   :  { %76 = vrot.lane.b32.xlu1 %v75_v18, %s171_s20 }
  0x10   :  { %88 = vrot.lane.b32.xlu0 %v87_v23, %s172_s21 }
  0x12   :  { %v129_v24 = vld [vmem:[#allocation0 + $0x30] sm:$0x1] }
  0x13   :  { %158 = vst [vmem:[%s262_s1 + $0x6] sm:$0x1] %v129_v24 }
  0x76   :  { %v17_v25 = vpop.permute.xlu0 %16  }
  0x77   :  { %19 = vst.msk [vmem:[#allocation0] ss:$8 sm:$0xf] %vm18_vm3, %v17_v25   ;;  %20 = vst.msk [vmem:[#allocation0] ss:$8 sm:$0x30] %vm18_vm3, %v17_v25   ;;  %v41_v26 = vpop.permute.xlu1 %40  }
  0x7a   :  { %v29_v27 = vpop.permute.xlu0 %28  }
  0x7b   :  { %31 = vst.msk [vmem:[#allocation0] ss:$8 sm:$0xf] %vm30_vm4, %v29_v27   ;;  %32 = vst.msk [vmem:[#allocation0] ss:$8 sm:$0x30] %vm30_vm4, %v29_v27   ;;  %v53_v28 = vpop.permute.xlu1 %52  }
  0x7c   :  { %43 = vst.msk [vmem:[#allocation0] ss:$8 sm:$0xf] %vm42_vm5, %v41_v26   ;;  %44 = vst.msk [vmem:[#allocation0] ss:$8 sm:$0x30] %vm42_vm5, %v41_v26  }
  0x7d   :  { %55 = vst.msk [vmem:[#allocation0] ss:$8 sm:$0xf] %vm54_vm6, %v53_v28   ;;  %56 = vst.msk [vmem:[#allocation0] ss:$8 sm:$0x30] %vm54_vm6, %v53_v28  }
  0x7e   :  { %v65_v29 = vpop.permute.xlu0 %64  }
  0x7f   :  { %67 = vst.msk [vmem:[#allocation0] ss:$8 sm:$0xf] %vm66_vm7, %v65_v29   ;;  %68 = vst.msk [vmem:[#allocation0] ss:$8 sm:$0x30] %vm66_vm7, %v65_v29   ;;  %v77_v30 = vpop.permute.xlu1 %76  }
  0x80   :  { %79 = vst.msk [vmem:[#allocation0] ss:$8 sm:$0xf] %vm78_vm8, %v77_v30   ;;  %80 = vst.msk [vmem:[#allocation0] ss:$8 sm:$0x30] %vm78_vm8, %v77_v30  }
  0x82   :  { %v89_v31 = vpop.permute.xlu0 %88  }
  0x83   :  { %91 = vst.msk [vmem:[#allocation0] ss:$8 sm:$0xf] %vm90_vm9, %v89_v31   ;;  %92 = vst.msk [vmem:[#allocation0] ss:$8 sm:$0x30] %vm90_vm9, %v89_v31  }
  0x8a   :  { %v96_v32 = vld [vmem:[#allocation0] sm:$0x1]  ;;  %v100_v33 = vld [vmem:[#allocation0 + $0x8] sm:$0x1]  ;;  %v105_v34 = vld [vmem:[#allocation0 + $0x10] sm:$0x1] }
  0x8b   :  { %98 = vst [vmem:[%s262_s1] sm:$0x1] %v96_v32  ;;  %153 = vst [vmem:[%s262_s1 + $0x1] sm:$0x1] %v100_v33  ;;  %v111_v35 = vld [vmem:[#allocation0 + $0x18] sm:$0x1] }
  0x8c   :  { %154 = vst [vmem:[%s262_s1 + $0x2] sm:$0x1] %v105_v34  ;;  %v117_v36 = vld [vmem:[#allocation0 + $0x20] sm:$0x1]  ;;  %v123_v37 = vld [vmem:[#allocation0 + $0x28] sm:$0x1] }
  0x8d   :  { %155 = vst [vmem:[%s262_s1 + $0x3] sm:$0x1] %v111_v35  ;;  %156 = vst [vmem:[%s262_s1 + $0x4] sm:$0x1] %v117_v36 }
  0x8e   :  { %157 = vst [vmem:[%s262_s1 + $0x5] sm:$0x1] %v123_v37 }

// kernel: tile.26
= control target key start
LH: loop header
LB: loop body
LE: loop exit
PB: predicated region body
PF: predicated region fallthrough
CT: control target
= control target key end

     0   :  { %s28_s0 = inlined_call_operand.vmem [shape: f32[10], index: 0, kind: input, shape index: {}]   ;;  %s29_s1 = inlined_call_operand.vmem [shape: f32[16,10], index: 1, kind: output, shape index: {}]  }
   0x1   :  { %v4_v0 = vld [vmem:[%s28_s0] ss:$0 sm:$0xff] }
   0x2   :  { %5 = vst [vmem:[%s29_s1] sm:$0xff] %v4_v0  ;;  %8 = vst [vmem:[%s29_s1 + $0x8] sm:$0xff] %v4_v0 }

// kernel: tile.29
= control target key start
LH: loop header
LB: loop body
LE: loop exit
PB: predicated region body
PF: predicated region fallthrough
CT: control target
= control target key end

     0   :  { %vm9_vm0 = vcmask 64512   ;;  %s148_s12 = smov 120   ;;  %s149_s13 = smov 100   ;;  %vm3_vm1 = vcmask 80896   ;;  %vm13_vm2 = vcmask 15360   ;;  %vm16_vm3 = vcmask 1048512   ;;  %s230_s0 = inlined_call_operand.vmem [shape: f32[16,10], index: 0, kind: input, shape index: {}]   ;;  %s231_s1 = inlined_call_operand.vmem [shape: f32[1,160], index: 1, kind: output, shape index: {}]  }
   0x1   :  { %v116_v0 = vld [vmem:[%s230_s0 + $0xc] sm:$0x1]   ;;  %v119_v3 = vld [vmem:[%s230_s0 + $0xa] sm:$0x1]   ;;  %v118_v4 = vld [vmem:[%s230_s0 + $0xb] sm:$0x1]  }
   0x2   :  { %v117_v1 = vld [vmem:[%s230_s0 + $0xc] sm:$0x1]   ;;  %26 = vrot.lane.b32.xlu1 %v119_v3, %s149_s13  ;;  %v120_v5 = vld [vmem:[%s230_s0 + $0x9] sm:$0x1]   ;;  %s150_s18 = smov 110   ;;  %s151_s19 = smov 90  }
   0x3   :  { %v10_v2 = vsel %vm9_vm0, %v117_v1, %v116_v0  ;;  %v121_v6 = vld [vmem:[%s230_s0 + $0x8] sm:$0x1]   ;;  %v122_v7 = vld [vmem:[%s230_s0 + $0x7] sm:$0x1]   ;;  %v2_v8 = vld [vmem:[%s230_s0] sm:$0x1]  }
   0x4   :  { %11 = vrot.lane.b32.xlu0 %v10_v2, %s148_s12  ;;  %4 = vst.msk [vmem:[#allocation0] sm:$0x1] %vm3_vm1, %v2_v8   ;;  %s152_s26 = smov 80   ;;  %s153_s27 = smov 70   ;;  %v123_v9 = vld [vmem:[%s230_s0 + $0x6] sm:$0x1]  }
   0x5   :  { %v124_v10 = vld [vmem:[%s230_s0 + $0x5] sm:$0x1]   ;;  %s154_s3 = smov 60   ;;  %s155_s4 = smov 50   ;;  %v125_v11 = vld [vmem:[%s230_s0 + $0x4] sm:$0x1]  }
   0x6   :  { %32 = vrot.lane.b32.xlu1 %v120_v5, %s151_s19  ;;  %v126_v12 = vld [vmem:[%s230_s0 + $0x3] sm:$0x1]   ;;  %s156_s9 = smov 40   ;;  %s157_s10 = smov 30   ;;  %v127_v13 = vld [vmem:[%s230_s0 + $0xf] sm:$0x1]  }
   0x7   :  { %v128_v14 = vld [vmem:[%s230_s0 + $0x2] sm:$0x1]   ;;  %s158_s15 = smov 22   ;;  %s159_s16 = smov 20   ;;  %v129_v15 = vld [vmem:[%s230_s0 + $0xe] sm:$0x1]  }
   0x8   :  { %20 = vrot.lane.b32.xlu0 %v118_v4, %s150_s18  ;;  %v130_v16 = vld [vmem:[%s230_s0 + $0x1] sm:$0x1]   ;;  %s160_s21 = smov 12   ;;  %s161_s22 = smov 10   ;;  %v131_v17 = vld [vmem:[%s230_s0 + $0xd] sm:$0x1]  }
   0x9   :  { %s162_s0 = smov 2   ;;  %vm22_vm4 = vcmask 982896   ;;  %vm28_vm5 = vcmask 900896   ;;  %vm34_vm6 = vcmask 818896   ;;  %vm40_vm7 = vcmask 736896  }
   0xa   :  { %44 = vrot.lane.b32.xlu1 %v122_v7, %s153_s27  ;;  %vm46_vm8 = vcmask 654896   ;;  %vm52_vm9 = vcmask 572896   ;;  %vm58_vm10 = vcmask 490896   ;;  %vm64_vm11 = vcmask 408896  }
   0xb   :  { %vm70_vm12 = vcmask 326896   ;;  %vm76_vm13 = vcmask 261296   ;;  %vm83_vm14 = vcmask 244896   ;;  %vm89_vm15 = vcmask 179296  }
   0xc   :  { %38 = vrot.lane.b32.xlu0 %v121_v6, %s152_s26  ;;  %vm96_vm0 = vcmask 162896   ;;  %vm102_vm1 = vcmask 97296  }
   0xe   :  { %56 = vrot.lane.b32.xlu1 %v124_v10, %s155_s4 }
  0x10   :  { %50 = vrot.lane.b32.xlu0 %v123_v9, %s154_s3 }
  0x12   :  { %68 = vrot.lane.b32.xlu1 %v126_v12, %s157_s10 }
  0x14   :  { %62 = vrot.lane.b32.xlu0 %v125_v11, %s156_s9 }
  0x16   :  { %81 = vrot.lane.b32.xlu1 %v128_v14, %s159_s16 }
  0x18   :  { %74 = vrot.lane.b32.xlu0 %v127_v13, %s158_s15 }
  0x1a   :  { %94 = vrot.lane.b32.xlu1 %v130_v16, %s161_s22 }
  0x1c   :  { %87 = vrot.lane.b32.xlu0 %v129_v15, %s160_s21 }
  0x20   :  { %100 = vrot.lane.b32.xlu0 %v131_v17, %s162_s0 }
  0x74   :  { %v27_v19 = vpop.permute.xlu1 %26  }
  0x76   :  { %v12_v18 = vpop.permute.xlu0 %11  }
  0x77   :  { %15 = vst.msk [vmem:[#allocation0 + $0x8] sm:$0x1] %vm13_vm2, %v12_v18  }
  0x78   :  { %17 = vst.msk [vmem:[#allocation0] sm:$0x1] %vm16_vm3, %v12_v18   ;;  %v33_v21 = vpop.permute.xlu1 %32  }
  0x7a   :  { %v21_v20 = vpop.permute.xlu0 %20  }
  0x7b   :  { %23 = vst.msk [vmem:[#allocation0] sm:$0x1] %vm22_vm4, %v21_v20  }
  0x7c   :  { %29 = vst.msk [vmem:[#allocation0] sm:$0x1] %vm28_vm5, %v27_v19   ;;  %v45_v23 = vpop.permute.xlu1 %44  }
  0x7d   :  { %35 = vst.msk [vmem:[#allocation0] sm:$0x1] %vm34_vm6, %v33_v21  }
  0x7e   :  { %v39_v22 = vpop.permute.xlu0 %38  }
  0x7f   :  { %41 = vst.msk [vmem:[#allocation0] sm:$0x1] %vm40_vm7, %v39_v22  }
  0x80   :  { %47 = vst.msk [vmem:[#allocation0] sm:$0x1] %vm46_vm8, %v45_v23   ;;  %v57_v25 = vpop.permute.xlu1 %56  }
  0x82   :  { %v51_v24 = vpop.permute.xlu0 %50  }
  0x83   :  { %53 = vst.msk [vmem:[#allocation0] sm:$0x1] %vm52_vm9, %v51_v24  }
  0x84   :  { %59 = vst.msk [vmem:[#allocation0] sm:$0x1] %vm58_vm10, %v57_v25   ;;  %v69_v27 = vpop.permute.xlu1 %68  }
  0x86   :  { %v63_v26 = vpop.permute.xlu0 %62  }
  0x87   :  { %65 = vst.msk [vmem:[#allocation0] sm:$0x1] %vm64_vm11, %v63_v26  }
  0x88   :  { %71 = vst.msk [vmem:[#allocation0] sm:$0x1] %vm70_vm12, %v69_v27   ;;  %v82_v29 = vpop.permute.xlu1 %81  }
  0x89   :  { %84 = vst.msk [vmem:[#allocation0] sm:$0x1] %vm83_vm14, %v82_v29  }
  0x8a   :  { %v75_v28 = vpop.permute.xlu0 %74  }
  0x8b   :  { %78 = vst.msk [vmem:[#allocation0 + $0x8] sm:$0x1] %vm76_vm13, %v75_v28  }
  0x8c   :  { %v95_v31 = vpop.permute.xlu1 %94  }
  0x8d   :  { %97 = vst.msk [vmem:[#allocation0] sm:$0x1] %vm96_vm0, %v95_v31  }
  0x8e   :  { %v88_v30 = vpop.permute.xlu0 %87  }
  0x8f   :  { %91 = vst.msk [vmem:[#allocation0 + $0x8] sm:$0x1] %vm89_vm15, %v88_v30  }
  0x92   :  { %v101_v32 = vpop.permute.xlu0 %100  }
  0x93   :  { %104 = vst.msk [vmem:[#allocation0 + $0x8] sm:$0x1] %vm102_vm1, %v101_v32  }
  0x94   :  { %v108_v33 = vld [vmem:[#allocation0] sm:$0x1] }
  0x95   :  { %110 = vst [vmem:[%s231_s1] sm:$0x1] %v108_v33 }
  0x9a   :  { %v112_v34 = vld [vmem:[#allocation0 + $0x8] sm:$0x1] }
  0x9b   :  { %132 = vst [vmem:[%s231_s1 + $0x1] sm:$0x1] %v112_v34 }

// kernel: mnist_cnn_forward.1
= control target key start
LH: loop header
LB: loop body
LE: loop exit
PB: predicated region body
PF: predicated region fallthrough
CT: control target
= control target key end

     0   :  { %v28886_v1 = vmov 0   ;;  %vm7639_vm0 = vcmask 130048   ;;  %vm28888_vm1 = vmmov 0   ;;  %vm18482_vm2 = vcmask 523264   ;;  %s37683_s1 = inlined_call_operand.vmem [shape: bf16[784,3136], index: 1, kind: input, shape index: {}]   ;;  %s37684_s0 = inlined_call_operand.vmem [shape: bf16[8,784], index: 0, kind: input, shape index: {}]   ;;  %s37685_s2 = inlined_call_operand.vmem [shape: f32[1,3136], index: 2, kind: input, shape index: {}]   ;;  %s37686_s3 = inlined_call_operand.vmem [shape: bf16[3136,784], index: 3, kind: input, shape index: {}]   ;;  %s37687_s4 = inlined_call_operand.vmem [shape: f32[1,784], index: 4, kind: input, shape index: {}]   ;;  %s37688_s5 = inlined_call_operand.vmem [shape: bf16[784,160], index: 5, kind: input, shape index: {}]   ;;  %s37689_s7 = inlined_call_operand.vmem [shape: bf16[160,128], index: 7, kind: input, shape index: {}]   ;;  %s37690_s6 = inlined_call_operand.vmem [shape: f32[1,160], index: 6, kind: input, shape index: {}]   ;;  %s37691_s8 = inlined_call_operand.vmem [shape: f32[8,128], index: 8, kind: output, shape index: {}]  }
   0x1   :  { %v24937_v0 = vld [vmem:[%s37683_s1 + $0x4] ss:$100 sps:$4 sm:$0xff]   ;;  %7798 = vmatprep.mubr.bf16.mxu1 %v28886_v1  ;;  %v24943_v5 = vld [vmem:[%s37683_s1 + $0xcc] ss:$100 sps:$4 sm:$0xff]   ;;  %v24945_v6 = vld [vmem:[%s37684_s0 + $0x18] ss:$0 sps:$4 sm:$0xff]  }
   0x2   :  { %v24939_v2 = vld [vmem:[%s37683_s1 + $0x2584] ss:$100 sps:$4 sm:$0xff]   ;;  %7643 = vmatprep.subr.bf16.mxu0 %v24937_v0  ;;  %v24948_v8 = vld [vmem:[%s37683_s1 + $0xc8c] ss:$100 sps:$4 sm:$0xff]   ;;  %v24950_v10 = vld [vmem:[%s37683_s1 + $0x194] ss:$100 sps:$4 sm:$0xff]  }
   0x3   :  { %v24941_v3 = vld [vmem:[%s37683_s1] ss:$100 sps:$4 sm:$0xff]   ;;  %7766 = vmatprep.subr.bf16.mxu1 %v24939_v2  ;;  %v24946_v7 = vld [vmem:[%s37683_s1 + $0xc88] ss:$100 sps:$4 sm:$0xff]   ;;  %v24952_v11 = vld [vmem:[%s37683_s1 + $0xd50] ss:$100 sps:$4 sm:$0xff]  }
   0x4   :  { %v24942_v4 = vld [vmem:[%s37683_s1 + $0x2580] ss:$100 sps:$4 sm:$0xff]   ;;  %7644 = vmatpush1.bf16.msra.mxu0 %v24941_v3  ;;  %v24949_v9 = vld [vmem:[%s37683_s1 + $0xc8] ss:$100 sps:$4 sm:$0xff]   ;;  %v24954_v12 = vld [vmem:[%s37683_s1 + $0xd54] ss:$100 sps:$4 sm:$0xff]  }
   0x5   :  { %7767 = vmatpush1.bf16.msra.mxu1 %v24942_v4  ;;  %7645 = vmatprep.subr.bf16.mxu0 %v24943_v5  ;;  %v24955_v13 = vld [vmem:[%s37683_s1 + $0x190] ss:$100 sps:$4 sm:$0xff]   ;;  %v24956_v14 = vld [vmem:[%s37683_s1 + $0x25c] ss:$100 sps:$4 sm:$0xff]   ;;  %v24962_v18 = vld [vmem:[%s37683_s1 + $0x324] ss:$100 sps:$4 sm:$0xff]  }
   0x6   :  { %7848 = vmatprep.subr.bf16.mxu1 %v24948_v8  ;;  %v24960_v15 = vld [vmem:[%s37683_s1 + $0xe1c] ss:$100 sps:$4 sm:$0xff]   ;;  %v24966_v19 = vld [vmem:[%s37683_s1 + $0xee4] ss:$100 sps:$4 sm:$0xff]   ;;  %v24968_v22 = vld [vmem:[%s37683_s1 + $0x3ec] ss:$100 sps:$4 sm:$0xff]  }
   0x7   :  { %v24958_v16 = vld [vmem:[%s37683_s1 + $0xe18] ss:$100 sps:$4 sm:$0xff]   ;;  %v24964_v20 = vld [vmem:[%s37683_s1 + $0xee0] ss:$100 sps:$4 sm:$0xff]   ;;  %v24972_v23 = vld [vmem:[%s37683_s1 + $0xfac] ss:$100 sps:$4 sm:$0xff]  }
   0x8   :  { %22752 = vmatmul.mubr.msk.bf16.vlgmr.msra.gmra.mrb[0].mxu1 %vm7639_vm0, %v24945_v6  ;;  %7646 = vmatpush1.bf16.msra.mxu0 %v24949_v9  ;;  %v24961_v17 = vld [vmem:[%s37683_s1 + $0x258] ss:$100 sps:$4 sm:$0xff]   ;;  %v24967_v21 = vld [vmem:[%s37683_s1 + $0x320] ss:$100 sps:$4 sm:$0xff]   ;;  %v24970_v24 = vld [vmem:[%s37683_s1 + $0xfa8] ss:$100 sps:$4 sm:$0xff]  }
   0x9   :  { %7849 = vmatpush1.bf16.msra.mxu1 %v24946_v7  ;;  %7647 = vmatprep.subr.bf16.mxu0 %v24950_v10  ;;  %v24973_v25 = vld [vmem:[%s37683_s1 + $0x3e8] ss:$100 sps:$4 sm:$0xff]   ;;  %v24974_v26 = vld [vmem:[%s37683_s1 + $0x4b4] ss:$100 sps:$4 sm:$0xff]   ;;  %v24980_v30 = vld [vmem:[%s37683_s1 + $0x57c] ss:$100 sps:$4 sm:$0xff]  }
   0xa   :  { %7850 = vmatprep.subr.bf16.mxu1 %v24954_v12  ;;  %v24978_v27 = vld [vmem:[%s37683_s1 + $0x1074] ss:$100 sps:$4 sm:$0xff]   ;;  %v24984_v31 = vld [vmem:[%s37683_s1 + $0x113c] ss:$100 sps:$4 sm:$0xff]   ;;  %v24986_v34 = vld [vmem:[%s37683_s1 + $0x644] ss:$100 sps:$4 sm:$0xff]  }
   0xb   :  { %v24976_v28 = vld [vmem:[%s37683_s1 + $0x1070] ss:$100 sps:$4 sm:$0xff]   ;;  %v24982_v32 = vld [vmem:[%s37683_s1 + $0x1138] ss:$100 sps:$4 sm:$0xff]   ;;  %v24990_v35 = vld [vmem:[%s37683_s1 + $0x1204] ss:$100 sps:$4 sm:$0xff]  }
   0xc   :  { %7648 = vmatpush1.bf16.msra.mxu0 %v24955_v13  ;;  %v24979_v29 = vld [vmem:[%s37683_s1 + $0x4b0] ss:$100 sps:$4 sm:$0xff]   ;;  %v24985_v33 = vld [vmem:[%s37683_s1 + $0x578] ss:$100 sps:$4 sm:$0xff]   ;;  %v24988_v36 = vld [vmem:[%s37683_s1 + $0x1200] ss:$100 sps:$4 sm:$0xff]  }
   0xd   :  { %7851 = vmatpush1.bf16.msra.mxu1 %v24952_v11  ;;  %7649 = vmatprep.subr.bf16.mxu0 %v24956_v14  ;;  %v24991_v37 = vld [vmem:[%s37683_s1 + $0x640] ss:$100 sps:$4 sm:$0xff]   ;;  %v24992_v38 = vld [vmem:[%s37683_s1 + $0x70c] ss:$100 sps:$4 sm:$0xff]   ;;  %v24998_v42 = vld [vmem:[%s37683_s1 + $0x7d4] ss:$100 sps:$4 sm:$0xff]  }
   0xe   :  { %7852 = vmatprep.subr.bf16.mxu1 %v24960_v15  ;;  %v24996_v39 = vld [vmem:[%s37683_s1 + $0x12cc] ss:$100 sps:$4 sm:$0xff]   ;;  %v25002_v43 = vld [vmem:[%s37683_s1 + $0x1394] ss:$100 sps:$4 sm:$0xff]   ;;  %v25004_v46 = vld [vmem:[%s37683_s1 + $0x89c] ss:$100 sps:$4 sm:$0xff]  }
   0xf   :  { %v24994_v40 = vld [vmem:[%s37683_s1 + $0x12c8] ss:$100 sps:$4 sm:$0xff]   ;;  %v25000_v44 = vld [vmem:[%s37683_s1 + $0x1390] ss:$100 sps:$4 sm:$0xff]   ;;  %v25008_v47 = vld [vmem:[%s37683_s1 + $0x145c] ss:$100 sps:$4 sm:$0xff]  }
  0x10   :  { %7650 = vmatpush1.bf16.msra.mxu0 %v24961_v17  ;;  %v24997_v41 = vld [vmem:[%s37683_s1 + $0x708] ss:$100 sps:$4 sm:$0xff]   ;;  %v25003_v45 = vld [vmem:[%s37683_s1 + $0x7d0] ss:$100 sps:$4 sm:$0xff]   ;;  %v25006_v48 = vld [vmem:[%s37683_s1 + $0x1458] ss:$100 sps:$4 sm:$0xff]  }
  0x11   :  { %7853 = vmatpush1.bf16.msra.mxu1 %v24958_v16  ;;  %7651 = vmatprep.subr.bf16.mxu0 %v24962_v18  ;;  %v30_v49 = vld [vmem:[%s37684_s0] sm:$0xff]  ;;  %v25009_v50 = vld [vmem:[%s37683_s1 + $0x898] ss:$100 sps:$4 sm:$0xff]   ;;  %v31_v56 = vld [vmem:[%s37684_s0 + $0x8] sm:$0xff]  ;;  %vm21470_vm3 = vcmask 261120  }
  0x12   :  { %7854 = vmatprep.subr.bf16.mxu1 %v24966_v19  ;;  %v25010_v51 = vld [vmem:[%s37683_s1 + $0x964] ss:$100 sps:$4 sm:$0xff]   ;;  %v29089_v52 = vcombine.high %v30_v49, %v30_v49  ;;  %v25016_v57 = vld [vmem:[%s37683_s1 + $0xa2c] ss:$100 sps:$4 sm:$0xff]   ;;  %v29107_v58 = vcombine.high %v31_v56, %v31_v56  ;;  %v25022_v62 = vld [vmem:[%s37683_s1 + $0xaf4] ss:$100 sps:$4 sm:$0xff]   ;;  %v29155_v11 = vcombine.low %v30_v49, %v30_v49  ;;  %v29170_v16 = vcombine.low %v31_v56, %v31_v56 }
  0x13   :  { %v25014_v53 = vld [vmem:[%s37683_s1 + $0x1524] ss:$100 sps:$4 sm:$0xff]   ;;  %v25020_v59 = vld [vmem:[%s37683_s1 + $0x15ec] ss:$100 sps:$4 sm:$0xff]   ;;  %v25026_v63 = vld [vmem:[%s37683_s1 + $0x16b4] ss:$100 sps:$4 sm:$0xff]  }
  0x14   :  { %7652 = vmatpush1.bf16.msra.mxu0 %v24967_v21  ;;  %7675 = vmatprep.mubr.bf16.mxu0 %v29089_v52  ;;  %v25012_v54 = vld [vmem:[%s37683_s1 + $0x1520] ss:$100 sps:$4 sm:$0xff]   ;;  %v25018_v60 = vld [vmem:[%s37683_s1 + $0x15e8] ss:$100 sps:$4 sm:$0xff]   ;;  %v25024_v0 = vld [vmem:[%s37683_s1 + $0x16b0] ss:$100 sps:$4 sm:$0xff]  }
  0x15   :  { %7855 = vmatpush1.bf16.msra.mxu1 %v24964_v20  ;;  %7653 = vmatprep.subr.bf16.mxu0 %v24968_v22  ;;  %v25015_v55 = vld [vmem:[%s37683_s1 + $0x960] ss:$100 sps:$4 sm:$0xff]   ;;  %v25021_v61 = vld [vmem:[%s37683_s1 + $0xa28] ss:$100 sps:$4 sm:$0xff]   ;;  %v25027_v2 = vld [vmem:[%s37683_s1 + $0xaf0] ss:$100 sps:$4 sm:$0xff]  }
  0x16   :  { %7856 = vmatprep.subr.bf16.mxu1 %v24972_v23  ;;  %7880 = vmatprep.mubr.bf16.mxu1 %v29107_v58  ;;  %v25028_v3 = vld [vmem:[%s37683_s1 + $0xbbc] ss:$100 sps:$4 sm:$0xff]   ;;  %v25037_v7 = vld [vmem:[%s37683_s1 + $0xc84] ss:$100 sps:$4 sm:$0xff]   ;;  %v25044_v12 = vld [vmem:[%s37683_s1 + $0xd4c] ss:$100 sps:$4 sm:$0xff]  }
  0x17   :  { %v25032_v4 = vld [vmem:[%s37683_s1 + $0x177c] ss:$100 sps:$4 sm:$0xff]   ;;  %v25040_v8 = vld [vmem:[%s37683_s1 + $0x1844] ss:$100 sps:$4 sm:$0xff]   ;;  %v25048_v13 = vld [vmem:[%s37683_s1 + $0x190c] ss:$100 sps:$4 sm:$0xff]  }
  0x18   :  { %7654 = vmatpush1.bf16.msra.mxu0 %v24973_v25  ;;  %v25030_v5 = vld [vmem:[%s37683_s1 + $0x1778] ss:$100 sps:$4 sm:$0xff]   ;;  %v25035_v9 = vld [vmem:[%s37683_s1 + $0xc80] ss:$100 sps:$4 sm:$0xff]   ;;  %v25042_v14 = vld [vmem:[%s37683_s1 + $0xd48] ss:$100 sps:$4 sm:$0xff]  }
  0x19   :  { %7857 = vmatpush1.bf16.msra.mxu1 %v24970_v24  ;;  %7655 = vmatprep.subr.bf16.mxu0 %v24974_v26  ;;  %v25033_v6 = vld [vmem:[%s37683_s1 + $0xbb8] ss:$100 sps:$4 sm:$0xff]   ;;  %v25038_v10 = vld [vmem:[%s37683_s1 + $0x1840] ss:$100 sps:$4 sm:$0xff]   ;;  %v25046_v15 = vld [vmem:[%s37683_s1 + $0x1908] ss:$100 sps:$4 sm:$0xff]  }
  0x1a   :  { %7858 = vmatprep.subr.bf16.mxu1 %v24978_v27  ;;  %v25052_v17 = vld [vmem:[%s37683_s1 + $0xe14] ss:$100 sps:$4 sm:$0xff]   ;;  %v25058_v21 = vld [vmem:[%s37683_s1 + $0xedc] ss:$100 sps:$4 sm:$0xff]   ;;  %v25064_v25 = vld [vmem:[%s37683_s1 + $0xfa4] ss:$100 sps:$4 sm:$0xff]  }
  0x1b   :  { %v25055_v18 = vld [vmem:[%s37683_s1 + $0x19d4] ss:$100 sps:$4 sm:$0xff]   ;;  %v25061_v22 = vld [vmem:[%s37683_s1 + $0x1a9c] ss:$100 sps:$4 sm:$0xff]   ;;  %v25067_v26 = vld [vmem:[%s37683_s1 + $0x1b64] ss:$100 sps:$4 sm:$0xff]  }
  0x1c   :  { %7656 = vmatpush1.bf16.msra.mxu0 %v24979_v29  ;;  %v25050_v19 = vld [vmem:[%s37683_s1 + $0xe10] ss:$100 sps:$4 sm:$0xff]   ;;  %v25056_v23 = vld [vmem:[%s37683_s1 + $0xed8] ss:$100 sps:$4 sm:$0xff]   ;;  %v25062_v27 = vld [vmem:[%s37683_s1 + $0xfa0] ss:$100 sps:$4 sm:$0xff]  }
  0x1d   :  { %7859 = vmatpush1.bf16.msra.mxu1 %v24976_v28  ;;  %7657 = vmatprep.subr.bf16.mxu0 %v24980_v30  ;;  %v25053_v20 = vld [vmem:[%s37683_s1 + $0x19d0] ss:$100 sps:$4 sm:$0xff]   ;;  %v25059_v24 = vld [vmem:[%s37683_s1 + $0x1a98] ss:$100 sps:$4 sm:$0xff]   ;;  %v25065_v28 = vld [vmem:[%s37683_s1 + $0x1b60] ss:$100 sps:$4 sm:$0xff]  }
  0x1e   :  { %7860 = vmatprep.subr.bf16.mxu1 %v24984_v31  ;;  %v25070_v29 = vld [vmem:[%s37683_s1 + $0x106c] ss:$100 sps:$4 sm:$0xff]   ;;  %v25106_v56 = vld [vmem:[%s37683_s1 + $0x151c] ss:$100 sps:$4 sm:$0xff]  }
  0x1f   :  { %v25073_v30 = vld [vmem:[%s37683_s1 + $0x1c2c] ss:$100 sps:$4 sm:$0xff]  }
  0x20   :  { %7658 = vmatpush1.bf16.msra.mxu0 %v24985_v33  ;;  %v25068_v31 = vld [vmem:[%s37683_s1 + $0x1068] ss:$100 sps:$4 sm:$0xff]   ;;  %v25076_v33 = vld [vmem:[%s37683_s1 + $0x1134] ss:$100 sps:$4 sm:$0xff]  }
  0x21   :  { %7861 = vmatpush1.bf16.msra.mxu1 %v24982_v32  ;;  %7659 = vmatprep.subr.bf16.mxu0 %v24986_v34  ;;  %v25071_v32 = vld [vmem:[%s37683_s1 + $0x1c28] ss:$100 sps:$4 sm:$0xff]   ;;  %v25079_v34 = vld [vmem:[%s37683_s1 + $0x1cf4] ss:$100 sps:$4 sm:$0xff]  }
  0x22   :  { %7862 = vmatprep.subr.bf16.mxu1 %v24990_v35  ;;  %v25074_v35 = vld [vmem:[%s37683_s1 + $0x1130] ss:$100 sps:$4 sm:$0xff]   ;;  %v25092_v49 = vld [vmem:[%s37683_s1 + $0x1388] ss:$100 sps:$4 sm:$0xff]  }
  0x24   :  { %7660 = vmatpush1.bf16.msra.mxu0 %v24991_v37  ;;  %v25082_v37 = vld [vmem:[%s37683_s1 + $0x11fc] ss:$100 sps:$4 sm:$0xff]  }
  0x25   :  { %7863 = vmatpush1.bf16.msra.mxu1 %v24988_v36  ;;  %7661 = vmatprep.subr.bf16.mxu0 %v24992_v38  ;;  %v25077_v36 = vld [vmem:[%s37683_s1 + $0x1cf0] ss:$100 sps:$4 sm:$0xff]   ;;  %v25085_v38 = vld [vmem:[%s37683_s1 + $0x1dbc] ss:$100 sps:$4 sm:$0xff]  }
  0x26   :  { %7864 = vmatprep.subr.bf16.mxu1 %v24996_v39  ;;  %v29243_v39 = vld [vmem:[%s37684_s0 + $0x10] sm:$0xff] }
  0x28   :  { %7662 = vmatpush1.bf16.msra.mxu0 %v24997_v41  ;;  %v25080_v41 = vld [vmem:[%s37683_s1 + $0x11f8] ss:$100 sps:$4 sm:$0xff]  }
  0x29   :  { %7865 = vmatpush1.bf16.msra.mxu1 %v24994_v40  ;;  %7663 = vmatprep.subr.bf16.mxu0 %v24998_v42  ;;  %v29247_v40 = vcombine.high %v29243_v39, %v29243_v39  ;;  %v25083_v42 = vld [vmem:[%s37683_s1 + $0x1db8] ss:$100 sps:$4 sm:$0xff]  }
  0x2a   :  { %7866 = vmatprep.subr.bf16.mxu1 %v25002_v43  ;;  %v25088_v43 = vld [vmem:[%s37683_s1 + $0x12c4] ss:$100 sps:$4 sm:$0xff]  }
  0x2c   :  { %7664 = vmatpush1.bf16.msra.mxu0 %v25003_v45  ;;  %v25086_v45 = vld [vmem:[%s37683_s1 + $0x12c0] ss:$100 sps:$4 sm:$0xff]  }
  0x2d   :  { %7867 = vmatpush1.bf16.msra.mxu1 %v25000_v44  ;;  %7665 = vmatprep.subr.bf16.mxu0 %v25004_v46  ;;  %v25091_v44 = vld [vmem:[%s37683_s1 + $0x1e84] ss:$100 sps:$4 sm:$0xff]  }
  0x2e   :  { %7868 = vmatprep.subr.bf16.mxu1 %v25008_v47  ;;  %v25089_v46 = vld [vmem:[%s37683_s1 + $0x1e80] ss:$100 sps:$4 sm:$0xff]   ;;  %v25094_v47 = vld [vmem:[%s37683_s1 + $0x138c] ss:$100 sps:$4 sm:$0xff]  }
  0x30   :  { %7666 = vmatpush1.bf16.msra.mxu0 %v25009_v50  ;;  %v25095_v50 = vld [vmem:[%s37683_s1 + $0x1f48] ss:$100 sps:$4 sm:$0xff]  }
  0x31   :  { %7869 = vmatpush1.bf16.msra.mxu1 %v25006_v48  ;;  %7667 = vmatprep.subr.bf16.mxu0 %v25010_v51  ;;  %v25097_v48 = vld [vmem:[%s37683_s1 + $0x1f4c] ss:$100 sps:$4 sm:$0xff]   ;;  %v25100_v51 = vld [vmem:[%s37683_s1 + $0x1454] ss:$100 sps:$4 sm:$0xff]  }
  0x32   :  { %7870 = vmatprep.subr.bf16.mxu1 %v25014_v53  ;;  %v25103_v53 = vld [vmem:[%s37683_s1 + $0x2014] ss:$100 sps:$4 sm:$0xff]  }
  0x34   :  { %7668 = vmatpush1.bf16.msra.mxu0 %v25015_v55  ;;  %v25101_v55 = vld [vmem:[%s37683_s1 + $0x2010] ss:$100 sps:$4 sm:$0xff]  }
  0x35   :  { %7871 = vmatpush1.bf16.msra.mxu1 %v25012_v54  ;;  %7669 = vmatprep.subr.bf16.mxu0 %v25016_v57  ;;  %v25098_v54 = vld [vmem:[%s37683_s1 + $0x1450] ss:$100 sps:$4 sm:$0xff]   ;;  %v25109_v57 = vld [vmem:[%s37683_s1 + $0x20dc] ss:$100 sps:$4 sm:$0xff]  }
  0x36   :  { %7872 = vmatprep.subr.bf16.mxu1 %v25020_v59  ;;  %v25104_v59 = vld [vmem:[%s37683_s1 + $0x1518] ss:$100 sps:$4 sm:$0xff]  }
  0x38   :  { %7670 = vmatpush1.bf16.msra.mxu0 %v25021_v61  ;;  %v25112_v61 = vld [vmem:[%s37683_s1 + $0x15e4] ss:$100 sps:$4 sm:$0xff]  }
  0x39   :  { %7873 = vmatpush1.bf16.msra.mxu1 %v25018_v60  ;;  %7671 = vmatprep.subr.bf16.mxu0 %v25022_v62  ;;  %v25107_v60 = vld [vmem:[%s37683_s1 + $0x20d8] ss:$100 sps:$4 sm:$0xff]   ;;  %v25115_v62 = vld [vmem:[%s37683_s1 + $0x21a4] ss:$100 sps:$4 sm:$0xff]  }
  0x3a   :  { %7874 = vmatprep.subr.bf16.mxu1 %v25026_v63  ;;  %v25110_v63 = vld [vmem:[%s37683_s1 + $0x15e0] ss:$100 sps:$4 sm:$0xff]  }
  0x3c   :  { %7672 = vmatpush1.bf16.msra.mxu0 %v25027_v2  ;;  %v25118_v2 = vld [vmem:[%s37683_s1 + $0x16ac] ss:$100 sps:$4 sm:$0xff]  }
  0x3d   :  { %7875 = vmatpush1.bf16.msra.mxu1 %v25024_v0  ;;  %7673 = vmatprep.subr.bf16.mxu0 %v25028_v3  ;;  %v25113_v0 = vld [vmem:[%s37683_s1 + $0x21a0] ss:$100 sps:$4 sm:$0xff]   ;;  %v25121_v3 = vld [vmem:[%s37683_s1 + $0x226c] ss:$100 sps:$4 sm:$0xff]  }
  0x3e   :  { %7876 = vmatprep.subr.bf16.mxu1 %v25032_v4  ;;  %v25116_v4 = vld [vmem:[%s37683_s1 + $0x16a8] ss:$100 sps:$4 sm:$0xff]  }
  0x40   :  { %7674 = vmatpush1.bf16.msra.mxu0 %v25033_v6  ;;  %v25124_v6 = vld [vmem:[%s37683_s1 + $0x1774] ss:$100 sps:$4 sm:$0xff]  }
  0x41   :  { %7877 = vmatpush1.bf16.msra.mxu1 %v25030_v5  ;;  %7684 = vmatprep.subr.bf16.mxu0 %v25037_v7  ;;  %v25119_v5 = vld [vmem:[%s37683_s1 + $0x2268] ss:$100 sps:$4 sm:$0xff]   ;;  %v25127_v7 = vld [vmem:[%s37683_s1 + $0x2334] ss:$100 sps:$4 sm:$0xff]  }
  0x42   :  { %7878 = vmatprep.subr.bf16.mxu1 %v25040_v8  ;;  %v25122_v8 = vld [vmem:[%s37683_s1 + $0x1770] ss:$100 sps:$4 sm:$0xff]  }
  0x43   :  { %7676 = vmatmul.mubr.bf16.vlgmr.msra.gmra.mrb[0].mxu0 %v29155_v11 }
  0x44   :  { %7685 = vmatpush1.bf16.msra.mxu0 %v25035_v9  ;;  %7716 = vmatprep.mubr.bf16.mxu0 %v29107_v58  ;;  %v25125_v9 = vld [vmem:[%s37683_s1 + $0x2330] ss:$100 sps:$4 sm:$0xff]  }
  0x45   :  { %7879 = vmatpush1.bf16.msra.mxu1 %v25038_v10  ;;  %7686 = vmatprep.subr.bf16.mxu0 %v25044_v12  ;;  %v25130_v10 = vld [vmem:[%s37683_s1 + $0x183c] ss:$100 sps:$4 sm:$0xff]  }
  0x46   :  { %7889 = vmatprep.subr.bf16.mxu1 %v25048_v13  ;;  %v25133_v12 = vld [vmem:[%s37683_s1 + $0x23fc] ss:$100 sps:$4 sm:$0xff]  }
  0x47   :  { %v25128_v13 = vld [vmem:[%s37683_s1 + $0x1838] ss:$100 sps:$4 sm:$0xff]  }
  0x48   :  { %7881 = vmatmul.mubr.bf16.vlgmr.msra.gmra.mrb[4].mxu1 %v29170_v16  ;;  %7687 = vmatpush1.bf16.msra.mxu0 %v25042_v14  ;;  %v25131_v14 = vld [vmem:[%s37683_s1 + $0x23f8] ss:$100 sps:$4 sm:$0xff]  }
  0x49   :  { %7890 = vmatpush1.bf16.msra.mxu1 %v25046_v15  ;;  %7688 = vmatprep.subr.bf16.mxu0 %v25052_v17  ;;  %v25136_v15 = vld [vmem:[%s37683_s1 + $0x1904] ss:$100 sps:$4 sm:$0xff]  }
  0x4a   :  { %7891 = vmatprep.subr.bf16.mxu1 %v25055_v18  ;;  %7921 = vmatprep.mubr.bf16.mxu1 %v29247_v40  ;;  %v25139_v17 = vld [vmem:[%s37683_s1 + $0x24c4] ss:$100 sps:$4 sm:$0xff]  }
  0x4b   :  { %v25134_v18 = vld [vmem:[%s37683_s1 + $0x1900] ss:$100 sps:$4 sm:$0xff]  }
  0x4c   :  { %7689 = vmatpush1.bf16.msra.mxu0 %v25050_v19  ;;  %v25137_v19 = vld [vmem:[%s37683_s1 + $0x24c0] ss:$100 sps:$4 sm:$0xff]  }
  0x4d   :  { %7892 = vmatpush1.bf16.msra.mxu1 %v25053_v20  ;;  %7690 = vmatprep.subr.bf16.mxu0 %v25058_v21  ;;  %v25143_v20 = vld [vmem:[%s37683_s1 + $0x19cc] ss:$100 sps:$4 sm:$0xff]  }
  0x4e   :  { %7893 = vmatprep.subr.bf16.mxu1 %v25061_v22  ;;  %v25147_v21 = vld [vmem:[%s37683_s1 + $0x258c] ss:$100 sps:$4 sm:$0xff]  }
  0x4f   :  { %v25141_v22 = vld [vmem:[%s37683_s1 + $0x19c8] ss:$100 sps:$4 sm:$0xff]  }
  0x50   :  { %7691 = vmatpush1.bf16.msra.mxu0 %v25056_v23  ;;  %v29376_v23 = vcombine.low %v29243_v39, %v29243_v39  ;;  %v25171_v39 = vld [vmem:[%s37683_s1 + $0x1db4] ss:$100 sps:$4 sm:$0xff]  }
  0x51   :  { %7894 = vmatpush1.bf16.msra.mxu1 %v25059_v24  ;;  %7692 = vmatprep.subr.bf16.mxu0 %v25064_v25  ;;  %v25145_v24 = vld [vmem:[%s37683_s1 + $0x2588] ss:$100 sps:$4 sm:$0xff]   ;;  %v25150_v25 = vld [vmem:[%s37683_s1 + $0x1a94] ss:$100 sps:$4 sm:$0xff]  }
  0x52   :  { %7895 = vmatprep.subr.bf16.mxu1 %v25067_v26  ;;  %v25156_v26 = vld [vmem:[%s37683_s1 + $0x1c] ss:$100 sps:$4 sm:$0xff]  }
  0x54   :  { %7693 = vmatpush1.bf16.msra.mxu0 %v25062_v27  ;;  %v25148_v27 = vld [vmem:[%s37683_s1 + $0x1a90] ss:$100 sps:$4 sm:$0xff]  }
  0x55   :  { %7896 = vmatpush1.bf16.msra.mxu1 %v25065_v28  ;;  %7694 = vmatprep.subr.bf16.mxu0 %v25070_v29  ;;  %v25153_v28 = vld [vmem:[%s37683_s1 + $0x1b5c] ss:$100 sps:$4 sm:$0xff]  }
  0x56   :  { %7897 = vmatprep.subr.bf16.mxu1 %v25073_v30  ;;  %v25151_v29 = vld [vmem:[%s37683_s1 + $0x1b58] ss:$100 sps:$4 sm:$0xff]   ;;  %v25159_v30 = vld [vmem:[%s37683_s1 + $0x1c24] ss:$100 sps:$4 sm:$0xff]  }
  0x58   :  { %7695 = vmatpush1.bf16.msra.mxu0 %v25068_v31  ;;  %v25154_v31 = vld [vmem:[%s37683_s1 + $0x18] ss:$100 sps:$4 sm:$0xff]  }
  0x59   :  { %7898 = vmatpush1.bf16.msra.mxu1 %v25071_v32  ;;  %7696 = vmatprep.subr.bf16.mxu0 %v25076_v33  ;;  %v25157_v32 = vld [vmem:[%s37683_s1 + $0x1c20] ss:$100 sps:$4 sm:$0xff]  }
  0x5a   :  { %7899 = vmatprep.subr.bf16.mxu1 %v25079_v34  ;;  %v25162_v33 = vld [vmem:[%s37683_s1 + $0xe4] ss:$100 sps:$4 sm:$0xff]   ;;  %v25165_v34 = vld [vmem:[%s37683_s1 + $0x1cec] ss:$100 sps:$4 sm:$0xff]  }
  0x5c   :  { %7697 = vmatpush1.bf16.msra.mxu0 %v25074_v35  ;;  %v28874_v35 = vld [vmem:[%s37684_s0 + $0x18] ss:$0 sps:$4 sm:$0xff]  }
  0x5d   :  { %7900 = vmatpush1.bf16.msra.mxu1 %v25077_v36  ;;  %7698 = vmatprep.subr.bf16.mxu0 %v25082_v37  ;;  %v25160_v36 = vld [vmem:[%s37683_s1 + $0xe0] ss:$100 sps:$4 sm:$0xff]   ;;  %v25163_v37 = vld [vmem:[%s37683_s1 + $0x1ce8] ss:$100 sps:$4 sm:$0xff]  }
  0x5e   :  { %7901 = vmatprep.subr.bf16.mxu1 %v25085_v38  ;;  %v25168_v38 = vld [vmem:[%s37683_s1 + $0x1ac] ss:$100 sps:$4 sm:$0xff]  }
  0x60   :  { %7699 = vmatpush1.bf16.msra.mxu0 %v25080_v41  ;;  %v25166_v41 = vld [vmem:[%s37683_s1 + $0x1a8] ss:$100 sps:$4 sm:$0xff]  }
  0x61   :  { %7902 = vmatpush1.bf16.msra.mxu1 %v25083_v42  ;;  %7700 = vmatprep.subr.bf16.mxu0 %v25088_v43  ;;  %v25169_v42 = vld [vmem:[%s37683_s1 + $0x1db0] ss:$100 sps:$4 sm:$0xff]  }
  0x62   :  { %7903 = vmatprep.subr.bf16.mxu1 %v25091_v44  ;;  %v25174_v43 = vld [vmem:[%s37683_s1 + $0x274] ss:$100 sps:$4 sm:$0xff]   ;;  %v25177_v44 = vld [vmem:[%s37683_s1 + $0x1e7c] ss:$100 sps:$4 sm:$0xff]  }
  0x64   :  { %7701 = vmatpush1.bf16.msra.mxu0 %v25086_v45  ;;  %v25172_v45 = vld [vmem:[%s37683_s1 + $0x270] ss:$100 sps:$4 sm:$0xff]  }
  0x65   :  { %7904 = vmatpush1.bf16.msra.mxu1 %v25089_v46  ;;  %7702 = vmatprep.subr.bf16.mxu0 %v25094_v47  ;;  %v25175_v46 = vld [vmem:[%s37683_s1 + $0x1e78] ss:$100 sps:$4 sm:$0xff]  }
  0x66   :  { %7905 = vmatprep.subr.bf16.mxu1 %v25097_v48  ;;  %v25180_v47 = vld [vmem:[%s37683_s1 + $0x33c] ss:$100 sps:$4 sm:$0xff]   ;;  %v25183_v48 = vld [vmem:[%s37683_s1 + $0x1f44] ss:$100 sps:$4 sm:$0xff]  }
  0x68   :  { %7703 = vmatpush1.bf16.msra.mxu0 %v25092_v49  ;;  %v25178_v49 = vld [vmem:[%s37683_s1 + $0x338] ss:$100 sps:$4 sm:$0xff]  }
  0x69   :  { %7906 = vmatpush1.bf16.msra.mxu1 %v25095_v50  ;;  %7704 = vmatprep.subr.bf16.mxu0 %v25100_v51  ;;  %v25181_v50 = vld [vmem:[%s37683_s1 + $0x1f40] ss:$100 sps:$4 sm:$0xff]  }
  0x6a   :  { %7907 = vmatprep.subr.bf16.mxu1 %v25103_v53  ;;  %v25186_v51 = vld [vmem:[%s37683_s1 + $0x404] ss:$100 sps:$4 sm:$0xff]   ;;  %v25189_v53 = vld [vmem:[%s37683_s1 + $0x200c] ss:$100 sps:$4 sm:$0xff]  }
  0x6c   :  { %7705 = vmatpush1.bf16.msra.mxu0 %v25098_v54  ;;  %v25184_v54 = vld [vmem:[%s37683_s1 + $0x400] ss:$100 sps:$4 sm:$0xff]  }
  0x6d   :  { %7908 = vmatpush1.bf16.msra.mxu1 %v25101_v55  ;;  %7706 = vmatprep.subr.bf16.mxu0 %v25106_v56  ;;  %v25187_v55 = vld [vmem:[%s37683_s1 + $0x2008] ss:$100 sps:$4 sm:$0xff]  }
  0x6e   :  { %7909 = vmatprep.subr.bf16.mxu1 %v25109_v57  ;;  %v25192_v56 = vld [vmem:[%s37683_s1 + $0x4cc] ss:$100 sps:$4 sm:$0xff]   ;;  %v25195_v57 = vld [vmem:[%s37683_s1 + $0x20d4] ss:$100 sps:$4 sm:$0xff]  }
  0x70   :  { %7707 = vmatpush1.bf16.msra.mxu0 %v25104_v59  ;;  %v25190_v59 = vld [vmem:[%s37683_s1 + $0x4c8] ss:$100 sps:$4 sm:$0xff]  }
  0x71   :  { %7910 = vmatpush1.bf16.msra.mxu1 %v25107_v60  ;;  %7708 = vmatprep.subr.bf16.mxu0 %v25112_v61  ;;  %v25193_v60 = vld [vmem:[%s37683_s1 + $0x20d0] ss:$100 sps:$4 sm:$0xff]  }
  0x72   :  { %7911 = vmatprep.subr.bf16.mxu1 %v25115_v62  ;;  %v25198_v61 = vld [vmem:[%s37683_s1 + $0x594] ss:$100 sps:$4 sm:$0xff]   ;;  %v25201_v62 = vld [vmem:[%s37683_s1 + $0x219c] ss:$100 sps:$4 sm:$0xff]  }
  0x74   :  { %7709 = vmatpush1.bf16.msra.mxu0 %v25110_v63  ;;  %v25196_v63 = vld [vmem:[%s37683_s1 + $0x590] ss:$100 sps:$4 sm:$0xff]  }
  0x75   :  { %7912 = vmatpush1.bf16.msra.mxu1 %v25113_v0  ;;  %7710 = vmatprep.subr.bf16.mxu0 %v25118_v2  ;;  %v25199_v0 = vld [vmem:[%s37683_s1 + $0x2198] ss:$100 sps:$4 sm:$0xff]  }
  0x76   :  { %7913 = vmatprep.subr.bf16.mxu1 %v25121_v3  ;;  %v25204_v2 = vld [vmem:[%s37683_s1 + $0x65c] ss:$100 sps:$4 sm:$0xff]   ;;  %v25207_v3 = vld [vmem:[%s37683_s1 + $0x2264] ss:$100 sps:$4 sm:$0xff]  }
  0x78   :  { %7711 = vmatpush1.bf16.msra.mxu0 %v25116_v4  ;;  %v25202_v4 = vld [vmem:[%s37683_s1 + $0x658] ss:$100 sps:$4 sm:$0xff]  }
  0x79   :  { %7914 = vmatpush1.bf16.msra.mxu1 %v25119_v5  ;;  %7712 = vmatprep.subr.bf16.mxu0 %v25124_v6  ;;  %v25205_v5 = vld [vmem:[%s37683_s1 + $0x2260] ss:$100 sps:$4 sm:$0xff]  }
  0x7a   :  { %7915 = vmatprep.subr.bf16.mxu1 %v25127_v7  ;;  %v25210_v6 = vld [vmem:[%s37683_s1 + $0x724] ss:$100 sps:$4 sm:$0xff]   ;;  %v25213_v7 = vld [vmem:[%s37683_s1 + $0x232c] ss:$100 sps:$4 sm:$0xff]  }
  0x7c   :  { %7713 = vmatpush1.bf16.msra.mxu0 %v25122_v8  ;;  %v25208_v8 = vld [vmem:[%s37683_s1 + $0x720] ss:$100 sps:$4 sm:$0xff]  }
  0x7d   :  { %7916 = vmatpush1.bf16.msra.mxu1 %v25125_v9  ;;  %7714 = vmatprep.subr.bf16.mxu0 %v25130_v10  ;;  %v25211_v9 = vld [vmem:[%s37683_s1 + $0x2328] ss:$100 sps:$4 sm:$0xff]  }
  0x7e   :  { %7917 = vmatprep.subr.bf16.mxu1 %v25133_v12  ;;  %v25216_v10 = vld [vmem:[%s37683_s1 + $0x7ec] ss:$100 sps:$4 sm:$0xff]   ;;  %v25219_v12 = vld [vmem:[%s37683_s1 + $0x23f4] ss:$100 sps:$4 sm:$0xff]  }
  0x80   :  { %7715 = vmatpush1.bf16.msra.mxu0 %v25128_v13  ;;  %v25214_v13 = vld [vmem:[%s37683_s1 + $0x7e8] ss:$100 sps:$4 sm:$0xff]  }
  0x81   :  { %7918 = vmatpush1.bf16.msra.mxu1 %v25131_v14  ;;  %7725 = vmatprep.subr.bf16.mxu0 %v25136_v15  ;;  %v25217_v14 = vld [vmem:[%s37683_s1 + $0x23f0] ss:$100 sps:$4 sm:$0xff]  }
  0x82   :  { %7919 = vmatprep.subr.bf16.mxu1 %v25139_v17  ;;  %v25222_v15 = vld [vmem:[%s37683_s1 + $0x8b4] ss:$100 sps:$4 sm:$0xff]   ;;  %v25225_v17 = vld [vmem:[%s37683_s1 + $0x24bc] ss:$100 sps:$4 sm:$0xff]  }
  0x83   :  { %7717 = vmatmul.mubr.bf16.vlgmr.msra.gmra.mrb[0].mxu0 %v29170_v16 }
  0x84   :  { %7726 = vmatpush1.bf16.msra.mxu0 %v25134_v18  ;;  %7757 = vmatprep.mubr.bf16.mxu0 %v29247_v40  ;;  %v25220_v18 = vld [vmem:[%s37683_s1 + $0x8b0] ss:$100 sps:$4 sm:$0xff]  }
  0x85   :  { %7920 = vmatpush1.bf16.msra.mxu1 %v25137_v19  ;;  %7727 = vmatprep.subr.bf16.mxu0 %v25143_v20  ;;  %v25223_v19 = vld [vmem:[%s37683_s1 + $0x24b8] ss:$100 sps:$4 sm:$0xff]  }
  0x86   :  { %7930 = vmatprep.subr.bf16.mxu1 %v25147_v21  ;;  %v25228_v20 = vld [vmem:[%s37683_s1 + $0x97c] ss:$100 sps:$4 sm:$0xff]   ;;  %v25231_v21 = vld [vmem:[%s37683_s1 + $0xc] ss:$100 sps:$4 sm:$0xff]  }
  0x88   :  { %7922 = vmatmul.mubr.bf16.vlgmr.msra.gmra.mrb[4].mxu1 %v29376_v23  ;;  %7728 = vmatpush1.bf16.msra.mxu0 %v25141_v22  ;;  %v25226_v22 = vld [vmem:[%s37683_s1 + $0x978] ss:$100 sps:$4 sm:$0xff]  }
  0x89   :  { %7931 = vmatpush1.bf16.msra.mxu1 %v25145_v24  ;;  %7729 = vmatprep.subr.bf16.mxu0 %v25150_v25  ;;  %v25229_v24 = vld [vmem:[%s37683_s1 + $0x8] ss:$100 sps:$4 sm:$0xff]  }
  0x8a   :  { %7962 = vmatprep.mubr.bf16.mxu1 %v28886_v1  ;;  %8135 = vmatprep.subr.bf16.mxu1 %v25156_v26  ;;  %v25234_v25 = vld [vmem:[%s37683_s1 + $0xa44] ss:$100 sps:$4 sm:$0xff]   ;;  %v25237_v26 = vld [vmem:[%s37683_s1 + $0xd4] ss:$100 sps:$4 sm:$0xff]  }
  0x8c   :  { %7730 = vmatpush1.bf16.msra.mxu0 %v25148_v27  ;;  %v25232_v27 = vld [vmem:[%s37683_s1 + $0xa40] ss:$100 sps:$4 sm:$0xff]  }
  0x8d   :  { %7731 = vmatprep.subr.bf16.mxu0 %v25153_v28  ;;  %v25235_v28 = vld [vmem:[%s37683_s1 + $0xd0] ss:$100 sps:$4 sm:$0xff]  }
  0x90   :  { %7732 = vmatpush1.bf16.msra.mxu0 %v25151_v29  ;;  %v25240_v29 = vld [vmem:[%s37683_s1 + $0xb0c] ss:$100 sps:$4 sm:$0xff]  }
  0x91   :  { %7733 = vmatprep.subr.bf16.mxu0 %v25159_v30  ;;  %v25243_v30 = vld [vmem:[%s37683_s1 + $0x19c] ss:$100 sps:$4 sm:$0xff]  }
  0x94   :  { %22753 = vmatmul.mubr.msk.bf16.vlgmr.msra.gmra.mrb[4].mxu1 %vm7639_vm0, %v28874_v35  ;;  %7734 = vmatpush1.bf16.msra.mxu0 %v25157_v32  ;;  %v25241_v32 = vld [vmem:[%s37683_s1 + $0x198] ss:$100 sps:$4 sm:$0xff]   ;;  %v25244_v35 = vld [vmem:[%s37683_s1 + $0xbd0] ss:$100 sps:$4 sm:$0xff]  }
  0x95   :  { %8136 = vmatpush1.bf16.msra.mxu1 %v25154_v31  ;;  %7735 = vmatprep.subr.bf16.mxu0 %v25165_v34  ;;  %v25238_v31 = vld [vmem:[%s37683_s1 + $0xb08] ss:$100 sps:$4 sm:$0xff]  }
  0x96   :  { %8137 = vmatprep.subr.bf16.mxu1 %v25162_v33  ;;  %8167 = vmatprep.mubr.bf16.mxu1 %v29089_v52  ;;  %v25246_v33 = vld [vmem:[%s37683_s1 + $0xbd4] ss:$100 sps:$4 sm:$0xff]   ;;  %v25249_v34 = vld [vmem:[%s37683_s1 + $0x264] ss:$100 sps:$4 sm:$0xff]  }
  0x98   :  { %7736 = vmatpush1.bf16.msra.mxu0 %v25163_v37  ;;  %v25252_v37 = vld [vmem:[%s37683_s1 + $0xc9c] ss:$100 sps:$4 sm:$0xff]  }
  0x99   :  { %8138 = vmatpush1.bf16.msra.mxu1 %v25160_v36  ;;  %7737 = vmatprep.subr.bf16.mxu0 %v25171_v39  ;;  %v25247_v36 = vld [vmem:[%s37683_s1 + $0x260] ss:$100 sps:$4 sm:$0xff]   ;;  %v25250_v39 = vld [vmem:[%s37683_s1 + $0xc98] ss:$100 sps:$4 sm:$0xff]  }
  0x9a   :  { %8139 = vmatprep.subr.bf16.mxu1 %v25168_v38  ;;  %v25255_v38 = vld [vmem:[%s37683_s1 + $0x32c] ss:$100 sps:$4 sm:$0xff]  }
  0x9c   :  { %7738 = vmatpush1.bf16.msra.mxu0 %v25169_v42  ;;  %v25258_v42 = vld [vmem:[%s37683_s1 + $0xd64] ss:$100 sps:$4 sm:$0xff]  }
  0x9d   :  { %8140 = vmatpush1.bf16.msra.mxu1 %v25166_v41  ;;  %7739 = vmatprep.subr.bf16.mxu0 %v25177_v44  ;;  %v25253_v41 = vld [vmem:[%s37683_s1 + $0x328] ss:$100 sps:$4 sm:$0xff]   ;;  %v25256_v44 = vld [vmem:[%s37683_s1 + $0xd60] ss:$100 sps:$4 sm:$0xff]  }
  0x9e   :  { %8141 = vmatprep.subr.bf16.mxu1 %v25174_v43  ;;  %v25261_v43 = vld [vmem:[%s37683_s1 + $0x3f4] ss:$100 sps:$4 sm:$0xff]  }
  0xa0   :  { %7740 = vmatpush1.bf16.msra.mxu0 %v25175_v46  ;;  %v25264_v46 = vld [vmem:[%s37683_s1 + $0xe2c] ss:$100 sps:$4 sm:$0xff]  }
  0xa1   :  { %8142 = vmatpush1.bf16.msra.mxu1 %v25172_v45  ;;  %7741 = vmatprep.subr.bf16.mxu0 %v25183_v48  ;;  %v25259_v45 = vld [vmem:[%s37683_s1 + $0x3f0] ss:$100 sps:$4 sm:$0xff]   ;;  %v25262_v48 = vld [vmem:[%s37683_s1 + $0xe28] ss:$100 sps:$4 sm:$0xff]  }
  0xa2   :  { %8143 = vmatprep.subr.bf16.mxu1 %v25180_v47  ;;  %v25267_v47 = vld [vmem:[%s37683_s1 + $0x4bc] ss:$100 sps:$4 sm:$0xff]  }
  0xa4   :  { %7742 = vmatpush1.bf16.msra.mxu0 %v25181_v50  ;;  %v25270_v50 = vld [vmem:[%s37683_s1 + $0xef4] ss:$100 sps:$4 sm:$0xff]  }
  0xa5   :  { %8144 = vmatpush1.bf16.msra.mxu1 %v25178_v49  ;;  %7743 = vmatprep.subr.bf16.mxu0 %v25189_v53  ;;  %v25265_v49 = vld [vmem:[%s37683_s1 + $0x4b8] ss:$100 sps:$4 sm:$0xff]  }
  0xa6   :  { %8145 = vmatprep.subr.bf16.mxu1 %v25186_v51  ;;  %v25273_v51 = vld [vmem:[%s37683_s1 + $0x584] ss:$100 sps:$4 sm:$0xff]  }
  0xa8   :  { %7744 = vmatpush1.bf16.msra.mxu0 %v25187_v55  ;;  %v25268_v55 = vld [vmem:[%s37683_s1 + $0xef0] ss:$100 sps:$4 sm:$0xff]  }
  0xa9   :  { %8146 = vmatpush1.bf16.msra.mxu1 %v25184_v54  ;;  %7745 = vmatprep.subr.bf16.mxu0 %v25195_v57  ;;  %v25271_v57 = vld [vmem:[%s37683_s1 + $0x580] ss:$100 sps:$4 sm:$0xff]  }
  0xaa   :  { %8147 = vmatprep.subr.bf16.mxu1 %v25192_v56 }
  0xac   :  { %7746 = vmatpush1.bf16.msra.mxu0 %v25193_v60  ;;  %v25276_v60 = vld [vmem:[%s37683_s1 + $0xfbc] ss:$100 sps:$4 sm:$0xff]  }
  0xad   :  { %8148 = vmatpush1.bf16.msra.mxu1 %v25190_v59  ;;  %7747 = vmatprep.subr.bf16.mxu0 %v25201_v62  ;;  %v25274_v62 = vld [vmem:[%s37683_s1 + $0xfb8] ss:$100 sps:$4 sm:$0xff]  }
  0xae   :  { %8149 = vmatprep.subr.bf16.mxu1 %v25198_v61  ;;  %v25279_v61 = vld [vmem:[%s37683_s1 + $0x64c] ss:$100 sps:$4 sm:$0xff]  }
  0xb0   :  { %7748 = vmatpush1.bf16.msra.mxu0 %v25199_v0  ;;  %v25282_v0 = vld [vmem:[%s37683_s1 + $0x1084] ss:$100 sps:$4 sm:$0xff]  }
  0xb1   :  { %8150 = vmatpush1.bf16.msra.mxu1 %v25196_v63  ;;  %7749 = vmatprep.subr.bf16.mxu0 %v25207_v3  ;;  %v25277_v63 = vld [vmem:[%s37683_s1 + $0x648] ss:$100 sps:$4 sm:$0xff]   ;;  %v25280_v3 = vld [vmem:[%s37683_s1 + $0x1080] ss:$100 sps:$4 sm:$0xff]  }
  0xb2   :  { %8151 = vmatprep.subr.bf16.mxu1 %v25204_v2  ;;  %v25285_v2 = vld [vmem:[%s37683_s1 + $0x714] ss:$100 sps:$4 sm:$0xff]  }
  0xb4   :  { %7750 = vmatpush1.bf16.msra.mxu0 %v25205_v5  ;;  %v25288_v5 = vld [vmem:[%s37683_s1 + $0x114c] ss:$100 sps:$4 sm:$0xff]  }
  0xb5   :  { %8152 = vmatpush1.bf16.msra.mxu1 %v25202_v4  ;;  %7751 = vmatprep.subr.bf16.mxu0 %v25213_v7  ;;  %v25283_v4 = vld [vmem:[%s37683_s1 + $0x710] ss:$100 sps:$4 sm:$0xff]   ;;  %v25286_v7 = vld [vmem:[%s37683_s1 + $0x1148] ss:$100 sps:$4 sm:$0xff]  }
  0xb6   :  { %8153 = vmatprep.subr.bf16.mxu1 %v25210_v6  ;;  %v25291_v6 = vld [vmem:[%s37683_s1 + $0x7dc] ss:$100 sps:$4 sm:$0xff]  }
  0xb8   :  { %7752 = vmatpush1.bf16.msra.mxu0 %v25211_v9  ;;  %v25294_v9 = vld [vmem:[%s37683_s1 + $0x1214] ss:$100 sps:$4 sm:$0xff]  }
  0xb9   :  { %8154 = vmatpush1.bf16.msra.mxu1 %v25208_v8  ;;  %7753 = vmatprep.subr.bf16.mxu0 %v25219_v12  ;;  %v25289_v8 = vld [vmem:[%s37683_s1 + $0x7d8] ss:$100 sps:$4 sm:$0xff]   ;;  %v25292_v12 = vld [vmem:[%s37683_s1 + $0x1210] ss:$100 sps:$4 sm:$0xff]  }
  0xba   :  { %8155 = vmatprep.subr.bf16.mxu1 %v25216_v10  ;;  %v25297_v10 = vld [vmem:[%s37683_s1 + $0x8a4] ss:$100 sps:$4 sm:$0xff]  }
  0xbc   :  { %7754 = vmatpush1.bf16.msra.mxu0 %v25217_v14  ;;  %v25300_v14 = vld [vmem:[%s37683_s1 + $0x12dc] ss:$100 sps:$4 sm:$0xff]  }
  0xbd   :  { %8156 = vmatpush1.bf16.msra.mxu1 %v25214_v13  ;;  %7755 = vmatprep.subr.bf16.mxu0 %v25225_v17  ;;  %v25295_v13 = vld [vmem:[%s37683_s1 + $0x8a0] ss:$100 sps:$4 sm:$0xff]   ;;  %v25298_v17 = vld [vmem:[%s37683_s1 + $0x12d8] ss:$100 sps:$4 sm:$0xff]  }
  0xbe   :  { %8157 = vmatprep.subr.bf16.mxu1 %v25222_v15  ;;  %v25303_v15 = vld [vmem:[%s37683_s1 + $0x96c] ss:$100 sps:$4 sm:$0xff]  }
  0xc0   :  { %7756 = vmatpush1.bf16.msra.mxu0 %v25223_v19  ;;  %v25306_v19 = vld [vmem:[%s37683_s1 + $0x13a4] ss:$100 sps:$4 sm:$0xff]  }
  0xc1   :  { %8158 = vmatpush1.bf16.msra.mxu1 %v25220_v18  ;;  %7807 = vmatprep.subr.bf16.mxu0 %v25231_v21  ;;  %v25301_v18 = vld [vmem:[%s37683_s1 + $0x968] ss:$100 sps:$4 sm:$0xff]   ;;  %v25304_v21 = vld [vmem:[%s37683_s1 + $0x13a0] ss:$100 sps:$4 sm:$0xff]  }
  0xc2   :  { %8159 = vmatprep.subr.bf16.mxu1 %v25228_v20  ;;  %v25309_v20 = vld [vmem:[%s37683_s1 + $0xa34] ss:$100 sps:$4 sm:$0xff]  }
  0xc3   :  { %7758 = vmatmul.mubr.bf16.vlgmr.msra.gmra.mrb[0].mxu0 %v29376_v23 }
  0xc4   :  { %7808 = vmatpush1.bf16.msra.mxu0 %v25229_v24  ;;  %7839 = vmatprep.mubr.bf16.mxu0 %v29089_v52  ;;  %v25312_v24 = vld [vmem:[%s37683_s1 + $0x146c] ss:$100 sps:$4 sm:$0xff]  }
  0xc5   :  { %8160 = vmatpush1.bf16.msra.mxu1 %v25226_v22  ;;  %7809 = vmatprep.subr.bf16.mxu0 %v25237_v26  ;;  %v25307_v22 = vld [vmem:[%s37683_s1 + $0xa30] ss:$100 sps:$4 sm:$0xff]   ;;  %v25310_v26 = vld [vmem:[%s37683_s1 + $0x1468] ss:$100 sps:$4 sm:$0xff]  }
  0xc6   :  { %8161 = vmatprep.subr.bf16.mxu1 %v25234_v25  ;;  %v25315_v25 = vld [vmem:[%s37683_s1 + $0xafc] ss:$100 sps:$4 sm:$0xff]  }
  0xc8   :  { %7810 = vmatpush1.bf16.msra.mxu0 %v25235_v28  ;;  %v25318_v28 = vld [vmem:[%s37683_s1 + $0x1534] ss:$100 sps:$4 sm:$0xff]  }
  0xc9   :  { %8162 = vmatpush1.bf16.msra.mxu1 %v25232_v27  ;;  %7811 = vmatprep.subr.bf16.mxu0 %v25243_v30  ;;  %v25313_v27 = vld [vmem:[%s37683_s1 + $0xaf8] ss:$100 sps:$4 sm:$0xff]   ;;  %v25316_v30 = vld [vmem:[%s37683_s1 + $0x1530] ss:$100 sps:$4 sm:$0xff]  }
  0xca   :  { %8163 = vmatprep.subr.bf16.mxu1 %v25240_v29  ;;  %v25321_v29 = vld [vmem:[%s37683_s1 + $0xbc4] ss:$100 sps:$4 sm:$0xff]  }
  0xcc   :  { %7812 = vmatpush1.bf16.msra.mxu0 %v25241_v32  ;;  %v25324_v32 = vld [vmem:[%s37683_s1 + $0x15fc] ss:$100 sps:$4 sm:$0xff]  }
  0xcd   :  { %8164 = vmatpush1.bf16.msra.mxu1 %v25238_v31  ;;  %7813 = vmatprep.subr.bf16.mxu0 %v25249_v34  ;;  %v25319_v31 = vld [vmem:[%s37683_s1 + $0xbc0] ss:$100 sps:$4 sm:$0xff]   ;;  %v25322_v34 = vld [vmem:[%s37683_s1 + $0x15f8] ss:$100 sps:$4 sm:$0xff]  }
  0xce   :  { %8165 = vmatprep.subr.bf16.mxu1 %v25246_v33  ;;  %v25327_v33 = vld [vmem:[%s37683_s1 + $0x14] ss:$100 sps:$4 sm:$0xff]  }
  0xd0   :  { %7814 = vmatpush1.bf16.msra.mxu0 %v25247_v36  ;;  %v25330_v36 = vld [vmem:[%s37683_s1 + $0x16c4] ss:$100 sps:$4 sm:$0xff]  }
  0xd1   :  { %8166 = vmatpush1.bf16.msra.mxu1 %v25244_v35  ;;  %7815 = vmatprep.subr.bf16.mxu0 %v25255_v38  ;;  %v25325_v35 = vld [vmem:[%s37683_s1 + $0x10] ss:$100 sps:$4 sm:$0xff]   ;;  %v25328_v38 = vld [vmem:[%s37683_s1 + $0x16c0] ss:$100 sps:$4 sm:$0xff]  }
  0xd2   :  { %8176 = vmatprep.subr.bf16.mxu1 %v25252_v37  ;;  %v25333_v37 = vld [vmem:[%s37683_s1 + $0xdc] ss:$100 sps:$4 sm:$0xff]  }
  0xd4   :  { %8168 = vmatmul.mubr.bf16.vlgmr.msra.gmra.mrb[8].mxu1 %v29155_v11  ;;  %7816 = vmatpush1.bf16.msra.mxu0 %v25253_v41  ;;  %v25336_v41 = vld [vmem:[%s37683_s1 + $0x178c] ss:$100 sps:$4 sm:$0xff]  }
  0xd5   :  { %8177 = vmatpush1.bf16.msra.mxu1 %v25250_v39  ;;  %7817 = vmatprep.subr.bf16.mxu0 %v25261_v43  ;;  %v25331_v39 = vld [vmem:[%s37683_s1 + $0xd8] ss:$100 sps:$4 sm:$0xff]   ;;  %v25334_v43 = vld [vmem:[%s37683_s1 + $0x1788] ss:$100 sps:$4 sm:$0xff]  }
  0xd6   :  { %8178 = vmatprep.subr.bf16.mxu1 %v25258_v42  ;;  %8208 = vmatprep.mubr.bf16.mxu1 %v29107_v58  ;;  %v25339_v42 = vld [vmem:[%s37683_s1 + $0x1a4] ss:$100 sps:$4 sm:$0xff]  }
  0xd8   :  { %7818 = vmatpush1.bf16.msra.mxu0 %v25259_v45  ;;  %v25342_v45 = vld [vmem:[%s37683_s1 + $0x1854] ss:$100 sps:$4 sm:$0xff]  }
  0xd9   :  { %8179 = vmatpush1.bf16.msra.mxu1 %v25256_v44  ;;  %7819 = vmatprep.subr.bf16.mxu0 %v25267_v47  ;;  %v25337_v44 = vld [vmem:[%s37683_s1 + $0x1a0] ss:$100 sps:$4 sm:$0xff]   ;;  %v25340_v47 = vld [vmem:[%s37683_s1 + $0x1850] ss:$100 sps:$4 sm:$0xff]  }
  0xda   :  { %8180 = vmatprep.subr.bf16.mxu1 %v25264_v46  ;;  %v25345_v46 = vld [vmem:[%s37683_s1 + $0x26c] ss:$100 sps:$4 sm:$0xff]  }
  0xdb   :  { %v29639_v53 = vpop.f32.mrb[0].mxu1 }
  0xdc   :  { %v29641_v54 = vpop.f32.mrb[1].mxu1  ;;  %7820 = vmatpush1.bf16.msra.mxu0 %v25265_v49  ;;  %v25348_v49 = vld [vmem:[%s37683_s1 + $0x191c] ss:$100 sps:$4 sm:$0xff]  }
  0xdd   :  { %8181 = vmatpush1.bf16.msra.mxu1 %v25262_v48  ;;  %v7804_v56 = vpop.f32.mrb[2].mxu1  ;;  %7821 = vmatprep.subr.bf16.mxu0 %v25273_v51  ;;  %v25343_v48 = vld [vmem:[%s37683_s1 + $0x268] ss:$100 sps:$4 sm:$0xff]   ;;  %v25346_v51 = vld [vmem:[%s37683_s1 + $0x1918] ss:$100 sps:$4 sm:$0xff]  }
  0xde   :  { %v7805_v59 = vpop.f32.mrb[3].mxu1  ;;  %8182 = vmatprep.subr.bf16.mxu1 %v25270_v50  ;;  %v25351_v50 = vld [vmem:[%s37683_s1 + $0x334] ss:$100 sps:$4 sm:$0xff]   ;;  %v25354_v56 = vld [vmem:[%s37683_s1 + $0x19e4] ss:$100 sps:$4 sm:$0xff]  }
  0xdf   :  { %v25352_v59 = vld [vmem:[%s37683_s1 + $0x19e0] ss:$100 sps:$4 sm:$0xff]  }
  0xe0   :  { %7822 = vmatpush1.bf16.msra.mxu0 %v25271_v57  ;;  %v25357_v57 = vld [vmem:[%s37683_s1 + $0x3fc] ss:$100 sps:$4 sm:$0xff]  }
  0xe1   :  { %8183 = vmatpush1.bf16.msra.mxu1 %v25268_v55  ;;  %7823 = vmatprep.subr.bf16.mxu0 %v25279_v61  ;;  %v25349_v55 = vld [vmem:[%s37683_s1 + $0x330] ss:$100 sps:$4 sm:$0xff]  }
  0xe2   :  { %8184 = vmatprep.subr.bf16.mxu1 %v25276_v60  ;;  %v25355_v60 = vld [vmem:[%s37683_s1 + $0x3f8] ss:$100 sps:$4 sm:$0xff]   ;;  %v25360_v61 = vld [vmem:[%s37683_s1 + $0x1aac] ss:$100 sps:$4 sm:$0xff]  }
  0xe4   :  { %7824 = vmatpush1.bf16.msra.mxu0 %v25277_v63  ;;  %v25358_v63 = vld [vmem:[%s37683_s1 + $0x1aa8] ss:$100 sps:$4 sm:$0xff]  }
  0xe5   :  { %8185 = vmatpush1.bf16.msra.mxu1 %v25274_v62  ;;  %7825 = vmatprep.subr.bf16.mxu0 %v25285_v2  ;;  %v25363_v62 = vld [vmem:[%s37683_s1 + $0x4c4] ss:$100 sps:$4 sm:$0xff]   ;;  %v25366_v2 = vld [vmem:[%s37683_s1 + $0x1b74] ss:$100 sps:$4 sm:$0xff]  }
  0xe6   :  { %8186 = vmatprep.subr.bf16.mxu1 %v25282_v0  ;;  %v25361_v0 = vld [vmem:[%s37683_s1 + $0x4c0] ss:$100 sps:$4 sm:$0xff]  }
  0xe8   :  { %7826 = vmatpush1.bf16.msra.mxu0 %v25283_v4  ;;  %v25364_v4 = vld [vmem:[%s37683_s1 + $0x1b70] ss:$100 sps:$4 sm:$0xff]  }
  0xe9   :  { %8187 = vmatpush1.bf16.msra.mxu1 %v25280_v3  ;;  %7827 = vmatprep.subr.bf16.mxu0 %v25291_v6  ;;  %v25369_v3 = vld [vmem:[%s37683_s1 + $0x58c] ss:$100 sps:$4 sm:$0xff]   ;;  %v25372_v6 = vld [vmem:[%s37683_s1 + $0x1c3c] ss:$100 sps:$4 sm:$0xff]  }
  0xea   :  { %8188 = vmatprep.subr.bf16.mxu1 %v25288_v5  ;;  %v25367_v5 = vld [vmem:[%s37683_s1 + $0x588] ss:$100 sps:$4 sm:$0xff]  }
  0xec   :  { %7828 = vmatpush1.bf16.msra.mxu0 %v25289_v8  ;;  %v25370_v8 = vld [vmem:[%s37683_s1 + $0x1c38] ss:$100 sps:$4 sm:$0xff]  }
  0xed   :  { %8189 = vmatpush1.bf16.msra.mxu1 %v25286_v7  ;;  %7829 = vmatprep.subr.bf16.mxu0 %v25297_v10  ;;  %v25375_v7 = vld [vmem:[%s37683_s1 + $0x654] ss:$100 sps:$4 sm:$0xff]   ;;  %v25378_v10 = vld [vmem:[%s37683_s1 + $0x1d04] ss:$100 sps:$4 sm:$0xff]  }
  0xee   :  { %8190 = vmatprep.subr.bf16.mxu1 %v25294_v9  ;;  %v25373_v9 = vld [vmem:[%s37683_s1 + $0x650] ss:$100 sps:$4 sm:$0xff]  }
  0xf0   :  { %7830 = vmatpush1.bf16.msra.mxu0 %v25295_v13  ;;  %v25376_v13 = vld [vmem:[%s37683_s1 + $0x1d00] ss:$100 sps:$4 sm:$0xff]  }
  0xf1   :  { %8191 = vmatpush1.bf16.msra.mxu1 %v25292_v12  ;;  %7831 = vmatprep.subr.bf16.mxu0 %v25303_v15  ;;  %v25381_v12 = vld [vmem:[%s37683_s1 + $0x71c] ss:$100 sps:$4 sm:$0xff]   ;;  %v25384_v15 = vld [vmem:[%s37683_s1 + $0x1dcc] ss:$100 sps:$4 sm:$0xff]  }
  0xf2   :  { %8192 = vmatprep.subr.bf16.mxu1 %v25300_v14  ;;  %v25379_v14 = vld [vmem:[%s37683_s1 + $0x718] ss:$100 sps:$4 sm:$0xff]  }
  0xf4   :  { %7832 = vmatpush1.bf16.msra.mxu0 %v25301_v18  ;;  %v25382_v18 = vld [vmem:[%s37683_s1 + $0x1dc8] ss:$100 sps:$4 sm:$0xff]  }
  0xf5   :  { %8193 = vmatpush1.bf16.msra.mxu1 %v25298_v17  ;;  %7833 = vmatprep.subr.bf16.mxu0 %v25309_v20  ;;  %v25387_v17 = vld [vmem:[%s37683_s1 + $0x7e4] ss:$100 sps:$4 sm:$0xff]   ;;  %v25390_v20 = vld [vmem:[%s37683_s1 + $0x1e94] ss:$100 sps:$4 sm:$0xff]  }
  0xf6   :  { %8194 = vmatprep.subr.bf16.mxu1 %v25306_v19  ;;  %v25385_v19 = vld [vmem:[%s37683_s1 + $0x7e0] ss:$100 sps:$4 sm:$0xff]  }
  0xf8   :  { %7834 = vmatpush1.bf16.msra.mxu0 %v25307_v22  ;;  %v25388_v22 = vld [vmem:[%s37683_s1 + $0x1e90] ss:$100 sps:$4 sm:$0xff]  }
  0xf9   :  { %8195 = vmatpush1.bf16.msra.mxu1 %v25304_v21  ;;  %7835 = vmatprep.subr.bf16.mxu0 %v25315_v25  ;;  %v25393_v21 = vld [vmem:[%s37683_s1 + $0x8ac] ss:$100 sps:$4 sm:$0xff]   ;;  %v25396_v25 = vld [vmem:[%s37683_s1 + $0x1f5c] ss:$100 sps:$4 sm:$0xff]  }
  0xfa   :  { %8196 = vmatprep.subr.bf16.mxu1 %v25312_v24  ;;  %v25391_v24 = vld [vmem:[%s37683_s1 + $0x8a8] ss:$100 sps:$4 sm:$0xff]  }
  0xfc   :  { %7836 = vmatpush1.bf16.msra.mxu0 %v25313_v27  ;;  %v25394_v27 = vld [vmem:[%s37683_s1 + $0x1f58] ss:$100 sps:$4 sm:$0xff]  }
  0xfd   :  { %8197 = vmatpush1.bf16.msra.mxu1 %v25310_v26  ;;  %7837 = vmatprep.subr.bf16.mxu0 %v25321_v29  ;;  %v25399_v26 = vld [vmem:[%s37683_s1 + $0x974] ss:$100 sps:$4 sm:$0xff]   ;;  %v25402_v29 = vld [vmem:[%s37683_s1 + $0x2024] ss:$100 sps:$4 sm:$0xff]  }
  0xfe   :  { %8198 = vmatprep.subr.bf16.mxu1 %v25318_v28  ;;  %v25397_v28 = vld [vmem:[%s37683_s1 + $0x970] ss:$100 sps:$4 sm:$0xff]  }
 0x100   :  { %7838 = vmatpush1.bf16.msra.mxu0 %v25319_v31  ;;  %v25400_v31 = vld [vmem:[%s37683_s1 + $0x2020] ss:$100 sps:$4 sm:$0xff]  }
 0x101   :  { %8199 = vmatpush1.bf16.msra.mxu1 %v25316_v30  ;;  %7971 = vmatprep.subr.bf16.mxu0 %v25327_v33  ;;  %v25405_v30 = vld [vmem:[%s37683_s1 + $0xa3c] ss:$100 sps:$4 sm:$0xff]   ;;  %v25408_v33 = vld [vmem:[%s37683_s1 + $0x20ec] ss:$100 sps:$4 sm:$0xff]  }
 0x102   :  { %8200 = vmatprep.subr.bf16.mxu1 %v25324_v32  ;;  %v25403_v32 = vld [vmem:[%s37683_s1 + $0xa38] ss:$100 sps:$4 sm:$0xff]  }
 0x103   :  { %7840 = vmatmul.mubr.bf16.vlgmr.msra.gmra.mrb[4].mxu0 %v29155_v11 }
 0x104   :  { %7972 = vmatpush1.bf16.msra.mxu0 %v25325_v35  ;;  %8003 = vmatprep.mubr.bf16.mxu0 %v29089_v52  ;;  %v25406_v35 = vld [vmem:[%s37683_s1 + $0x20e8] ss:$100 sps:$4 sm:$0xff]  }
 0x105   :  { %8201 = vmatpush1.bf16.msra.mxu1 %v25322_v34  ;;  %7973 = vmatprep.subr.bf16.mxu0 %v25333_v37  ;;  %v25411_v34 = vld [vmem:[%s37683_s1 + $0xb04] ss:$100 sps:$4 sm:$0xff]   ;;  %v25414_v37 = vld [vmem:[%s37683_s1 + $0x21b4] ss:$100 sps:$4 sm:$0xff]  }
 0x106   :  { %8202 = vmatprep.subr.bf16.mxu1 %v25330_v36  ;;  %v25409_v36 = vld [vmem:[%s37683_s1 + $0xb00] ss:$100 sps:$4 sm:$0xff]  }
 0x108   :  { %7974 = vmatpush1.bf16.msra.mxu0 %v25331_v39  ;;  %v25412_v39 = vld [vmem:[%s37683_s1 + $0x21b0] ss:$100 sps:$4 sm:$0xff]  }
 0x109   :  { %8203 = vmatpush1.bf16.msra.mxu1 %v25328_v38  ;;  %7975 = vmatprep.subr.bf16.mxu0 %v25339_v42  ;;  %v25417_v38 = vld [vmem:[%s37683_s1 + $0xbcc] ss:$100 sps:$4 sm:$0xff]   ;;  %v25420_v42 = vld [vmem:[%s37683_s1 + $0x227c] ss:$100 sps:$4 sm:$0xff]  }
 0x10a   :  { %8204 = vmatprep.subr.bf16.mxu1 %v25336_v41  ;;  %v25415_v41 = vld [vmem:[%s37683_s1 + $0xbc8] ss:$100 sps:$4 sm:$0xff]  }
 0x10c   :  { %7976 = vmatpush1.bf16.msra.mxu0 %v25337_v44  ;;  %v25418_v44 = vld [vmem:[%s37683_s1 + $0x2278] ss:$100 sps:$4 sm:$0xff]  }
 0x10d   :  { %8205 = vmatpush1.bf16.msra.mxu1 %v25334_v43  ;;  %7977 = vmatprep.subr.bf16.mxu0 %v25345_v46  ;;  %v25423_v43 = vld [vmem:[%s37683_s1 + $0xc94] ss:$100 sps:$4 sm:$0xff]   ;;  %v25426_v46 = vld [vmem:[%s37683_s1 + $0x2344] ss:$100 sps:$4 sm:$0xff]  }
 0x10e   :  { %8206 = vmatprep.subr.bf16.mxu1 %v25342_v45  ;;  %v25421_v45 = vld [vmem:[%s37683_s1 + $0xc90] ss:$100 sps:$4 sm:$0xff]  }
 0x110   :  { %7978 = vmatpush1.bf16.msra.mxu0 %v25343_v48  ;;  %v25424_v48 = vld [vmem:[%s37683_s1 + $0x2340] ss:$100 sps:$4 sm:$0xff]  }
 0x111   :  { %8207 = vmatpush1.bf16.msra.mxu1 %v25340_v47  ;;  %7979 = vmatprep.subr.bf16.mxu0 %v25351_v50  ;;  %v25429_v47 = vld [vmem:[%s37683_s1 + $0xd5c] ss:$100 sps:$4 sm:$0xff]   ;;  %v25432_v50 = vld [vmem:[%s37683_s1 + $0x240c] ss:$100 sps:$4 sm:$0xff]  }
 0x112   :  { %8217 = vmatprep.subr.bf16.mxu1 %v25348_v49  ;;  %v25427_v49 = vld [vmem:[%s37683_s1 + $0xd58] ss:$100 sps:$4 sm:$0xff]  }
 0x114   :  { %8209 = vmatmul.mubr.bf16.vlgmr.msra.gmra.mrb[8].mxu1 %v29170_v16  ;;  %7980 = vmatpush1.bf16.msra.mxu0 %v25349_v55  ;;  %v25430_v55 = vld [vmem:[%s37683_s1 + $0x2408] ss:$100 sps:$4 sm:$0xff]  }
 0x115   :  { %8218 = vmatpush1.bf16.msra.mxu1 %v25346_v51  ;;  %7981 = vmatprep.subr.bf16.mxu0 %v25357_v57  ;;  %v25435_v51 = vld [vmem:[%s37683_s1 + $0xe24] ss:$100 sps:$4 sm:$0xff]   ;;  %v25438_v57 = vld [vmem:[%s37683_s1 + $0x24d4] ss:$100 sps:$4 sm:$0xff]  }
 0x116   :  { %8219 = vmatprep.subr.bf16.mxu1 %v25354_v56  ;;  %8249 = vmatprep.mubr.bf16.mxu1 %v29247_v40  ;;  %v25433_v56 = vld [vmem:[%s37683_s1 + $0xe20] ss:$100 sps:$4 sm:$0xff]  }
 0x118   :  { %7982 = vmatpush1.bf16.msra.mxu0 %v25355_v60  ;;  %v25436_v60 = vld [vmem:[%s37683_s1 + $0x24d0] ss:$100 sps:$4 sm:$0xff]  }
 0x119   :  { %8220 = vmatpush1.bf16.msra.mxu1 %v25352_v59  ;;  %7983 = vmatprep.subr.bf16.mxu0 %v25363_v62  ;;  %v25441_v59 = vld [vmem:[%s37683_s1 + $0xeec] ss:$100 sps:$4 sm:$0xff]   ;;  %v25444_v62 = vld [vmem:[%s37683_s1 + $0x259c] ss:$100 sps:$4 sm:$0xff]  }
 0x11a   :  { %8221 = vmatprep.subr.bf16.mxu1 %v25360_v61  ;;  %v25439_v61 = vld [vmem:[%s37683_s1 + $0xee8] ss:$100 sps:$4 sm:$0xff]  }
 0x11c   :  { %7984 = vmatpush1.bf16.msra.mxu0 %v25361_v0  ;;  %v25442_v0 = vld [vmem:[%s37683_s1 + $0x2598] ss:$100 sps:$4 sm:$0xff]  }
 0x11d   :  { %8222 = vmatpush1.bf16.msra.mxu1 %v25358_v63  ;;  %7985 = vmatprep.subr.bf16.mxu0 %v25369_v3  ;;  %v25447_v63 = vld [vmem:[%s37683_s1 + $0xfb4] ss:$100 sps:$4 sm:$0xff]   ;;  %v25450_v3 = vld [vmem:[%s37683_s1 + $0x107c] ss:$100 sps:$4 sm:$0xff]  }
 0x11e   :  { %8223 = vmatprep.subr.bf16.mxu1 %v25366_v2  ;;  %v25445_v2 = vld [vmem:[%s37683_s1 + $0xfb0] ss:$100 sps:$4 sm:$0xff]  }
 0x120   :  { %7986 = vmatpush1.bf16.msra.mxu0 %v25367_v5  ;;  %v25448_v5 = vld [vmem:[%s37683_s1 + $0x1078] ss:$100 sps:$4 sm:$0xff]  }
 0x121   :  { %8224 = vmatpush1.bf16.msra.mxu1 %v25364_v4  ;;  %7987 = vmatprep.subr.bf16.mxu0 %v25375_v7  ;;  %v25456_v4 = vld [vmem:[%s37683_s1 + $0x2c] ss:$100 sps:$4 sm:$0xff]   ;;  %v25451_v7 = vld [vmem:[%s37683_s1 + $0x1140] ss:$100 sps:$4 sm:$0xff]  }
 0x122   :  { %8225 = vmatprep.subr.bf16.mxu1 %v25372_v6  ;;  %v25453_v6 = vld [vmem:[%s37683_s1 + $0x1144] ss:$100 sps:$4 sm:$0xff]  }
 0x124   :  { %7988 = vmatpush1.bf16.msra.mxu0 %v25373_v9  ;;  %v25454_v9 = vld [vmem:[%s37683_s1 + $0x28] ss:$100 sps:$4 sm:$0xff]  }
 0x125   :  { %8226 = vmatpush1.bf16.msra.mxu1 %v25370_v8  ;;  %7989 = vmatprep.subr.bf16.mxu0 %v25381_v12  ;;  %v25459_v8 = vld [vmem:[%s37683_s1 + $0x120c] ss:$100 sps:$4 sm:$0xff]   ;;  %v25462_v12 = vld [vmem:[%s37683_s1 + $0xf4] ss:$100 sps:$4 sm:$0xff]  }
 0x126   :  { %8227 = vmatprep.subr.bf16.mxu1 %v25378_v10  ;;  %v25457_v10 = vld [vmem:[%s37683_s1 + $0x1208] ss:$100 sps:$4 sm:$0xff]  }
 0x128   :  { %7990 = vmatpush1.bf16.msra.mxu0 %v25379_v14  ;;  %v30038_v14 = vld [vmem:[%s37684_s0 + $0x18] ss:$0 sps:$4 sm:$0xff]  }
 0x129   :  { %8228 = vmatpush1.bf16.msra.mxu1 %v25376_v13  ;;  %7991 = vmatprep.subr.bf16.mxu0 %v25387_v17  ;;  %v25465_v13 = vld [vmem:[%s37683_s1 + $0x12d4] ss:$100 sps:$4 sm:$0xff]  }
 0x12a   :  { %8229 = vmatprep.subr.bf16.mxu1 %v25384_v15  ;;  %v25460_v15 = vld [vmem:[%s37683_s1 + $0xf0] ss:$100 sps:$4 sm:$0xff]  }
 0x12b   :  { %v25463_v17 = vld [vmem:[%s37683_s1 + $0x12d0] ss:$100 sps:$4 sm:$0xff]  }
 0x12c   :  { %7992 = vmatpush1.bf16.msra.mxu0 %v25385_v19  ;;  %v25471_v19 = vld [vmem:[%s37683_s1 + $0x139c] ss:$100 sps:$4 sm:$0xff]  }
 0x12d   :  { %8230 = vmatpush1.bf16.msra.mxu1 %v25382_v18  ;;  %7993 = vmatprep.subr.bf16.mxu0 %v25393_v21  ;;  %v25468_v18 = vld [vmem:[%s37683_s1 + $0x1bc] ss:$100 sps:$4 sm:$0xff]  }
 0x12e   :  { %8231 = vmatprep.subr.bf16.mxu1 %v25390_v20  ;;  %v25466_v20 = vld [vmem:[%s37683_s1 + $0x1b8] ss:$100 sps:$4 sm:$0xff]  }
 0x12f   :  { %v25469_v21 = vld [vmem:[%s37683_s1 + $0x1398] ss:$100 sps:$4 sm:$0xff]  }
 0x130   :  { %7994 = vmatpush1.bf16.msra.mxu0 %v25391_v24  ;;  %v25477_v24 = vld [vmem:[%s37683_s1 + $0x1464] ss:$100 sps:$4 sm:$0xff]  }
 0x131   :  { %8232 = vmatpush1.bf16.msra.mxu1 %v25388_v22  ;;  %7995 = vmatprep.subr.bf16.mxu0 %v25399_v26  ;;  %v25474_v22 = vld [vmem:[%s37683_s1 + $0x284] ss:$100 sps:$4 sm:$0xff]  }
 0x132   :  { %8233 = vmatprep.subr.bf16.mxu1 %v25396_v25 }
 0x134   :  { %7996 = vmatpush1.bf16.msra.mxu0 %v25397_v28  ;;  %v25472_v28 = vld [vmem:[%s37683_s1 + $0x280] ss:$100 sps:$4 sm:$0xff]  }
 0x135   :  { %8234 = vmatpush1.bf16.msra.mxu1 %v25394_v27  ;;  %7997 = vmatprep.subr.bf16.mxu0 %v25405_v30 }
 0x136   :  { %8235 = vmatprep.subr.bf16.mxu1 %v25402_v29  ;;  %v25475_v29 = vld [vmem:[%s37683_s1 + $0x1460] ss:$100 sps:$4 sm:$0xff]  }
 0x138   :  { %7998 = vmatpush1.bf16.msra.mxu0 %v25403_v32  ;;  %v25483_v32 = vld [vmem:[%s37683_s1 + $0x152c] ss:$100 sps:$4 sm:$0xff]  }
 0x139   :  { %8236 = vmatpush1.bf16.msra.mxu1 %v25400_v31  ;;  %7999 = vmatprep.subr.bf16.mxu0 %v25411_v34  ;;  %v25480_v31 = vld [vmem:[%s37683_s1 + $0x34c] ss:$100 sps:$4 sm:$0xff]  }
 0x13a   :  { %8237 = vmatprep.subr.bf16.mxu1 %v25408_v33  ;;  %v25478_v33 = vld [vmem:[%s37683_s1 + $0x348] ss:$100 sps:$4 sm:$0xff]  }
 0x13b   :  { %v25481_v34 = vld [vmem:[%s37683_s1 + $0x1528] ss:$100 sps:$4 sm:$0xff]  }
 0x13c   :  { %8000 = vmatpush1.bf16.msra.mxu0 %v25409_v36  ;;  %v25489_v36 = vld [vmem:[%s37683_s1 + $0x15f4] ss:$100 sps:$4 sm:$0xff]  }
 0x13d   :  { %8238 = vmatpush1.bf16.msra.mxu1 %v25406_v35  ;;  %8001 = vmatprep.subr.bf16.mxu0 %v25417_v38  ;;  %v25486_v35 = vld [vmem:[%s37683_s1 + $0x414] ss:$100 sps:$4 sm:$0xff]  }
 0x13e   :  { %8239 = vmatprep.subr.bf16.mxu1 %v25414_v37  ;;  %v25484_v37 = vld [vmem:[%s37683_s1 + $0x410] ss:$100 sps:$4 sm:$0xff]  }
 0x13f   :  { %v25487_v38 = vld [vmem:[%s37683_s1 + $0x15f0] ss:$100 sps:$4 sm:$0xff]  }
 0x140   :  { %8002 = vmatpush1.bf16.msra.mxu0 %v25415_v41  ;;  %v25495_v41 = vld [vmem:[%s37683_s1 + $0x16bc] ss:$100 sps:$4 sm:$0xff]  }
 0x141   :  { %8240 = vmatpush1.bf16.msra.mxu1 %v25412_v39  ;;  %8012 = vmatprep.subr.bf16.mxu0 %v25423_v43  ;;  %v25492_v39 = vld [vmem:[%s37683_s1 + $0x4dc] ss:$100 sps:$4 sm:$0xff]  }
 0x142   :  { %8241 = vmatprep.subr.bf16.mxu1 %v25420_v42  ;;  %v25490_v42 = vld [vmem:[%s37683_s1 + $0x4d8] ss:$100 sps:$4 sm:$0xff]  }
 0x143   :  { %8004 = vmatmul.mubr.bf16.vlgmr.msra.gmra.mrb[8].mxu0 %v29155_v11  ;;  %v25493_v43 = vld [vmem:[%s37683_s1 + $0x16b8] ss:$100 sps:$4 sm:$0xff]  }
 0x144   :  { %8013 = vmatpush1.bf16.msra.mxu0 %v25421_v45  ;;  %8044 = vmatprep.mubr.bf16.mxu0 %v29107_v58  ;;  %v25501_v45 = vld [vmem:[%s37683_s1 + $0x1784] ss:$100 sps:$4 sm:$0xff]  }
 0x145   :  { %8242 = vmatpush1.bf16.msra.mxu1 %v25418_v44  ;;  %8014 = vmatprep.subr.bf16.mxu0 %v25429_v47  ;;  %v25498_v44 = vld [vmem:[%s37683_s1 + $0x5a4] ss:$100 sps:$4 sm:$0xff]  }
 0x146   :  { %8243 = vmatprep.subr.bf16.mxu1 %v25426_v46  ;;  %v25496_v46 = vld [vmem:[%s37683_s1 + $0x5a0] ss:$100 sps:$4 sm:$0xff]  }
 0x147   :  { %v25499_v47 = vld [vmem:[%s37683_s1 + $0x1780] ss:$100 sps:$4 sm:$0xff]  }
 0x148   :  { %8015 = vmatpush1.bf16.msra.mxu0 %v25427_v49  ;;  %v25507_v49 = vld [vmem:[%s37683_s1 + $0x184c] ss:$100 sps:$4 sm:$0xff]  }
 0x149   :  { %8244 = vmatpush1.bf16.msra.mxu1 %v25424_v48  ;;  %8016 = vmatprep.subr.bf16.mxu0 %v25435_v51  ;;  %v25504_v48 = vld [vmem:[%s37683_s1 + $0x66c] ss:$100 sps:$4 sm:$0xff]  }
 0x14a   :  { %8245 = vmatprep.subr.bf16.mxu1 %v25432_v50  ;;  %v25502_v50 = vld [vmem:[%s37683_s1 + $0x668] ss:$100 sps:$4 sm:$0xff]  }
 0x14b   :  { %v25505_v51 = vld [vmem:[%s37683_s1 + $0x1848] ss:$100 sps:$4 sm:$0xff]  }
 0x14c   :  { %8017 = vmatpush1.bf16.msra.mxu0 %v25433_v56  ;;  %v25513_v56 = vld [vmem:[%s37683_s1 + $0x1914] ss:$100 sps:$4 sm:$0xff]  }
 0x14d   :  { %8246 = vmatpush1.bf16.msra.mxu1 %v25430_v55  ;;  %8018 = vmatprep.subr.bf16.mxu0 %v25441_v59  ;;  %v25510_v55 = vld [vmem:[%s37683_s1 + $0x734] ss:$100 sps:$4 sm:$0xff]  }
 0x14e   :  { %8247 = vmatprep.subr.bf16.mxu1 %v25438_v57  ;;  %v25508_v57 = vld [vmem:[%s37683_s1 + $0x730] ss:$100 sps:$4 sm:$0xff]  }
 0x14f   :  { %v25511_v59 = vld [vmem:[%s37683_s1 + $0x1910] ss:$100 sps:$4 sm:$0xff]  }
 0x150   :  { %8019 = vmatpush1.bf16.msra.mxu0 %v25439_v61  ;;  %v25519_v61 = vld [vmem:[%s37683_s1 + $0x19dc] ss:$100 sps:$4 sm:$0xff]  }
 0x151   :  { %8248 = vmatpush1.bf16.msra.mxu1 %v25436_v60  ;;  %8020 = vmatprep.subr.bf16.mxu0 %v25447_v63  ;;  %v25516_v60 = vld [vmem:[%s37683_s1 + $0x7fc] ss:$100 sps:$4 sm:$0xff]  }
 0x152   :  { %8258 = vmatprep.subr.bf16.mxu1 %v25444_v62  ;;  %v25514_v62 = vld [vmem:[%s37683_s1 + $0x7f8] ss:$100 sps:$4 sm:$0xff]  }
 0x153   :  { %v25517_v63 = vld [vmem:[%s37683_s1 + $0x19d8] ss:$100 sps:$4 sm:$0xff]  }
 0x154   :  { %8250 = vmatmul.mubr.bf16.vlgmr.msra.gmra.mrb[8].mxu1 %v29376_v23  ;;  %8021 = vmatpush1.bf16.msra.mxu0 %v25445_v2  ;;  %v25525_v2 = vld [vmem:[%s37683_s1 + $0x1aa4] ss:$100 sps:$4 sm:$0xff]  }
 0x155   :  { %8259 = vmatpush1.bf16.msra.mxu1 %v25442_v0  ;;  %8022 = vmatprep.subr.bf16.mxu0 %v25450_v3  ;;  %v25522_v0 = vld [vmem:[%s37683_s1 + $0x8c4] ss:$100 sps:$4 sm:$0xff]   ;;  %v1316_v3 = vlaneseq }
 0x156   :  { %8290 = vmatprep.mubr.bf16.mxu1 %v28886_v1  ;;  %8463 = vmatprep.subr.bf16.mxu1 %v25456_v4  ;;  %v25520_v4 = vld [vmem:[%s37683_s1 + $0x8c0] ss:$100 sps:$4 sm:$0xff]  }
 0x158   :  { %8023 = vmatpush1.bf16.msra.mxu0 %v25448_v5  ;;  %v25523_v5 = vld [vmem:[%s37683_s1 + $0x1aa0] ss:$100 sps:$4 sm:$0xff]  }
 0x159   :  { %8024 = vmatprep.subr.bf16.mxu0 %v25453_v6  ;;  %v25528_v6 = vld [vmem:[%s37683_s1 + $0x98c] ss:$100 sps:$4 sm:$0xff]  }
 0x15c   :  { %8025 = vmatpush1.bf16.msra.mxu0 %v25451_v7  ;;  %v25531_v7 = vld [vmem:[%s37683_s1 + $0x1b6c] ss:$100 sps:$4 sm:$0xff]  }
 0x15d   :  { %8026 = vmatprep.subr.bf16.mxu0 %v25459_v8  ;;  %v30181_v8 = vshrl.u32 %v1316_v3, 7  ;;  %v25585_v3 = vld [vmem:[%s37683_s1 + $0x2274] ss:$100 sps:$4 sm:$0xff]  }
 0x160   :  { %22755 = vmatmul.mubr.msk.bf16.vlgmr.msra.gmra.mrb[8].mxu1 %vm7639_vm0, %v30038_v14  ;;  %8027 = vmatpush1.bf16.msra.mxu0 %v25457_v10  ;;  %v25529_v10 = vld [vmem:[%s37683_s1 + $0x1b68] ss:$100 sps:$4 sm:$0xff]  }
 0x161   :  { %8464 = vmatpush1.bf16.msra.mxu1 %v25454_v9  ;;  %8028 = vmatprep.subr.bf16.mxu0 %v25465_v13  ;;  %v25526_v9 = vld [vmem:[%s37683_s1 + $0x988] ss:$100 sps:$4 sm:$0xff]   ;;  %v25537_v13 = vld [vmem:[%s37683_s1 + $0x1c34] ss:$100 sps:$4 sm:$0xff]  }
 0x162   :  { %8465 = vmatprep.subr.bf16.mxu1 %v25462_v12  ;;  %8495 = vmatprep.mubr.bf16.mxu1 %v29089_v52  ;;  %v25534_v12 = vld [vmem:[%s37683_s1 + $0xa54] ss:$100 sps:$4 sm:$0xff]  }
 0x164   :  { %8029 = vmatpush1.bf16.msra.mxu0 %v25463_v17  ;;  %v30199_v17 = vsub.s32 0, %v30181_v8 }
 0x165   :  { %8466 = vmatpush1.bf16.msra.mxu1 %v25460_v15  ;;  %8030 = vmatprep.subr.bf16.mxu0 %v25471_v19  ;;  %v25532_v15 = vld [vmem:[%s37683_s1 + $0xa50] ss:$100 sps:$4 sm:$0xff]   ;;  %v30207_v19 = vld [vmem:[%s37685_s2] sm:$0xff] }
 0x166   :  { %8467 = vmatprep.subr.bf16.mxu1 %v25468_v18  ;;  %v25535_v18 = vld [vmem:[%s37683_s1 + $0x1c30] ss:$100 sps:$4 sm:$0xff]  }
 0x167   :  { %v30067_v25 = vpop.f32.mrb[4].mxu1 }
 0x168   :  { %v30069_v26 = vpop.f32.mrb[5].mxu1  ;;  %8031 = vmatpush1.bf16.msra.mxu0 %v25469_v21  ;;  %v25540_v21 = vld [vmem:[%s37683_s1 + $0xb1c] ss:$100 sps:$4 sm:$0xff]  }
 0x169   :  { %8468 = vmatpush1.bf16.msra.mxu1 %v25466_v20  ;;  %v7968_v27 = vpop.f32.mrb[6].mxu1  ;;  %8032 = vmatprep.subr.bf16.mxu0 %v25477_v24  ;;  %v30210_v20 = vsub.s32 1, %v30181_v8  ;;  %v1319_v24 = vrot.slane %v30207_v19, %v30199_v17 }
 0x16a   :  { %v7969_v30 = vpop.f32.mrb[7].mxu1  ;;  %8469 = vmatprep.subr.bf16.mxu1 %v25474_v22  ;;  %v25543_v22 = vld [vmem:[%s37683_s1 + $0x1cfc] ss:$100 sps:$4 sm:$0xff]  }
 0x16b   :  { %v25538_v27 = vld [vmem:[%s37683_s1 + $0xb18] ss:$100 sps:$4 sm:$0xff]   ;;  %v25546_v30 = vld [vmem:[%s37683_s1 + $0xbe4] ss:$100 sps:$4 sm:$0xff]  }
 0x16c   :  { %8033 = vmatpush1.bf16.msra.mxu0 %v25475_v29  ;;  %v25541_v29 = vld [vmem:[%s37683_s1 + $0x1cf8] ss:$100 sps:$4 sm:$0xff]  }
 0x16d   :  { %8470 = vmatpush1.bf16.msra.mxu1 %v25472_v28  ;;  %8034 = vmatprep.subr.bf16.mxu0 %v25483_v32  ;;  %v1323_v28 = vrot.slane %v30207_v19, %v30210_v20 }
 0x16e   :  { %8471 = vmatprep.subr.bf16.mxu1 %v25480_v31  ;;  %v25549_v31 = vld [vmem:[%s37683_s1 + $0x1dc4] ss:$100 sps:$4 sm:$0xff]  }
 0x170   :  { %8035 = vmatpush1.bf16.msra.mxu0 %v25481_v34 }
 0x171   :  { %8472 = vmatpush1.bf16.msra.mxu1 %v25478_v33  ;;  %8036 = vmatprep.subr.bf16.mxu0 %v25489_v36  ;;  %v25544_v36 = vld [vmem:[%s37683_s1 + $0xbe0] ss:$100 sps:$4 sm:$0xff]  }
 0x172   :  { %8473 = vmatprep.subr.bf16.mxu1 %v25486_v35 }
 0x174   :  { %8037 = vmatpush1.bf16.msra.mxu0 %v25487_v38 }
 0x175   :  { %8474 = vmatpush1.bf16.msra.mxu1 %v25484_v37  ;;  %8038 = vmatprep.subr.bf16.mxu0 %v25495_v41  ;;  %v25547_v37 = vld [vmem:[%s37683_s1 + $0x1dc0] ss:$100 sps:$4 sm:$0xff]   ;;  %v25552_v41 = vld [vmem:[%s37683_s1 + $0xcac] ss:$100 sps:$4 sm:$0xff]  }
 0x176   :  { %8475 = vmatprep.subr.bf16.mxu1 %v25492_v39 }
 0x178   :  { %8039 = vmatpush1.bf16.msra.mxu0 %v25493_v43 }
 0x179   :  { %8476 = vmatpush1.bf16.msra.mxu1 %v25490_v42  ;;  %8040 = vmatprep.subr.bf16.mxu0 %v25501_v45  ;;  %v25555_v42 = vld [vmem:[%s37683_s1 + $0x1e8c] ss:$100 sps:$4 sm:$0xff]  }
 0x17a   :  { %8477 = vmatprep.subr.bf16.mxu1 %v25498_v44  ;;  %v25550_v45 = vld [vmem:[%s37683_s1 + $0xca8] ss:$100 sps:$4 sm:$0xff]  }
 0x17c   :  { %8041 = vmatpush1.bf16.msra.mxu0 %v25499_v47  ;;  %v25561_v47 = vld [vmem:[%s37683_s1 + $0x1f54] ss:$100 sps:$4 sm:$0xff]  }
 0x17d   :  { %8478 = vmatpush1.bf16.msra.mxu1 %v25496_v46  ;;  %8042 = vmatprep.subr.bf16.mxu0 %v25507_v49  ;;  %v25558_v46 = vld [vmem:[%s37683_s1 + $0xd74] ss:$100 sps:$4 sm:$0xff]   ;;  %v25564_v49 = vld [vmem:[%s37683_s1 + $0xe3c] ss:$100 sps:$4 sm:$0xff]  }
 0x17e   :  { %8479 = vmatprep.subr.bf16.mxu1 %v25504_v48  ;;  %v25559_v48 = vld [vmem:[%s37683_s1 + $0x1f50] ss:$100 sps:$4 sm:$0xff]  }
 0x180   :  { %8043 = vmatpush1.bf16.msra.mxu0 %v25505_v51  ;;  %v25562_v51 = vld [vmem:[%s37683_s1 + $0xe38] ss:$100 sps:$4 sm:$0xff]  }
 0x181   :  { %8480 = vmatpush1.bf16.msra.mxu1 %v25502_v50  ;;  %8053 = vmatprep.subr.bf16.mxu0 %v25513_v56  ;;  %v25567_v50 = vld [vmem:[%s37683_s1 + $0x201c] ss:$100 sps:$4 sm:$0xff]   ;;  %v25570_v56 = vld [vmem:[%s37683_s1 + $0xf04] ss:$100 sps:$4 sm:$0xff]  }
 0x182   :  { %8481 = vmatprep.subr.bf16.mxu1 %v25510_v55  ;;  %v25565_v55 = vld [vmem:[%s37683_s1 + $0x2018] ss:$100 sps:$4 sm:$0xff]  }
 0x183   :  { %8045 = vmatmul.mubr.bf16.vlgmr.msra.gmra.mrb[8].mxu0 %v29170_v16 }
 0x184   :  { %8054 = vmatpush1.bf16.msra.mxu0 %v25511_v59  ;;  %8085 = vmatprep.mubr.bf16.mxu0 %v29247_v40  ;;  %v25568_v59 = vld [vmem:[%s37683_s1 + $0xf00] ss:$100 sps:$4 sm:$0xff]  }
 0x185   :  { %8482 = vmatpush1.bf16.msra.mxu1 %v25508_v57  ;;  %8055 = vmatprep.subr.bf16.mxu0 %v25519_v61  ;;  %v25573_v57 = vld [vmem:[%s37683_s1 + $0x20e4] ss:$100 sps:$4 sm:$0xff]   ;;  %v25576_v61 = vld [vmem:[%s37683_s1 + $0xfcc] ss:$100 sps:$4 sm:$0xff]  }
 0x186   :  { %8483 = vmatprep.subr.bf16.mxu1 %v25516_v60  ;;  %v25571_v60 = vld [vmem:[%s37683_s1 + $0x20e0] ss:$100 sps:$4 sm:$0xff]  }
 0x188   :  { %8056 = vmatpush1.bf16.msra.mxu0 %v25517_v63  ;;  %v25574_v63 = vld [vmem:[%s37683_s1 + $0xfc8] ss:$100 sps:$4 sm:$0xff]  }
 0x189   :  { %8484 = vmatpush1.bf16.msra.mxu1 %v25514_v62  ;;  %8057 = vmatprep.subr.bf16.mxu0 %v25525_v2  ;;  %v25579_v62 = vld [vmem:[%s37683_s1 + $0x21ac] ss:$100 sps:$4 sm:$0xff]   ;;  %v25582_v2 = vld [vmem:[%s37683_s1 + $0x1094] ss:$100 sps:$4 sm:$0xff]  }
 0x18a   :  { %8485 = vmatprep.subr.bf16.mxu1 %v25522_v0  ;;  %v25577_v0 = vld [vmem:[%s37683_s1 + $0x21a8] ss:$100 sps:$4 sm:$0xff]  }
 0x18c   :  { %8058 = vmatpush1.bf16.msra.mxu0 %v25523_v5  ;;  %v25583_v5 = vld [vmem:[%s37683_s1 + $0x2270] ss:$100 sps:$4 sm:$0xff]  }
 0x18d   :  { %8486 = vmatpush1.bf16.msra.mxu1 %v25520_v4  ;;  %8059 = vmatprep.subr.bf16.mxu0 %v25531_v7  ;;  %v25580_v4 = vld [vmem:[%s37683_s1 + $0x1090] ss:$100 sps:$4 sm:$0xff]   ;;  %v25591_v7 = vld [vmem:[%s37683_s1 + $0x233c] ss:$100 sps:$4 sm:$0xff]  }
 0x18e   :  { %8487 = vmatprep.subr.bf16.mxu1 %v25528_v6  ;;  %v25588_v6 = vld [vmem:[%s37683_s1 + $0x115c] ss:$100 sps:$4 sm:$0xff]  }
 0x190   :  { %8060 = vmatpush1.bf16.msra.mxu0 %v25529_v10  ;;  %v25589_v10 = vld [vmem:[%s37683_s1 + $0x2338] ss:$100 sps:$4 sm:$0xff]  }
 0x191   :  { %8488 = vmatpush1.bf16.msra.mxu1 %v25526_v9  ;;  %8061 = vmatprep.subr.bf16.mxu0 %v25537_v13  ;;  %v25586_v9 = vld [vmem:[%s37683_s1 + $0x1158] ss:$100 sps:$4 sm:$0xff]   ;;  %v25597_v13 = vld [vmem:[%s37683_s1 + $0x2404] ss:$100 sps:$4 sm:$0xff]  }
 0x192   :  { %8489 = vmatprep.subr.bf16.mxu1 %v25534_v12  ;;  %v25594_v12 = vld [vmem:[%s37683_s1 + $0x1224] ss:$100 sps:$4 sm:$0xff]  }
 0x194   :  { %8062 = vmatpush1.bf16.msra.mxu0 %v25535_v18  ;;  %v25595_v18 = vld [vmem:[%s37683_s1 + $0x2400] ss:$100 sps:$4 sm:$0xff]  }
 0x195   :  { %8490 = vmatpush1.bf16.msra.mxu1 %v25532_v15  ;;  %8063 = vmatprep.subr.bf16.mxu0 %v25543_v22  ;;  %v25592_v15 = vld [vmem:[%s37683_s1 + $0x1220] ss:$100 sps:$4 sm:$0xff]   ;;  %v25603_v22 = vld [vmem:[%s37683_s1 + $0x24cc] ss:$100 sps:$4 sm:$0xff]  }
 0x196   :  { %8491 = vmatprep.subr.bf16.mxu1 %v25540_v21  ;;  %v7759_v32 = vpop.f32.mrb[0].mxu0  ;;  %v25600_v21 = vld [vmem:[%s37683_s1 + $0x12ec] ss:$100 sps:$4 sm:$0xff]  }
 0x197   :  { %v24606_v33 = vadd.f32 %v7759_v32, %v1319_v24  ;;  %v7761_v34 = vpop.f32.mrb[1].mxu0  ;;  %v25598_v24 = vld [vmem:[%s37683_s1 + $0x12e8] ss:$100 sps:$4 sm:$0xff]   ;;  %v25613_v32 = vld [vmem:[%s37683_s1 + $0x2590] ss:$100 sps:$4 sm:$0xff]  }
 0x198   :  { %v24608_v35 = vadd.f32 %v7761_v34, %v1323_v28  ;;  %8064 = vmatpush1.bf16.msra.mxu0 %v25541_v29  ;;  %v7763_v38 = vpop.f32.mrb[2].mxu0  ;;  %v25606_v28 = vld [vmem:[%s37683_s1 + $0x13b4] ss:$100 sps:$4 sm:$0xff]  }
 0x199   :  { %8492 = vmatpush1.bf16.msra.mxu1 %v25538_v27  ;;  %v30241_v39 = vadd.f32 %v24606_v33, %v29639_v53  ;;  %8065 = vmatprep.subr.bf16.mxu0 %v25549_v31  ;;  %v7764_v43 = vpop.f32.mrb[3].mxu0  ;;  %v25553_v53 = vld [vmem:[%s37683_s1 + $0x1e88] ss:$100 sps:$4 sm:$0xff]   ;;  %v25615_v29 = vld [vmem:[%s37683_s1 + $0x2594] ss:$100 sps:$4 sm:$0xff]  }
 0x19a   :  { %8493 = vmatprep.subr.bf16.mxu1 %v25546_v30  ;;  %v30250_v44 = vadd.f32 %v24608_v35, %v29641_v54  ;;  %v25556_v54 = vld [vmem:[%s37683_s1 + $0xd70] ss:$100 sps:$4 sm:$0xff]   ;;  %v25601_v27 = vld [vmem:[%s37683_s1 + $0x24c8] ss:$100 sps:$4 sm:$0xff]   ;;  %v25609_v31 = vld [vmem:[%s37683_s1 + $0x147c] ss:$100 sps:$4 sm:$0xff]  }
 0x19b   :  { %v25604_v30 = vld [vmem:[%s37683_s1 + $0x13b0] ss:$100 sps:$4 sm:$0xff]   ;;  %v25621_v33 = vld [vmem:[%s37683_s1 + $0x24] ss:$100 sps:$4 sm:$0xff]   ;;  %v25607_v34 = vld [vmem:[%s37683_s1 + $0x1478] ss:$100 sps:$4 sm:$0xff]  }
 0x19c   :  { %8066 = vmatpush1.bf16.msra.mxu0 %v25547_v37  ;;  %v25612_v35 = vld [vmem:[%s37683_s1 + $0x1544] ss:$100 sps:$4 sm:$0xff]   ;;  %v25618_v37 = vld [vmem:[%s37683_s1 + $0x160c] ss:$100 sps:$4 sm:$0xff]  }
 0x19d   :  { %8494 = vmatpush1.bf16.msra.mxu1 %v25544_v36  ;;  %8067 = vmatprep.subr.bf16.mxu0 %v25555_v42  ;;  %v25610_v36 = vld [vmem:[%s37683_s1 + $0x1540] ss:$100 sps:$4 sm:$0xff]   ;;  %v25616_v38 = vld [vmem:[%s37683_s1 + $0x1608] ss:$100 sps:$4 sm:$0xff]   ;;  %v25624_v42 = vld [vmem:[%s37683_s1 + $0x16d4] ss:$100 sps:$4 sm:$0xff]  }
 0x19e   :  { %8504 = vmatprep.subr.bf16.mxu1 %v25552_v41  ;;  %v25619_v41 = vld [vmem:[%s37683_s1 + $0x20] ss:$100 sps:$4 sm:$0xff]   ;;  %v25627_v43 = vld [vmem:[%s37683_s1 + $0xec] ss:$100 sps:$4 sm:$0xff]  }
 0x1a0   :  { %8496 = vmatmul.mubr.bf16.vlgmr.msra.gmra.mrb[12].mxu1 %v29155_v11  ;;  %8068 = vmatpush1.bf16.msra.mxu0 %v25553_v53  ;;  %v25625_v53 = vld [vmem:[%s37683_s1 + $0xe8] ss:$100 sps:$4 sm:$0xff]  }
 0x1a1   :  { %8505 = vmatpush1.bf16.msra.mxu1 %v25550_v45  ;;  %8069 = vmatprep.subr.bf16.mxu0 %v25561_v47  ;;  %v25622_v45 = vld [vmem:[%s37683_s1 + $0x16d0] ss:$100 sps:$4 sm:$0xff]   ;;  %v25630_v47 = vld [vmem:[%s37683_s1 + $0x179c] ss:$100 sps:$4 sm:$0xff]  }
 0x1a2   :  { %8506 = vmatprep.subr.bf16.mxu1 %v25558_v46  ;;  %8536 = vmatprep.mubr.bf16.mxu1 %v29107_v58  ;;  %v30409_v46 = vsub.s32 2, %v30181_v8 }
 0x1a4   :  { %8070 = vmatpush1.bf16.msra.mxu0 %v25559_v48  ;;  %v30418_v48 = vsub.s32 3, %v30181_v8 }
 0x1a5   :  { %8507 = vmatpush1.bf16.msra.mxu1 %v25556_v54  ;;  %8071 = vmatprep.subr.bf16.mxu0 %v25567_v50  ;;  %v25633_v54 = vld [vmem:[%s37683_s1 + $0x1b4] ss:$100 sps:$4 sm:$0xff]  }
 0x1a6   :  { %8508 = vmatprep.subr.bf16.mxu1 %v25564_v49  ;;  %v1327_v49 = vrot.slane %v30207_v19, %v30409_v46  ;;  %v25631_v50 = vld [vmem:[%s37683_s1 + $0x1b0] ss:$100 sps:$4 sm:$0xff]  }
 0x1a8   :  { %8072 = vmatpush1.bf16.msra.mxu0 %v25565_v55  ;;  %v25636_v55 = vld [vmem:[%s37683_s1 + $0x1864] ss:$100 sps:$4 sm:$0xff]  }
 0x1a9   :  { %8509 = vmatpush1.bf16.msra.mxu1 %v25562_v51  ;;  %8073 = vmatprep.subr.bf16.mxu0 %v25573_v57  ;;  %v1331_v51 = vrot.slane %v30207_v19, %v30418_v48  ;;  %v25637_v19 = vld [vmem:[%s37683_s1 + $0x278] ss:$100 sps:$4 sm:$0xff]  }
 0x1aa   :  { %8510 = vmatprep.subr.bf16.mxu1 %v25570_v56  ;;  %v25639_v56 = vld [vmem:[%s37683_s1 + $0x27c] ss:$100 sps:$4 sm:$0xff]  }
 0x1ac   :  { %8074 = vmatpush1.bf16.msra.mxu0 %v25571_v60 }
 0x1ad   :  { %8511 = vmatpush1.bf16.msra.mxu1 %v25568_v59  ;;  %8075 = vmatprep.subr.bf16.mxu0 %v25579_v62 }
 0x1ae   :  { %8512 = vmatprep.subr.bf16.mxu1 %v25576_v61  ;;  %v25634_v61 = vld [vmem:[%s37683_s1 + $0x1860] ss:$100 sps:$4 sm:$0xff]  }
 0x1b0   :  { %8076 = vmatpush1.bf16.msra.mxu0 %v25577_v0  ;;  %v25645_v0 = vld [vmem:[%s37683_s1 + $0x344] ss:$100 sps:$4 sm:$0xff]  }
 0x1b1   :  { %8513 = vmatpush1.bf16.msra.mxu1 %v25574_v63  ;;  %8077 = vmatprep.subr.bf16.mxu0 %v25585_v3  ;;  %v25642_v63 = vld [vmem:[%s37683_s1 + $0x192c] ss:$100 sps:$4 sm:$0xff]  }
 0x1b2   :  { %8514 = vmatprep.subr.bf16.mxu1 %v25582_v2 }
 0x1b4   :  { %8078 = vmatpush1.bf16.msra.mxu0 %v25583_v5 }
 0x1b5   :  { %8515 = vmatpush1.bf16.msra.mxu1 %v25580_v4  ;;  %8079 = vmatprep.subr.bf16.mxu0 %v25591_v7  ;;  %v25643_v7 = vld [vmem:[%s37683_s1 + $0x340] ss:$100 sps:$4 sm:$0xff]  }
 0x1b6   :  { %8516 = vmatprep.subr.bf16.mxu1 %v25588_v6  ;;  %v25640_v6 = vld [vmem:[%s37683_s1 + $0x1928] ss:$100 sps:$4 sm:$0xff]  }
 0x1b8   :  { %8080 = vmatpush1.bf16.msra.mxu0 %v25589_v10  ;;  %v25649_v10 = vld [vmem:[%s37683_s1 + $0x408] ss:$100 sps:$4 sm:$0xff]  }
 0x1b9   :  { %8517 = vmatpush1.bf16.msra.mxu1 %v25586_v9  ;;  %8081 = vmatprep.subr.bf16.mxu0 %v25597_v13  ;;  %v25646_v9 = vld [vmem:[%s37683_s1 + $0x19f0] ss:$100 sps:$4 sm:$0xff]  }
 0x1ba   :  { %8518 = vmatprep.subr.bf16.mxu1 %v25594_v12  ;;  %v25654_v12 = vld [vmem:[%s37683_s1 + $0x1abc] ss:$100 sps:$4 sm:$0xff]   ;;  %v25657_v13 = vld [vmem:[%s37683_s1 + $0x4d4] ss:$100 sps:$4 sm:$0xff]  }
 0x1bc   :  { %8082 = vmatpush1.bf16.msra.mxu0 %v25595_v18  ;;  %v25655_v18 = vld [vmem:[%s37683_s1 + $0x4d0] ss:$100 sps:$4 sm:$0xff]  }
 0x1bd   :  { %8519 = vmatpush1.bf16.msra.mxu1 %v25592_v15  ;;  %8083 = vmatprep.subr.bf16.mxu0 %v25603_v22  ;;  %v25652_v15 = vld [vmem:[%s37683_s1 + $0x1ab8] ss:$100 sps:$4 sm:$0xff]  }
 0x1be   :  { %8520 = vmatprep.subr.bf16.mxu1 %v25600_v21  ;;  %v25660_v21 = vld [vmem:[%s37683_s1 + $0x1b84] ss:$100 sps:$4 sm:$0xff]   ;;  %v25663_v22 = vld [vmem:[%s37683_s1 + $0x59c] ss:$100 sps:$4 sm:$0xff]  }
 0x1c0   :  { %8084 = vmatpush1.bf16.msra.mxu0 %v25601_v27  ;;  %v25661_v27 = vld [vmem:[%s37683_s1 + $0x598] ss:$100 sps:$4 sm:$0xff]  }
 0x1c1   :  { %8521 = vmatpush1.bf16.msra.mxu1 %v25598_v24  ;;  %8094 = vmatprep.subr.bf16.mxu0 %v25615_v29  ;;  %v25658_v24 = vld [vmem:[%s37683_s1 + $0x1b80] ss:$100 sps:$4 sm:$0xff]  }
 0x1c2   :  { %8522 = vmatprep.subr.bf16.mxu1 %v25606_v28  ;;  %v25666_v28 = vld [vmem:[%s37683_s1 + $0x1c4c] ss:$100 sps:$4 sm:$0xff]   ;;  %v25669_v29 = vld [vmem:[%s37683_s1 + $0x664] ss:$100 sps:$4 sm:$0xff]  }
 0x1c3   :  { %8086 = vmatmul.mubr.bf16.vlgmr.msra.gmra.mrb[8].mxu0 %v29376_v23 }
 0x1c4   :  { %8095 = vmatpush1.bf16.msra.mxu0 %v25613_v32  ;;  %8126 = vmatprep.mubr.bf16.mxu0 %v28886_v1  ;;  %v25672_v32 = vld [vmem:[%s37683_s1 + $0x1d14] ss:$100 sps:$4 sm:$0xff]  }
 0x1c5   :  { %8523 = vmatpush1.bf16.msra.mxu1 %v25604_v30  ;;  %8299 = vmatprep.subr.bf16.mxu0 %v25621_v33  ;;  %v25664_v30 = vld [vmem:[%s37683_s1 + $0x1c48] ss:$100 sps:$4 sm:$0xff]  }
 0x1c6   :  { %8524 = vmatprep.subr.bf16.mxu1 %v25609_v31  ;;  %v25667_v31 = vld [vmem:[%s37683_s1 + $0x660] ss:$100 sps:$4 sm:$0xff]   ;;  %v25675_v33 = vld [vmem:[%s37683_s1 + $0x72c] ss:$100 sps:$4 sm:$0xff]  }
 0x1c9   :  { %8525 = vmatpush1.bf16.msra.mxu1 %v25607_v34  ;;  %v25670_v34 = vld [vmem:[%s37683_s1 + $0x1d10] ss:$100 sps:$4 sm:$0xff]  }
 0x1ca   :  { %8526 = vmatprep.subr.bf16.mxu1 %v25612_v35  ;;  %v25673_v35 = vld [vmem:[%s37683_s1 + $0x728] ss:$100 sps:$4 sm:$0xff]  }
 0x1cd   :  { %8527 = vmatpush1.bf16.msra.mxu1 %v25610_v36  ;;  %v25678_v36 = vld [vmem:[%s37683_s1 + $0x1ddc] ss:$100 sps:$4 sm:$0xff]  }
 0x1ce   :  { %8528 = vmatprep.subr.bf16.mxu1 %v25618_v37  ;;  %v25681_v37 = vld [vmem:[%s37683_s1 + $0x7f4] ss:$100 sps:$4 sm:$0xff]  }
 0x1cf   :  { %22754 = vmatmul.mubr.msk.bf16.vlgmr.msra.gmra.mrb[8].mxu0 %vm7639_vm0, %v30038_v14  ;;  %v25628_v14 = vld [vmem:[%s37683_s1 + $0x1798] ss:$100 sps:$4 sm:$0xff]  }
 0x1d0   :  { %8300 = vmatpush1.bf16.msra.mxu0 %v25619_v41  ;;  %8331 = vmatprep.mubr.bf16.mxu0 %v29089_v52  ;;  %v25679_v41 = vld [vmem:[%s37683_s1 + $0x7f0] ss:$100 sps:$4 sm:$0xff]  }
 0x1d1   :  { %8529 = vmatpush1.bf16.msra.mxu1 %v25616_v38  ;;  %8301 = vmatprep.subr.bf16.mxu0 %v25627_v43  ;;  %v25676_v38 = vld [vmem:[%s37683_s1 + $0x1dd8] ss:$100 sps:$4 sm:$0xff]  }
 0x1d2   :  { %8530 = vmatprep.subr.bf16.mxu1 %v25624_v42  ;;  %v25684_v42 = vld [vmem:[%s37683_s1 + $0x1ea4] ss:$100 sps:$4 sm:$0xff]   ;;  %v25687_v43 = vld [vmem:[%s37683_s1 + $0x8bc] ss:$100 sps:$4 sm:$0xff]  }
 0x1d4   :  { %8302 = vmatpush1.bf16.msra.mxu0 %v25625_v53  ;;  %v25685_v53 = vld [vmem:[%s37683_s1 + $0x8b8] ss:$100 sps:$4 sm:$0xff]  }
 0x1d5   :  { %8531 = vmatpush1.bf16.msra.mxu1 %v25622_v45  ;;  %8303 = vmatprep.subr.bf16.mxu0 %v25633_v54  ;;  %v25682_v45 = vld [vmem:[%s37683_s1 + $0x1ea0] ss:$100 sps:$4 sm:$0xff]  }
 0x1d6   :  { %8532 = vmatprep.subr.bf16.mxu1 %v25630_v47  ;;  %v7841_v57 = vpop.f32.mrb[4].mxu0  ;;  %v25690_v47 = vld [vmem:[%s37683_s1 + $0x1f6c] ss:$100 sps:$4 sm:$0xff]   ;;  %v25693_v54 = vld [vmem:[%s37683_s1 + $0x984] ss:$100 sps:$4 sm:$0xff]  }
 0x1d7   :  { %v7842_v59 = vadd.f32 %v7841_v57, %v1327_v49  ;;  %v7843_v60 = vpop.f32.mrb[5].mxu0  ;;  %v25691_v49 = vld [vmem:[%s37683_s1 + $0x980] ss:$100 sps:$4 sm:$0xff]  }
 0x1d8   :  { %v7844_v62 = vadd.f32 %v7843_v60, %v1331_v51  ;;  %8304 = vmatpush1.bf16.msra.mxu0 %v25631_v50  ;;  %v7845_v3 = vpop.f32.mrb[6].mxu0  ;;  %v25696_v50 = vld [vmem:[%s37683_s1 + $0x2034] ss:$100 sps:$4 sm:$0xff]   ;;  %v25699_v51 = vld [vmem:[%s37683_s1 + $0xa4c] ss:$100 sps:$4 sm:$0xff]  }
 0x1d9   :  { %8533 = vmatpush1.bf16.msra.mxu1 %v25628_v14  ;;  %v30450_v2 = vadd.f32 %v30067_v25, %v7842_v59  ;;  %8305 = vmatprep.subr.bf16.mxu0 %v25639_v56  ;;  %v7846_v5 = vpop.f32.mrb[7].mxu0  ;;  %v25648_v25 = vld [vmem:[%s37683_s1 + $0x19f4] ss:$100 sps:$4 sm:$0xff]   ;;  %v25688_v14 = vld [vmem:[%s37683_s1 + $0x1f68] ss:$100 sps:$4 sm:$0xff]  }
 0x1da   :  { %8534 = vmatprep.subr.bf16.mxu1 %v25636_v55  ;;  %v30453_v4 = vadd.f32 %v30069_v26, %v7844_v62  ;;  %v25651_v26 = vld [vmem:[%s37683_s1 + $0x40c] ss:$100 sps:$4 sm:$0xff]   ;;  %v25702_v57 = vld [vmem:[%s37683_s1 + $0x20fc] ss:$100 sps:$4 sm:$0xff]   ;;  %v25705_v59 = vld [vmem:[%s37683_s1 + $0xb14] ss:$100 sps:$4 sm:$0xff]  }
 0x1db   :  { %v25694_v55 = vld [vmem:[%s37683_s1 + $0x2030] ss:$100 sps:$4 sm:$0xff]   ;;  %v25697_v56 = vld [vmem:[%s37683_s1 + $0xa48] ss:$100 sps:$4 sm:$0xff]   ;;  %v25700_v60 = vld [vmem:[%s37683_s1 + $0x20f8] ss:$100 sps:$4 sm:$0xff]  }
 0x1dc   :  { %8306 = vmatpush1.bf16.msra.mxu0 %v25637_v19  ;;  %v25708_v62 = vld [vmem:[%s37683_s1 + $0x21c4] ss:$100 sps:$4 sm:$0xff]   ;;  %v25711_v19 = vld [vmem:[%s37683_s1 + $0xbdc] ss:$100 sps:$4 sm:$0xff]   ;;  %v25714_v3 = vld [vmem:[%s37683_s1 + $0x228c] ss:$100 sps:$4 sm:$0xff]  }
 0x1dd   :  { %8535 = vmatpush1.bf16.msra.mxu1 %v25634_v61  ;;  %8307 = vmatprep.subr.bf16.mxu0 %v25645_v0  ;;  %v25703_v61 = vld [vmem:[%s37683_s1 + $0xb10] ss:$100 sps:$4 sm:$0xff]   ;;  %v25709_v0 = vld [vmem:[%s37683_s1 + $0xbd8] ss:$100 sps:$4 sm:$0xff]   ;;  %v25717_v5 = vld [vmem:[%s37683_s1 + $0xca4] ss:$100 sps:$4 sm:$0xff]  }
 0x1de   :  { %8545 = vmatprep.subr.bf16.mxu1 %v25642_v63  ;;  %v25706_v63 = vld [vmem:[%s37683_s1 + $0x21c0] ss:$100 sps:$4 sm:$0xff]  }
 0x1e0   :  { %8537 = vmatmul.mubr.bf16.vlgmr.msra.gmra.mrb[12].mxu1 %v29170_v16  ;;  %8308 = vmatpush1.bf16.msra.mxu0 %v25643_v7  ;;  %v25715_v7 = vld [vmem:[%s37683_s1 + $0xca0] ss:$100 sps:$4 sm:$0xff]  }
 0x1e1   :  { %8546 = vmatpush1.bf16.msra.mxu1 %v25640_v6  ;;  %8309 = vmatprep.subr.bf16.mxu0 %v25651_v26  ;;  %v25712_v6 = vld [vmem:[%s37683_s1 + $0x2288] ss:$100 sps:$4 sm:$0xff]  }
 0x1e2   :  { %8547 = vmatprep.subr.bf16.mxu1 %v25648_v25  ;;  %8577 = vmatprep.mubr.bf16.mxu1 %v29247_v40  ;;  %v25720_v25 = vld [vmem:[%s37683_s1 + $0x2354] ss:$100 sps:$4 sm:$0xff]   ;;  %v25723_v26 = vld [vmem:[%s37683_s1 + $0xd6c] ss:$100 sps:$4 sm:$0xff]  }
 0x1e4   :  { %8310 = vmatpush1.bf16.msra.mxu0 %v25649_v10  ;;  %v25721_v10 = vld [vmem:[%s37683_s1 + $0xd68] ss:$100 sps:$4 sm:$0xff]  }
 0x1e5   :  { %8548 = vmatpush1.bf16.msra.mxu1 %v25646_v9  ;;  %8311 = vmatprep.subr.bf16.mxu0 %v25657_v13  ;;  %v25718_v9 = vld [vmem:[%s37683_s1 + $0x2350] ss:$100 sps:$4 sm:$0xff]  }
 0x1e6   :  { %8549 = vmatprep.subr.bf16.mxu1 %v25654_v12  ;;  %v25726_v12 = vld [vmem:[%s37683_s1 + $0x241c] ss:$100 sps:$4 sm:$0xff]   ;;  %v25729_v13 = vld [vmem:[%s37683_s1 + $0xe34] ss:$100 sps:$4 sm:$0xff]  }
 0x1e8   :  { %8312 = vmatpush1.bf16.msra.mxu0 %v25655_v18  ;;  %v25727_v18 = vld [vmem:[%s37683_s1 + $0xe30] ss:$100 sps:$4 sm:$0xff]  }
 0x1e9   :  { %8550 = vmatpush1.bf16.msra.mxu1 %v25652_v15  ;;  %8313 = vmatprep.subr.bf16.mxu0 %v25663_v22  ;;  %v25724_v15 = vld [vmem:[%s37683_s1 + $0x2418] ss:$100 sps:$4 sm:$0xff]  }
 0x1ea   :  { %8551 = vmatprep.subr.bf16.mxu1 %v25660_v21  ;;  %v25732_v21 = vld [vmem:[%s37683_s1 + $0x24e4] ss:$100 sps:$4 sm:$0xff]   ;;  %v25735_v22 = vld [vmem:[%s37683_s1 + $0xefc] ss:$100 sps:$4 sm:$0xff]  }
 0x1ec   :  { %8314 = vmatpush1.bf16.msra.mxu0 %v25661_v27  ;;  %v25733_v27 = vld [vmem:[%s37683_s1 + $0xef8] ss:$100 sps:$4 sm:$0xff]  }
 0x1ed   :  { %8552 = vmatpush1.bf16.msra.mxu1 %v25658_v24  ;;  %8315 = vmatprep.subr.bf16.mxu0 %v25669_v29  ;;  %v25730_v24 = vld [vmem:[%s37683_s1 + $0x24e0] ss:$100 sps:$4 sm:$0xff]  }
 0x1ee   :  { %8553 = vmatprep.subr.bf16.mxu1 %v25666_v28  ;;  %v25738_v28 = vld [vmem:[%s37683_s1 + $0x25ac] ss:$100 sps:$4 sm:$0xff]   ;;  %v25741_v29 = vld [vmem:[%s37683_s1 + $0xfc4] ss:$100 sps:$4 sm:$0xff]  }
 0x1f0   :  { %8316 = vmatpush1.bf16.msra.mxu0 %v25667_v31  ;;  %v25739_v31 = vld [vmem:[%s37683_s1 + $0xfc0] ss:$100 sps:$4 sm:$0xff]  }
 0x1f1   :  { %8554 = vmatpush1.bf16.msra.mxu1 %v25664_v30  ;;  %8317 = vmatprep.subr.bf16.mxu0 %v25675_v33  ;;  %v25736_v30 = vld [vmem:[%s37683_s1 + $0x25a8] ss:$100 sps:$4 sm:$0xff]   ;;  %v25750_v33 = vld [vmem:[%s37683_s1 + $0x3c] ss:$100 sps:$4 sm:$0xff]  }
 0x1f2   :  { %8555 = vmatprep.subr.bf16.mxu1 %v25672_v32  ;;  %v25744_v32 = vld [vmem:[%s37683_s1 + $0x108c] ss:$100 sps:$4 sm:$0xff]  }
 0x1f4   :  { %8318 = vmatpush1.bf16.msra.mxu0 %v25673_v35  ;;  %v25747_v35 = vld [vmem:[%s37683_s1 + $0x1154] ss:$100 sps:$4 sm:$0xff]  }
 0x1f5   :  { %8556 = vmatpush1.bf16.msra.mxu1 %v25670_v34  ;;  %8319 = vmatprep.subr.bf16.mxu0 %v25681_v37  ;;  %v25742_v34 = vld [vmem:[%s37683_s1 + $0x1088] ss:$100 sps:$4 sm:$0xff]   ;;  %v25753_v37 = vld [vmem:[%s37683_s1 + $0x121c] ss:$100 sps:$4 sm:$0xff]  }
 0x1f6   :  { %8557 = vmatprep.subr.bf16.mxu1 %v25678_v36  ;;  %v25745_v36 = vld [vmem:[%s37683_s1 + $0x1150] ss:$100 sps:$4 sm:$0xff]  }
 0x1f8   :  { %8320 = vmatpush1.bf16.msra.mxu0 %v25679_v41  ;;  %v25751_v41 = vld [vmem:[%s37683_s1 + $0x1218] ss:$100 sps:$4 sm:$0xff]  }
 0x1f9   :  { %8558 = vmatpush1.bf16.msra.mxu1 %v25676_v38  ;;  %8321 = vmatprep.subr.bf16.mxu0 %v25687_v43  ;;  %v25748_v38 = vld [vmem:[%s37683_s1 + $0x38] ss:$100 sps:$4 sm:$0xff]   ;;  %v25759_v43 = vld [vmem:[%s37683_s1 + $0x12e4] ss:$100 sps:$4 sm:$0xff]  }
 0x1fa   :  { %8559 = vmatprep.subr.bf16.mxu1 %v25684_v42  ;;  %v25756_v42 = vld [vmem:[%s37683_s1 + $0x104] ss:$100 sps:$4 sm:$0xff]  }
 0x1fc   :  { %8322 = vmatpush1.bf16.msra.mxu0 %v25685_v53  ;;  %v25754_v53 = vld [vmem:[%s37683_s1 + $0x100] ss:$100 sps:$4 sm:$0xff]  }
 0x1fd   :  { %8560 = vmatpush1.bf16.msra.mxu1 %v25682_v45  ;;  %8323 = vmatprep.subr.bf16.mxu0 %v25693_v54  ;;  %v30692_v45 = vld [vmem:[%s37684_s0 + $0x18] ss:$0 sps:$4 sm:$0xff]   ;;  %v25762_v54 = vld [vmem:[%s37683_s1 + $0x1cc] ss:$100 sps:$4 sm:$0xff]  }
 0x1fe   :  { %8561 = vmatprep.subr.bf16.mxu1 %v25690_v47  ;;  %v25757_v47 = vld [vmem:[%s37683_s1 + $0x12e0] ss:$100 sps:$4 sm:$0xff]  }
 0x200   :  { %8324 = vmatpush1.bf16.msra.mxu0 %v25691_v49  ;;  %v25760_v49 = vld [vmem:[%s37683_s1 + $0x1c8] ss:$100 sps:$4 sm:$0xff]  }
 0x201   :  { %8562 = vmatpush1.bf16.msra.mxu1 %v25688_v14  ;;  %8325 = vmatprep.subr.bf16.mxu0 %v25699_v51  ;;  %v25765_v14 = vld [vmem:[%s37683_s1 + $0x13ac] ss:$100 sps:$4 sm:$0xff]   ;;  %v25768_v51 = vld [vmem:[%s37683_s1 + $0x294] ss:$100 sps:$4 sm:$0xff]  }
 0x202   :  { %8563 = vmatprep.subr.bf16.mxu1 %v25696_v50  ;;  %v25763_v50 = vld [vmem:[%s37683_s1 + $0x13a8] ss:$100 sps:$4 sm:$0xff]  }
 0x204   :  { %8326 = vmatpush1.bf16.msra.mxu0 %v25697_v56 }
 0x205   :  { %8564 = vmatpush1.bf16.msra.mxu1 %v25694_v55  ;;  %8327 = vmatprep.subr.bf16.mxu0 %v25705_v59  ;;  %v25771_v55 = vld [vmem:[%s37683_s1 + $0x1474] ss:$100 sps:$4 sm:$0xff]  }
 0x206   :  { %8565 = vmatprep.subr.bf16.mxu1 %v25702_v57 }
 0x208   :  { %8328 = vmatpush1.bf16.msra.mxu0 %v25703_v61  ;;  %v25769_v61 = vld [vmem:[%s37683_s1 + $0x1470] ss:$100 sps:$4 sm:$0xff]  }
 0x209   :  { %8566 = vmatpush1.bf16.msra.mxu1 %v25700_v60  ;;  %8329 = vmatprep.subr.bf16.mxu0 %v25711_v19  ;;  %v25766_v60 = vld [vmem:[%s37683_s1 + $0x290] ss:$100 sps:$4 sm:$0xff]   ;;  %v25774_v19 = vld [vmem:[%s37683_s1 + $0x35c] ss:$100 sps:$4 sm:$0xff]  }
 0x20a   :  { %8567 = vmatprep.subr.bf16.mxu1 %v25708_v62 }
 0x20c   :  { %8330 = vmatpush1.bf16.msra.mxu0 %v25709_v0  ;;  %v25772_v0 = vld [vmem:[%s37683_s1 + $0x358] ss:$100 sps:$4 sm:$0xff]  }
 0x20d   :  { %8568 = vmatpush1.bf16.msra.mxu1 %v25706_v63  ;;  %8340 = vmatprep.subr.bf16.mxu0 %v25717_v5  ;;  %v25777_v63 = vld [vmem:[%s37683_s1 + $0x153c] ss:$100 sps:$4 sm:$0xff]   ;;  %v25780_v5 = vld [vmem:[%s37683_s1 + $0x424] ss:$100 sps:$4 sm:$0xff]  }
 0x20e   :  { %8569 = vmatprep.subr.bf16.mxu1 %v25714_v3  ;;  %v25775_v3 = vld [vmem:[%s37683_s1 + $0x1538] ss:$100 sps:$4 sm:$0xff]  }
 0x20f   :  { %8332 = vmatmul.mubr.bf16.vlgmr.msra.gmra.mrb[12].mxu0 %v29155_v11 }
 0x210   :  { %8341 = vmatpush1.bf16.msra.mxu0 %v25715_v7  ;;  %8372 = vmatprep.mubr.bf16.mxu0 %v29107_v58  ;;  %v25778_v7 = vld [vmem:[%s37683_s1 + $0x420] ss:$100 sps:$4 sm:$0xff]  }
 0x211   :  { %8570 = vmatpush1.bf16.msra.mxu1 %v25712_v6  ;;  %8342 = vmatprep.subr.bf16.mxu0 %v25723_v26  ;;  %v25783_v6 = vld [vmem:[%s37683_s1 + $0x1604] ss:$100 sps:$4 sm:$0xff]   ;;  %v25786_v26 = vld [vmem:[%s37683_s1 + $0x4ec] ss:$100 sps:$4 sm:$0xff]  }
 0x212   :  { %8571 = vmatprep.subr.bf16.mxu1 %v25720_v25  ;;  %v25781_v25 = vld [vmem:[%s37683_s1 + $0x1600] ss:$100 sps:$4 sm:$0xff]  }
 0x214   :  { %8343 = vmatpush1.bf16.msra.mxu0 %v25721_v10  ;;  %v25784_v10 = vld [vmem:[%s37683_s1 + $0x4e8] ss:$100 sps:$4 sm:$0xff]  }
 0x215   :  { %8572 = vmatpush1.bf16.msra.mxu1 %v25718_v9  ;;  %8344 = vmatprep.subr.bf16.mxu0 %v25729_v13  ;;  %v25789_v9 = vld [vmem:[%s37683_s1 + $0x16cc] ss:$100 sps:$4 sm:$0xff]   ;;  %v25792_v13 = vld [vmem:[%s37683_s1 + $0x5b4] ss:$100 sps:$4 sm:$0xff]  }
 0x216   :  { %8573 = vmatprep.subr.bf16.mxu1 %v25726_v12  ;;  %v25787_v12 = vld [vmem:[%s37683_s1 + $0x16c8] ss:$100 sps:$4 sm:$0xff]  }
 0x218   :  { %8345 = vmatpush1.bf16.msra.mxu0 %v25727_v18  ;;  %v25790_v18 = vld [vmem:[%s37683_s1 + $0x5b0] ss:$100 sps:$4 sm:$0xff]  }
 0x219   :  { %8574 = vmatpush1.bf16.msra.mxu1 %v25724_v15  ;;  %8346 = vmatprep.subr.bf16.mxu0 %v25735_v22  ;;  %v25795_v15 = vld [vmem:[%s37683_s1 + $0x1794] ss:$100 sps:$4 sm:$0xff]   ;;  %v25798_v22 = vld [vmem:[%s37683_s1 + $0x67c] ss:$100 sps:$4 sm:$0xff]  }
 0x21a   :  { %8575 = vmatprep.subr.bf16.mxu1 %v25732_v21  ;;  %v25793_v21 = vld [vmem:[%s37683_s1 + $0x1790] ss:$100 sps:$4 sm:$0xff]  }
 0x21c   :  { %8347 = vmatpush1.bf16.msra.mxu0 %v25733_v27  ;;  %v25796_v27 = vld [vmem:[%s37683_s1 + $0x678] ss:$100 sps:$4 sm:$0xff]  }
 0x21d   :  { %8576 = vmatpush1.bf16.msra.mxu1 %v25730_v24  ;;  %8348 = vmatprep.subr.bf16.mxu0 %v25741_v29  ;;  %v25801_v24 = vld [vmem:[%s37683_s1 + $0x185c] ss:$100 sps:$4 sm:$0xff]   ;;  %v25804_v29 = vld [vmem:[%s37683_s1 + $0x744] ss:$100 sps:$4 sm:$0xff]  }
 0x21e   :  { %8586 = vmatprep.subr.bf16.mxu1 %v25738_v28  ;;  %v25799_v28 = vld [vmem:[%s37683_s1 + $0x1858] ss:$100 sps:$4 sm:$0xff]  }
 0x220   :  { %8578 = vmatmul.mubr.bf16.vlgmr.msra.gmra.mrb[12].mxu1 %v29376_v23  ;;  %8349 = vmatpush1.bf16.msra.mxu0 %v25739_v31  ;;  %v25802_v31 = vld [vmem:[%s37683_s1 + $0x740] ss:$100 sps:$4 sm:$0xff]  }
 0x221   :  { %8587 = vmatpush1.bf16.msra.mxu1 %v25736_v30  ;;  %8350 = vmatprep.subr.bf16.mxu0 %v25744_v32  ;;  %v25807_v30 = vld [vmem:[%s37683_s1 + $0x1924] ss:$100 sps:$4 sm:$0xff]  }
 0x222   :  { %8618 = vmatprep.mubr.bf16.mxu1 %v28886_v1  ;;  %8791 = vmatprep.subr.bf16.mxu1 %v25750_v33  ;;  %v25805_v32 = vld [vmem:[%s37683_s1 + $0x1920] ss:$100 sps:$4 sm:$0xff]   ;;  %v25810_v33 = vld [vmem:[%s37683_s1 + $0x80c] ss:$100 sps:$4 sm:$0xff]  }
 0x224   :  { %8351 = vmatpush1.bf16.msra.mxu0 %v25742_v34  ;;  %v25813_v34 = vld [vmem:[%s37683_s1 + $0x19ec] ss:$100 sps:$4 sm:$0xff]  }
 0x225   :  { %8352 = vmatprep.subr.bf16.mxu0 %v25747_v35  ;;  %v25808_v35 = vld [vmem:[%s37683_s1 + $0x808] ss:$100 sps:$4 sm:$0xff]  }
 0x228   :  { %8353 = vmatpush1.bf16.msra.mxu0 %v25745_v36  ;;  %v25811_v36 = vld [vmem:[%s37683_s1 + $0x19e8] ss:$100 sps:$4 sm:$0xff]  }
 0x229   :  { %8354 = vmatprep.subr.bf16.mxu0 %v25753_v37  ;;  %v25816_v37 = vld [vmem:[%s37683_s1 + $0x8d4] ss:$100 sps:$4 sm:$0xff]  }
 0x22c   :  { %22757 = vmatmul.mubr.msk.bf16.vlgmr.msra.gmra.mrb[12].mxu1 %vm7639_vm0, %v30692_v45  ;;  %8355 = vmatpush1.bf16.msra.mxu0 %v25751_v41  ;;  %v25814_v41 = vld [vmem:[%s37683_s1 + $0x8d0] ss:$100 sps:$4 sm:$0xff]  }
 0x22d   :  { %8792 = vmatpush1.bf16.msra.mxu1 %v25748_v38  ;;  %8356 = vmatprep.subr.bf16.mxu0 %v25759_v43  ;;  %v25819_v38 = vld [vmem:[%s37683_s1 + $0x1ab4] ss:$100 sps:$4 sm:$0xff]   ;;  %v25822_v43 = vld [vmem:[%s37683_s1 + $0x99c] ss:$100 sps:$4 sm:$0xff]  }
 0x22e   :  { %8793 = vmatprep.subr.bf16.mxu1 %v25756_v42  ;;  %8823 = vmatprep.mubr.bf16.mxu1 %v29089_v52  ;;  %v25817_v42 = vld [vmem:[%s37683_s1 + $0x1ab0] ss:$100 sps:$4 sm:$0xff]  }
 0x230   :  { %8357 = vmatpush1.bf16.msra.mxu0 %v25757_v47  ;;  %v25820_v47 = vld [vmem:[%s37683_s1 + $0x998] ss:$100 sps:$4 sm:$0xff]  }
 0x231   :  { %8794 = vmatpush1.bf16.msra.mxu1 %v25754_v53  ;;  %8358 = vmatprep.subr.bf16.mxu0 %v25765_v14  ;;  %v25825_v53 = vld [vmem:[%s37683_s1 + $0x1b7c] ss:$100 sps:$4 sm:$0xff]   ;;  %v25828_v14 = vld [vmem:[%s37683_s1 + $0xa64] ss:$100 sps:$4 sm:$0xff]  }
 0x232   :  { %8795 = vmatprep.subr.bf16.mxu1 %v25762_v54  ;;  %v25823_v54 = vld [vmem:[%s37683_s1 + $0x1b78] ss:$100 sps:$4 sm:$0xff]  }
 0x233   :  { %v30721_v56 = vpop.f32.mrb[8].mxu1 }
 0x234   :  { %v30723_v57 = vpop.f32.mrb[9].mxu1  ;;  %8359 = vmatpush1.bf16.msra.mxu0 %v25763_v50  ;;  %v25826_v50 = vld [vmem:[%s37683_s1 + $0xa60] ss:$100 sps:$4 sm:$0xff]  }
 0x235   :  { %8796 = vmatpush1.bf16.msra.mxu1 %v25760_v49  ;;  %v8296_v59 = vpop.f32.mrb[10].mxu1  ;;  %8360 = vmatprep.subr.bf16.mxu0 %v25771_v55  ;;  %v25831_v49 = vld [vmem:[%s37683_s1 + $0x1c44] ss:$100 sps:$4 sm:$0xff]   ;;  %v25834_v55 = vld [vmem:[%s37683_s1 + $0xb2c] ss:$100 sps:$4 sm:$0xff]  }
 0x236   :  { %v8297_v62 = vpop.f32.mrb[11].mxu1  ;;  %8797 = vmatprep.subr.bf16.mxu1 %v25768_v51  ;;  %v25829_v51 = vld [vmem:[%s37683_s1 + $0x1c40] ss:$100 sps:$4 sm:$0xff]   ;;  %v25837_v59 = vld [vmem:[%s37683_s1 + $0x1d0c] ss:$100 sps:$4 sm:$0xff]  }
 0x237   :  { %v25840_v62 = vld [vmem:[%s37683_s1 + $0xbf4] ss:$100 sps:$4 sm:$0xff]  }
 0x238   :  { %8361 = vmatpush1.bf16.msra.mxu0 %v25769_v61  ;;  %v25835_v61 = vld [vmem:[%s37683_s1 + $0x1d08] ss:$100 sps:$4 sm:$0xff]  }
 0x239   :  { %8798 = vmatpush1.bf16.msra.mxu1 %v25766_v60  ;;  %8362 = vmatprep.subr.bf16.mxu0 %v25777_v63  ;;  %v25832_v60 = vld [vmem:[%s37683_s1 + $0xb28] ss:$100 sps:$4 sm:$0xff]   ;;  %v25838_v63 = vld [vmem:[%s37683_s1 + $0xbf0] ss:$100 sps:$4 sm:$0xff]  }
 0x23a   :  { %8799 = vmatprep.subr.bf16.mxu1 %v25774_v19  ;;  %v25843_v19 = vld [vmem:[%s37683_s1 + $0x1dd4] ss:$100 sps:$4 sm:$0xff]  }
 0x23c   :  { %8363 = vmatpush1.bf16.msra.mxu0 %v25775_v3  ;;  %v25846_v3 = vld [vmem:[%s37683_s1 + $0xcbc] ss:$100 sps:$4 sm:$0xff]  }
 0x23d   :  { %8800 = vmatpush1.bf16.msra.mxu1 %v25772_v0  ;;  %8364 = vmatprep.subr.bf16.mxu0 %v25783_v6  ;;  %v25841_v0 = vld [vmem:[%s37683_s1 + $0x1dd0] ss:$100 sps:$4 sm:$0xff]   ;;  %v25844_v6 = vld [vmem:[%s37683_s1 + $0xcb8] ss:$100 sps:$4 sm:$0xff]  }
 0x23e   :  { %8801 = vmatprep.subr.bf16.mxu1 %v25780_v5  ;;  %v25849_v5 = vld [vmem:[%s37683_s1 + $0x1e9c] ss:$100 sps:$4 sm:$0xff]  }
 0x240   :  { %8365 = vmatpush1.bf16.msra.mxu0 %v25781_v25  ;;  %v25852_v25 = vld [vmem:[%s37683_s1 + $0xd84] ss:$100 sps:$4 sm:$0xff]  }
 0x241   :  { %8802 = vmatpush1.bf16.msra.mxu1 %v25778_v7  ;;  %8366 = vmatprep.subr.bf16.mxu0 %v25789_v9  ;;  %v25847_v7 = vld [vmem:[%s37683_s1 + $0x1e98] ss:$100 sps:$4 sm:$0xff]   ;;  %v25850_v9 = vld [vmem:[%s37683_s1 + $0xd80] ss:$100 sps:$4 sm:$0xff]  }
 0x242   :  { %8803 = vmatprep.subr.bf16.mxu1 %v25786_v26  ;;  %v25855_v26 = vld [vmem:[%s37683_s1 + $0x1f64] ss:$100 sps:$4 sm:$0xff]  }
 0x244   :  { %8367 = vmatpush1.bf16.msra.mxu0 %v25787_v12  ;;  %v25858_v12 = vld [vmem:[%s37683_s1 + $0xe4c] ss:$100 sps:$4 sm:$0xff]  }
 0x245   :  { %8804 = vmatpush1.bf16.msra.mxu1 %v25784_v10  ;;  %8368 = vmatprep.subr.bf16.mxu0 %v25795_v15  ;;  %v25853_v10 = vld [vmem:[%s37683_s1 + $0x1f60] ss:$100 sps:$4 sm:$0xff]   ;;  %v25856_v15 = vld [vmem:[%s37683_s1 + $0xe48] ss:$100 sps:$4 sm:$0xff]  }
 0x246   :  { %8805 = vmatprep.subr.bf16.mxu1 %v25792_v13  ;;  %v25861_v13 = vld [vmem:[%s37683_s1 + $0x202c] ss:$100 sps:$4 sm:$0xff]  }
 0x248   :  { %8369 = vmatpush1.bf16.msra.mxu0 %v25793_v21  ;;  %v25864_v21 = vld [vmem:[%s37683_s1 + $0xf14] ss:$100 sps:$4 sm:$0xff]  }
 0x249   :  { %8806 = vmatpush1.bf16.msra.mxu1 %v25790_v18  ;;  %8370 = vmatprep.subr.bf16.mxu0 %v25801_v24  ;;  %v25859_v18 = vld [vmem:[%s37683_s1 + $0x2028] ss:$100 sps:$4 sm:$0xff]   ;;  %v25862_v24 = vld [vmem:[%s37683_s1 + $0xf10] ss:$100 sps:$4 sm:$0xff]  }
 0x24a   :  { %8807 = vmatprep.subr.bf16.mxu1 %v25798_v22  ;;  %v25867_v22 = vld [vmem:[%s37683_s1 + $0x20f4] ss:$100 sps:$4 sm:$0xff]  }
 0x24c   :  { %8371 = vmatpush1.bf16.msra.mxu0 %v25799_v28  ;;  %v25870_v28 = vld [vmem:[%s37683_s1 + $0xfdc] ss:$100 sps:$4 sm:$0xff]  }
 0x24d   :  { %8808 = vmatpush1.bf16.msra.mxu1 %v25796_v27  ;;  %8381 = vmatprep.subr.bf16.mxu0 %v25807_v30  ;;  %v25865_v27 = vld [vmem:[%s37683_s1 + $0x20f0] ss:$100 sps:$4 sm:$0xff]   ;;  %v25868_v30 = vld [vmem:[%s37683_s1 + $0xfd8] ss:$100 sps:$4 sm:$0xff]  }
 0x24e   :  { %8809 = vmatprep.subr.bf16.mxu1 %v25804_v29  ;;  %v25873_v29 = vld [vmem:[%s37683_s1 + $0x21bc] ss:$100 sps:$4 sm:$0xff]  }
 0x24f   :  { %8373 = vmatmul.mubr.bf16.vlgmr.msra.gmra.mrb[12].mxu0 %v29170_v16 }
 0x250   :  { %8382 = vmatpush1.bf16.msra.mxu0 %v25805_v32  ;;  %8413 = vmatprep.mubr.bf16.mxu0 %v29247_v40  ;;  %v25876_v32 = vld [vmem:[%s37683_s1 + $0x10a4] ss:$100 sps:$4 sm:$0xff]  }
 0x251   :  { %8810 = vmatpush1.bf16.msra.mxu1 %v25802_v31  ;;  %8383 = vmatprep.subr.bf16.mxu0 %v25813_v34  ;;  %v25871_v31 = vld [vmem:[%s37683_s1 + $0x21b8] ss:$100 sps:$4 sm:$0xff]   ;;  %v25874_v34 = vld [vmem:[%s37683_s1 + $0x10a0] ss:$100 sps:$4 sm:$0xff]  }
 0x252   :  { %8811 = vmatprep.subr.bf16.mxu1 %v25810_v33  ;;  %v25879_v33 = vld [vmem:[%s37683_s1 + $0x2284] ss:$100 sps:$4 sm:$0xff]  }
 0x254   :  { %8384 = vmatpush1.bf16.msra.mxu0 %v25811_v36  ;;  %v25882_v36 = vld [vmem:[%s37683_s1 + $0x116c] ss:$100 sps:$4 sm:$0xff]  }
 0x255   :  { %8812 = vmatpush1.bf16.msra.mxu1 %v25808_v35  ;;  %8385 = vmatprep.subr.bf16.mxu0 %v25819_v38  ;;  %v25877_v35 = vld [vmem:[%s37683_s1 + $0x2280] ss:$100 sps:$4 sm:$0xff]   ;;  %v25880_v38 = vld [vmem:[%s37683_s1 + $0x1168] ss:$100 sps:$4 sm:$0xff]  }
 0x256   :  { %8813 = vmatprep.subr.bf16.mxu1 %v25816_v37  ;;  %v25885_v37 = vld [vmem:[%s37683_s1 + $0x234c] ss:$100 sps:$4 sm:$0xff]  }
 0x258   :  { %8386 = vmatpush1.bf16.msra.mxu0 %v25817_v42  ;;  %v25888_v42 = vld [vmem:[%s37683_s1 + $0x1234] ss:$100 sps:$4 sm:$0xff]  }
 0x259   :  { %8814 = vmatpush1.bf16.msra.mxu1 %v25814_v41  ;;  %8387 = vmatprep.subr.bf16.mxu0 %v25825_v53  ;;  %v25883_v41 = vld [vmem:[%s37683_s1 + $0x2348] ss:$100 sps:$4 sm:$0xff]   ;;  %v25886_v53 = vld [vmem:[%s37683_s1 + $0x1230] ss:$100 sps:$4 sm:$0xff]  }
 0x25a   :  { %8815 = vmatprep.subr.bf16.mxu1 %v25822_v43  ;;  %v25891_v43 = vld [vmem:[%s37683_s1 + $0x2414] ss:$100 sps:$4 sm:$0xff]  }
 0x25c   :  { %8388 = vmatpush1.bf16.msra.mxu0 %v25823_v54  ;;  %v25894_v54 = vld [vmem:[%s37683_s1 + $0x12fc] ss:$100 sps:$4 sm:$0xff]  }
 0x25d   :  { %8816 = vmatpush1.bf16.msra.mxu1 %v25820_v47  ;;  %8389 = vmatprep.subr.bf16.mxu0 %v25831_v49  ;;  %v25889_v47 = vld [vmem:[%s37683_s1 + $0x2410] ss:$100 sps:$4 sm:$0xff]   ;;  %v25892_v49 = vld [vmem:[%s37683_s1 + $0x12f8] ss:$100 sps:$4 sm:$0xff]  }
 0x25e   :  { %8817 = vmatprep.subr.bf16.mxu1 %v25828_v14  ;;  %v25897_v14 = vld [vmem:[%s37683_s1 + $0x24dc] ss:$100 sps:$4 sm:$0xff]  }
 0x260   :  { %8390 = vmatpush1.bf16.msra.mxu0 %v25829_v51  ;;  %v25900_v51 = vld [vmem:[%s37683_s1 + $0x13c4] ss:$100 sps:$4 sm:$0xff]  }
 0x261   :  { %8818 = vmatpush1.bf16.msra.mxu1 %v25826_v50  ;;  %8391 = vmatprep.subr.bf16.mxu0 %v25837_v59  ;;  %v25895_v50 = vld [vmem:[%s37683_s1 + $0x24d8] ss:$100 sps:$4 sm:$0xff]   ;;  %v25898_v59 = vld [vmem:[%s37683_s1 + $0x13c0] ss:$100 sps:$4 sm:$0xff]  }
 0x262   :  { %8819 = vmatprep.subr.bf16.mxu1 %v25834_v55  ;;  %v25909_v55 = vld [vmem:[%s37683_s1 + $0x25a4] ss:$100 sps:$4 sm:$0xff]  }
 0x264   :  { %8392 = vmatpush1.bf16.msra.mxu0 %v25835_v61  ;;  %v25907_v61 = vld [vmem:[%s37683_s1 + $0x25a0] ss:$100 sps:$4 sm:$0xff]  }
 0x265   :  { %8820 = vmatpush1.bf16.msra.mxu1 %v25832_v60  ;;  %8393 = vmatprep.subr.bf16.mxu0 %v25843_v19  ;;  %v25903_v60 = vld [vmem:[%s37683_s1 + $0x148c] ss:$100 sps:$4 sm:$0xff]  }
 0x266   :  { %8821 = vmatprep.subr.bf16.mxu1 %v25840_v62  ;;  %v25915_v62 = vld [vmem:[%s37683_s1 + $0x34] ss:$100 sps:$4 sm:$0xff]   ;;  %v25901_v19 = vld [vmem:[%s37683_s1 + $0x1488] ss:$100 sps:$4 sm:$0xff]  }
 0x268   :  { %8394 = vmatpush1.bf16.msra.mxu0 %v25841_v0  ;;  %v25904_v0 = vld [vmem:[%s37683_s1 + $0x1550] ss:$100 sps:$4 sm:$0xff]  }
 0x269   :  { %8822 = vmatpush1.bf16.msra.mxu1 %v25838_v63  ;;  %8395 = vmatprep.subr.bf16.mxu0 %v25849_v5  ;;  %v25906_v63 = vld [vmem:[%s37683_s1 + $0x1554] ss:$100 sps:$4 sm:$0xff]  }
 0x26a   :  { %8832 = vmatprep.subr.bf16.mxu1 %v25846_v3  ;;  %v25912_v3 = vld [vmem:[%s37683_s1 + $0x161c] ss:$100 sps:$4 sm:$0xff]  }
 0x26b   :  { %v25910_v5 = vld [vmem:[%s37683_s1 + $0x1618] ss:$100 sps:$4 sm:$0xff]  }
 0x26c   :  { %8824 = vmatmul.mubr.bf16.vlgmr.msra.gmra.mrb[16].mxu1 %v29155_v11  ;;  %8396 = vmatpush1.bf16.msra.mxu0 %v25847_v7  ;;  %v25918_v7 = vld [vmem:[%s37683_s1 + $0x16e4] ss:$100 sps:$4 sm:$0xff]  }
 0x26d   :  { %8833 = vmatpush1.bf16.msra.mxu1 %v25844_v6  ;;  %8397 = vmatprep.subr.bf16.mxu0 %v25855_v26  ;;  %v25913_v6 = vld [vmem:[%s37683_s1 + $0x30] ss:$100 sps:$4 sm:$0xff]   ;;  %v25916_v26 = vld [vmem:[%s37683_s1 + $0x16e0] ss:$100 sps:$4 sm:$0xff]  }
 0x26e   :  { %8834 = vmatprep.subr.bf16.mxu1 %v25852_v25  ;;  %8864 = vmatprep.mubr.bf16.mxu1 %v29107_v58  ;;  %v25921_v25 = vld [vmem:[%s37683_s1 + $0xfc] ss:$100 sps:$4 sm:$0xff]  }
 0x270   :  { %8398 = vmatpush1.bf16.msra.mxu0 %v25853_v10  ;;  %v25924_v10 = vld [vmem:[%s37683_s1 + $0x17ac] ss:$100 sps:$4 sm:$0xff]  }
 0x271   :  { %8835 = vmatpush1.bf16.msra.mxu1 %v25850_v9  ;;  %8399 = vmatprep.subr.bf16.mxu0 %v25861_v13  ;;  %v25919_v9 = vld [vmem:[%s37683_s1 + $0xf8] ss:$100 sps:$4 sm:$0xff]   ;;  %v25925_v13 = vld [vmem:[%s37683_s1 + $0x1c0] ss:$100 sps:$4 sm:$0xff]  }
 0x272   :  { %8836 = vmatprep.subr.bf16.mxu1 %v25858_v12  ;;  %v25922_v12 = vld [vmem:[%s37683_s1 + $0x17a8] ss:$100 sps:$4 sm:$0xff]  }
 0x274   :  { %8400 = vmatpush1.bf16.msra.mxu0 %v25859_v18  ;;  %v25933_v18 = vld [vmem:[%s37683_s1 + $0x28c] ss:$100 sps:$4 sm:$0xff]  }
 0x275   :  { %8837 = vmatpush1.bf16.msra.mxu1 %v25856_v15  ;;  %8401 = vmatprep.subr.bf16.mxu0 %v25867_v22  ;;  %v25930_v15 = vld [vmem:[%s37683_s1 + $0x1874] ss:$100 sps:$4 sm:$0xff]  }
 0x276   :  { %8838 = vmatprep.subr.bf16.mxu1 %v25864_v21  ;;  %v25928_v22 = vld [vmem:[%s37683_s1 + $0x1870] ss:$100 sps:$4 sm:$0xff]  }
 0x278   :  { %8402 = vmatpush1.bf16.msra.mxu0 %v25865_v27  ;;  %v25931_v27 = vld [vmem:[%s37683_s1 + $0x288] ss:$100 sps:$4 sm:$0xff]  }
 0x279   :  { %8839 = vmatpush1.bf16.msra.mxu1 %v25862_v24  ;;  %8403 = vmatprep.subr.bf16.mxu0 %v25873_v29 }
 0x27a   :  { %8840 = vmatprep.subr.bf16.mxu1 %v25870_v28  ;;  %v25936_v28 = vld [vmem:[%s37683_s1 + $0x193c] ss:$100 sps:$4 sm:$0xff]  }
 0x27c   :  { %8404 = vmatpush1.bf16.msra.mxu0 %v25871_v31 }
 0x27d   :  { %8841 = vmatpush1.bf16.msra.mxu1 %v25868_v30  ;;  %8405 = vmatprep.subr.bf16.mxu0 %v25879_v33  ;;  %v25939_v30 = vld [vmem:[%s37683_s1 + $0x354] ss:$100 sps:$4 sm:$0xff]  }
 0x27e   :  { %8842 = vmatprep.subr.bf16.mxu1 %v25876_v32  ;;  %v25934_v32 = vld [vmem:[%s37683_s1 + $0x1938] ss:$100 sps:$4 sm:$0xff]   ;;  %v25937_v33 = vld [vmem:[%s37683_s1 + $0x350] ss:$100 sps:$4 sm:$0xff]  }
 0x280   :  { %8406 = vmatpush1.bf16.msra.mxu0 %v25877_v35  ;;  %v25945_v35 = vld [vmem:[%s37683_s1 + $0x41c] ss:$100 sps:$4 sm:$0xff]  }
 0x281   :  { %8843 = vmatpush1.bf16.msra.mxu1 %v25874_v34  ;;  %8407 = vmatprep.subr.bf16.mxu0 %v25885_v37  ;;  %v25942_v34 = vld [vmem:[%s37683_s1 + $0x1a04] ss:$100 sps:$4 sm:$0xff]   ;;  %v25943_v37 = vld [vmem:[%s37683_s1 + $0x418] ss:$100 sps:$4 sm:$0xff]  }
 0x282   :  { %8844 = vmatprep.subr.bf16.mxu1 %v25882_v36  ;;  %v25940_v36 = vld [vmem:[%s37683_s1 + $0x1a00] ss:$100 sps:$4 sm:$0xff]  }
 0x284   :  { %8408 = vmatpush1.bf16.msra.mxu0 %v25883_v41  ;;  %v25951_v41 = vld [vmem:[%s37683_s1 + $0x4e4] ss:$100 sps:$4 sm:$0xff]  }
 0x285   :  { %8845 = vmatpush1.bf16.msra.mxu1 %v25880_v38  ;;  %8409 = vmatprep.subr.bf16.mxu0 %v25891_v43  ;;  %v25948_v38 = vld [vmem:[%s37683_s1 + $0x1acc] ss:$100 sps:$4 sm:$0xff]   ;;  %v25949_v43 = vld [vmem:[%s37683_s1 + $0x4e0] ss:$100 sps:$4 sm:$0xff]  }
 0x286   :  { %8846 = vmatprep.subr.bf16.mxu1 %v25888_v42  ;;  %v25946_v42 = vld [vmem:[%s37683_s1 + $0x1ac8] ss:$100 sps:$4 sm:$0xff]  }
 0x288   :  { %8410 = vmatpush1.bf16.msra.mxu0 %v25889_v47  ;;  %v25957_v47 = vld [vmem:[%s37683_s1 + $0x5ac] ss:$100 sps:$4 sm:$0xff]  }
 0x289   :  { %8847 = vmatpush1.bf16.msra.mxu1 %v25886_v53  ;;  %8411 = vmatprep.subr.bf16.mxu0 %v25897_v14  ;;  %v25954_v53 = vld [vmem:[%s37683_s1 + $0x1b94] ss:$100 sps:$4 sm:$0xff]   ;;  %v25955_v14 = vld [vmem:[%s37683_s1 + $0x5a8] ss:$100 sps:$4 sm:$0xff]  }
 0x28a   :  { %8848 = vmatprep.subr.bf16.mxu1 %v25894_v54  ;;  %v25952_v54 = vld [vmem:[%s37683_s1 + $0x1b90] ss:$100 sps:$4 sm:$0xff]  }
 0x28c   :  { %8412 = vmatpush1.bf16.msra.mxu0 %v25895_v50  ;;  %v25963_v50 = vld [vmem:[%s37683_s1 + $0x674] ss:$100 sps:$4 sm:$0xff]  }
 0x28d   :  { %8849 = vmatpush1.bf16.msra.mxu1 %v25892_v49  ;;  %8422 = vmatprep.subr.bf16.mxu0 %v25909_v55  ;;  %v25960_v49 = vld [vmem:[%s37683_s1 + $0x1c5c] ss:$100 sps:$4 sm:$0xff]   ;;  %v25961_v55 = vld [vmem:[%s37683_s1 + $0x670] ss:$100 sps:$4 sm:$0xff]  }
 0x28e   :  { %8850 = vmatprep.subr.bf16.mxu1 %v25900_v51  ;;  %v25958_v51 = vld [vmem:[%s37683_s1 + $0x1c58] ss:$100 sps:$4 sm:$0xff]  }
 0x28f   :  { %8414 = vmatmul.mubr.bf16.vlgmr.msra.gmra.mrb[12].mxu0 %v29376_v23 }
 0x290   :  { %8423 = vmatpush1.bf16.msra.mxu0 %v25907_v61  ;;  %8454 = vmatprep.mubr.bf16.mxu0 %v28886_v1  ;;  %v25964_v61 = vld [vmem:[%s37683_s1 + $0x1d20] ss:$100 sps:$4 sm:$0xff]  }
 0x291   :  { %8851 = vmatpush1.bf16.msra.mxu1 %v25898_v59  ;;  %8627 = vmatprep.subr.bf16.mxu0 %v25915_v62  ;;  %v25966_v59 = vld [vmem:[%s37683_s1 + $0x1d24] ss:$100 sps:$4 sm:$0xff]   ;;  %v25967_v62 = vld [vmem:[%s37683_s1 + $0x738] ss:$100 sps:$4 sm:$0xff]  }
 0x292   :  { %8852 = vmatprep.subr.bf16.mxu1 %v25903_v60  ;;  %v25969_v60 = vld [vmem:[%s37683_s1 + $0x73c] ss:$100 sps:$4 sm:$0xff]  }
 0x295   :  { %8853 = vmatpush1.bf16.msra.mxu1 %v25901_v19  ;;  %v25972_v19 = vld [vmem:[%s37683_s1 + $0x1dec] ss:$100 sps:$4 sm:$0xff]  }
 0x296   :  { %8854 = vmatprep.subr.bf16.mxu1 %v25906_v63  ;;  %v25975_v63 = vld [vmem:[%s37683_s1 + $0x804] ss:$100 sps:$4 sm:$0xff]  }
 0x299   :  { %8855 = vmatpush1.bf16.msra.mxu1 %v25904_v0  ;;  %v25970_v0 = vld [vmem:[%s37683_s1 + $0x1de8] ss:$100 sps:$4 sm:$0xff]  }
 0x29a   :  { %8856 = vmatprep.subr.bf16.mxu1 %v25912_v3  ;;  %v25973_v3 = vld [vmem:[%s37683_s1 + $0x800] ss:$100 sps:$4 sm:$0xff]  }
 0x29b   :  { %22756 = vmatmul.mubr.msk.bf16.vlgmr.msra.gmra.mrb[12].mxu0 %vm7639_vm0, %v30692_v45  ;;  %v25927_v45 = vld [vmem:[%s37683_s1 + $0x1c4] ss:$100 sps:$4 sm:$0xff]  }
 0x29c   :  { %8628 = vmatpush1.bf16.msra.mxu0 %v25913_v6  ;;  %8659 = vmatprep.mubr.bf16.mxu0 %v29089_v52  ;;  %v25981_v6 = vld [vmem:[%s37683_s1 + $0x8cc] ss:$100 sps:$4 sm:$0xff]  }
 0x29d   :  { %8857 = vmatpush1.bf16.msra.mxu1 %v25910_v5  ;;  %8629 = vmatprep.subr.bf16.mxu0 %v25921_v25  ;;  %v25978_v5 = vld [vmem:[%s37683_s1 + $0x1eb4] ss:$100 sps:$4 sm:$0xff]   ;;  %v25979_v25 = vld [vmem:[%s37683_s1 + $0x8c8] ss:$100 sps:$4 sm:$0xff]  }
 0x29e   :  { %8858 = vmatprep.subr.bf16.mxu1 %v25918_v7  ;;  %v25976_v7 = vld [vmem:[%s37683_s1 + $0x1eb0] ss:$100 sps:$4 sm:$0xff]  }
 0x2a0   :  { %8630 = vmatpush1.bf16.msra.mxu0 %v25919_v9  ;;  %v25987_v9 = vld [vmem:[%s37683_s1 + $0x994] ss:$100 sps:$4 sm:$0xff]  }
 0x2a1   :  { %8859 = vmatpush1.bf16.msra.mxu1 %v25916_v26  ;;  %8631 = vmatprep.subr.bf16.mxu0 %v25927_v45  ;;  %v25984_v26 = vld [vmem:[%s37683_s1 + $0x1f7c] ss:$100 sps:$4 sm:$0xff]   ;;  %v25985_v45 = vld [vmem:[%s37683_s1 + $0x990] ss:$100 sps:$4 sm:$0xff]  }
 0x2a2   :  { %8860 = vmatprep.subr.bf16.mxu1 %v25924_v10  ;;  %v31058_v21 = vpop.f32.mrb[8].mxu0  ;;  %v25982_v10 = vld [vmem:[%s37683_s1 + $0x1f78] ss:$100 sps:$4 sm:$0xff]  }
 0x2a3   :  { %v31063_v24 = vpop.f32.mrb[9].mxu0 }
 0x2a4   :  { %8632 = vmatpush1.bf16.msra.mxu0 %v25925_v13  ;;  %v8132_v29 = vpop.f32.mrb[10].mxu0  ;;  %v25993_v13 = vld [vmem:[%s37683_s1 + $0xa5c] ss:$100 sps:$4 sm:$0xff]  }
 0x2a5   :  { %8861 = vmatpush1.bf16.msra.mxu1 %v25922_v12  ;;  %8633 = vmatprep.subr.bf16.mxu0 %v25933_v18  ;;  %v8133_v31 = vpop.f32.mrb[11].mxu0  ;;  %v25990_v12 = vld [vmem:[%s37683_s1 + $0x2044] ss:$100 sps:$4 sm:$0xff]   ;;  %v25991_v18 = vld [vmem:[%s37683_s1 + $0xa58] ss:$100 sps:$4 sm:$0xff]  }
 0x2a6   :  { %8862 = vmatprep.subr.bf16.mxu1 %v25930_v15  ;;  %v25988_v15 = vld [vmem:[%s37683_s1 + $0x2040] ss:$100 sps:$4 sm:$0xff]   ;;  %v26005_v31 = vld [vmem:[%s37683_s1 + $0xbec] ss:$100 sps:$4 sm:$0xff]  }
 0x2a7   :  { %v25997_v29 = vld [vmem:[%s37683_s1 + $0xb20] ss:$100 sps:$4 sm:$0xff]  }
 0x2a8   :  { %8634 = vmatpush1.bf16.msra.mxu0 %v25931_v27  ;;  %v25999_v27 = vld [vmem:[%s37683_s1 + $0xb24] ss:$100 sps:$4 sm:$0xff]  }
 0x2a9   :  { %8863 = vmatpush1.bf16.msra.mxu1 %v25928_v22  ;;  %8635 = vmatprep.subr.bf16.mxu0 %v25939_v30  ;;  %v25996_v22 = vld [vmem:[%s37683_s1 + $0x210c] ss:$100 sps:$4 sm:$0xff]   ;;  %v26002_v30 = vld [vmem:[%s37683_s1 + $0x21d4] ss:$100 sps:$4 sm:$0xff]  }
 0x2aa   :  { %8873 = vmatprep.subr.bf16.mxu1 %v25936_v28  ;;  %v25994_v28 = vld [vmem:[%s37683_s1 + $0x2108] ss:$100 sps:$4 sm:$0xff]  }
 0x2ac   :  { %8865 = vmatmul.mubr.bf16.vlgmr.msra.gmra.mrb[16].mxu1 %v29170_v16  ;;  %8636 = vmatpush1.bf16.msra.mxu0 %v25937_v33  ;;  %v26003_v33 = vld [vmem:[%s37683_s1 + $0xbe8] ss:$100 sps:$4 sm:$0xff]  }
 0x2ad   :  { %8874 = vmatpush1.bf16.msra.mxu1 %v25934_v32  ;;  %8637 = vmatprep.subr.bf16.mxu0 %v25945_v35  ;;  %v26000_v32 = vld [vmem:[%s37683_s1 + $0x21d0] ss:$100 sps:$4 sm:$0xff]  }
 0x2ae   :  { %8875 = vmatprep.subr.bf16.mxu1 %v25942_v34  ;;  %8905 = vmatprep.mubr.bf16.mxu1 %v29247_v40  ;;  %v26008_v34 = vld [vmem:[%s37683_s1 + $0x229c] ss:$100 sps:$4 sm:$0xff]   ;;  %v26011_v35 = vld [vmem:[%s37683_s1 + $0xcb4] ss:$100 sps:$4 sm:$0xff]  }
 0x2b0   :  { %8638 = vmatpush1.bf16.msra.mxu0 %v25943_v37  ;;  %v26009_v37 = vld [vmem:[%s37683_s1 + $0xcb0] ss:$100 sps:$4 sm:$0xff]  }
 0x2b1   :  { %8876 = vmatpush1.bf16.msra.mxu1 %v25940_v36  ;;  %8639 = vmatprep.subr.bf16.mxu0 %v25951_v41  ;;  %v26006_v36 = vld [vmem:[%s37683_s1 + $0x2298] ss:$100 sps:$4 sm:$0xff]  }
 0x2b2   :  { %8877 = vmatprep.subr.bf16.mxu1 %v25948_v38  ;;  %v26014_v38 = vld [vmem:[%s37683_s1 + $0x2364] ss:$100 sps:$4 sm:$0xff]   ;;  %v26017_v41 = vld [vmem:[%s37683_s1 + $0xd7c] ss:$100 sps:$4 sm:$0xff]  }
 0x2b4   :  { %8640 = vmatpush1.bf16.msra.mxu0 %v25949_v43  ;;  %v26015_v43 = vld [vmem:[%s37683_s1 + $0xd78] ss:$100 sps:$4 sm:$0xff]  }
 0x2b5   :  { %8878 = vmatpush1.bf16.msra.mxu1 %v25946_v42  ;;  %8641 = vmatprep.subr.bf16.mxu0 %v25957_v47  ;;  %v26012_v42 = vld [vmem:[%s37683_s1 + $0x2360] ss:$100 sps:$4 sm:$0xff]  }
 0x2b6   :  { %8879 = vmatprep.subr.bf16.mxu1 %v25954_v53  ;;  %v26020_v53 = vld [vmem:[%s37683_s1 + $0x242c] ss:$100 sps:$4 sm:$0xff]   ;;  %v26023_v47 = vld [vmem:[%s37683_s1 + $0xe44] ss:$100 sps:$4 sm:$0xff]  }
 0x2b8   :  { %8642 = vmatpush1.bf16.msra.mxu0 %v25955_v14  ;;  %v26021_v14 = vld [vmem:[%s37683_s1 + $0xe40] ss:$100 sps:$4 sm:$0xff]  }
 0x2b9   :  { %8880 = vmatpush1.bf16.msra.mxu1 %v25952_v54  ;;  %8643 = vmatprep.subr.bf16.mxu0 %v25963_v50  ;;  %v26018_v54 = vld [vmem:[%s37683_s1 + $0x2428] ss:$100 sps:$4 sm:$0xff]  }
 0x2ba   :  { %8881 = vmatprep.subr.bf16.mxu1 %v25960_v49  ;;  %v26026_v49 = vld [vmem:[%s37683_s1 + $0x24f4] ss:$100 sps:$4 sm:$0xff]   ;;  %v26029_v50 = vld [vmem:[%s37683_s1 + $0xf0c] ss:$100 sps:$4 sm:$0xff]  }
 0x2bc   :  { %8644 = vmatpush1.bf16.msra.mxu0 %v25961_v55  ;;  %v26027_v55 = vld [vmem:[%s37683_s1 + $0xf08] ss:$100 sps:$4 sm:$0xff]  }
 0x2bd   :  { %8882 = vmatpush1.bf16.msra.mxu1 %v25958_v51  ;;  %8645 = vmatprep.subr.bf16.mxu0 %v25969_v60  ;;  %v26024_v51 = vld [vmem:[%s37683_s1 + $0x24f0] ss:$100 sps:$4 sm:$0xff]  }
 0x2be   :  { %8883 = vmatprep.subr.bf16.mxu1 %v25966_v59  ;;  %v26032_v59 = vld [vmem:[%s37683_s1 + $0x25bc] ss:$100 sps:$4 sm:$0xff]   ;;  %v26035_v60 = vld [vmem:[%s37683_s1 + $0xfd4] ss:$100 sps:$4 sm:$0xff]  }
 0x2c0   :  { %8646 = vmatpush1.bf16.msra.mxu0 %v25967_v62  ;;  %v26033_v62 = vld [vmem:[%s37683_s1 + $0xfd0] ss:$100 sps:$4 sm:$0xff]  }
 0x2c1   :  { %8884 = vmatpush1.bf16.msra.mxu1 %v25964_v61  ;;  %8647 = vmatprep.subr.bf16.mxu0 %v25975_v63  ;;  %v26030_v61 = vld [vmem:[%s37683_s1 + $0x25b8] ss:$100 sps:$4 sm:$0xff]   ;;  %v26044_v63 = vld [vmem:[%s37683_s1 + $0x4c] ss:$100 sps:$4 sm:$0xff]  }
 0x2c2   :  { %8885 = vmatprep.subr.bf16.mxu1 %v25972_v19  ;;  %v26038_v19 = vld [vmem:[%s37683_s1 + $0x109c] ss:$100 sps:$4 sm:$0xff]  }
 0x2c4   :  { %8648 = vmatpush1.bf16.msra.mxu0 %v25973_v3  ;;  %v26041_v3 = vld [vmem:[%s37683_s1 + $0x1164] ss:$100 sps:$4 sm:$0xff]  }
 0x2c5   :  { %8886 = vmatpush1.bf16.msra.mxu1 %v25970_v0  ;;  %8649 = vmatprep.subr.bf16.mxu0 %v25981_v6  ;;  %v26036_v0 = vld [vmem:[%s37683_s1 + $0x1098] ss:$100 sps:$4 sm:$0xff]   ;;  %v26047_v6 = vld [vmem:[%s37683_s1 + $0x122c] ss:$100 sps:$4 sm:$0xff]  }
 0x2c6   :  { %8887 = vmatprep.subr.bf16.mxu1 %v25978_v5  ;;  %v26039_v5 = vld [vmem:[%s37683_s1 + $0x1160] ss:$100 sps:$4 sm:$0xff]  }
 0x2c8   :  { %8650 = vmatpush1.bf16.msra.mxu0 %v25979_v25  ;;  %v26045_v25 = vld [vmem:[%s37683_s1 + $0x1228] ss:$100 sps:$4 sm:$0xff]  }
 0x2c9   :  { %8888 = vmatpush1.bf16.msra.mxu1 %v25976_v7  ;;  %8651 = vmatprep.subr.bf16.mxu0 %v25987_v9  ;;  %v26042_v7 = vld [vmem:[%s37683_s1 + $0x48] ss:$100 sps:$4 sm:$0xff]   ;;  %v26053_v9 = vld [vmem:[%s37683_s1 + $0x12f4] ss:$100 sps:$4 sm:$0xff]  }
 0x2ca   :  { %8889 = vmatprep.subr.bf16.mxu1 %v25984_v26  ;;  %v26050_v26 = vld [vmem:[%s37683_s1 + $0x114] ss:$100 sps:$4 sm:$0xff]  }
 0x2cc   :  { %8652 = vmatpush1.bf16.msra.mxu0 %v25985_v45  ;;  %v26048_v45 = vld [vmem:[%s37683_s1 + $0x110] ss:$100 sps:$4 sm:$0xff]  }
 0x2cd   :  { %8890 = vmatpush1.bf16.msra.mxu1 %v25982_v10  ;;  %8653 = vmatprep.subr.bf16.mxu0 %v25993_v13  ;;  %v31311_v10 = vld [vmem:[%s37684_s0 + $0x18] ss:$0 sps:$4 sm:$0xff]   ;;  %v26056_v13 = vld [vmem:[%s37683_s1 + $0x1dc] ss:$100 sps:$4 sm:$0xff]  }
 0x2ce   :  { %8891 = vmatprep.subr.bf16.mxu1 %v25990_v12  ;;  %v26051_v12 = vld [vmem:[%s37683_s1 + $0x12f0] ss:$100 sps:$4 sm:$0xff]  }
 0x2d0   :  { %8654 = vmatpush1.bf16.msra.mxu0 %v25991_v18  ;;  %v26054_v18 = vld [vmem:[%s37683_s1 + $0x1d8] ss:$100 sps:$4 sm:$0xff]  }
 0x2d1   :  { %8892 = vmatpush1.bf16.msra.mxu1 %v25988_v15  ;;  %8655 = vmatprep.subr.bf16.mxu0 %v25999_v27  ;;  %v26059_v15 = vld [vmem:[%s37683_s1 + $0x13bc] ss:$100 sps:$4 sm:$0xff]   ;;  %v26062_v27 = vld [vmem:[%s37683_s1 + $0x2a4] ss:$100 sps:$4 sm:$0xff]  }
 0x2d2   :  { %8893 = vmatprep.subr.bf16.mxu1 %v25996_v22  ;;  %v26057_v22 = vld [vmem:[%s37683_s1 + $0x13b8] ss:$100 sps:$4 sm:$0xff]  }
 0x2d4   :  { %8656 = vmatpush1.bf16.msra.mxu0 %v25997_v29 }
 0x2d5   :  { %8894 = vmatpush1.bf16.msra.mxu1 %v25994_v28  ;;  %8657 = vmatprep.subr.bf16.mxu0 %v26005_v31  ;;  %v26065_v28 = vld [vmem:[%s37683_s1 + $0x1484] ss:$100 sps:$4 sm:$0xff]  }
 0x2d6   :  { %8895 = vmatprep.subr.bf16.mxu1 %v26002_v30 }
 0x2d8   :  { %8658 = vmatpush1.bf16.msra.mxu0 %v26003_v33  ;;  %v26063_v33 = vld [vmem:[%s37683_s1 + $0x1480] ss:$100 sps:$4 sm:$0xff]  }
 0x2d9   :  { %8896 = vmatpush1.bf16.msra.mxu1 %v26000_v32  ;;  %8668 = vmatprep.subr.bf16.mxu0 %v26011_v35  ;;  %v26060_v32 = vld [vmem:[%s37683_s1 + $0x2a0] ss:$100 sps:$4 sm:$0xff]   ;;  %v26068_v35 = vld [vmem:[%s37683_s1 + $0x36c] ss:$100 sps:$4 sm:$0xff]  }
 0x2da   :  { %8897 = vmatprep.subr.bf16.mxu1 %v26008_v34 }
 0x2db   :  { %8660 = vmatmul.mubr.bf16.vlgmr.msra.gmra.mrb[16].mxu0 %v29155_v11 }
 0x2dc   :  { %8669 = vmatpush1.bf16.msra.mxu0 %v26009_v37  ;;  %8700 = vmatprep.mubr.bf16.mxu0 %v29107_v58  ;;  %v26066_v37 = vld [vmem:[%s37683_s1 + $0x368] ss:$100 sps:$4 sm:$0xff]  }
 0x2dd   :  { %8898 = vmatpush1.bf16.msra.mxu1 %v26006_v36  ;;  %8670 = vmatprep.subr.bf16.mxu0 %v26017_v41  ;;  %v26071_v36 = vld [vmem:[%s37683_s1 + $0x154c] ss:$100 sps:$4 sm:$0xff]   ;;  %v26074_v41 = vld [vmem:[%s37683_s1 + $0x434] ss:$100 sps:$4 sm:$0xff]  }
 0x2de   :  { %8899 = vmatprep.subr.bf16.mxu1 %v26014_v38  ;;  %v26069_v38 = vld [vmem:[%s37683_s1 + $0x1548] ss:$100 sps:$4 sm:$0xff]  }
 0x2e0   :  { %8671 = vmatpush1.bf16.msra.mxu0 %v26015_v43  ;;  %v26072_v43 = vld [vmem:[%s37683_s1 + $0x430] ss:$100 sps:$4 sm:$0xff]  }
 0x2e1   :  { %8900 = vmatpush1.bf16.msra.mxu1 %v26012_v42  ;;  %8672 = vmatprep.subr.bf16.mxu0 %v26023_v47  ;;  %v26077_v42 = vld [vmem:[%s37683_s1 + $0x1614] ss:$100 sps:$4 sm:$0xff]   ;;  %v26080_v47 = vld [vmem:[%s37683_s1 + $0x4fc] ss:$100 sps:$4 sm:$0xff]  }
 0x2e2   :  { %8901 = vmatprep.subr.bf16.mxu1 %v26020_v53  ;;  %v26075_v53 = vld [vmem:[%s37683_s1 + $0x1610] ss:$100 sps:$4 sm:$0xff]  }
 0x2e4   :  { %8673 = vmatpush1.bf16.msra.mxu0 %v26021_v14  ;;  %v26078_v14 = vld [vmem:[%s37683_s1 + $0x4f8] ss:$100 sps:$4 sm:$0xff]  }
 0x2e5   :  { %8902 = vmatpush1.bf16.msra.mxu1 %v26018_v54  ;;  %8674 = vmatprep.subr.bf16.mxu0 %v26029_v50  ;;  %v26083_v54 = vld [vmem:[%s37683_s1 + $0x16dc] ss:$100 sps:$4 sm:$0xff]   ;;  %v26086_v50 = vld [vmem:[%s37683_s1 + $0x5c4] ss:$100 sps:$4 sm:$0xff]  }
 0x2e6   :  { %8903 = vmatprep.subr.bf16.mxu1 %v26026_v49  ;;  %v26081_v49 = vld [vmem:[%s37683_s1 + $0x16d8] ss:$100 sps:$4 sm:$0xff]  }
 0x2e8   :  { %8675 = vmatpush1.bf16.msra.mxu0 %v26027_v55  ;;  %v26084_v55 = vld [vmem:[%s37683_s1 + $0x5c0] ss:$100 sps:$4 sm:$0xff]  }
 0x2e9   :  { %8904 = vmatpush1.bf16.msra.mxu1 %v26024_v51  ;;  %8676 = vmatprep.subr.bf16.mxu0 %v26035_v60  ;;  %v26089_v51 = vld [vmem:[%s37683_s1 + $0x17a4] ss:$100 sps:$4 sm:$0xff]   ;;  %v26092_v60 = vld [vmem:[%s37683_s1 + $0x68c] ss:$100 sps:$4 sm:$0xff]  }
 0x2ea   :  { %8914 = vmatprep.subr.bf16.mxu1 %v26032_v59  ;;  %v26087_v59 = vld [vmem:[%s37683_s1 + $0x17a0] ss:$100 sps:$4 sm:$0xff]  }
 0x2ec   :  { %8906 = vmatmul.mubr.bf16.vlgmr.msra.gmra.mrb[16].mxu1 %v29376_v23  ;;  %8677 = vmatpush1.bf16.msra.mxu0 %v26033_v62  ;;  %v26090_v62 = vld [vmem:[%s37683_s1 + $0x688] ss:$100 sps:$4 sm:$0xff]  }
 0x2ed   :  { %8915 = vmatpush1.bf16.msra.mxu1 %v26030_v61  ;;  %8678 = vmatprep.subr.bf16.mxu0 %v26038_v19  ;;  %v26095_v61 = vld [vmem:[%s37683_s1 + $0x186c] ss:$100 sps:$4 sm:$0xff]  }
 0x2ee   :  { %8946 = vmatprep.mubr.bf16.mxu1 %v28886_v1  ;;  %9119 = vmatprep.subr.bf16.mxu1 %v26044_v63  ;;  %v26093_v19 = vld [vmem:[%s37683_s1 + $0x1868] ss:$100 sps:$4 sm:$0xff]   ;;  %v26098_v63 = vld [vmem:[%s37683_s1 + $0x754] ss:$100 sps:$4 sm:$0xff]  }
 0x2f0   :  { %8679 = vmatpush1.bf16.msra.mxu0 %v26036_v0  ;;  %v26101_v0 = vld [vmem:[%s37683_s1 + $0x1934] ss:$100 sps:$4 sm:$0xff]  }
 0x2f1   :  { %8680 = vmatprep.subr.bf16.mxu0 %v26041_v3  ;;  %v26096_v3 = vld [vmem:[%s37683_s1 + $0x750] ss:$100 sps:$4 sm:$0xff]  }
 0x2f4   :  { %8681 = vmatpush1.bf16.msra.mxu0 %v26039_v5  ;;  %v26099_v5 = vld [vmem:[%s37683_s1 + $0x1930] ss:$100 sps:$4 sm:$0xff]  }
 0x2f5   :  { %8682 = vmatprep.subr.bf16.mxu0 %v26047_v6  ;;  %v26104_v6 = vld [vmem:[%s37683_s1 + $0x81c] ss:$100 sps:$4 sm:$0xff]  }
 0x2f8   :  { %22759 = vmatmul.mubr.msk.bf16.vlgmr.msra.gmra.mrb[16].mxu1 %vm7639_vm0, %v31311_v10  ;;  %8683 = vmatpush1.bf16.msra.mxu0 %v26045_v25  ;;  %v26102_v25 = vld [vmem:[%s37683_s1 + $0x818] ss:$100 sps:$4 sm:$0xff]  }
 0x2f9   :  { %9120 = vmatpush1.bf16.msra.mxu1 %v26042_v7  ;;  %8684 = vmatprep.subr.bf16.mxu0 %v26053_v9  ;;  %v26107_v7 = vld [vmem:[%s37683_s1 + $0x19fc] ss:$100 sps:$4 sm:$0xff]   ;;  %v26110_v9 = vld [vmem:[%s37683_s1 + $0x8e4] ss:$100 sps:$4 sm:$0xff]  }
 0x2fa   :  { %9121 = vmatprep.subr.bf16.mxu1 %v26050_v26  ;;  %9151 = vmatprep.mubr.bf16.mxu1 %v29089_v52  ;;  %v26105_v26 = vld [vmem:[%s37683_s1 + $0x19f8] ss:$100 sps:$4 sm:$0xff]  }
 0x2fc   :  { %8685 = vmatpush1.bf16.msra.mxu0 %v26051_v12  ;;  %v26108_v12 = vld [vmem:[%s37683_s1 + $0x8e0] ss:$100 sps:$4 sm:$0xff]  }
 0x2fd   :  { %9122 = vmatpush1.bf16.msra.mxu1 %v26048_v45  ;;  %8686 = vmatprep.subr.bf16.mxu0 %v26059_v15  ;;  %v26113_v45 = vld [vmem:[%s37683_s1 + $0x1ac4] ss:$100 sps:$4 sm:$0xff]   ;;  %v26116_v15 = vld [vmem:[%s37683_s1 + $0x9ac] ss:$100 sps:$4 sm:$0xff]  }
 0x2fe   :  { %9123 = vmatprep.subr.bf16.mxu1 %v26056_v13  ;;  %v26111_v13 = vld [vmem:[%s37683_s1 + $0x1ac0] ss:$100 sps:$4 sm:$0xff]  }
 0x2ff   :  { %v31340_v29 = vpop.f32.mrb[12].mxu1 }
 0x300   :  { %v31342_v30 = vpop.f32.mrb[13].mxu1  ;;  %8687 = vmatpush1.bf16.msra.mxu0 %v26057_v22  ;;  %v26114_v22 = vld [vmem:[%s37683_s1 + $0x9a8] ss:$100 sps:$4 sm:$0xff]  }
 0x301   :  { %9124 = vmatpush1.bf16.msra.mxu1 %v26054_v18  ;;  %v8624_v31 = vpop.f32.mrb[14].mxu1  ;;  %8688 = vmatprep.subr.bf16.mxu0 %v26065_v28  ;;  %v26119_v18 = vld [vmem:[%s37683_s1 + $0x1b8c] ss:$100 sps:$4 sm:$0xff]   ;;  %v26122_v28 = vld [vmem:[%s37683_s1 + $0xa74] ss:$100 sps:$4 sm:$0xff]  }
 0x302   :  { %v8625_v34 = vpop.f32.mrb[15].mxu1  ;;  %9125 = vmatprep.subr.bf16.mxu1 %v26062_v27  ;;  %v26117_v27 = vld [vmem:[%s37683_s1 + $0x1b88] ss:$100 sps:$4 sm:$0xff]   ;;  %v26125_v31 = vld [vmem:[%s37683_s1 + $0x1c54] ss:$100 sps:$4 sm:$0xff]  }
 0x303   :  { %v26128_v34 = vld [vmem:[%s37683_s1 + $0xb3c] ss:$100 sps:$4 sm:$0xff]  }
 0x304   :  { %8689 = vmatpush1.bf16.msra.mxu0 %v26063_v33  ;;  %v26123_v33 = vld [vmem:[%s37683_s1 + $0x1c50] ss:$100 sps:$4 sm:$0xff]  }
 0x305   :  { %9126 = vmatpush1.bf16.msra.mxu1 %v26060_v32  ;;  %8690 = vmatprep.subr.bf16.mxu0 %v26071_v36  ;;  %v26120_v32 = vld [vmem:[%s37683_s1 + $0xa70] ss:$100 sps:$4 sm:$0xff]   ;;  %v26126_v36 = vld [vmem:[%s37683_s1 + $0xb38] ss:$100 sps:$4 sm:$0xff]  }
 0x306   :  { %9127 = vmatprep.subr.bf16.mxu1 %v26068_v35  ;;  %v26131_v35 = vld [vmem:[%s37683_s1 + $0x1d1c] ss:$100 sps:$4 sm:$0xff]  }
 0x308   :  { %8691 = vmatpush1.bf16.msra.mxu0 %v26069_v38  ;;  %v26134_v38 = vld [vmem:[%s37683_s1 + $0xc04] ss:$100 sps:$4 sm:$0xff]  }
 0x309   :  { %9128 = vmatpush1.bf16.msra.mxu1 %v26066_v37  ;;  %8692 = vmatprep.subr.bf16.mxu0 %v26077_v42  ;;  %v26129_v37 = vld [vmem:[%s37683_s1 + $0x1d18] ss:$100 sps:$4 sm:$0xff]   ;;  %v26132_v42 = vld [vmem:[%s37683_s1 + $0xc00] ss:$100 sps:$4 sm:$0xff]  }
 0x30a   :  { %9129 = vmatprep.subr.bf16.mxu1 %v26074_v41  ;;  %v26137_v41 = vld [vmem:[%s37683_s1 + $0x1de4] ss:$100 sps:$4 sm:$0xff]  }
 0x30c   :  { %8693 = vmatpush1.bf16.msra.mxu0 %v26075_v53  ;;  %v26140_v53 = vld [vmem:[%s37683_s1 + $0xccc] ss:$100 sps:$4 sm:$0xff]  }
 0x30d   :  { %9130 = vmatpush1.bf16.msra.mxu1 %v26072_v43  ;;  %8694 = vmatprep.subr.bf16.mxu0 %v26083_v54  ;;  %v26135_v43 = vld [vmem:[%s37683_s1 + $0x1de0] ss:$100 sps:$4 sm:$0xff]   ;;  %v26138_v54 = vld [vmem:[%s37683_s1 + $0xcc8] ss:$100 sps:$4 sm:$0xff]  }
 0x30e   :  { %9131 = vmatprep.subr.bf16.mxu1 %v26080_v47  ;;  %v26143_v47 = vld [vmem:[%s37683_s1 + $0x1eac] ss:$100 sps:$4 sm:$0xff]  }
 0x310   :  { %8695 = vmatpush1.bf16.msra.mxu0 %v26081_v49  ;;  %v26146_v49 = vld [vmem:[%s37683_s1 + $0xd94] ss:$100 sps:$4 sm:$0xff]  }
 0x311   :  { %9132 = vmatpush1.bf16.msra.mxu1 %v26078_v14  ;;  %8696 = vmatprep.subr.bf16.mxu0 %v26089_v51  ;;  %v26141_v14 = vld [vmem:[%s37683_s1 + $0x1ea8] ss:$100 sps:$4 sm:$0xff]   ;;  %v26144_v51 = vld [vmem:[%s37683_s1 + $0xd90] ss:$100 sps:$4 sm:$0xff]  }
 0x312   :  { %9133 = vmatprep.subr.bf16.mxu1 %v26086_v50  ;;  %v26149_v50 = vld [vmem:[%s37683_s1 + $0x1f74] ss:$100 sps:$4 sm:$0xff]  }
 0x314   :  { %8697 = vmatpush1.bf16.msra.mxu0 %v26087_v59  ;;  %v26152_v59 = vld [vmem:[%s37683_s1 + $0xe5c] ss:$100 sps:$4 sm:$0xff]  }
 0x315   :  { %9134 = vmatpush1.bf16.msra.mxu1 %v26084_v55  ;;  %8698 = vmatprep.subr.bf16.mxu0 %v26095_v61  ;;  %v26147_v55 = vld [vmem:[%s37683_s1 + $0x1f70] ss:$100 sps:$4 sm:$0xff]   ;;  %v26150_v61 = vld [vmem:[%s37683_s1 + $0xe58] ss:$100 sps:$4 sm:$0xff]  }
 0x316   :  { %9135 = vmatprep.subr.bf16.mxu1 %v26092_v60  ;;  %v26155_v60 = vld [vmem:[%s37683_s1 + $0x203c] ss:$100 sps:$4 sm:$0xff]  }
 0x318   :  { %8699 = vmatpush1.bf16.msra.mxu0 %v26093_v19  ;;  %v26158_v19 = vld [vmem:[%s37683_s1 + $0xf24] ss:$100 sps:$4 sm:$0xff]  }
 0x319   :  { %9136 = vmatpush1.bf16.msra.mxu1 %v26090_v62  ;;  %8709 = vmatprep.subr.bf16.mxu0 %v26101_v0  ;;  %v26153_v62 = vld [vmem:[%s37683_s1 + $0x2038] ss:$100 sps:$4 sm:$0xff]   ;;  %v26156_v0 = vld [vmem:[%s37683_s1 + $0xf20] ss:$100 sps:$4 sm:$0xff]  }
 0x31a   :  { %9137 = vmatprep.subr.bf16.mxu1 %v26098_v63  ;;  %v26161_v63 = vld [vmem:[%s37683_s1 + $0x2104] ss:$100 sps:$4 sm:$0xff]  }
 0x31b   :  { %8701 = vmatmul.mubr.bf16.vlgmr.msra.gmra.mrb[16].mxu0 %v29170_v16 }
 0x31c   :  { %8710 = vmatpush1.bf16.msra.mxu0 %v26099_v5  ;;  %8741 = vmatprep.mubr.bf16.mxu0 %v29247_v40  ;;  %v26164_v5 = vld [vmem:[%s37683_s1 + $0xfec] ss:$100 sps:$4 sm:$0xff]  }
 0x31d   :  { %9138 = vmatpush1.bf16.msra.mxu1 %v26096_v3  ;;  %8711 = vmatprep.subr.bf16.mxu0 %v26107_v7  ;;  %v26159_v3 = vld [vmem:[%s37683_s1 + $0x2100] ss:$100 sps:$4 sm:$0xff]   ;;  %v26162_v7 = vld [vmem:[%s37683_s1 + $0xfe8] ss:$100 sps:$4 sm:$0xff]  }
 0x31e   :  { %9139 = vmatprep.subr.bf16.mxu1 %v26104_v6  ;;  %v26167_v6 = vld [vmem:[%s37683_s1 + $0x21cc] ss:$100 sps:$4 sm:$0xff]  }
 0x320   :  { %8712 = vmatpush1.bf16.msra.mxu0 %v26105_v26  ;;  %v26170_v26 = vld [vmem:[%s37683_s1 + $0x10b4] ss:$100 sps:$4 sm:$0xff]  }
 0x321   :  { %9140 = vmatpush1.bf16.msra.mxu1 %v26102_v25  ;;  %8713 = vmatprep.subr.bf16.mxu0 %v26113_v45  ;;  %v26165_v25 = vld [vmem:[%s37683_s1 + $0x21c8] ss:$100 sps:$4 sm:$0xff]   ;;  %v26168_v45 = vld [vmem:[%s37683_s1 + $0x10b0] ss:$100 sps:$4 sm:$0xff]  }
 0x322   :  { %9141 = vmatprep.subr.bf16.mxu1 %v26110_v9  ;;  %v26173_v9 = vld [vmem:[%s37683_s1 + $0x2294] ss:$100 sps:$4 sm:$0xff]  }
 0x324   :  { %8714 = vmatpush1.bf16.msra.mxu0 %v26111_v13  ;;  %v26176_v13 = vld [vmem:[%s37683_s1 + $0x117c] ss:$100 sps:$4 sm:$0xff]  }
 0x325   :  { %9142 = vmatpush1.bf16.msra.mxu1 %v26108_v12  ;;  %8715 = vmatprep.subr.bf16.mxu0 %v26119_v18  ;;  %v26171_v12 = vld [vmem:[%s37683_s1 + $0x2290] ss:$100 sps:$4 sm:$0xff]   ;;  %v26174_v18 = vld [vmem:[%s37683_s1 + $0x1178] ss:$100 sps:$4 sm:$0xff]  }
 0x326   :  { %9143 = vmatprep.subr.bf16.mxu1 %v26116_v15  ;;  %v26179_v15 = vld [vmem:[%s37683_s1 + $0x235c] ss:$100 sps:$4 sm:$0xff]  }
 0x328   :  { %8716 = vmatpush1.bf16.msra.mxu0 %v26117_v27  ;;  %v26182_v27 = vld [vmem:[%s37683_s1 + $0x1244] ss:$100 sps:$4 sm:$0xff]  }
 0x329   :  { %9144 = vmatpush1.bf16.msra.mxu1 %v26114_v22  ;;  %8717 = vmatprep.subr.bf16.mxu0 %v26125_v31  ;;  %v26177_v22 = vld [vmem:[%s37683_s1 + $0x2358] ss:$100 sps:$4 sm:$0xff]   ;;  %v26180_v31 = vld [vmem:[%s37683_s1 + $0x1240] ss:$100 sps:$4 sm:$0xff]  }
 0x32a   :  { %9145 = vmatprep.subr.bf16.mxu1 %v26122_v28  ;;  %v26185_v28 = vld [vmem:[%s37683_s1 + $0x2424] ss:$100 sps:$4 sm:$0xff]  }
 0x32c   :  { %8718 = vmatpush1.bf16.msra.mxu0 %v26123_v33  ;;  %v26188_v33 = vld [vmem:[%s37683_s1 + $0x130c] ss:$100 sps:$4 sm:$0xff]  }
 0x32d   :  { %9146 = vmatpush1.bf16.msra.mxu1 %v26120_v32  ;;  %8719 = vmatprep.subr.bf16.mxu0 %v26131_v35  ;;  %v26183_v32 = vld [vmem:[%s37683_s1 + $0x2420] ss:$100 sps:$4 sm:$0xff]   ;;  %v26186_v35 = vld [vmem:[%s37683_s1 + $0x1308] ss:$100 sps:$4 sm:$0xff]  }
 0x32e   :  { %9147 = vmatprep.subr.bf16.mxu1 %v26128_v34  ;;  %v26191_v34 = vld [vmem:[%s37683_s1 + $0x24ec] ss:$100 sps:$4 sm:$0xff]  }
 0x330   :  { %8720 = vmatpush1.bf16.msra.mxu0 %v26129_v37  ;;  %v26194_v37 = vld [vmem:[%s37683_s1 + $0x13d4] ss:$100 sps:$4 sm:$0xff]  }
 0x331   :  { %9148 = vmatpush1.bf16.msra.mxu1 %v26126_v36  ;;  %8721 = vmatprep.subr.bf16.mxu0 %v26137_v41  ;;  %v26189_v36 = vld [vmem:[%s37683_s1 + $0x24e8] ss:$100 sps:$4 sm:$0xff]   ;;  %v26192_v41 = vld [vmem:[%s37683_s1 + $0x13d0] ss:$100 sps:$4 sm:$0xff]  }
 0x332   :  { %9149 = vmatprep.subr.bf16.mxu1 %v26134_v38  ;;  %v26203_v38 = vld [vmem:[%s37683_s1 + $0x25b4] ss:$100 sps:$4 sm:$0xff]  }
 0x334   :  { %8722 = vmatpush1.bf16.msra.mxu0 %v26135_v43  ;;  %v26197_v43 = vld [vmem:[%s37683_s1 + $0x149c] ss:$100 sps:$4 sm:$0xff]  }
 0x335   :  { %9150 = vmatpush1.bf16.msra.mxu1 %v26132_v42  ;;  %8723 = vmatprep.subr.bf16.mxu0 %v26143_v47  ;;  %v26201_v42 = vld [vmem:[%s37683_s1 + $0x25b0] ss:$100 sps:$4 sm:$0xff]   ;;  %v26195_v47 = vld [vmem:[%s37683_s1 + $0x1498] ss:$100 sps:$4 sm:$0xff]  }
 0x336   :  { %9160 = vmatprep.subr.bf16.mxu1 %v26140_v53  ;;  %v26209_v53 = vld [vmem:[%s37683_s1 + $0x44] ss:$100 sps:$4 sm:$0xff]  }
 0x338   :  { %9152 = vmatmul.mubr.bf16.vlgmr.msra.gmra.mrb[20].mxu1 %v29155_v11  ;;  %8724 = vmatpush1.bf16.msra.mxu0 %v26141_v14  ;;  %v26198_v14 = vld [vmem:[%s37683_s1 + $0x1560] ss:$100 sps:$4 sm:$0xff]  }
 0x339   :  { %9161 = vmatpush1.bf16.msra.mxu1 %v26138_v54  ;;  %8725 = vmatprep.subr.bf16.mxu0 %v26149_v50  ;;  %v26200_v54 = vld [vmem:[%s37683_s1 + $0x1564] ss:$100 sps:$4 sm:$0xff]  }
 0x33a   :  { %9162 = vmatprep.subr.bf16.mxu1 %v26146_v49  ;;  %9192 = vmatprep.mubr.bf16.mxu1 %v29107_v58  ;;  %v26206_v49 = vld [vmem:[%s37683_s1 + $0x162c] ss:$100 sps:$4 sm:$0xff]  }
 0x33b   :  { %v26204_v50 = vld [vmem:[%s37683_s1 + $0x1628] ss:$100 sps:$4 sm:$0xff]  }
 0x33c   :  { %8726 = vmatpush1.bf16.msra.mxu0 %v26147_v55  ;;  %v26212_v55 = vld [vmem:[%s37683_s1 + $0x16f4] ss:$100 sps:$4 sm:$0xff]  }
 0x33d   :  { %9163 = vmatpush1.bf16.msra.mxu1 %v26144_v51  ;;  %8727 = vmatprep.subr.bf16.mxu0 %v26155_v60  ;;  %v26207_v51 = vld [vmem:[%s37683_s1 + $0x40] ss:$100 sps:$4 sm:$0xff]   ;;  %v26210_v60 = vld [vmem:[%s37683_s1 + $0x16f0] ss:$100 sps:$4 sm:$0xff]  }
 0x33e   :  { %9164 = vmatprep.subr.bf16.mxu1 %v26152_v59  ;;  %v26215_v59 = vld [vmem:[%s37683_s1 + $0x10c] ss:$100 sps:$4 sm:$0xff]  }
 0x340   :  { %8728 = vmatpush1.bf16.msra.mxu0 %v26153_v62  ;;  %v26218_v62 = vld [vmem:[%s37683_s1 + $0x17bc] ss:$100 sps:$4 sm:$0xff]  }
 0x341   :  { %9165 = vmatpush1.bf16.msra.mxu1 %v26150_v61  ;;  %8729 = vmatprep.subr.bf16.mxu0 %v26161_v63  ;;  %v26213_v61 = vld [vmem:[%s37683_s1 + $0x108] ss:$100 sps:$4 sm:$0xff]   ;;  %v26216_v63 = vld [vmem:[%s37683_s1 + $0x17b8] ss:$100 sps:$4 sm:$0xff]  }
 0x342   :  { %9166 = vmatprep.subr.bf16.mxu1 %v26158_v19  ;;  %v26221_v19 = vld [vmem:[%s37683_s1 + $0x1d4] ss:$100 sps:$4 sm:$0xff]  }
 0x344   :  { %8730 = vmatpush1.bf16.msra.mxu0 %v26159_v3  ;;  %v26224_v3 = vld [vmem:[%s37683_s1 + $0x1884] ss:$100 sps:$4 sm:$0xff]  }
 0x345   :  { %9167 = vmatpush1.bf16.msra.mxu1 %v26156_v0  ;;  %8731 = vmatprep.subr.bf16.mxu0 %v26167_v6  ;;  %v26219_v0 = vld [vmem:[%s37683_s1 + $0x1d0] ss:$100 sps:$4 sm:$0xff]  }
 0x346   :  { %9168 = vmatprep.subr.bf16.mxu1 %v26164_v5  ;;  %v26227_v5 = vld [vmem:[%s37683_s1 + $0x29c] ss:$100 sps:$4 sm:$0xff]  }
 0x348   :  { %8732 = vmatpush1.bf16.msra.mxu0 %v26165_v25  ;;  %v26222_v25 = vld [vmem:[%s37683_s1 + $0x1880] ss:$100 sps:$4 sm:$0xff]  }
 0x349   :  { %9169 = vmatpush1.bf16.msra.mxu1 %v26162_v7  ;;  %8733 = vmatprep.subr.bf16.mxu0 %v26173_v9 }
 0x34a   :  { %9170 = vmatprep.subr.bf16.mxu1 %v26170_v26  ;;  %v26225_v26 = vld [vmem:[%s37683_s1 + $0x298] ss:$100 sps:$4 sm:$0xff]  }
 0x34c   :  { %8734 = vmatpush1.bf16.msra.mxu0 %v26171_v12  ;;  %v26233_v12 = vld [vmem:[%s37683_s1 + $0x364] ss:$100 sps:$4 sm:$0xff]  }
 0x34d   :  { %9171 = vmatpush1.bf16.msra.mxu1 %v26168_v45  ;;  %8735 = vmatprep.subr.bf16.mxu0 %v26179_v15  ;;  %v26230_v45 = vld [vmem:[%s37683_s1 + $0x194c] ss:$100 sps:$4 sm:$0xff]  }
 0x34e   :  { %9172 = vmatprep.subr.bf16.mxu1 %v26176_v13  ;;  %v26228_v15 = vld [vmem:[%s37683_s1 + $0x1948] ss:$100 sps:$4 sm:$0xff]  }
 0x350   :  { %8736 = vmatpush1.bf16.msra.mxu0 %v26177_v22  ;;  %v26236_v22 = vld [vmem:[%s37683_s1 + $0x1a14] ss:$100 sps:$4 sm:$0xff]  }
 0x351   :  { %9173 = vmatpush1.bf16.msra.mxu1 %v26174_v18  ;;  %8737 = vmatprep.subr.bf16.mxu0 %v26185_v28  ;;  %v26231_v18 = vld [vmem:[%s37683_s1 + $0x360] ss:$100 sps:$4 sm:$0xff]   ;;  %v26234_v28 = vld [vmem:[%s37683_s1 + $0x1a10] ss:$100 sps:$4 sm:$0xff]  }
 0x352   :  { %9174 = vmatprep.subr.bf16.mxu1 %v26182_v27  ;;  %v26239_v27 = vld [vmem:[%s37683_s1 + $0x42c] ss:$100 sps:$4 sm:$0xff]  }
 0x354   :  { %8738 = vmatpush1.bf16.msra.mxu0 %v26183_v32  ;;  %v26242_v32 = vld [vmem:[%s37683_s1 + $0x1adc] ss:$100 sps:$4 sm:$0xff]  }
 0x355   :  { %9175 = vmatpush1.bf16.msra.mxu1 %v26180_v31  ;;  %8739 = vmatprep.subr.bf16.mxu0 %v26191_v34  ;;  %v26237_v31 = vld [vmem:[%s37683_s1 + $0x428] ss:$100 sps:$4 sm:$0xff]   ;;  %v26240_v34 = vld [vmem:[%s37683_s1 + $0x1ad8] ss:$100 sps:$4 sm:$0xff]  }
 0x356   :  { %9176 = vmatprep.subr.bf16.mxu1 %v26188_v33  ;;  %v26245_v33 = vld [vmem:[%s37683_s1 + $0x4f4] ss:$100 sps:$4 sm:$0xff]  }
 0x358   :  { %8740 = vmatpush1.bf16.msra.mxu0 %v26189_v36  ;;  %v26248_v36 = vld [vmem:[%s37683_s1 + $0x1ba4] ss:$100 sps:$4 sm:$0xff]  }
 0x359   :  { %9177 = vmatpush1.bf16.msra.mxu1 %v26186_v35  ;;  %8750 = vmatprep.subr.bf16.mxu0 %v26203_v38  ;;  %v26243_v35 = vld [vmem:[%s37683_s1 + $0x4f0] ss:$100 sps:$4 sm:$0xff]   ;;  %v26246_v38 = vld [vmem:[%s37683_s1 + $0x1ba0] ss:$100 sps:$4 sm:$0xff]  }
 0x35a   :  { %9178 = vmatprep.subr.bf16.mxu1 %v26194_v37  ;;  %v26251_v37 = vld [vmem:[%s37683_s1 + $0x5bc] ss:$100 sps:$4 sm:$0xff]  }
 0x35b   :  { %8742 = vmatmul.mubr.bf16.vlgmr.msra.gmra.mrb[16].mxu0 %v29376_v23 }
 0x35c   :  { %8751 = vmatpush1.bf16.msra.mxu0 %v26201_v42  ;;  %8782 = vmatprep.mubr.bf16.mxu0 %v28886_v1  ;;  %v26254_v42 = vld [vmem:[%s37683_s1 + $0x1c6c] ss:$100 sps:$4 sm:$0xff]  }
 0x35d   :  { %9179 = vmatpush1.bf16.msra.mxu1 %v26192_v41  ;;  %8955 = vmatprep.subr.bf16.mxu0 %v26209_v53  ;;  %v26249_v41 = vld [vmem:[%s37683_s1 + $0x5b8] ss:$100 sps:$4 sm:$0xff]   ;;  %v26252_v53 = vld [vmem:[%s37683_s1 + $0x1c68] ss:$100 sps:$4 sm:$0xff]  }
 0x35e   :  { %9180 = vmatprep.subr.bf16.mxu1 %v26197_v43  ;;  %v26257_v43 = vld [vmem:[%s37683_s1 + $0x684] ss:$100 sps:$4 sm:$0xff]  }
 0x361   :  { %9181 = vmatpush1.bf16.msra.mxu1 %v26195_v47  ;;  %v26255_v47 = vld [vmem:[%s37683_s1 + $0x680] ss:$100 sps:$4 sm:$0xff]  }
 0x362   :  { %9182 = vmatprep.subr.bf16.mxu1 %v26200_v54  ;;  %v26260_v54 = vld [vmem:[%s37683_s1 + $0x1d34] ss:$100 sps:$4 sm:$0xff]  }
 0x365   :  { %9183 = vmatpush1.bf16.msra.mxu1 %v26198_v14  ;;  %v26263_v14 = vld [vmem:[%s37683_s1 + $0x74c] ss:$100 sps:$4 sm:$0xff]  }
 0x366   :  { %9184 = vmatprep.subr.bf16.mxu1 %v26206_v49  ;;  %v26258_v49 = vld [vmem:[%s37683_s1 + $0x1d30] ss:$100 sps:$4 sm:$0xff]  }
 0x367   :  { %22758 = vmatmul.mubr.msk.bf16.vlgmr.msra.gmra.mrb[16].mxu0 %vm7639_vm0, %v31311_v10 }
 0x368   :  { %8956 = vmatpush1.bf16.msra.mxu0 %v26207_v51  ;;  %8987 = vmatprep.mubr.bf16.mxu0 %v29089_v52  ;;  %v26266_v51 = vld [vmem:[%s37683_s1 + $0x1dfc] ss:$100 sps:$4 sm:$0xff]  }
 0x369   :  { %9185 = vmatpush1.bf16.msra.mxu1 %v26204_v50  ;;  %8957 = vmatprep.subr.bf16.mxu0 %v26215_v59  ;;  %v26261_v50 = vld [vmem:[%s37683_s1 + $0x748] ss:$100 sps:$4 sm:$0xff]   ;;  %v26264_v59 = vld [vmem:[%s37683_s1 + $0x1df8] ss:$100 sps:$4 sm:$0xff]  }
 0x36a   :  { %9186 = vmatprep.subr.bf16.mxu1 %v26212_v55  ;;  %v26269_v55 = vld [vmem:[%s37683_s1 + $0x814] ss:$100 sps:$4 sm:$0xff]  }
 0x36c   :  { %8958 = vmatpush1.bf16.msra.mxu0 %v26213_v61  ;;  %v26272_v61 = vld [vmem:[%s37683_s1 + $0x1ec4] ss:$100 sps:$4 sm:$0xff]  }
 0x36d   :  { %9187 = vmatpush1.bf16.msra.mxu1 %v26210_v60  ;;  %8959 = vmatprep.subr.bf16.mxu0 %v26221_v19  ;;  %v26267_v60 = vld [vmem:[%s37683_s1 + $0x810] ss:$100 sps:$4 sm:$0xff]   ;;  %v26270_v19 = vld [vmem:[%s37683_s1 + $0x1ec0] ss:$100 sps:$4 sm:$0xff]  }
 0x36e   :  { %9188 = vmatprep.subr.bf16.mxu1 %v26218_v62  ;;  %v31677_v6 = vpop.f32.mrb[12].mxu0  ;;  %v26275_v62 = vld [vmem:[%s37683_s1 + $0x8dc] ss:$100 sps:$4 sm:$0xff]  }
 0x36f   :  { %v31679_v7 = vpop.f32.mrb[13].mxu0 }
 0x370   :  { %8960 = vmatpush1.bf16.msra.mxu0 %v26219_v0  ;;  %v8460_v9 = vpop.f32.mrb[14].mxu0  ;;  %v26278_v0 = vld [vmem:[%s37683_s1 + $0x1f8c] ss:$100 sps:$4 sm:$0xff]  }
 0x371   :  { %9189 = vmatpush1.bf16.msra.mxu1 %v26216_v63  ;;  %8961 = vmatprep.subr.bf16.mxu0 %v26227_v5  ;;  %v8461_v13 = vpop.f32.mrb[15].mxu0  ;;  %v26273_v63 = vld [vmem:[%s37683_s1 + $0x8d8] ss:$100 sps:$4 sm:$0xff]   ;;  %v26276_v5 = vld [vmem:[%s37683_s1 + $0x1f88] ss:$100 sps:$4 sm:$0xff]  }
 0x372   :  { %9190 = vmatprep.subr.bf16.mxu1 %v26224_v3  ;;  %v26281_v3 = vld [vmem:[%s37683_s1 + $0x9a4] ss:$100 sps:$4 sm:$0xff]   ;;  %v26287_v9 = vld [vmem:[%s37683_s1 + $0xa6c] ss:$100 sps:$4 sm:$0xff]   ;;  %v26290_v13 = vld [vmem:[%s37683_s1 + $0x211c] ss:$100 sps:$4 sm:$0xff]  }
 0x374   :  { %8962 = vmatpush1.bf16.msra.mxu0 %v26225_v26  ;;  %v26284_v26 = vld [vmem:[%s37683_s1 + $0x2054] ss:$100 sps:$4 sm:$0xff]  }
 0x375   :  { %9191 = vmatpush1.bf16.msra.mxu1 %v26222_v25  ;;  %8963 = vmatprep.subr.bf16.mxu0 %v26233_v12  ;;  %v26279_v25 = vld [vmem:[%s37683_s1 + $0x9a0] ss:$100 sps:$4 sm:$0xff]   ;;  %v26285_v12 = vld [vmem:[%s37683_s1 + $0xa68] ss:$100 sps:$4 sm:$0xff]  }
 0x376   :  { %9201 = vmatprep.subr.bf16.mxu1 %v26230_v45  ;;  %v26282_v45 = vld [vmem:[%s37683_s1 + $0x2050] ss:$100 sps:$4 sm:$0xff]  }
 0x378   :  { %9193 = vmatmul.mubr.bf16.vlgmr.msra.gmra.mrb[20].mxu1 %v29170_v16  ;;  %8964 = vmatpush1.bf16.msra.mxu0 %v26231_v18  ;;  %v26288_v18 = vld [vmem:[%s37683_s1 + $0x2118] ss:$100 sps:$4 sm:$0xff]  }
 0x379   :  { %9202 = vmatpush1.bf16.msra.mxu1 %v26228_v15  ;;  %8965 = vmatprep.subr.bf16.mxu0 %v26239_v27  ;;  %v26293_v15 = vld [vmem:[%s37683_s1 + $0xb34] ss:$100 sps:$4 sm:$0xff]   ;;  %v26296_v27 = vld [vmem:[%s37683_s1 + $0x21e4] ss:$100 sps:$4 sm:$0xff]  }
 0x37a   :  { %9203 = vmatprep.subr.bf16.mxu1 %v26236_v22  ;;  %9233 = vmatprep.mubr.bf16.mxu1 %v29247_v40  ;;  %v26291_v22 = vld [vmem:[%s37683_s1 + $0xb30] ss:$100 sps:$4 sm:$0xff]  }
 0x37c   :  { %8966 = vmatpush1.bf16.msra.mxu0 %v26237_v31  ;;  %v26294_v31 = vld [vmem:[%s37683_s1 + $0x21e0] ss:$100 sps:$4 sm:$0xff]  }
 0x37d   :  { %9204 = vmatpush1.bf16.msra.mxu1 %v26234_v28  ;;  %8967 = vmatprep.subr.bf16.mxu0 %v26245_v33  ;;  %v26299_v28 = vld [vmem:[%s37683_s1 + $0xbfc] ss:$100 sps:$4 sm:$0xff]   ;;  %v26302_v33 = vld [vmem:[%s37683_s1 + $0x22ac] ss:$100 sps:$4 sm:$0xff]  }
 0x37e   :  { %9205 = vmatprep.subr.bf16.mxu1 %v26242_v32  ;;  %v26297_v32 = vld [vmem:[%s37683_s1 + $0xbf8] ss:$100 sps:$4 sm:$0xff]  }
 0x380   :  { %8968 = vmatpush1.bf16.msra.mxu0 %v26243_v35  ;;  %v26300_v35 = vld [vmem:[%s37683_s1 + $0x22a8] ss:$100 sps:$4 sm:$0xff]  }
 0x381   :  { %9206 = vmatpush1.bf16.msra.mxu1 %v26240_v34  ;;  %8969 = vmatprep.subr.bf16.mxu0 %v26251_v37  ;;  %v26305_v34 = vld [vmem:[%s37683_s1 + $0xcc4] ss:$100 sps:$4 sm:$0xff]   ;;  %v26308_v37 = vld [vmem:[%s37683_s1 + $0x2374] ss:$100 sps:$4 sm:$0xff]  }
 0x382   :  { %9207 = vmatprep.subr.bf16.mxu1 %v26248_v36  ;;  %v26303_v36 = vld [vmem:[%s37683_s1 + $0xcc0] ss:$100 sps:$4 sm:$0xff]  }
 0x384   :  { %8970 = vmatpush1.bf16.msra.mxu0 %v26249_v41  ;;  %v26306_v41 = vld [vmem:[%s37683_s1 + $0x2370] ss:$100 sps:$4 sm:$0xff]  }
 0x385   :  { %9208 = vmatpush1.bf16.msra.mxu1 %v26246_v38  ;;  %8971 = vmatprep.subr.bf16.mxu0 %v26257_v43  ;;  %v26311_v38 = vld [vmem:[%s37683_s1 + $0xd8c] ss:$100 sps:$4 sm:$0xff]   ;;  %v26314_v43 = vld [vmem:[%s37683_s1 + $0x243c] ss:$100 sps:$4 sm:$0xff]  }
 0x386   :  { %9209 = vmatprep.subr.bf16.mxu1 %v26254_v42  ;;  %v26309_v42 = vld [vmem:[%s37683_s1 + $0xd88] ss:$100 sps:$4 sm:$0xff]  }
 0x388   :  { %8972 = vmatpush1.bf16.msra.mxu0 %v26255_v47  ;;  %v26312_v47 = vld [vmem:[%s37683_s1 + $0x2438] ss:$100 sps:$4 sm:$0xff]  }
 0x389   :  { %9210 = vmatpush1.bf16.msra.mxu1 %v26252_v53  ;;  %8973 = vmatprep.subr.bf16.mxu0 %v26263_v14  ;;  %v26317_v53 = vld [vmem:[%s37683_s1 + $0xe54] ss:$100 sps:$4 sm:$0xff]   ;;  %v26320_v14 = vld [vmem:[%s37683_s1 + $0x2504] ss:$100 sps:$4 sm:$0xff]  }
 0x38a   :  { %9211 = vmatprep.subr.bf16.mxu1 %v26260_v54  ;;  %v26315_v54 = vld [vmem:[%s37683_s1 + $0xe50] ss:$100 sps:$4 sm:$0xff]  }
 0x38c   :  { %8974 = vmatpush1.bf16.msra.mxu0 %v26261_v50  ;;  %v26318_v50 = vld [vmem:[%s37683_s1 + $0x2500] ss:$100 sps:$4 sm:$0xff]  }
 0x38d   :  { %9212 = vmatpush1.bf16.msra.mxu1 %v26258_v49  ;;  %8975 = vmatprep.subr.bf16.mxu0 %v26269_v55  ;;  %v26323_v49 = vld [vmem:[%s37683_s1 + $0xf1c] ss:$100 sps:$4 sm:$0xff]   ;;  %v26326_v55 = vld [vmem:[%s37683_s1 + $0x25cc] ss:$100 sps:$4 sm:$0xff]  }
 0x38e   :  { %9213 = vmatprep.subr.bf16.mxu1 %v26266_v51  ;;  %v26321_v51 = vld [vmem:[%s37683_s1 + $0xf18] ss:$100 sps:$4 sm:$0xff]  }
 0x390   :  { %8976 = vmatpush1.bf16.msra.mxu0 %v26267_v60  ;;  %v26324_v60 = vld [vmem:[%s37683_s1 + $0x25c8] ss:$100 sps:$4 sm:$0xff]  }
 0x391   :  { %9214 = vmatpush1.bf16.msra.mxu1 %v26264_v59  ;;  %8977 = vmatprep.subr.bf16.mxu0 %v26275_v62  ;;  %v26329_v59 = vld [vmem:[%s37683_s1 + $0xfe4] ss:$100 sps:$4 sm:$0xff]   ;;  %v26332_v62 = vld [vmem:[%s37683_s1 + $0x10ac] ss:$100 sps:$4 sm:$0xff]  }
 0x392   :  { %9215 = vmatprep.subr.bf16.mxu1 %v26272_v61  ;;  %v26327_v61 = vld [vmem:[%s37683_s1 + $0xfe0] ss:$100 sps:$4 sm:$0xff]  }
 0x394   :  { %8978 = vmatpush1.bf16.msra.mxu0 %v26273_v63  ;;  %v26330_v63 = vld [vmem:[%s37683_s1 + $0x10a8] ss:$100 sps:$4 sm:$0xff]  }
 0x395   :  { %9216 = vmatpush1.bf16.msra.mxu1 %v26270_v19  ;;  %8979 = vmatprep.subr.bf16.mxu0 %v26281_v3  ;;  %v26338_v19 = vld [vmem:[%s37683_s1 + $0x5c] ss:$100 sps:$4 sm:$0xff]   ;;  %v26333_v3 = vld [vmem:[%s37683_s1 + $0x1170] ss:$100 sps:$4 sm:$0xff]  }
 0x396   :  { %9217 = vmatprep.subr.bf16.mxu1 %v26278_v0  ;;  %v26335_v0 = vld [vmem:[%s37683_s1 + $0x1174] ss:$100 sps:$4 sm:$0xff]  }
 0x398   :  { %8980 = vmatpush1.bf16.msra.mxu0 %v26279_v25  ;;  %v26336_v25 = vld [vmem:[%s37683_s1 + $0x58] ss:$100 sps:$4 sm:$0xff]  }
 0x399   :  { %9218 = vmatpush1.bf16.msra.mxu1 %v26276_v5  ;;  %8981 = vmatprep.subr.bf16.mxu0 %v26287_v9  ;;  %v26341_v5 = vld [vmem:[%s37683_s1 + $0x123c] ss:$100 sps:$4 sm:$0xff]   ;;  %v26344_v9 = vld [vmem:[%s37683_s1 + $0x124] ss:$100 sps:$4 sm:$0xff]  }
 0x39a   :  { %9219 = vmatprep.subr.bf16.mxu1 %v26284_v26  ;;  %v26339_v26 = vld [vmem:[%s37683_s1 + $0x1238] ss:$100 sps:$4 sm:$0xff]  }
 0x39c   :  { %8982 = vmatpush1.bf16.msra.mxu0 %v26285_v12  ;;  %v26342_v12 = vld [vmem:[%s37683_s1 + $0x120] ss:$100 sps:$4 sm:$0xff]  }
 0x39d   :  { %9220 = vmatpush1.bf16.msra.mxu1 %v26282_v45  ;;  %8983 = vmatprep.subr.bf16.mxu0 %v26293_v15  ;;  %v26347_v45 = vld [vmem:[%s37683_s1 + $0x1304] ss:$100 sps:$4 sm:$0xff]   ;;  %v26350_v15 = vld [vmem:[%s37683_s1 + $0x1ec] ss:$100 sps:$4 sm:$0xff]  }
 0x39e   :  { %9221 = vmatprep.subr.bf16.mxu1 %v26290_v13  ;;  %v26345_v13 = vld [vmem:[%s37683_s1 + $0x1300] ss:$100 sps:$4 sm:$0xff]  }
 0x3a0   :  { %8984 = vmatpush1.bf16.msra.mxu0 %v26291_v22  ;;  %v26351_v22 = vld [vmem:[%s37683_s1 + $0x13c8] ss:$100 sps:$4 sm:$0xff]  }
 0x3a1   :  { %9222 = vmatpush1.bf16.msra.mxu1 %v26288_v18  ;;  %8985 = vmatprep.subr.bf16.mxu0 %v26299_v28  ;;  %v26348_v18 = vld [vmem:[%s37683_s1 + $0x1e8] ss:$100 sps:$4 sm:$0xff]   ;;  %v26359_v28 = vld [vmem:[%s37683_s1 + $0x1494] ss:$100 sps:$4 sm:$0xff]  }
 0x3a2   :  { %9223 = vmatprep.subr.bf16.mxu1 %v26296_v27  ;;  %v26356_v27 = vld [vmem:[%s37683_s1 + $0x2b4] ss:$100 sps:$4 sm:$0xff]  }
 0x3a4   :  { %8986 = vmatpush1.bf16.msra.mxu0 %v26297_v32 }
 0x3a5   :  { %9224 = vmatpush1.bf16.msra.mxu1 %v26294_v31  ;;  %8996 = vmatprep.subr.bf16.mxu0 %v26305_v34  ;;  %v26354_v34 = vld [vmem:[%s37683_s1 + $0x2b0] ss:$100 sps:$4 sm:$0xff]  }
 0x3a6   :  { %9225 = vmatprep.subr.bf16.mxu1 %v26302_v33 }
 0x3a7   :  { %8988 = vmatmul.mubr.bf16.vlgmr.msra.gmra.mrb[20].mxu0 %v29155_v11 }
 0x3a8   :  { %8997 = vmatpush1.bf16.msra.mxu0 %v26303_v36  ;;  %9028 = vmatprep.mubr.bf16.mxu0 %v29107_v58 }
 0x3a9   :  { %9226 = vmatpush1.bf16.msra.mxu1 %v26300_v35  ;;  %8998 = vmatprep.subr.bf16.mxu0 %v26311_v38  ;;  %v26357_v35 = vld [vmem:[%s37683_s1 + $0x1490] ss:$100 sps:$4 sm:$0xff]   ;;  %v26365_v38 = vld [vmem:[%s37683_s1 + $0x155c] ss:$100 sps:$4 sm:$0xff]  }
 0x3aa   :  { %9227 = vmatprep.subr.bf16.mxu1 %v26308_v37  ;;  %v26362_v37 = vld [vmem:[%s37683_s1 + $0x37c] ss:$100 sps:$4 sm:$0xff]  }
 0x3ac   :  { %8999 = vmatpush1.bf16.msra.mxu0 %v26309_v42  ;;  %v26363_v42 = vld [vmem:[%s37683_s1 + $0x1558] ss:$100 sps:$4 sm:$0xff]  }
 0x3ad   :  { %9228 = vmatpush1.bf16.msra.mxu1 %v26306_v41  ;;  %9000 = vmatprep.subr.bf16.mxu0 %v26317_v53  ;;  %v26360_v41 = vld [vmem:[%s37683_s1 + $0x378] ss:$100 sps:$4 sm:$0xff]   ;;  %v26371_v53 = vld [vmem:[%s37683_s1 + $0x1624] ss:$100 sps:$4 sm:$0xff]  }
 0x3ae   :  { %9229 = vmatprep.subr.bf16.mxu1 %v26314_v43  ;;  %v26368_v43 = vld [vmem:[%s37683_s1 + $0x444] ss:$100 sps:$4 sm:$0xff]  }
 0x3b0   :  { %9001 = vmatpush1.bf16.msra.mxu0 %v26315_v54  ;;  %v26369_v54 = vld [vmem:[%s37683_s1 + $0x1620] ss:$100 sps:$4 sm:$0xff]  }
 0x3b1   :  { %9230 = vmatpush1.bf16.msra.mxu1 %v26312_v47  ;;  %9002 = vmatprep.subr.bf16.mxu0 %v26323_v49  ;;  %v26366_v47 = vld [vmem:[%s37683_s1 + $0x440] ss:$100 sps:$4 sm:$0xff]   ;;  %v26377_v49 = vld [vmem:[%s37683_s1 + $0x16ec] ss:$100 sps:$4 sm:$0xff]  }
 0x3b2   :  { %9231 = vmatprep.subr.bf16.mxu1 %v26320_v14  ;;  %v26374_v14 = vld [vmem:[%s37683_s1 + $0x50c] ss:$100 sps:$4 sm:$0xff]  }
 0x3b4   :  { %9003 = vmatpush1.bf16.msra.mxu0 %v26321_v51  ;;  %v26375_v51 = vld [vmem:[%s37683_s1 + $0x16e8] ss:$100 sps:$4 sm:$0xff]  }
 0x3b5   :  { %9232 = vmatpush1.bf16.msra.mxu1 %v26318_v50  ;;  %9004 = vmatprep.subr.bf16.mxu0 %v26329_v59  ;;  %v26372_v50 = vld [vmem:[%s37683_s1 + $0x508] ss:$100 sps:$4 sm:$0xff]   ;;  %v26383_v59 = vld [vmem:[%s37683_s1 + $0x17b4] ss:$100 sps:$4 sm:$0xff]  }
 0x3b6   :  { %9242 = vmatprep.subr.bf16.mxu1 %v26326_v55  ;;  %v26380_v55 = vld [vmem:[%s37683_s1 + $0x5d4] ss:$100 sps:$4 sm:$0xff]  }
 0x3b8   :  { %9234 = vmatmul.mubr.bf16.vlgmr.msra.gmra.mrb[20].mxu1 %v29376_v23  ;;  %9005 = vmatpush1.bf16.msra.mxu0 %v26327_v61  ;;  %v26381_v61 = vld [vmem:[%s37683_s1 + $0x17b0] ss:$100 sps:$4 sm:$0xff]  }
 0x3b9   :  { %9243 = vmatpush1.bf16.msra.mxu1 %v26324_v60  ;;  %9006 = vmatprep.subr.bf16.mxu0 %v26332_v62  ;;  %v26378_v60 = vld [vmem:[%s37683_s1 + $0x5d0] ss:$100 sps:$4 sm:$0xff]   ;;  %v26386_v62 = vld [vmem:[%s37683_s1 + $0x69c] ss:$100 sps:$4 sm:$0xff]  }
 0x3ba   :  { %9274 = vmatprep.mubr.bf16.mxu1 %v28886_v1  ;;  %9447 = vmatprep.subr.bf16.mxu1 %v26338_v19  ;;  %v26389_v19 = vld [vmem:[%s37683_s1 + $0x187c] ss:$100 sps:$4 sm:$0xff]  }
 0x3bc   :  { %9007 = vmatpush1.bf16.msra.mxu0 %v26330_v63  ;;  %v26384_v63 = vld [vmem:[%s37683_s1 + $0x698] ss:$100 sps:$4 sm:$0xff]  }
 0x3bd   :  { %9008 = vmatprep.subr.bf16.mxu0 %v26335_v0  ;;  %v26387_v0 = vld [vmem:[%s37683_s1 + $0x1878] ss:$100 sps:$4 sm:$0xff]  }
 0x3c0   :  { %9009 = vmatpush1.bf16.msra.mxu0 %v26333_v3  ;;  %v26392_v3 = vld [vmem:[%s37683_s1 + $0x764] ss:$100 sps:$4 sm:$0xff]  }
 0x3c1   :  { %9010 = vmatprep.subr.bf16.mxu0 %v26341_v5  ;;  %v26395_v5 = vld [vmem:[%s37683_s1 + $0x1944] ss:$100 sps:$4 sm:$0xff]  }
 0x3c4   :  { %22761 = vmatmul.mubr.msk.bf16.vlgmr.msra.gmra.mrb[20].mxu1 %vm7639_vm0, %v31311_v10  ;;  %9011 = vmatpush1.bf16.msra.mxu0 %v26339_v26  ;;  %v26353_v10 = vld [vmem:[%s37683_s1 + $0x13cc] ss:$100 sps:$4 sm:$0xff]   ;;  %v26393_v26 = vld [vmem:[%s37683_s1 + $0x1940] ss:$100 sps:$4 sm:$0xff]  }
 0x3c5   :  { %9448 = vmatpush1.bf16.msra.mxu1 %v26336_v25  ;;  %9012 = vmatprep.subr.bf16.mxu0 %v26347_v45  ;;  %v26390_v25 = vld [vmem:[%s37683_s1 + $0x760] ss:$100 sps:$4 sm:$0xff]   ;;  %v26401_v45 = vld [vmem:[%s37683_s1 + $0x1a0c] ss:$100 sps:$4 sm:$0xff]  }
 0x3c6   :  { %9449 = vmatprep.subr.bf16.mxu1 %v26344_v9  ;;  %9479 = vmatprep.mubr.bf16.mxu1 %v29089_v52  ;;  %v26398_v9 = vld [vmem:[%s37683_s1 + $0x82c] ss:$100 sps:$4 sm:$0xff]  }
 0x3c8   :  { %9013 = vmatpush1.bf16.msra.mxu0 %v26345_v13  ;;  %v26399_v13 = vld [vmem:[%s37683_s1 + $0x1a08] ss:$100 sps:$4 sm:$0xff]  }
 0x3c9   :  { %9450 = vmatpush1.bf16.msra.mxu1 %v26342_v12  ;;  %9014 = vmatprep.subr.bf16.mxu0 %v26353_v10  ;;  %v26396_v12 = vld [vmem:[%s37683_s1 + $0x828] ss:$100 sps:$4 sm:$0xff]   ;;  %v26407_v10 = vld [vmem:[%s37683_s1 + $0x1ad4] ss:$100 sps:$4 sm:$0xff]  }
 0x3ca   :  { %9451 = vmatprep.subr.bf16.mxu1 %v26350_v15  ;;  %v26404_v15 = vld [vmem:[%s37683_s1 + $0x8f4] ss:$100 sps:$4 sm:$0xff]  }
 0x3cb   :  { %v31954_v31 = vpop.f32.mrb[16].mxu1 }
 0x3cc   :  { %v31956_v32 = vpop.f32.mrb[17].mxu1  ;;  %9015 = vmatpush1.bf16.msra.mxu0 %v26351_v22  ;;  %v26405_v22 = vld [vmem:[%s37683_s1 + $0x1ad0] ss:$100 sps:$4 sm:$0xff]  }
 0x3cd   :  { %9452 = vmatpush1.bf16.msra.mxu1 %v26348_v18  ;;  %v8952_v33 = vpop.f32.mrb[18].mxu1  ;;  %9016 = vmatprep.subr.bf16.mxu0 %v26359_v28  ;;  %v26402_v18 = vld [vmem:[%s37683_s1 + $0x8f0] ss:$100 sps:$4 sm:$0xff]   ;;  %v26413_v28 = vld [vmem:[%s37683_s1 + $0x1b9c] ss:$100 sps:$4 sm:$0xff]  }
 0x3ce   :  { %v8953_v36 = vpop.f32.mrb[19].mxu1  ;;  %9453 = vmatprep.subr.bf16.mxu1 %v26356_v27  ;;  %v26410_v27 = vld [vmem:[%s37683_s1 + $0x9bc] ss:$100 sps:$4 sm:$0xff]  }
 0x3cf   :  { %v26408_v33 = vld [vmem:[%s37683_s1 + $0x9b8] ss:$100 sps:$4 sm:$0xff]   ;;  %v26419_v36 = vld [vmem:[%s37683_s1 + $0x1c64] ss:$100 sps:$4 sm:$0xff]  }
 0x3d0   :  { %9017 = vmatpush1.bf16.msra.mxu0 %v26357_v35  ;;  %v26416_v35 = vld [vmem:[%s37683_s1 + $0xa84] ss:$100 sps:$4 sm:$0xff]  }
 0x3d1   :  { %9454 = vmatpush1.bf16.msra.mxu1 %v26354_v34  ;;  %9018 = vmatprep.subr.bf16.mxu0 %v26365_v38  ;;  %v26411_v34 = vld [vmem:[%s37683_s1 + $0x1b98] ss:$100 sps:$4 sm:$0xff]   ;;  %v26417_v38 = vld [vmem:[%s37683_s1 + $0x1c60] ss:$100 sps:$4 sm:$0xff]  }
 0x3d2   :  { %9455 = vmatprep.subr.bf16.mxu1 %v26362_v37  ;;  %v26414_v37 = vld [vmem:[%s37683_s1 + $0xa80] ss:$100 sps:$4 sm:$0xff]  }
 0x3d4   :  { %9019 = vmatpush1.bf16.msra.mxu0 %v26363_v42  ;;  %v26425_v42 = vld [vmem:[%s37683_s1 + $0x1d2c] ss:$100 sps:$4 sm:$0xff]  }
 0x3d5   :  { %9456 = vmatpush1.bf16.msra.mxu1 %v26360_v41  ;;  %9020 = vmatprep.subr.bf16.mxu0 %v26371_v53  ;;  %v26422_v41 = vld [vmem:[%s37683_s1 + $0xb4c] ss:$100 sps:$4 sm:$0xff]  }
 0x3d6   :  { %9457 = vmatprep.subr.bf16.mxu1 %v26368_v43  ;;  %v26420_v43 = vld [vmem:[%s37683_s1 + $0xb48] ss:$100 sps:$4 sm:$0xff]  }
 0x3d7   :  { %v26423_v53 = vld [vmem:[%s37683_s1 + $0x1d28] ss:$100 sps:$4 sm:$0xff]  }
 0x3d8   :  { %9021 = vmatpush1.bf16.msra.mxu0 %v26369_v54  ;;  %v26431_v54 = vld [vmem:[%s37683_s1 + $0x1df4] ss:$100 sps:$4 sm:$0xff]  }
 0x3d9   :  { %9458 = vmatpush1.bf16.msra.mxu1 %v26366_v47  ;;  %9022 = vmatprep.subr.bf16.mxu0 %v26377_v49  ;;  %v26428_v47 = vld [vmem:[%s37683_s1 + $0xc14] ss:$100 sps:$4 sm:$0xff]  }
 0x3da   :  { %9459 = vmatprep.subr.bf16.mxu1 %v26374_v14  ;;  %v26426_v14 = vld [vmem:[%s37683_s1 + $0xc10] ss:$100 sps:$4 sm:$0xff]  }
 0x3db   :  { %v26429_v49 = vld [vmem:[%s37683_s1 + $0x1df0] ss:$100 sps:$4 sm:$0xff]  }
 0x3dc   :  { %9023 = vmatpush1.bf16.msra.mxu0 %v26375_v51  ;;  %v26437_v51 = vld [vmem:[%s37683_s1 + $0x1ebc] ss:$100 sps:$4 sm:$0xff]  }
 0x3dd   :  { %9460 = vmatpush1.bf16.msra.mxu1 %v26372_v50  ;;  %9024 = vmatprep.subr.bf16.mxu0 %v26383_v59  ;;  %v26434_v50 = vld [vmem:[%s37683_s1 + $0xcdc] ss:$100 sps:$4 sm:$0xff]  }
 0x3de   :  { %9461 = vmatprep.subr.bf16.mxu1 %v26380_v55  ;;  %v26432_v55 = vld [vmem:[%s37683_s1 + $0xcd8] ss:$100 sps:$4 sm:$0xff]  }
 0x3df   :  { %v26435_v59 = vld [vmem:[%s37683_s1 + $0x1eb8] ss:$100 sps:$4 sm:$0xff]  }
 0x3e0   :  { %9025 = vmatpush1.bf16.msra.mxu0 %v26381_v61  ;;  %v26443_v61 = vld [vmem:[%s37683_s1 + $0x1f84] ss:$100 sps:$4 sm:$0xff]  }
 0x3e1   :  { %9462 = vmatpush1.bf16.msra.mxu1 %v26378_v60  ;;  %9026 = vmatprep.subr.bf16.mxu0 %v26389_v19  ;;  %v26440_v60 = vld [vmem:[%s37683_s1 + $0xda4] ss:$100 sps:$4 sm:$0xff]  }
 0x3e2   :  { %9463 = vmatprep.subr.bf16.mxu1 %v26386_v62  ;;  %v26438_v62 = vld [vmem:[%s37683_s1 + $0xda0] ss:$100 sps:$4 sm:$0xff]  }
 0x3e3   :  { %v26441_v19 = vld [vmem:[%s37683_s1 + $0x1f80] ss:$100 sps:$4 sm:$0xff]  }
 0x3e4   :  { %9027 = vmatpush1.bf16.msra.mxu0 %v26387_v0  ;;  %v26449_v0 = vld [vmem:[%s37683_s1 + $0x204c] ss:$100 sps:$4 sm:$0xff]  }
 0x3e5   :  { %9464 = vmatpush1.bf16.msra.mxu1 %v26384_v63  ;;  %9037 = vmatprep.subr.bf16.mxu0 %v26395_v5  ;;  %v26446_v63 = vld [vmem:[%s37683_s1 + $0xe6c] ss:$100 sps:$4 sm:$0xff]  }
 0x3e6   :  { %9465 = vmatprep.subr.bf16.mxu1 %v26392_v3  ;;  %v26444_v3 = vld [vmem:[%s37683_s1 + $0xe68] ss:$100 sps:$4 sm:$0xff]  }
 0x3e7   :  { %9029 = vmatmul.mubr.bf16.vlgmr.msra.gmra.mrb[20].mxu0 %v29170_v16  ;;  %v26447_v5 = vld [vmem:[%s37683_s1 + $0x2048] ss:$100 sps:$4 sm:$0xff]  }
 0x3e8   :  { %9038 = vmatpush1.bf16.msra.mxu0 %v26393_v26  ;;  %9069 = vmatprep.mubr.bf16.mxu0 %v29247_v40  ;;  %v26455_v26 = vld [vmem:[%s37683_s1 + $0x2114] ss:$100 sps:$4 sm:$0xff]  }
 0x3e9   :  { %9466 = vmatpush1.bf16.msra.mxu1 %v26390_v25  ;;  %9039 = vmatprep.subr.bf16.mxu0 %v26401_v45  ;;  %v26452_v25 = vld [vmem:[%s37683_s1 + $0xf34] ss:$100 sps:$4 sm:$0xff]  }
 0x3ea   :  { %9467 = vmatprep.subr.bf16.mxu1 %v26398_v9  ;;  %v26450_v9 = vld [vmem:[%s37683_s1 + $0xf30] ss:$100 sps:$4 sm:$0xff]  }
 0x3eb   :  { %v26453_v45 = vld [vmem:[%s37683_s1 + $0x2110] ss:$100 sps:$4 sm:$0xff]  }
 0x3ec   :  { %9040 = vmatpush1.bf16.msra.mxu0 %v26399_v13  ;;  %v26461_v13 = vld [vmem:[%s37683_s1 + $0x21dc] ss:$100 sps:$4 sm:$0xff]  }
 0x3ed   :  { %9468 = vmatpush1.bf16.msra.mxu1 %v26396_v12  ;;  %9041 = vmatprep.subr.bf16.mxu0 %v26407_v10  ;;  %v26458_v12 = vld [vmem:[%s37683_s1 + $0xffc] ss:$100 sps:$4 sm:$0xff]  }
 0x3ee   :  { %9469 = vmatprep.subr.bf16.mxu1 %v26404_v15  ;;  %v26456_v15 = vld [vmem:[%s37683_s1 + $0xff8] ss:$100 sps:$4 sm:$0xff]  }
 0x3ef   :  { %v26459_v10 = vld [vmem:[%s37683_s1 + $0x21d8] ss:$100 sps:$4 sm:$0xff]  }
 0x3f0   :  { %9042 = vmatpush1.bf16.msra.mxu0 %v26405_v22  ;;  %v26467_v22 = vld [vmem:[%s37683_s1 + $0x22a4] ss:$100 sps:$4 sm:$0xff]  }
 0x3f1   :  { %9470 = vmatpush1.bf16.msra.mxu1 %v26402_v18  ;;  %9043 = vmatprep.subr.bf16.mxu0 %v26413_v28  ;;  %v26464_v18 = vld [vmem:[%s37683_s1 + $0x10c4] ss:$100 sps:$4 sm:$0xff]  }
 0x3f2   :  { %9471 = vmatprep.subr.bf16.mxu1 %v26410_v27  ;;  %v26462_v27 = vld [vmem:[%s37683_s1 + $0x10c0] ss:$100 sps:$4 sm:$0xff]  }
 0x3f3   :  { %v26465_v28 = vld [vmem:[%s37683_s1 + $0x22a0] ss:$100 sps:$4 sm:$0xff]  }
 0x3f4   :  { %9044 = vmatpush1.bf16.msra.mxu0 %v26411_v34  ;;  %v26473_v34 = vld [vmem:[%s37683_s1 + $0x236c] ss:$100 sps:$4 sm:$0xff]  }
 0x3f5   :  { %9472 = vmatpush1.bf16.msra.mxu1 %v26408_v33  ;;  %9045 = vmatprep.subr.bf16.mxu0 %v26419_v36  ;;  %v26470_v33 = vld [vmem:[%s37683_s1 + $0x118c] ss:$100 sps:$4 sm:$0xff]  }
 0x3f6   :  { %9473 = vmatprep.subr.bf16.mxu1 %v26416_v35  ;;  %v26468_v35 = vld [vmem:[%s37683_s1 + $0x1188] ss:$100 sps:$4 sm:$0xff]  }
 0x3f7   :  { %v26471_v36 = vld [vmem:[%s37683_s1 + $0x2368] ss:$100 sps:$4 sm:$0xff]  }
 0x3f8   :  { %9046 = vmatpush1.bf16.msra.mxu0 %v26417_v38  ;;  %v26479_v38 = vld [vmem:[%s37683_s1 + $0x2434] ss:$100 sps:$4 sm:$0xff]  }
 0x3f9   :  { %9474 = vmatpush1.bf16.msra.mxu1 %v26414_v37  ;;  %9047 = vmatprep.subr.bf16.mxu0 %v26425_v42  ;;  %v26476_v37 = vld [vmem:[%s37683_s1 + $0x1254] ss:$100 sps:$4 sm:$0xff]  }
 0x3fa   :  { %9475 = vmatprep.subr.bf16.mxu1 %v26422_v41  ;;  %v26474_v41 = vld [vmem:[%s37683_s1 + $0x1250] ss:$100 sps:$4 sm:$0xff]  }
 0x3fb   :  { %v26477_v42 = vld [vmem:[%s37683_s1 + $0x2430] ss:$100 sps:$4 sm:$0xff]  }
 0x3fc   :  { %9048 = vmatpush1.bf16.msra.mxu0 %v26423_v53  ;;  %v26485_v53 = vld [vmem:[%s37683_s1 + $0x24fc] ss:$100 sps:$4 sm:$0xff]  }
 0x3fd   :  { %9476 = vmatpush1.bf16.msra.mxu1 %v26420_v43  ;;  %9049 = vmatprep.subr.bf16.mxu0 %v26431_v54  ;;  %v26482_v43 = vld [vmem:[%s37683_s1 + $0x131c] ss:$100 sps:$4 sm:$0xff]  }
 0x3fe   :  { %9477 = vmatprep.subr.bf16.mxu1 %v26428_v47  ;;  %v26480_v47 = vld [vmem:[%s37683_s1 + $0x1318] ss:$100 sps:$4 sm:$0xff]  }
 0x3ff   :  { %v26483_v54 = vld [vmem:[%s37683_s1 + $0x24f8] ss:$100 sps:$4 sm:$0xff]  }
 0x400   :  { %9050 = vmatpush1.bf16.msra.mxu0 %v26429_v49  ;;  %v26497_v49 = vld [vmem:[%s37683_s1 + $0x25c4] ss:$100 sps:$4 sm:$0xff]  }
 0x401   :  { %9478 = vmatpush1.bf16.msra.mxu1 %v26426_v14  ;;  %9051 = vmatprep.subr.bf16.mxu0 %v26437_v51  ;;  %v26488_v14 = vld [vmem:[%s37683_s1 + $0x13e4] ss:$100 sps:$4 sm:$0xff]  }
 0x402   :  { %9488 = vmatprep.subr.bf16.mxu1 %v26434_v50  ;;  %v26486_v50 = vld [vmem:[%s37683_s1 + $0x13e0] ss:$100 sps:$4 sm:$0xff]  }
 0x403   :  { %v26495_v51 = vld [vmem:[%s37683_s1 + $0x25c0] ss:$100 sps:$4 sm:$0xff]  }
 0x404   :  { %9480 = vmatmul.mubr.bf16.vlgmr.msra.gmra.mrb[24].mxu1 %v29155_v11  ;;  %9052 = vmatpush1.bf16.msra.mxu0 %v26435_v59  ;;  %v26503_v59 = vld [vmem:[%s37683_s1 + $0x54] ss:$100 sps:$4 sm:$0xff]  }
 0x405   :  { %9489 = vmatpush1.bf16.msra.mxu1 %v26432_v55  ;;  %9053 = vmatprep.subr.bf16.mxu0 %v26443_v61  ;;  %v26491_v55 = vld [vmem:[%s37683_s1 + $0x14ac] ss:$100 sps:$4 sm:$0xff]   ;;  %v26494_v61 = vld [vmem:[%s37683_s1 + $0x1574] ss:$100 sps:$4 sm:$0xff]  }
 0x406   :  { %9490 = vmatprep.subr.bf16.mxu1 %v26440_v60  ;;  %9520 = vmatprep.mubr.bf16.mxu1 %v29107_v58  ;;  %v26489_v60 = vld [vmem:[%s37683_s1 + $0x14a8] ss:$100 sps:$4 sm:$0xff]  }
 0x408   :  { %9054 = vmatpush1.bf16.msra.mxu0 %v26441_v19  ;;  %v26500_v19 = vld [vmem:[%s37683_s1 + $0x163c] ss:$100 sps:$4 sm:$0xff]  }
 0x409   :  { %9491 = vmatpush1.bf16.msra.mxu1 %v26438_v62  ;;  %9055 = vmatprep.subr.bf16.mxu0 %v26449_v0  ;;  %v26492_v62 = vld [vmem:[%s37683_s1 + $0x1570] ss:$100 sps:$4 sm:$0xff]  }
 0x40a   :  { %9492 = vmatprep.subr.bf16.mxu1 %v26446_v63  ;;  %v26498_v63 = vld [vmem:[%s37683_s1 + $0x1638] ss:$100 sps:$4 sm:$0xff]   ;;  %v26501_v0 = vld [vmem:[%s37683_s1 + $0x50] ss:$100 sps:$4 sm:$0xff]  }
 0x40c   :  { %9056 = vmatpush1.bf16.msra.mxu0 %v26447_v5  ;;  %v26509_v5 = vld [vmem:[%s37683_s1 + $0x11c] ss:$100 sps:$4 sm:$0xff]  }
 0x40d   :  { %9493 = vmatpush1.bf16.msra.mxu1 %v26444_v3  ;;  %9057 = vmatprep.subr.bf16.mxu0 %v26455_v26  ;;  %v26506_v3 = vld [vmem:[%s37683_s1 + $0x1704] ss:$100 sps:$4 sm:$0xff]  }
 0x40e   :  { %9494 = vmatprep.subr.bf16.mxu1 %v26452_v25  ;;  %v32267_v25 = vld [vmem:[%s37684_s0 + $0x18] ss:$0 sps:$4 sm:$0xff]   ;;  %v26504_v26 = vld [vmem:[%s37683_s1 + $0x1700] ss:$100 sps:$4 sm:$0xff]  }
 0x410   :  { %9058 = vmatpush1.bf16.msra.mxu0 %v26453_v45  ;;  %v26512_v45 = vld [vmem:[%s37683_s1 + $0x17cc] ss:$100 sps:$4 sm:$0xff]  }
 0x411   :  { %9495 = vmatpush1.bf16.msra.mxu1 %v26450_v9  ;;  %9059 = vmatprep.subr.bf16.mxu0 %v26461_v13  ;;  %v26507_v9 = vld [vmem:[%s37683_s1 + $0x118] ss:$100 sps:$4 sm:$0xff]   ;;  %v26510_v13 = vld [vmem:[%s37683_s1 + $0x17c8] ss:$100 sps:$4 sm:$0xff]  }
 0x412   :  { %9496 = vmatprep.subr.bf16.mxu1 %v26458_v12  ;;  %v26515_v12 = vld [vmem:[%s37683_s1 + $0x1e4] ss:$100 sps:$4 sm:$0xff]  }
 0x414   :  { %9060 = vmatpush1.bf16.msra.mxu0 %v26459_v10  ;;  %v26518_v10 = vld [vmem:[%s37683_s1 + $0x1894] ss:$100 sps:$4 sm:$0xff]  }
 0x415   :  { %9497 = vmatpush1.bf16.msra.mxu1 %v26456_v15  ;;  %9061 = vmatprep.subr.bf16.mxu0 %v26467_v22  ;;  %v26513_v15 = vld [vmem:[%s37683_s1 + $0x1e0] ss:$100 sps:$4 sm:$0xff]  }
 0x416   :  { %9498 = vmatprep.subr.bf16.mxu1 %v26464_v18  ;;  %v26521_v18 = vld [vmem:[%s37683_s1 + $0x2ac] ss:$100 sps:$4 sm:$0xff]  }
 0x418   :  { %9062 = vmatpush1.bf16.msra.mxu0 %v26465_v28  ;;  %v26516_v28 = vld [vmem:[%s37683_s1 + $0x1890] ss:$100 sps:$4 sm:$0xff]  }
 0x419   :  { %9499 = vmatpush1.bf16.msra.mxu1 %v26462_v27  ;;  %9063 = vmatprep.subr.bf16.mxu0 %v26473_v34 }
 0x41a   :  { %9500 = vmatprep.subr.bf16.mxu1 %v26470_v33  ;;  %v26519_v33 = vld [vmem:[%s37683_s1 + $0x2a8] ss:$100 sps:$4 sm:$0xff]  }
 0x41c   :  { %9064 = vmatpush1.bf16.msra.mxu0 %v26471_v36  ;;  %v26527_v36 = vld [vmem:[%s37683_s1 + $0x374] ss:$100 sps:$4 sm:$0xff]  }
 0x41d   :  { %9501 = vmatpush1.bf16.msra.mxu1 %v26468_v35  ;;  %9065 = vmatprep.subr.bf16.mxu0 %v26479_v38  ;;  %v26524_v35 = vld [vmem:[%s37683_s1 + $0x195c] ss:$100 sps:$4 sm:$0xff]  }
 0x41e   :  { %9502 = vmatprep.subr.bf16.mxu1 %v26476_v37  ;;  %v26522_v38 = vld [vmem:[%s37683_s1 + $0x1958] ss:$100 sps:$4 sm:$0xff]  }
 0x420   :  { %9066 = vmatpush1.bf16.msra.mxu0 %v26477_v42  ;;  %v26530_v42 = vld [vmem:[%s37683_s1 + $0x1a24] ss:$100 sps:$4 sm:$0xff]  }
 0x421   :  { %9503 = vmatpush1.bf16.msra.mxu1 %v26474_v41  ;;  %9067 = vmatprep.subr.bf16.mxu0 %v26485_v53  ;;  %v26525_v41 = vld [vmem:[%s37683_s1 + $0x370] ss:$100 sps:$4 sm:$0xff]   ;;  %v26528_v53 = vld [vmem:[%s37683_s1 + $0x1a20] ss:$100 sps:$4 sm:$0xff]  }
 0x422   :  { %9504 = vmatprep.subr.bf16.mxu1 %v26482_v43  ;;  %v26533_v43 = vld [vmem:[%s37683_s1 + $0x43c] ss:$100 sps:$4 sm:$0xff]  }
 0x424   :  { %9068 = vmatpush1.bf16.msra.mxu0 %v26483_v54  ;;  %v26536_v54 = vld [vmem:[%s37683_s1 + $0x1aec] ss:$100 sps:$4 sm:$0xff]  }
 0x425   :  { %9505 = vmatpush1.bf16.msra.mxu1 %v26480_v47  ;;  %9078 = vmatprep.subr.bf16.mxu0 %v26497_v49  ;;  %v26531_v47 = vld [vmem:[%s37683_s1 + $0x438] ss:$100 sps:$4 sm:$0xff]   ;;  %v26534_v49 = vld [vmem:[%s37683_s1 + $0x1ae8] ss:$100 sps:$4 sm:$0xff]  }
 0x426   :  { %9506 = vmatprep.subr.bf16.mxu1 %v26488_v14  ;;  %v26539_v14 = vld [vmem:[%s37683_s1 + $0x504] ss:$100 sps:$4 sm:$0xff]  }
 0x427   :  { %9070 = vmatmul.mubr.bf16.vlgmr.msra.gmra.mrb[20].mxu0 %v29376_v23 }
 0x428   :  { %9079 = vmatpush1.bf16.msra.mxu0 %v26495_v51  ;;  %9110 = vmatprep.mubr.bf16.mxu0 %v28886_v1  ;;  %v26542_v51 = vld [vmem:[%s37683_s1 + $0x1bb4] ss:$100 sps:$4 sm:$0xff]  }
 0x429   :  { %9507 = vmatpush1.bf16.msra.mxu1 %v26486_v50  ;;  %9283 = vmatprep.subr.bf16.mxu0 %v26503_v59  ;;  %v26537_v50 = vld [vmem:[%s37683_s1 + $0x500] ss:$100 sps:$4 sm:$0xff]   ;;  %v26540_v59 = vld [vmem:[%s37683_s1 + $0x1bb0] ss:$100 sps:$4 sm:$0xff]  }
 0x42a   :  { %9508 = vmatprep.subr.bf16.mxu1 %v26491_v55  ;;  %v26545_v55 = vld [vmem:[%s37683_s1 + $0x5cc] ss:$100 sps:$4 sm:$0xff]  }
 0x42d   :  { %9509 = vmatpush1.bf16.msra.mxu1 %v26489_v60  ;;  %v26543_v60 = vld [vmem:[%s37683_s1 + $0x5c8] ss:$100 sps:$4 sm:$0xff]  }
 0x42e   :  { %9510 = vmatprep.subr.bf16.mxu1 %v26494_v61  ;;  %v26548_v61 = vld [vmem:[%s37683_s1 + $0x1c7c] ss:$100 sps:$4 sm:$0xff]  }
 0x431   :  { %9511 = vmatpush1.bf16.msra.mxu1 %v26492_v62  ;;  %v26551_v62 = vld [vmem:[%s37683_s1 + $0x694] ss:$100 sps:$4 sm:$0xff]  }
 0x432   :  { %9512 = vmatprep.subr.bf16.mxu1 %v26500_v19  ;;  %v26546_v19 = vld [vmem:[%s37683_s1 + $0x1c78] ss:$100 sps:$4 sm:$0xff]  }
 0x433   :  { %22760 = vmatmul.mubr.msk.bf16.vlgmr.msra.gmra.mrb[20].mxu0 %vm7639_vm0, %v32267_v25 }
 0x434   :  { %9284 = vmatpush1.bf16.msra.mxu0 %v26501_v0  ;;  %9315 = vmatprep.mubr.bf16.mxu0 %v29089_v52  ;;  %v26554_v0 = vld [vmem:[%s37683_s1 + $0x1d44] ss:$100 sps:$4 sm:$0xff]  }
 0x435   :  { %9513 = vmatpush1.bf16.msra.mxu1 %v26498_v63  ;;  %9285 = vmatprep.subr.bf16.mxu0 %v26509_v5  ;;  %v26549_v63 = vld [vmem:[%s37683_s1 + $0x690] ss:$100 sps:$4 sm:$0xff]   ;;  %v26552_v5 = vld [vmem:[%s37683_s1 + $0x1d40] ss:$100 sps:$4 sm:$0xff]  }
 0x436   :  { %9514 = vmatprep.subr.bf16.mxu1 %v26506_v3  ;;  %v26557_v3 = vld [vmem:[%s37683_s1 + $0x75c] ss:$100 sps:$4 sm:$0xff]  }
 0x438   :  { %9286 = vmatpush1.bf16.msra.mxu0 %v26507_v9  ;;  %v26560_v9 = vld [vmem:[%s37683_s1 + $0x1e0c] ss:$100 sps:$4 sm:$0xff]  }
 0x439   :  { %9515 = vmatpush1.bf16.msra.mxu1 %v26504_v26  ;;  %9287 = vmatprep.subr.bf16.mxu0 %v26515_v12  ;;  %v26555_v26 = vld [vmem:[%s37683_s1 + $0x758] ss:$100 sps:$4 sm:$0xff]   ;;  %v26558_v12 = vld [vmem:[%s37683_s1 + $0x1e08] ss:$100 sps:$4 sm:$0xff]  }
 0x43a   :  { %9516 = vmatprep.subr.bf16.mxu1 %v26512_v45  ;;  %v32296_v22 = vpop.f32.mrb[16].mxu0  ;;  %v26563_v45 = vld [vmem:[%s37683_s1 + $0x824] ss:$100 sps:$4 sm:$0xff]  }
 0x43b   :  { %v32298_v27 = vpop.f32.mrb[17].mxu0 }
 0x43c   :  { %9288 = vmatpush1.bf16.msra.mxu0 %v26513_v15  ;;  %v8788_v34 = vpop.f32.mrb[18].mxu0  ;;  %v26566_v15 = vld [vmem:[%s37683_s1 + $0x1ed4] ss:$100 sps:$4 sm:$0xff]  }
 0x43d   :  { %9517 = vmatpush1.bf16.msra.mxu1 %v26510_v13  ;;  %9289 = vmatprep.subr.bf16.mxu0 %v26521_v18  ;;  %v8789_v37 = vpop.f32.mrb[19].mxu0  ;;  %v26561_v13 = vld [vmem:[%s37683_s1 + $0x820] ss:$100 sps:$4 sm:$0xff]   ;;  %v26564_v18 = vld [vmem:[%s37683_s1 + $0x1ed0] ss:$100 sps:$4 sm:$0xff]  }
 0x43e   :  { %9518 = vmatprep.subr.bf16.mxu1 %v26518_v10  ;;  %v26569_v10 = vld [vmem:[%s37683_s1 + $0x8ec] ss:$100 sps:$4 sm:$0xff]   ;;  %v26575_v34 = vld [vmem:[%s37683_s1 + $0x9b4] ss:$100 sps:$4 sm:$0xff]   ;;  %v26578_v37 = vld [vmem:[%s37683_s1 + $0x2064] ss:$100 sps:$4 sm:$0xff]  }
 0x440   :  { %9290 = vmatpush1.bf16.msra.mxu0 %v26519_v33  ;;  %v26572_v33 = vld [vmem:[%s37683_s1 + $0x1f9c] ss:$100 sps:$4 sm:$0xff]  }
 0x441   :  { %9519 = vmatpush1.bf16.msra.mxu1 %v26516_v28  ;;  %9291 = vmatprep.subr.bf16.mxu0 %v26527_v36  ;;  %v26567_v28 = vld [vmem:[%s37683_s1 + $0x8e8] ss:$100 sps:$4 sm:$0xff]   ;;  %v26573_v36 = vld [vmem:[%s37683_s1 + $0x9b0] ss:$100 sps:$4 sm:$0xff]  }
 0x442   :  { %9529 = vmatprep.subr.bf16.mxu1 %v26524_v35  ;;  %v26570_v35 = vld [vmem:[%s37683_s1 + $0x1f98] ss:$100 sps:$4 sm:$0xff]  }
 0x444   :  { %9521 = vmatmul.mubr.bf16.vlgmr.msra.gmra.mrb[24].mxu1 %v29170_v16  ;;  %9292 = vmatpush1.bf16.msra.mxu0 %v26525_v41  ;;  %v26576_v41 = vld [vmem:[%s37683_s1 + $0x2060] ss:$100 sps:$4 sm:$0xff]  }
 0x445   :  { %9530 = vmatpush1.bf16.msra.mxu1 %v26522_v38  ;;  %9293 = vmatprep.subr.bf16.mxu0 %v26533_v43  ;;  %v26581_v38 = vld [vmem:[%s37683_s1 + $0xa7c] ss:$100 sps:$4 sm:$0xff]   ;;  %v26584_v43 = vld [vmem:[%s37683_s1 + $0x212c] ss:$100 sps:$4 sm:$0xff]  }
 0x446   :  { %9531 = vmatprep.subr.bf16.mxu1 %v26530_v42  ;;  %9561 = vmatprep.mubr.bf16.mxu1 %v29247_v40  ;;  %v26579_v42 = vld [vmem:[%s37683_s1 + $0xa78] ss:$100 sps:$4 sm:$0xff]  }
 0x448   :  { %9294 = vmatpush1.bf16.msra.mxu0 %v26531_v47  ;;  %v26582_v47 = vld [vmem:[%s37683_s1 + $0x2128] ss:$100 sps:$4 sm:$0xff]  }
 0x449   :  { %9532 = vmatpush1.bf16.msra.mxu1 %v26528_v53  ;;  %9295 = vmatprep.subr.bf16.mxu0 %v26539_v14  ;;  %v26587_v53 = vld [vmem:[%s37683_s1 + $0xb44] ss:$100 sps:$4 sm:$0xff]   ;;  %v26590_v14 = vld [vmem:[%s37683_s1 + $0x21f4] ss:$100 sps:$4 sm:$0xff]  }
 0x44a   :  { %9533 = vmatprep.subr.bf16.mxu1 %v26536_v54  ;;  %v26585_v54 = vld [vmem:[%s37683_s1 + $0xb40] ss:$100 sps:$4 sm:$0xff]  }
 0x44c   :  { %9296 = vmatpush1.bf16.msra.mxu0 %v26537_v50  ;;  %v26588_v50 = vld [vmem:[%s37683_s1 + $0x21f0] ss:$100 sps:$4 sm:$0xff]  }
 0x44d   :  { %9534 = vmatpush1.bf16.msra.mxu1 %v26534_v49  ;;  %9297 = vmatprep.subr.bf16.mxu0 %v26545_v55  ;;  %v26593_v49 = vld [vmem:[%s37683_s1 + $0xc0c] ss:$100 sps:$4 sm:$0xff]   ;;  %v26596_v55 = vld [vmem:[%s37683_s1 + $0x22bc] ss:$100 sps:$4 sm:$0xff]  }
 0x44e   :  { %9535 = vmatprep.subr.bf16.mxu1 %v26542_v51  ;;  %v26591_v51 = vld [vmem:[%s37683_s1 + $0xc08] ss:$100 sps:$4 sm:$0xff]  }
 0x450   :  { %9298 = vmatpush1.bf16.msra.mxu0 %v26543_v60  ;;  %v26594_v60 = vld [vmem:[%s37683_s1 + $0x22b8] ss:$100 sps:$4 sm:$0xff]  }
 0x451   :  { %9536 = vmatpush1.bf16.msra.mxu1 %v26540_v59  ;;  %9299 = vmatprep.subr.bf16.mxu0 %v26551_v62  ;;  %v26599_v59 = vld [vmem:[%s37683_s1 + $0xcd4] ss:$100 sps:$4 sm:$0xff]   ;;  %v26602_v62 = vld [vmem:[%s37683_s1 + $0x2384] ss:$100 sps:$4 sm:$0xff]  }
 0x452   :  { %9537 = vmatprep.subr.bf16.mxu1 %v26548_v61  ;;  %v26597_v61 = vld [vmem:[%s37683_s1 + $0xcd0] ss:$100 sps:$4 sm:$0xff]  }
 0x454   :  { %9300 = vmatpush1.bf16.msra.mxu0 %v26549_v63  ;;  %v26600_v63 = vld [vmem:[%s37683_s1 + $0x2380] ss:$100 sps:$4 sm:$0xff]  }
 0x455   :  { %9538 = vmatpush1.bf16.msra.mxu1 %v26546_v19  ;;  %9301 = vmatprep.subr.bf16.mxu0 %v26557_v3  ;;  %v26605_v19 = vld [vmem:[%s37683_s1 + $0xd9c] ss:$100 sps:$4 sm:$0xff]   ;;  %v26608_v3 = vld [vmem:[%s37683_s1 + $0x244c] ss:$100 sps:$4 sm:$0xff]  }
 0x456   :  { %9539 = vmatprep.subr.bf16.mxu1 %v26554_v0  ;;  %v26603_v0 = vld [vmem:[%s37683_s1 + $0xd98] ss:$100 sps:$4 sm:$0xff]  }
 0x458   :  { %9302 = vmatpush1.bf16.msra.mxu0 %v26555_v26  ;;  %v26606_v26 = vld [vmem:[%s37683_s1 + $0x2448] ss:$100 sps:$4 sm:$0xff]  }
 0x459   :  { %9540 = vmatpush1.bf16.msra.mxu1 %v26552_v5  ;;  %9303 = vmatprep.subr.bf16.mxu0 %v26563_v45  ;;  %v26611_v5 = vld [vmem:[%s37683_s1 + $0xe64] ss:$100 sps:$4 sm:$0xff]   ;;  %v26614_v45 = vld [vmem:[%s37683_s1 + $0x2514] ss:$100 sps:$4 sm:$0xff]  }
 0x45a   :  { %9541 = vmatprep.subr.bf16.mxu1 %v26560_v9  ;;  %v26609_v9 = vld [vmem:[%s37683_s1 + $0xe60] ss:$100 sps:$4 sm:$0xff]  }
 0x45c   :  { %9304 = vmatpush1.bf16.msra.mxu0 %v26561_v13  ;;  %v26612_v13 = vld [vmem:[%s37683_s1 + $0x2510] ss:$100 sps:$4 sm:$0xff]  }
 0x45d   :  { %9542 = vmatpush1.bf16.msra.mxu1 %v26558_v12  ;;  %9305 = vmatprep.subr.bf16.mxu0 %v26569_v10  ;;  %v26617_v12 = vld [vmem:[%s37683_s1 + $0xf2c] ss:$100 sps:$4 sm:$0xff]   ;;  %v26620_v10 = vld [vmem:[%s37683_s1 + $0x25dc] ss:$100 sps:$4 sm:$0xff]  }
 0x45e   :  { %9543 = vmatprep.subr.bf16.mxu1 %v26566_v15  ;;  %v26615_v15 = vld [vmem:[%s37683_s1 + $0xf28] ss:$100 sps:$4 sm:$0xff]  }
 0x460   :  { %9306 = vmatpush1.bf16.msra.mxu0 %v26567_v28  ;;  %v26618_v28 = vld [vmem:[%s37683_s1 + $0x25d8] ss:$100 sps:$4 sm:$0xff]  }
 0x461   :  { %9544 = vmatpush1.bf16.msra.mxu1 %v26564_v18  ;;  %9307 = vmatprep.subr.bf16.mxu0 %v26575_v34  ;;  %v26623_v18 = vld [vmem:[%s37683_s1 + $0xff4] ss:$100 sps:$4 sm:$0xff]   ;;  %v26626_v34 = vld [vmem:[%s37683_s1 + $0x10bc] ss:$100 sps:$4 sm:$0xff]  }
 0x462   :  { %9545 = vmatprep.subr.bf16.mxu1 %v26572_v33  ;;  %v26621_v33 = vld [vmem:[%s37683_s1 + $0xff0] ss:$100 sps:$4 sm:$0xff]  }
 0x464   :  { %9308 = vmatpush1.bf16.msra.mxu0 %v26573_v36  ;;  %v26624_v36 = vld [vmem:[%s37683_s1 + $0x10b8] ss:$100 sps:$4 sm:$0xff]  }
 0x465   :  { %9546 = vmatpush1.bf16.msra.mxu1 %v26570_v35  ;;  %9309 = vmatprep.subr.bf16.mxu0 %v26581_v38  ;;  %v26630_v35 = vld [vmem:[%s37683_s1 + $0x1320] ss:$100 sps:$4 sm:$0xff]  }
 0x466   :  { %9547 = vmatprep.subr.bf16.mxu1 %v26578_v37  ;;  %v26629_v37 = vld [vmem:[%s37683_s1 + $0x1184] ss:$100 sps:$4 sm:$0xff]  }
 0x467   :  { %v26627_v38 = vld [vmem:[%s37683_s1 + $0x1180] ss:$100 sps:$4 sm:$0xff]  }
 0x468   :  { %9310 = vmatpush1.bf16.msra.mxu0 %v26579_v42  ;;  %v26631_v42 = vld [vmem:[%s37683_s1 + $0xce0] ss:$100 sps:$4 sm:$0xff]  }
 0x469   :  { %9548 = vmatpush1.bf16.msra.mxu1 %v26576_v41  ;;  %9311 = vmatprep.subr.bf16.mxu0 %v26587_v53  ;;  %v26634_v41 = vld [vmem:[%s37683_s1 + $0x124c] ss:$100 sps:$4 sm:$0xff]  }
 0x46a   :  { %9549 = vmatprep.subr.bf16.mxu1 %v26584_v43  ;;  %v26632_v43 = vld [vmem:[%s37683_s1 + $0x1248] ss:$100 sps:$4 sm:$0xff]  }
 0x46b   :  { %v26635_v53 = vld [vmem:[%s37683_s1 + $0x13e8] ss:$100 sps:$4 sm:$0xff]  }
 0x46c   :  { %9312 = vmatpush1.bf16.msra.mxu0 %v26585_v54  ;;  %v26636_v54 = vld [vmem:[%s37683_s1 + $0xda8] ss:$100 sps:$4 sm:$0xff]  }
 0x46d   :  { %9550 = vmatpush1.bf16.msra.mxu1 %v26582_v47  ;;  %9313 = vmatprep.subr.bf16.mxu0 %v26593_v49  ;;  %v26639_v47 = vld [vmem:[%s37683_s1 + $0x1314] ss:$100 sps:$4 sm:$0xff]  }
 0x46e   :  { %9551 = vmatprep.subr.bf16.mxu1 %v26590_v14  ;;  %v26637_v14 = vld [vmem:[%s37683_s1 + $0x1310] ss:$100 sps:$4 sm:$0xff]  }
 0x46f   :  { %v26640_v49 = vld [vmem:[%s37683_s1 + $0x14b0] ss:$100 sps:$4 sm:$0xff]  }
 0x470   :  { %9314 = vmatpush1.bf16.msra.mxu0 %v26591_v51  ;;  %v26642_v51 = vld [vmem:[%s37683_s1 + $0x13d8] ss:$100 sps:$4 sm:$0xff]  }
 0x471   :  { %9552 = vmatpush1.bf16.msra.mxu1 %v26588_v50  ;;  %9324 = vmatprep.subr.bf16.mxu0 %v26599_v59  ;;  %v26641_v50 = vld [vmem:[%s37683_s1 + $0xe70] ss:$100 sps:$4 sm:$0xff]  }
 0x472   :  { %9553 = vmatprep.subr.bf16.mxu1 %v26596_v55  ;;  %v26645_v55 = vld [vmem:[%s37683_s1 + $0x1578] ss:$100 sps:$4 sm:$0xff]  }
 0x473   :  { %9316 = vmatmul.mubr.bf16.vlgmr.msra.gmra.mrb[24].mxu0 %v29155_v11 }
 0x474   :  { %9325 = vmatpush1.bf16.msra.mxu0 %v26597_v61  ;;  %9356 = vmatprep.mubr.bf16.mxu0 %v29107_v58  ;;  %v26646_v61 = vld [vmem:[%s37683_s1 + $0xf38] ss:$100 sps:$4 sm:$0xff]  }
 0x475   :  { %9554 = vmatpush1.bf16.msra.mxu1 %v26594_v60  ;;  %9326 = vmatprep.subr.bf16.mxu0 %v26605_v19  ;;  %v26647_v19 = vld [vmem:[%s37683_s1 + $0x14a0] ss:$100 sps:$4 sm:$0xff]  }
 0x476   :  { %9555 = vmatprep.subr.bf16.mxu1 %v26602_v62 }
 0x478   :  { %9327 = vmatpush1.bf16.msra.mxu0 %v26603_v0  ;;  %v26650_v0 = vld [vmem:[%s37683_s1 + $0x1640] ss:$100 sps:$4 sm:$0xff]  }
 0x479   :  { %9556 = vmatpush1.bf16.msra.mxu1 %v26600_v63  ;;  %9328 = vmatprep.subr.bf16.mxu0 %v26611_v5  ;;  %v26651_v5 = vld [vmem:[%s37683_s1 + $0x1000] ss:$100 sps:$4 sm:$0xff]  }
 0x47a   :  { %9557 = vmatprep.subr.bf16.mxu1 %v26608_v3  ;;  %v26654_v3 = vld [vmem:[%s37683_s1 + $0x156c] ss:$100 sps:$4 sm:$0xff]  }
 0x47c   :  { %9329 = vmatpush1.bf16.msra.mxu0 %v26609_v9  ;;  %v26655_v9 = vld [vmem:[%s37683_s1 + $0x1708] ss:$100 sps:$4 sm:$0xff]  }
 0x47d   :  { %9558 = vmatpush1.bf16.msra.mxu1 %v26606_v26  ;;  %9330 = vmatprep.subr.bf16.mxu0 %v26617_v12  ;;  %v26652_v26 = vld [vmem:[%s37683_s1 + $0x1568] ss:$100 sps:$4 sm:$0xff]  }
 0x47e   :  { %9559 = vmatprep.subr.bf16.mxu1 %v26614_v45  ;;  %v26659_v45 = vld [vmem:[%s37683_s1 + $0x1634] ss:$100 sps:$4 sm:$0xff]   ;;  %v26656_v12 = vld [vmem:[%s37683_s1 + $0x10c8] ss:$100 sps:$4 sm:$0xff]  }
 0x480   :  { %9331 = vmatpush1.bf16.msra.mxu0 %v26615_v15  ;;  %v26660_v15 = vld [vmem:[%s37683_s1 + $0x17d0] ss:$100 sps:$4 sm:$0xff]  }
 0x481   :  { %9560 = vmatpush1.bf16.msra.mxu1 %v26612_v13  ;;  %9332 = vmatprep.subr.bf16.mxu0 %v26623_v18  ;;  %v26657_v13 = vld [vmem:[%s37683_s1 + $0x1630] ss:$100 sps:$4 sm:$0xff]  }
 0x482   :  { %9570 = vmatprep.subr.bf16.mxu1 %v26620_v10  ;;  %v26664_v10 = vld [vmem:[%s37683_s1 + $0x16fc] ss:$100 sps:$4 sm:$0xff]   ;;  %v26661_v18 = vld [vmem:[%s37683_s1 + $0x1190] ss:$100 sps:$4 sm:$0xff]  }
 0x484   :  { %9562 = vmatmul.mubr.bf16.vlgmr.msra.gmra.mrb[24].mxu1 %v29376_v23  ;;  %9333 = vmatpush1.bf16.msra.mxu0 %v26621_v33  ;;  %v26665_v33 = vld [vmem:[%s37683_s1 + $0x1898] ss:$100 sps:$4 sm:$0xff]  }
 0x485   :  { %9571 = vmatpush1.bf16.msra.mxu1 %v26618_v28  ;;  %9334 = vmatprep.subr.bf16.mxu0 %v26626_v34  ;;  %v26662_v28 = vld [vmem:[%s37683_s1 + $0x16f8] ss:$100 sps:$4 sm:$0xff]   ;;  %v26669_v34 = vld [vmem:[%s37683_s1 + $0x17c4] ss:$100 sps:$4 sm:$0xff]  }
 0x486   :  { %9602 = vmatprep.mubr.bf16.mxu1 %v28886_v1  ;;  %24273 = vmatprep.subr.bf16.mxu1 %v26630_v35  ;;  %v26666_v35 = vld [vmem:[%s37683_s1 + $0x1258] ss:$100 sps:$4 sm:$0xff]  }
 0x488   :  { %9335 = vmatpush1.bf16.msra.mxu0 %v26624_v36  ;;  %v26667_v36 = vld [vmem:[%s37683_s1 + $0x17c0] ss:$100 sps:$4 sm:$0xff]  }
 0x489   :  { %9336 = vmatprep.subr.bf16.mxu0 %v26629_v37  ;;  %v26673_v37 = vld [vmem:[%s37683_s1 + $0x188c] ss:$100 sps:$4 sm:$0xff]  }
 0x48c   :  { %9337 = vmatpush1.bf16.msra.mxu0 %v26627_v38  ;;  %v26670_v38 = vld [vmem:[%s37683_s1 + $0x25e0] ss:$100 sps:$4 sm:$0xff]  }
 0x48d   :  { %9338 = vmatprep.subr.bf16.mxu0 %v26634_v41  ;;  %v26671_v41 = vld [vmem:[%s37683_s1 + $0x1888] ss:$100 sps:$4 sm:$0xff]  }
 0x490   :  { %22763 = vmatmul.mubr.msk.bf16.vlgmr.msra.gmra.mrb[24].mxu1 %vm7639_vm0, %v32267_v25  ;;  %9339 = vmatpush1.bf16.msra.mxu0 %v26632_v43  ;;  %v26644_v25 = vld [vmem:[%s37683_s1 + $0x13dc] ss:$100 sps:$4 sm:$0xff]   ;;  %v26676_v43 = vld [vmem:[%s37683_s1 + $0x1954] ss:$100 sps:$4 sm:$0xff]  }
 0x491   :  { %24274 = vmatpush3.bf16.msra.mxu1 %v26631_v42  ;;  %9340 = vmatprep.subr.bf16.mxu0 %v26639_v47  ;;  %v28887_v42 = vmov 0.0   ;;  %v26674_v47 = vld [vmem:[%s37683_s1 + $0x1950] ss:$100 sps:$4 sm:$0xff]  }
 0x492   :  { %24275 = vmatprep.subr.bf16.mxu1 %v26635_v53  ;;  %9683 = vmatprep.mubr.bf16.mxu1 %v29107_v58  ;;  %v26649_v58 = vld [vmem:[%s37683_s1 + $0x14a4] ss:$100 sps:$4 sm:$0xff]  }
 0x493   :  { %v26679_v53 = vld [vmem:[%s37686_s3 + $0x4] ss:$28 sps:$4 sm:$0xff]  }
 0x494   :  { %9341 = vmatpush1.bf16.msra.mxu0 %v26637_v14  ;;  %v9772_v14 = vmax.f32 %v30250_v44, 0.0 }
 0x495   :  { %24276 = vmatpush3.bf16.msra.mxu1 %v26636_v54  ;;  %9342 = vmatprep.subr.bf16.mxu0 %v26644_v25  ;;  %v26682_v54 = vld [vmem:[%s37683_s1 + $0x1a1c] ss:$100 sps:$4 sm:$0xff]  }
 0x496   :  { %24277 = vmatprep.subr.bf16.mxu1 %v26640_v49  ;;  %v26677_v49 = vld [vmem:[%s37686_s3] ss:$28 sps:$4 sm:$0xff]   ;;  %v32668_v44 = vpack.c.bf16 %v9772_v14, %v9772_v14 }
 0x497   :  { %v32573_v59 = vpop.f32.mrb[20].mxu1  ;;  %v26680_v25 = vld [vmem:[%s37683_s1 + $0x1a18] ss:$100 sps:$4 sm:$0xff]  }
 0x498   :  { %v32575_v60 = vpop.f32.mrb[21].mxu1  ;;  %9343 = vmatpush1.bf16.msra.mxu0 %v26642_v51  ;;  %v32676_v51 = vld [vmem:[%s37684_s0 + $0x18] ss:$0 sps:$4 sm:$0xff]  }
 0x499   :  { %24278 = vmatpush3.bf16.msra.mxu1 %v26641_v50  ;;  %v9280_v62 = vpop.f32.mrb[22].mxu1  ;;  %9344 = vmatprep.subr.bf16.mxu0 %v26649_v58  ;;  %v26685_v50 = vld [vmem:[%s37686_s3 + $0x3c] ss:$28 sps:$4 sm:$0xff]   ;;  %v26686_v58 = vld [vmem:[%s37683_s1 + $0x1ae0] ss:$100 sps:$4 sm:$0xff]  }
 0x49a   :  { %v9281_v63 = vpop.f32.mrb[23].mxu1  ;;  %24279 = vmatprep.subr.bf16.mxu1 %v26645_v55  ;;  %v26683_v55 = vld [vmem:[%s37686_s3 + $0x38] ss:$28 sps:$4 sm:$0xff]   ;;  %v26694_v62 = vld [vmem:[%s37683_s1 + $0x1bac] ss:$100 sps:$4 sm:$0xff]  }
 0x49b   :  { %v26692_v63 = vld [vmem:[%s37683_s1 + $0x1ba8] ss:$100 sps:$4 sm:$0xff]   ;;  %v26728_v14 = vld [vmem:[%s37683_s1 + $0x2058] ss:$100 sps:$4 sm:$0xff]  }
 0x49c   :  { %9345 = vmatpush1.bf16.msra.mxu0 %v26647_v19  ;;  %v26689_v19 = vld [vmem:[%s37686_s3 + $0x70] ss:$28 sps:$4 sm:$0xff]  }
 0x49d   :  { %24280 = vmatpush3.bf16.msra.mxu1 %v26646_v61  ;;  %9346 = vmatprep.subr.bf16.mxu0 %v26654_v3  ;;  %v26691_v61 = vld [vmem:[%s37686_s3 + $0x74] ss:$28 sps:$4 sm:$0xff]  }
 0x49e   :  { %24281 = vmatprep.subr.bf16.mxu1 %v26650_v0  ;;  %v26697_v0 = vld [vmem:[%s37686_s3 + $0xac] ss:$28 sps:$4 sm:$0xff]   ;;  %v26700_v3 = vld [vmem:[%s37683_s1 + $0x1c74] ss:$100 sps:$4 sm:$0xff]  }
 0x4a0   :  { %9347 = vmatpush1.bf16.msra.mxu0 %v26652_v26  ;;  %v26698_v26 = vld [vmem:[%s37683_s1 + $0x1c70] ss:$100 sps:$4 sm:$0xff]  }
 0x4a1   :  { %24282 = vmatpush3.bf16.msra.mxu1 %v26651_v5  ;;  %9348 = vmatprep.subr.bf16.mxu0 %v26659_v45  ;;  %v26695_v5 = vld [vmem:[%s37686_s3 + $0xa8] ss:$28 sps:$4 sm:$0xff]   ;;  %v26706_v45 = vld [vmem:[%s37683_s1 + $0x1d3c] ss:$100 sps:$4 sm:$0xff]  }
 0x4a2   :  { %24283 = vmatprep.subr.bf16.mxu1 %v26655_v9  ;;  %v26703_v9 = vld [vmem:[%s37686_s3 + $0xe4] ss:$28 sps:$4 sm:$0xff]  }
 0x4a4   :  { %9349 = vmatpush1.bf16.msra.mxu0 %v26657_v13  ;;  %v26704_v13 = vld [vmem:[%s37683_s1 + $0x1d38] ss:$100 sps:$4 sm:$0xff]  }
 0x4a5   :  { %24284 = vmatpush3.bf16.msra.mxu1 %v26656_v12  ;;  %9350 = vmatprep.subr.bf16.mxu0 %v26664_v10  ;;  %v26701_v12 = vld [vmem:[%s37686_s3 + $0xe0] ss:$28 sps:$4 sm:$0xff]   ;;  %v26712_v10 = vld [vmem:[%s37683_s1 + $0x1e04] ss:$100 sps:$4 sm:$0xff]  }
 0x4a6   :  { %24285 = vmatprep.subr.bf16.mxu1 %v26660_v15  ;;  %v26709_v15 = vld [vmem:[%s37686_s3 + $0x11c] ss:$28 sps:$4 sm:$0xff]  }
 0x4a8   :  { %9351 = vmatpush1.bf16.msra.mxu0 %v26662_v28  ;;  %v26710_v28 = vld [vmem:[%s37683_s1 + $0x1e00] ss:$100 sps:$4 sm:$0xff]  }
 0x4a9   :  { %24286 = vmatpush3.bf16.msra.mxu1 %v26661_v18  ;;  %9352 = vmatprep.subr.bf16.mxu0 %v26669_v34  ;;  %v26707_v18 = vld [vmem:[%s37686_s3 + $0x118] ss:$28 sps:$4 sm:$0xff]   ;;  %v26718_v34 = vld [vmem:[%s37683_s1 + $0x1ecc] ss:$100 sps:$4 sm:$0xff]  }
 0x4aa   :  { %24287 = vmatprep.subr.bf16.mxu1 %v26665_v33  ;;  %v26715_v33 = vld [vmem:[%s37686_s3 + $0x154] ss:$28 sps:$4 sm:$0xff]  }
 0x4ac   :  { %9353 = vmatpush1.bf16.msra.mxu0 %v26667_v36  ;;  %v26716_v36 = vld [vmem:[%s37683_s1 + $0x1ec8] ss:$100 sps:$4 sm:$0xff]  }
 0x4ad   :  { %24288 = vmatpush3.bf16.msra.mxu1 %v26666_v35  ;;  %9354 = vmatprep.subr.bf16.mxu0 %v26673_v37  ;;  %v26713_v35 = vld [vmem:[%s37686_s3 + $0x150] ss:$28 sps:$4 sm:$0xff]  }
 0x4ae   :  { %24588 = vmatprep.subr.bf16.mxu1 %v28887_v42  ;;  %v26721_v37 = vld [vmem:[%s37686_s3 + $0x18c] ss:$28 sps:$4 sm:$0xff]  }
 0x4b0   :  { %9684 = vmatmul.mubr.bf16.vlgmr.msra.gmra.mrb[28].mxu1 %v29170_v16  ;;  %9355 = vmatpush1.bf16.msra.mxu0 %v26671_v41  ;;  %v26719_v41 = vld [vmem:[%s37686_s3 + $0x188] ss:$28 sps:$4 sm:$0xff]  }
 0x4b1   :  { %24589 = vmatpush3.bf16.msra.mxu1 %v26670_v38  ;;  %9365 = vmatprep.subr.bf16.mxu0 %v26676_v43  ;;  %v26724_v38 = vld [vmem:[%s37683_s1 + $0x1f94] ss:$100 sps:$4 sm:$0xff]  }
 0x4b2   :  { %24590 = vmatprep.mubr.msk.bf16.mxu1 %vm28888_vm1, %v28887_v42  ;;  %18486 = vmatprep.subr.bf16.mxu1 %v26679_v53  ;;  %v26722_v43 = vld [vmem:[%s37683_s1 + $0x1f90] ss:$100 sps:$4 sm:$0xff]   ;;  %v26727_v53 = vld [vmem:[%s37686_s3 + $0x1c4] ss:$28 sps:$4 sm:$0xff]  }
 0x4b3   :  { %9357 = vmatmul.mubr.bf16.vlgmr.msra.gmra.mrb[24].mxu0 %v29170_v16  ;;  %v26688_v16 = vld [vmem:[%s37683_s1 + $0x1ae4] ss:$100 sps:$4 sm:$0xff]  }
 0x4b4   :  { %9366 = vmatpush1.bf16.msra.mxu0 %v26674_v47  ;;  %9397 = vmatprep.mubr.bf16.mxu0 %v29247_v40  ;;  %v26730_v47 = vld [vmem:[%s37683_s1 + $0x205c] ss:$100 sps:$4 sm:$0xff]  }
 0x4b5   :  { %9367 = vmatprep.subr.bf16.mxu0 %v26682_v54  ;;  %v26725_v54 = vld [vmem:[%s37686_s3 + $0x1c0] ss:$28 sps:$4 sm:$0xff]  }
 0x4b8   :  { %24591 = vmatmul.mubr.msk.bf16.vlgmr.msra.gmra.mrb[32].mxu1 %vm7639_vm0, %v32676_v51  ;;  %9368 = vmatpush1.bf16.msra.mxu0 %v26680_v25  ;;  %v26736_v25 = vld [vmem:[%s37683_s1 + $0x2124] ss:$100 sps:$4 sm:$0xff]  }
 0x4b9   :  { %18487 = vmatpush1.bf16.msra.mxu1 %v26677_v49  ;;  %18518 = vmatprep.mubr.bf16.mxu1 %v32668_v44  ;;  %v26733_v49 = vld [vmem:[%s37686_s3 + $0x1fc] ss:$28 sps:$4 sm:$0xff]  }
 0x4ba   :  { %18488 = vmatprep.subr.bf16.mxu1 %v26685_v50  ;;  %9369 = vmatprep.subr.bf16.mxu0 %v26688_v16  ;;  %v26731_v50 = vld [vmem:[%s37686_s3 + $0x1f8] ss:$28 sps:$4 sm:$0xff]   ;;  %v26734_v16 = vld [vmem:[%s37683_s1 + $0x2120] ss:$100 sps:$4 sm:$0xff]  }
 0x4bc   :  { %9370 = vmatpush1.bf16.msra.mxu0 %v26686_v58  ;;  %v26742_v58 = vld [vmem:[%s37683_s1 + $0x21ec] ss:$100 sps:$4 sm:$0xff]  }
 0x4bd   :  { %18489 = vmatpush1.bf16.msra.mxu1 %v26683_v55  ;;  %9371 = vmatprep.subr.bf16.mxu0 %v26694_v62  ;;  %v26739_v55 = vld [vmem:[%s37686_s3 + $0x234] ss:$28 sps:$4 sm:$0xff]   ;;  %v26740_v62 = vld [vmem:[%s37683_s1 + $0x21e8] ss:$100 sps:$4 sm:$0xff]  }
 0x4be   :  { %18490 = vmatprep.subr.bf16.mxu1 %v26691_v61  ;;  %v26737_v61 = vld [vmem:[%s37686_s3 + $0x230] ss:$28 sps:$4 sm:$0xff]  }
 0x4c0   :  { %9372 = vmatpush1.bf16.msra.mxu0 %v26692_v63  ;;  %v26748_v63 = vld [vmem:[%s37683_s1 + $0x22b4] ss:$100 sps:$4 sm:$0xff]  }
 0x4c1   :  { %18491 = vmatpush1.bf16.msra.mxu1 %v26689_v19  ;;  %9373 = vmatprep.subr.bf16.mxu0 %v26700_v3  ;;  %v26745_v19 = vld [vmem:[%s37686_s3 + $0x26c] ss:$28 sps:$4 sm:$0xff]   ;;  %v26746_v3 = vld [vmem:[%s37683_s1 + $0x22b0] ss:$100 sps:$4 sm:$0xff]  }
 0x4c2   :  { %18492 = vmatprep.subr.bf16.mxu1 %v26697_v0  ;;  %v26743_v0 = vld [vmem:[%s37686_s3 + $0x268] ss:$28 sps:$4 sm:$0xff]  }
 0x4c4   :  { %9374 = vmatpush1.bf16.msra.mxu0 %v26698_v26  ;;  %v26754_v26 = vld [vmem:[%s37683_s1 + $0x237c] ss:$100 sps:$4 sm:$0xff]  }
 0x4c5   :  { %18493 = vmatpush1.bf16.msra.mxu1 %v26695_v5  ;;  %9375 = vmatprep.subr.bf16.mxu0 %v26706_v45  ;;  %v26751_v5 = vld [vmem:[%s37686_s3 + $0x2a4] ss:$28 sps:$4 sm:$0xff]   ;;  %v26752_v45 = vld [vmem:[%s37683_s1 + $0x2378] ss:$100 sps:$4 sm:$0xff]  }
 0x4c6   :  { %18494 = vmatprep.subr.bf16.mxu1 %v26703_v9  ;;  %v26749_v9 = vld [vmem:[%s37686_s3 + $0x2a0] ss:$28 sps:$4 sm:$0xff]  }
 0x4c8   :  { %9376 = vmatpush1.bf16.msra.mxu0 %v26704_v13  ;;  %v26760_v13 = vld [vmem:[%s37683_s1 + $0x2444] ss:$100 sps:$4 sm:$0xff]  }
 0x4c9   :  { %18495 = vmatpush1.bf16.msra.mxu1 %v26701_v12  ;;  %9377 = vmatprep.subr.bf16.mxu0 %v26712_v10  ;;  %v26757_v12 = vld [vmem:[%s37686_s3 + $0x2dc] ss:$28 sps:$4 sm:$0xff]   ;;  %v26758_v10 = vld [vmem:[%s37683_s1 + $0x2440] ss:$100 sps:$4 sm:$0xff]  }
 0x4ca   :  { %18496 = vmatprep.subr.bf16.mxu1 %v26709_v15  ;;  %v26755_v15 = vld [vmem:[%s37686_s3 + $0x2d8] ss:$28 sps:$4 sm:$0xff]  }
 0x4cc   :  { %9378 = vmatpush1.bf16.msra.mxu0 %v26710_v28  ;;  %v26766_v28 = vld [vmem:[%s37683_s1 + $0x250c] ss:$100 sps:$4 sm:$0xff]  }
 0x4cd   :  { %18497 = vmatpush1.bf16.msra.mxu1 %v26707_v18  ;;  %9379 = vmatprep.subr.bf16.mxu0 %v26718_v34  ;;  %v26763_v18 = vld [vmem:[%s37686_s3 + $0x314] ss:$28 sps:$4 sm:$0xff]   ;;  %v26764_v34 = vld [vmem:[%s37683_s1 + $0x2508] ss:$100 sps:$4 sm:$0xff]  }
 0x4ce   :  { %18498 = vmatprep.subr.bf16.mxu1 %v26715_v33  ;;  %v26761_v33 = vld [vmem:[%s37686_s3 + $0x310] ss:$28 sps:$4 sm:$0xff]  }
 0x4d0   :  { %9380 = vmatpush1.bf16.msra.mxu0 %v26716_v36  ;;  %v26778_v36 = vld [vmem:[%s37683_s1 + $0x25d4] ss:$100 sps:$4 sm:$0xff]  }
 0x4d1   :  { %18499 = vmatpush1.bf16.msra.mxu1 %v26713_v35  ;;  %9381 = vmatprep.subr.bf16.mxu0 %v26724_v38  ;;  %v26769_v35 = vld [vmem:[%s37686_s3 + $0x34c] ss:$28 sps:$4 sm:$0xff]   ;;  %v26772_v38 = vld [vmem:[%s37686_s3 + $0x384] ss:$28 sps:$4 sm:$0xff]  }
 0x4d2   :  { %18500 = vmatprep.subr.bf16.mxu1 %v26721_v37  ;;  %v26767_v37 = vld [vmem:[%s37686_s3 + $0x348] ss:$28 sps:$4 sm:$0xff]  }
 0x4d4   :  { %9382 = vmatpush1.bf16.msra.mxu0 %v26722_v43  ;;  %v26776_v43 = vld [vmem:[%s37683_s1 + $0x25d0] ss:$100 sps:$4 sm:$0xff]  }
 0x4d5   :  { %18501 = vmatpush1.bf16.msra.mxu1 %v26719_v41  ;;  %9383 = vmatprep.subr.bf16.mxu0 %v26730_v47  ;;  %v9771_v41 = vmax.f32 %v30241_v39, 0.0  ;;  %v9774_v47 = vmax.f32 %v30453_v4, 0.0  ;;  %v26770_v39 = vld [vmem:[%s37686_s3 + $0x380] ss:$28 sps:$4 sm:$0xff]   ;;  %v26773_v4 = vld [vmem:[%s37686_s3 + $0x3b8] ss:$28 sps:$4 sm:$0xff]  }
 0x4d6   :  { %18502 = vmatprep.subr.bf16.mxu1 %v26727_v53  ;;  %v26782_v53 = vld [vmem:[%s37683_s1 + $0x6a0] ss:$100 sps:$4 sm:$0xff]  }
 0x4d8   :  { %9384 = vmatpush1.bf16.msra.mxu0 %v26728_v14  ;;  %v26775_v14 = vld [vmem:[%s37686_s3 + $0x3bc] ss:$28 sps:$4 sm:$0xff]  }
 0x4d9   :  { %18503 = vmatpush1.bf16.msra.mxu1 %v26725_v54  ;;  %9385 = vmatprep.subr.bf16.mxu0 %v26736_v25  ;;  %v32867_v54 = vpack.c.bf16 %v9771_v41, %v9771_v41  ;;  %v26781_v25 = vld [vmem:[%s37686_s3 + $0x3f4] ss:$28 sps:$4 sm:$0xff]   ;;  %v26809_v41 = vld [vmem:[%s37686_s3 + $0x540] ss:$28 sps:$4 sm:$0xff]  }
 0x4da   :  { %18504 = vmatprep.subr.bf16.mxu1 %v26733_v49  ;;  %v32872_v49 = vpack.c.bf16 %v9774_v47, %v9774_v47  ;;  %v26817_v47 = vld [vmem:[%s37683_s1 + $0xc18] ss:$100 sps:$4 sm:$0xff]  }
 0x4dc   :  { %9386 = vmatpush1.bf16.msra.mxu0 %v26734_v16  ;;  %v26783_v16 = vld [vmem:[%s37683_s1 + $0x60] ss:$100 sps:$4 sm:$0xff]  }
 0x4dd   :  { %18505 = vmatpush1.bf16.msra.mxu1 %v26731_v50  ;;  %9387 = vmatprep.subr.bf16.mxu0 %v26742_v58  ;;  %v26779_v50 = vld [vmem:[%s37686_s3 + $0x3f0] ss:$28 sps:$4 sm:$0xff]  }
 0x4de   :  { %18506 = vmatprep.subr.bf16.mxu1 %v26739_v55  ;;  %v26786_v55 = vld [vmem:[%s37686_s3 + $0x42c] ss:$28 sps:$4 sm:$0xff]  }
 0x4df   :  { %v26787_v58 = vld [vmem:[%s37683_s1 + $0x768] ss:$100 sps:$4 sm:$0xff]  }
 0x4e0   :  { %9388 = vmatpush1.bf16.msra.mxu0 %v26740_v62  ;;  %v26788_v62 = vld [vmem:[%s37683_s1 + $0x128] ss:$100 sps:$4 sm:$0xff]  }
 0x4e1   :  { %18507 = vmatpush1.bf16.msra.mxu1 %v26737_v61  ;;  %9389 = vmatprep.subr.bf16.mxu0 %v26748_v63  ;;  %v26784_v61 = vld [vmem:[%s37686_s3 + $0x428] ss:$28 sps:$4 sm:$0xff]   ;;  %v26792_v63 = vld [vmem:[%s37683_s1 + $0x830] ss:$100 sps:$4 sm:$0xff]  }
 0x4e2   :  { %18508 = vmatprep.subr.bf16.mxu1 %v26745_v19  ;;  %v26791_v19 = vld [vmem:[%s37686_s3 + $0x464] ss:$28 sps:$4 sm:$0xff]  }
 0x4e4   :  { %9390 = vmatpush1.bf16.msra.mxu0 %v26746_v3  ;;  %v26796_v3 = vld [vmem:[%s37686_s3 + $0x49c] ss:$28 sps:$4 sm:$0xff]  }
 0x4e5   :  { %18509 = vmatpush1.bf16.msra.mxu1 %v26743_v0  ;;  %9391 = vmatprep.subr.bf16.mxu0 %v26754_v26  ;;  %v26793_v0 = vld [vmem:[%s37683_s1 + $0x1f0] ss:$100 sps:$4 sm:$0xff]  }
 0x4e6   :  { %18510 = vmatprep.subr.bf16.mxu1 %v26751_v5  ;;  %v26797_v5 = vld [vmem:[%s37683_s1 + $0x8f8] ss:$100 sps:$4 sm:$0xff]  }
 0x4e7   :  { %v26794_v26 = vld [vmem:[%s37686_s3 + $0x498] ss:$28 sps:$4 sm:$0xff]  }
 0x4e8   :  { %9392 = vmatpush1.bf16.msra.mxu0 %v26752_v45  ;;  %v26798_v45 = vld [vmem:[%s37683_s1 + $0x2b8] ss:$100 sps:$4 sm:$0xff]  }
 0x4e9   :  { %18511 = vmatpush1.bf16.msra.mxu1 %v26749_v9  ;;  %9393 = vmatprep.subr.bf16.mxu0 %v26760_v13  ;;  %v26801_v13 = vld [vmem:[%s37686_s3 + $0x4d4] ss:$28 sps:$4 sm:$0xff]  }
 0x4ea   :  { %18512 = vmatprep.subr.bf16.mxu1 %v26757_v12 }
 0x4ec   :  { %9394 = vmatpush1.bf16.msra.mxu0 %v26758_v10  ;;  %v26802_v10 = vld [vmem:[%s37683_s1 + $0x9c0] ss:$100 sps:$4 sm:$0xff]  }
 0x4ed   :  { %18513 = vmatpush1.bf16.msra.mxu1 %v26755_v15  ;;  %9395 = vmatprep.subr.bf16.mxu0 %v26766_v28  ;;  %v26803_v28 = vld [vmem:[%s37683_s1 + $0x380] ss:$100 sps:$4 sm:$0xff]  }
 0x4ee   :  { %18514 = vmatprep.subr.bf16.mxu1 %v26763_v18  ;;  %v26799_v18 = vld [vmem:[%s37686_s3 + $0x4d0] ss:$28 sps:$4 sm:$0xff]  }
 0x4f0   :  { %9396 = vmatpush1.bf16.msra.mxu0 %v26764_v34  ;;  %v26807_v34 = vld [vmem:[%s37683_s1 + $0xa88] ss:$100 sps:$4 sm:$0xff]  }
 0x4f1   :  { %18515 = vmatpush1.bf16.msra.mxu1 %v26761_v33  ;;  %9406 = vmatprep.subr.bf16.mxu0 %v26778_v36  ;;  %v26806_v33 = vld [vmem:[%s37686_s3 + $0x50c] ss:$28 sps:$4 sm:$0xff]  }
 0x4f2   :  { %18516 = vmatprep.subr.bf16.mxu1 %v26769_v35  ;;  %v26804_v35 = vld [vmem:[%s37686_s3 + $0x508] ss:$28 sps:$4 sm:$0xff]  }
 0x4f3   :  { %9398 = vmatmul.mubr.bf16.vlgmr.msra.gmra.mrb[24].mxu0 %v29376_v23  ;;  %v26808_v36 = vld [vmem:[%s37683_s1 + $0x448] ss:$100 sps:$4 sm:$0xff]  }
 0x4f4   :  { %9407 = vmatpush1.bf16.msra.mxu0 %v26776_v43  ;;  %9438 = vmatprep.mubr.bf16.mxu0 %v28886_v1  ;;  %v26813_v43 = vld [vmem:[%s37683_s1 + $0x510] ss:$100 sps:$4 sm:$0xff]  }
 0x4f5   :  { %18517 = vmatpush1.bf16.msra.mxu1 %v26767_v37  ;;  %24251 = vmatprep.subr.bf16.mxu0 %v26782_v53  ;;  %v26811_v37 = vld [vmem:[%s37686_s3 + $0x544] ss:$28 sps:$4 sm:$0xff]   ;;  %v26816_v53 = vld [vmem:[%s37686_s3 + $0x57c] ss:$28 sps:$4 sm:$0xff]  }
 0x4f6   :  { %18527 = vmatprep.subr.bf16.mxu1 %v26772_v38  ;;  %v26812_v38 = vld [vmem:[%s37683_s1 + $0xb50] ss:$100 sps:$4 sm:$0xff]  }
 0x4f8   :  { %18519 = vmatmul.mubr.bf16.vlgmr.msra.gmra.mrb[36].mxu1 %v32867_v54 }
 0x4f9   :  { %18528 = vmatpush1.bf16.msra.mxu1 %v26770_v39  ;;  %18559 = vmatprep.mubr.bf16.mxu1 %v32872_v49  ;;  %v26814_v39 = vld [vmem:[%s37686_s3 + $0x578] ss:$28 sps:$4 sm:$0xff]  }
 0x4fa   :  { %18529 = vmatprep.subr.bf16.mxu1 %v26775_v14  ;;  %v26818_v14 = vld [vmem:[%s37683_s1 + $0x5d8] ss:$100 sps:$4 sm:$0xff]  }
 0x4fd   :  { %18530 = vmatpush1.bf16.msra.mxu1 %v26773_v4  ;;  %v26821_v4 = vld [vmem:[%s37686_s3 + $0x5b4] ss:$28 sps:$4 sm:$0xff]  }
 0x4fe   :  { %18531 = vmatprep.subr.bf16.mxu1 %v26781_v25  ;;  %v26822_v25 = vld [vmem:[%s37683_s1 + $0x1fa0] ss:$100 sps:$4 sm:$0xff]  }
 0x4ff   :  { %22762 = vmatmul.mubr.msk.bf16.vlgmr.msra.gmra.mrb[24].mxu0 %vm7639_vm0, %v32676_v51  ;;  %v26789_v51 = vld [vmem:[%s37686_s3 + $0x460] ss:$28 sps:$4 sm:$0xff]  }
 0x500   :  { %24252 = vmatpush3.bf16.msra.mxu0 %v26783_v16  ;;  %9643 = vmatprep.mubr.bf16.mxu0 %v29089_v52  ;;  %v26823_v16 = vld [vmem:[%s37683_s1 + $0x1960] ss:$100 sps:$4 sm:$0xff]  }
 0x501   :  { %18532 = vmatpush1.bf16.msra.mxu1 %v26779_v50  ;;  %24253 = vmatprep.subr.bf16.mxu0 %v26787_v58  ;;  %v26819_v50 = vld [vmem:[%s37686_s3 + $0x5b0] ss:$28 sps:$4 sm:$0xff]  }
 0x502   :  { %18533 = vmatprep.subr.bf16.mxu1 %v26786_v55  ;;  %v26826_v55 = vld [vmem:[%s37686_s3 + $0x5ec] ss:$28 sps:$4 sm:$0xff]  }
 0x503   :  { %v26827_v58 = vld [vmem:[%s37683_s1 + $0x2068] ss:$100 sps:$4 sm:$0xff]  }
 0x504   :  { %24254 = vmatpush3.bf16.msra.mxu0 %v26788_v62  ;;  %v26828_v62 = vld [vmem:[%s37683_s1 + $0x1a28] ss:$100 sps:$4 sm:$0xff]  }
 0x505   :  { %18534 = vmatpush1.bf16.msra.mxu1 %v26784_v61  ;;  %24255 = vmatprep.subr.bf16.mxu0 %v26792_v63  ;;  %v26824_v61 = vld [vmem:[%s37686_s3 + $0x5e8] ss:$28 sps:$4 sm:$0xff]   ;;  %v26832_v63 = vld [vmem:[%s37683_s1 + $0x2130] ss:$100 sps:$4 sm:$0xff]  }
 0x506   :  { %18535 = vmatprep.subr.bf16.mxu1 %v26791_v19  ;;  %v32922_v52 = vpop.f32.mrb[20].mxu0  ;;  %v26831_v19 = vld [vmem:[%s37686_s3 + $0x624] ss:$28 sps:$4 sm:$0xff]  }
 0x507   :  { %v32927_v9 = vpop.f32.mrb[21].mxu0 }
 0x508   :  { %v9116_v12 = vpop.f32.mrb[22].mxu0  ;;  %24256 = vmatpush3.bf16.msra.mxu0 %v26793_v0  ;;  %v26836_v0 = vld [vmem:[%s37686_s3 + $0x65c] ss:$28 sps:$4 sm:$0xff]  }
 0x509   :  { %18536 = vmatpush1.bf16.msra.mxu1 %v26789_v51  ;;  %v9117_v15 = vpop.f32.mrb[23].mxu0  ;;  %24257 = vmatprep.subr.bf16.mxu0 %v26797_v5  ;;  %v26833_v51 = vld [vmem:[%s37683_s1 + $0x1af0] ss:$100 sps:$4 sm:$0xff]   ;;  %v26842_v12 = vld [vmem:[%s37683_s1 + $0x22c0] ss:$100 sps:$4 sm:$0xff]  }
 0x50a   :  { %18537 = vmatprep.subr.bf16.mxu1 %v26796_v3  ;;  %v26837_v3 = vld [vmem:[%s37683_s1 + $0x21f8] ss:$100 sps:$4 sm:$0xff]  }
 0x50b   :  { %v26834_v5 = vld [vmem:[%s37686_s3 + $0x658] ss:$28 sps:$4 sm:$0xff]  }
 0x50c   :  { %24258 = vmatpush3.bf16.msra.mxu0 %v26798_v45  ;;  %v26841_v45 = vld [vmem:[%s37686_s3 + $0x694] ss:$28 sps:$4 sm:$0xff]  }
 0x50d   :  { %18538 = vmatpush1.bf16.msra.mxu1 %v26794_v26  ;;  %24259 = vmatprep.subr.bf16.mxu0 %v26802_v10  ;;  %v26838_v26 = vld [vmem:[%s37683_s1 + $0x1bb8] ss:$100 sps:$4 sm:$0xff]   ;;  %v26839_v10 = vld [vmem:[%s37686_s3 + $0x690] ss:$28 sps:$4 sm:$0xff]  }
 0x50e   :  { %18539 = vmatprep.subr.bf16.mxu1 %v26801_v13  ;;  %v33042_v13 = vld [vmem:[%s37685_s2] sm:$0xff] }
 0x510   :  { %24260 = vmatpush3.bf16.msra.mxu0 %v26803_v28  ;;  %v26846_v28 = vld [vmem:[%s37686_s3 + $0x6cc] ss:$28 sps:$4 sm:$0xff]  }
 0x511   :  { %18540 = vmatpush1.bf16.msra.mxu1 %v26799_v18  ;;  %24261 = vmatprep.subr.bf16.mxu0 %v26807_v34  ;;  %v26843_v18 = vld [vmem:[%s37683_s1 + $0x1c80] ss:$100 sps:$4 sm:$0xff]  }
 0x512   :  { %18541 = vmatprep.subr.bf16.mxu1 %v26806_v33  ;;  %v26847_v33 = vld [vmem:[%s37683_s1 + $0x2388] ss:$100 sps:$4 sm:$0xff]  }
 0x514   :  { %24262 = vmatpush3.bf16.msra.mxu0 %v26808_v36  ;;  %v26848_v36 = vld [vmem:[%s37683_s1 + $0x1d48] ss:$100 sps:$4 sm:$0xff]  }
 0x515   :  { %18542 = vmatpush1.bf16.msra.mxu1 %v26804_v35  ;;  %24263 = vmatprep.subr.bf16.mxu0 %v26812_v38  ;;  %v26844_v35 = vld [vmem:[%s37686_s3 + $0x6c8] ss:$28 sps:$4 sm:$0xff]  }
 0x516   :  { %18543 = vmatprep.subr.bf16.mxu1 %v26811_v37  ;;  %v9773_v37 = vmax.f32 %v30450_v2, 0.0  ;;  %v26851_v38 = vld [vmem:[%s37686_s3 + $0x704] ss:$28 sps:$4 sm:$0xff]   ;;  %v26853_v2 = vld [vmem:[%s37683_s1 + $0x1e10] ss:$100 sps:$4 sm:$0xff]  }
 0x518   :  { %24264 = vmatpush3.bf16.msra.mxu0 %v26813_v43  ;;  %v26849_v43 = vld [vmem:[%s37686_s3 + $0x700] ss:$28 sps:$4 sm:$0xff]  }
 0x519   :  { %18544 = vmatpush1.bf16.msra.mxu1 %v26809_v41  ;;  %24265 = vmatprep.subr.bf16.mxu0 %v26817_v47  ;;  %v26856_v47 = vld [vmem:[%s37686_s3 + $0x73c] ss:$28 sps:$4 sm:$0xff]  }
 0x51a   :  { %18545 = vmatprep.subr.bf16.mxu1 %v26816_v53  ;;  %v33078_v53 = vpack.c.bf16 %v9773_v37, %v9773_v37  ;;  %v26900_v37 = vld [vmem:[%s37686_s3 + $0x15c] ss:$28 sps:$4 sm:$0xff]  }
 0x51c   :  { %24266 = vmatpush3.bf16.msra.mxu0 %v26818_v14  ;;  %v26857_v14 = vld [vmem:[%s37683_s1 + $0x2518] ss:$100 sps:$4 sm:$0xff]  }
 0x51d   :  { %18546 = vmatpush1.bf16.msra.mxu1 %v26814_v39  ;;  %24295 = vmatprep.subr.bf16.mxu0 %v26822_v25  ;;  %v26858_v25 = vld [vmem:[%s37683_s1 + $0x1ed8] ss:$100 sps:$4 sm:$0xff]  }
 0x51e   :  { %18547 = vmatprep.subr.bf16.mxu1 %v26821_v4  ;;  %v26854_v4 = vld [vmem:[%s37686_s3 + $0x738] ss:$28 sps:$4 sm:$0xff]  }
 0x51f   :  { %9644 = vmatmul.mubr.bf16.vlgmr.msra.gmra.mrb[28].mxu0 %v29155_v11  ;;  %v26829_v11 = vld [vmem:[%s37686_s3 + $0x620] ss:$28 sps:$4 sm:$0xff]  }
 0x520   :  { %24296 = vmatpush3.bf16.msra.mxu0 %v26823_v16  ;;  %9723 = vmatprep.mubr.bf16.mxu0 %v29247_v40  ;;  %v33025_v40 = vsub.s32 5, %v30181_v8  ;;  %v26864_v16 = vld [vmem:[%s37686_s3 + $0xc] ss:$28 sps:$4 sm:$0xff]  }
 0x521   :  { %18548 = vmatpush1.bf16.msra.mxu1 %v26819_v50  ;;  %24297 = vmatprep.subr.bf16.mxu0 %v26827_v58  ;;  %v26861_v50 = vld [vmem:[%s37686_s3 + $0x774] ss:$28 sps:$4 sm:$0xff]   ;;  %v26862_v58 = vld [vmem:[%s37686_s3 + $0x8] ss:$28 sps:$4 sm:$0xff]  }
 0x522   :  { %18549 = vmatprep.subr.bf16.mxu1 %v26826_v55  ;;  %v1339_v15 = vrot.slane %v33042_v13, %v33025_v40  ;;  %v26859_v55 = vld [vmem:[%s37686_s3 + $0x770] ss:$28 sps:$4 sm:$0xff]  }
 0x524   :  { %24298 = vmatpush3.bf16.msra.mxu0 %v26828_v62  ;;  %v24615_v34 = vadd.f32 %v31063_v24, %v1339_v15  ;;  %v26852_v24 = vld [vmem:[%s37683_s1 + $0x2450] ss:$100 sps:$4 sm:$0xff]   ;;  %v26870_v62 = vld [vmem:[%s37686_s3 + $0x44] ss:$28 sps:$4 sm:$0xff]   ;;  %v26888_v15 = vld [vmem:[%s37686_s3 + $0xec] ss:$28 sps:$4 sm:$0xff]  }
 0x525   :  { %18550 = vmatpush1.bf16.msra.mxu1 %v26824_v61  ;;  %24299 = vmatprep.subr.bf16.mxu0 %v26832_v63  ;;  %v26867_v61 = vld [vmem:[%s37686_s3 + $0x7ac] ss:$28 sps:$4 sm:$0xff]   ;;  %v26868_v63 = vld [vmem:[%s37686_s3 + $0x40] ss:$28 sps:$4 sm:$0xff]  }
 0x526   :  { %18551 = vmatprep.subr.bf16.mxu1 %v26831_v19  ;;  %v9776_v41 = vmax.f32 %v24615_v34, 0.0  ;;  %v26865_v19 = vld [vmem:[%s37686_s3 + $0x7a8] ss:$28 sps:$4 sm:$0xff]  }
 0x527   :  { %v26889_v34 = vld [vmem:[%s37686_s3 + $0x888] ss:$28 sps:$4 sm:$0xff]  }
 0x528   :  { %24300 = vmatpush3.bf16.msra.mxu0 %v26833_v51  ;;  %v33083_v39 = vpack.c.bf16 %v9776_v41, %v9776_v41  ;;  %v26876_v51 = vld [vmem:[%s37686_s3 + $0x7c] ss:$28 sps:$4 sm:$0xff]  }
 0x529   :  { %18552 = vmatpush1.bf16.msra.mxu1 %v26829_v11  ;;  %24301 = vmatprep.subr.bf16.mxu0 %v26837_v3  ;;  %v26873_v11 = vld [vmem:[%s37686_s3 + $0x7e4] ss:$28 sps:$4 sm:$0xff]   ;;  %v26879_v3 = vld [vmem:[%s37686_s3 + $0x81c] ss:$28 sps:$4 sm:$0xff]  }
 0x52a   :  { %18553 = vmatprep.subr.bf16.mxu1 %v26836_v0  ;;  %v26874_v0 = vld [vmem:[%s37686_s3 + $0x78] ss:$28 sps:$4 sm:$0xff]  }
 0x52b   :  { %v26903_v41 = vld [vmem:[%s37686_s3 + $0x8fc] ss:$28 sps:$4 sm:$0xff]  }
 0x52c   :  { %24302 = vmatpush3.bf16.msra.mxu0 %v26838_v26  ;;  %v26877_v26 = vld [vmem:[%s37686_s3 + $0x818] ss:$28 sps:$4 sm:$0xff]  }
 0x52d   :  { %18554 = vmatpush1.bf16.msra.mxu1 %v26834_v5  ;;  %24303 = vmatprep.subr.bf16.mxu0 %v26842_v12  ;;  %v26882_v5 = vld [vmem:[%s37686_s3 + $0xb4] ss:$28 sps:$4 sm:$0xff]  }
 0x52e   :  { %18555 = vmatprep.subr.bf16.mxu1 %v26841_v45  ;;  %v26880_v45 = vld [vmem:[%s37686_s3 + $0xb0] ss:$28 sps:$4 sm:$0xff]  }
 0x52f   :  { %v26885_v12 = vld [vmem:[%s37686_s3 + $0x854] ss:$28 sps:$4 sm:$0xff]  }
 0x530   :  { %24304 = vmatpush3.bf16.msra.mxu0 %v26843_v18  ;;  %v26886_v18 = vld [vmem:[%s37686_s3 + $0xe8] ss:$28 sps:$4 sm:$0xff]  }
 0x531   :  { %18556 = vmatpush1.bf16.msra.mxu1 %v26839_v10  ;;  %24305 = vmatprep.subr.bf16.mxu0 %v26847_v33  ;;  %v26883_v10 = vld [vmem:[%s37686_s3 + $0x850] ss:$28 sps:$4 sm:$0xff]   ;;  %v26894_v33 = vld [vmem:[%s37686_s3 + $0x124] ss:$28 sps:$4 sm:$0xff]  }
 0x532   :  { %18557 = vmatprep.subr.bf16.mxu1 %v26846_v28  ;;  %v26891_v28 = vld [vmem:[%s37686_s3 + $0x88c] ss:$28 sps:$4 sm:$0xff]  }
 0x534   :  { %24306 = vmatpush3.bf16.msra.mxu0 %v26848_v36  ;;  %v26897_v36 = vld [vmem:[%s37686_s3 + $0x8c4] ss:$28 sps:$4 sm:$0xff]  }
 0x535   :  { %18558 = vmatpush1.bf16.msra.mxu1 %v26844_v35  ;;  %24307 = vmatprep.subr.bf16.mxu0 %v26852_v24  ;;  %v26892_v35 = vld [vmem:[%s37686_s3 + $0x120] ss:$28 sps:$4 sm:$0xff]   ;;  %v26898_v24 = vld [vmem:[%s37686_s3 + $0x158] ss:$28 sps:$4 sm:$0xff]  }
 0x536   :  { %18568 = vmatprep.subr.bf16.mxu1 %v26851_v38  ;;  %v26895_v38 = vld [vmem:[%s37686_s3 + $0x8c0] ss:$28 sps:$4 sm:$0xff]  }
 0x538   :  { %18560 = vmatmul.mubr.bf16.vlgmr.msra.gmra.mrb[36].mxu1 %v33078_v53  ;;  %24308 = vmatpush3.bf16.msra.mxu0 %v26853_v2  ;;  %v26901_v2 = vld [vmem:[%s37686_s3 + $0x8f8] ss:$28 sps:$4 sm:$0xff]  }
 0x539   :  { %18569 = vmatpush1.bf16.msra.mxu1 %v26849_v43  ;;  %18600 = vmatprep.mubr.bf16.mxu1 %v33083_v39  ;;  %v26906_v43 = vld [vmem:[%s37686_s3 + $0x194] ss:$28 sps:$4 sm:$0xff]  }
 0x53a   :  { %18570 = vmatprep.subr.bf16.mxu1 %v26856_v47  ;;  %24309 = vmatprep.subr.bf16.mxu0 %v26857_v14  ;;  %v26904_v47 = vld [vmem:[%s37686_s3 + $0x190] ss:$28 sps:$4 sm:$0xff]  }
 0x53b   :  { %v26909_v14 = vld [vmem:[%s37686_s3 + $0x934] ss:$28 sps:$4 sm:$0xff]  }
 0x53c   :  { %24310 = vmatpush3.bf16.msra.mxu0 %v26858_v25  ;;  %v26907_v25 = vld [vmem:[%s37686_s3 + $0x930] ss:$28 sps:$4 sm:$0xff]  }
 0x53d   :  { %18571 = vmatpush1.bf16.msra.mxu1 %v26854_v4  ;;  %19019 = vmatprep.subr.bf16.mxu0 %v26864_v16  ;;  %v26912_v4 = vld [vmem:[%s37686_s3 + $0x1cc] ss:$28 sps:$4 sm:$0xff]  }
 0x53e   :  { %18572 = vmatprep.subr.bf16.mxu1 %v26861_v50  ;;  %v26910_v50 = vld [vmem:[%s37686_s3 + $0x1c8] ss:$28 sps:$4 sm:$0xff]  }
 0x53f   :  { %9724 = vmatmul.mubr.bf16.vlgmr.msra.gmra.mrb[32].mxu0 %v29376_v23  ;;  %v26871_v23 = vld [vmem:[%s37686_s3 + $0x7e0] ss:$28 sps:$4 sm:$0xff]   ;;  %v26915_v16 = vld [vmem:[%s37686_s3 + $0x96c] ss:$28 sps:$4 sm:$0xff]  }
 0x540   :  { %19020 = vmatpush1.bf16.msra.mxu0 %v26862_v58  ;;  %19051 = vmatprep.mubr.bf16.mxu0 %v32668_v44  ;;  %v26913_v58 = vld [vmem:[%s37686_s3 + $0x968] ss:$28 sps:$4 sm:$0xff]  }
 0x541   :  { %18573 = vmatpush1.bf16.msra.mxu1 %v26859_v55  ;;  %19021 = vmatprep.subr.bf16.mxu0 %v26870_v62  ;;  %v26918_v55 = vld [vmem:[%s37686_s3 + $0x204] ss:$28 sps:$4 sm:$0xff]  }
 0x542   :  { %18574 = vmatprep.subr.bf16.mxu1 %v26867_v61  ;;  %v26916_v61 = vld [vmem:[%s37686_s3 + $0x200] ss:$28 sps:$4 sm:$0xff]  }
 0x543   :  { %v26921_v62 = vld [vmem:[%s37686_s3 + $0x9a4] ss:$28 sps:$4 sm:$0xff]  }
 0x544   :  { %19022 = vmatpush1.bf16.msra.mxu0 %v26868_v63 }
 0x545   :  { %18575 = vmatpush1.bf16.msra.mxu1 %v26865_v19  ;;  %19023 = vmatprep.subr.bf16.mxu0 %v26876_v51  ;;  %v26924_v19 = vld [vmem:[%s37686_s3 + $0x23c] ss:$28 sps:$4 sm:$0xff]  }
 0x546   :  { %18576 = vmatprep.subr.bf16.mxu1 %v26873_v11  ;;  %v26919_v51 = vld [vmem:[%s37686_s3 + $0x9a0] ss:$28 sps:$4 sm:$0xff]  }
 0x548   :  { %19024 = vmatpush1.bf16.msra.mxu0 %v26874_v0  ;;  %v26922_v0 = vld [vmem:[%s37686_s3 + $0x238] ss:$28 sps:$4 sm:$0xff]  }
 0x549   :  { %18577 = vmatpush1.bf16.msra.mxu1 %v26871_v23  ;;  %19025 = vmatprep.subr.bf16.mxu0 %v26882_v5 }
 0x54a   :  { %18578 = vmatprep.subr.bf16.mxu1 %v26879_v3  ;;  %v33235_v3 = vsub.s32 4, %v30181_v8 }
 0x54c   :  { %19026 = vmatpush1.bf16.msra.mxu0 %v26880_v45  ;;  %v26930_v45 = vld [vmem:[%s37686_s3 + $0x274] ss:$28 sps:$4 sm:$0xff]  }
 0x54d   :  { %18579 = vmatpush1.bf16.msra.mxu1 %v26877_v26  ;;  %19027 = vmatprep.subr.bf16.mxu0 %v26888_v15  ;;  %v26927_v26 = vld [vmem:[%s37686_s3 + $0x9dc] ss:$28 sps:$4 sm:$0xff]  }
 0x54e   :  { %18580 = vmatprep.subr.bf16.mxu1 %v26885_v12  ;;  %v33244_v12 = vsub.s32 7, %v30181_v8  ;;  %v26925_v15 = vld [vmem:[%s37686_s3 + $0x9d8] ss:$28 sps:$4 sm:$0xff]  }
 0x550   :  { %19028 = vmatpush1.bf16.msra.mxu0 %v26886_v18  ;;  %v1335_v18 = vrot.slane %v33042_v13, %v33235_v3 }
 0x551   :  { %18581 = vmatpush1.bf16.msra.mxu1 %v26883_v10  ;;  %19029 = vmatprep.subr.bf16.mxu0 %v26894_v33  ;;  %v26928_v10 = vld [vmem:[%s37686_s3 + $0x270] ss:$28 sps:$4 sm:$0xff]  }
 0x552   :  { %18582 = vmatprep.subr.bf16.mxu1 %v26891_v28  ;;  %v26933_v28 = vld [vmem:[%s37686_s3 + $0xa14] ss:$28 sps:$4 sm:$0xff]   ;;  %v26936_v33 = vld [vmem:[%s37686_s3 + $0x2ac] ss:$28 sps:$4 sm:$0xff]  }
 0x554   :  { %19030 = vmatpush1.bf16.msra.mxu0 %v26892_v35  ;;  %v26931_v35 = vld [vmem:[%s37686_s3 + $0xa10] ss:$28 sps:$4 sm:$0xff]  }
 0x555   :  { %18583 = vmatpush1.bf16.msra.mxu1 %v26889_v34  ;;  %19031 = vmatprep.subr.bf16.mxu0 %v26900_v37  ;;  %v1347_v34 = vrot.slane %v33042_v13, %v33244_v12  ;;  %v24614_v37 = vadd.f32 %v31058_v21, %v1335_v18  ;;  %v26942_v13 = vld [vmem:[%s37686_s3 + $0x2e4] ss:$28 sps:$4 sm:$0xff]  }
 0x556   :  { %18584 = vmatprep.subr.bf16.mxu1 %v26897_v36  ;;  %v26934_v36 = vld [vmem:[%s37686_s3 + $0x2a8] ss:$28 sps:$4 sm:$0xff]   ;;  %v26940_v21 = vld [vmem:[%s37686_s3 + $0x2e0] ss:$28 sps:$4 sm:$0xff]  }
 0x558   :  { %19032 = vmatpush1.bf16.msra.mxu0 %v26898_v24  ;;  %v24617_v24 = vadd.f32 %v30723_v57, %v1347_v34  ;;  %v26948_v57 = vld [vmem:[%s37686_s3 + $0x31c] ss:$28 sps:$4 sm:$0xff]  }
 0x559   :  { %18585 = vmatpush1.bf16.msra.mxu1 %v26895_v38  ;;  %19033 = vmatprep.subr.bf16.mxu0 %v26906_v43  ;;  %v26939_v38 = vld [vmem:[%s37686_s3 + $0xa4c] ss:$28 sps:$4 sm:$0xff]   ;;  %v9775_v43 = vmax.f32 %v24614_v37, 0.0 }
 0x55a   :  { %18586 = vmatprep.subr.bf16.mxu1 %v26903_v41  ;;  %v26937_v41 = vld [vmem:[%s37686_s3 + $0xa48] ss:$28 sps:$4 sm:$0xff]  }
 0x55c   :  { %19034 = vmatpush1.bf16.msra.mxu0 %v26904_v47  ;;  %v9778_v47 = vmax.f32 %v24617_v24, 0.0  ;;  %v26973_v24 = vld [vmem:[%s37686_s3 + $0xb98] ss:$28 sps:$4 sm:$0xff]  }
 0x55d   :  { %18587 = vmatpush1.bf16.msra.mxu1 %v26901_v2  ;;  %19035 = vmatprep.subr.bf16.mxu0 %v26912_v4  ;;  %v26945_v2 = vld [vmem:[%s37686_s3 + $0xa84] ss:$28 sps:$4 sm:$0xff]   ;;  %v26946_v4 = vld [vmem:[%s37686_s3 + $0x318] ss:$28 sps:$4 sm:$0xff]  }
 0x55e   :  { %18588 = vmatprep.subr.bf16.mxu1 %v26909_v14  ;;  %v26943_v14 = vld [vmem:[%s37686_s3 + $0xa80] ss:$28 sps:$4 sm:$0xff]  }
 0x560   :  { %19036 = vmatpush1.bf16.msra.mxu0 %v26910_v50  ;;  %v26951_v50 = vld [vmem:[%s37686_s3 + $0xabc] ss:$28 sps:$4 sm:$0xff]  }
 0x561   :  { %18589 = vmatpush1.bf16.msra.mxu1 %v26907_v25  ;;  %19037 = vmatprep.subr.bf16.mxu0 %v26918_v55  ;;  %v33294_v25 = vpack.c.bf16 %v9775_v43, %v9775_v43  ;;  %v26954_v55 = vld [vmem:[%s37686_s3 + $0x354] ss:$28 sps:$4 sm:$0xff]   ;;  %v26984_v43 = vld [vmem:[%s37686_s3 + $0x46c] ss:$28 sps:$4 sm:$0xff]  }
 0x562   :  { %18590 = vmatprep.subr.bf16.mxu1 %v26915_v16  ;;  %v33299_v16 = vpack.c.bf16 %v9778_v47, %v9778_v47  ;;  %v26979_v47 = vld [vmem:[%s37686_s3 + $0xbd0] ss:$28 sps:$4 sm:$0xff]  }
 0x563   :  { %v33224_v63 = vpop.f32.mrb[24].mxu1 }
 0x564   :  { %v33226_v11 = vpop.f32.mrb[25].mxu1  ;;  %19038 = vmatpush1.bf16.msra.mxu0 %v26916_v61  ;;  %v26952_v61 = vld [vmem:[%s37686_s3 + $0x350] ss:$28 sps:$4 sm:$0xff]  }
 0x565   :  { %18591 = vmatpush1.bf16.msra.mxu1 %v26913_v58  ;;  %v9608_v23 = vpop.f32.mrb[26].mxu1  ;;  %19039 = vmatprep.subr.bf16.mxu0 %v26924_v19  ;;  %v26949_v58 = vld [vmem:[%s37686_s3 + $0xab8] ss:$28 sps:$4 sm:$0xff]   ;;  %v26960_v19 = vld [vmem:[%s37686_s3 + $0x38c] ss:$28 sps:$4 sm:$0xff]  }
 0x566   :  { %v9609_v5 = vpop.f32.mrb[27].mxu1  ;;  %18592 = vmatprep.subr.bf16.mxu1 %v26921_v62  ;;  %v26957_v62 = vld [vmem:[%s37686_s3 + $0xaf4] ss:$28 sps:$4 sm:$0xff]   ;;  %v26958_v23 = vld [vmem:[%s37686_s3 + $0x388] ss:$28 sps:$4 sm:$0xff]  }
 0x567   :  { %v26966_v5 = vld [vmem:[%s37686_s3 + $0x3c4] ss:$28 sps:$4 sm:$0xff]  }
 0x568   :  { %19040 = vmatpush1.bf16.msra.mxu0 %v26922_v0  ;;  %v26963_v0 = vld [vmem:[%s37686_s3 + $0xb2c] ss:$28 sps:$4 sm:$0xff]  }
 0x569   :  { %18593 = vmatpush1.bf16.msra.mxu1 %v26919_v51  ;;  %19041 = vmatprep.subr.bf16.mxu0 %v26930_v45  ;;  %v26955_v51 = vld [vmem:[%s37686_s3 + $0xaf0] ss:$28 sps:$4 sm:$0xff]   ;;  %v26964_v45 = vld [vmem:[%s37686_s3 + $0x3c0] ss:$28 sps:$4 sm:$0xff]  }
 0x56a   :  { %18594 = vmatprep.subr.bf16.mxu1 %v26927_v26  ;;  %v26961_v26 = vld [vmem:[%s37686_s3 + $0xb28] ss:$28 sps:$4 sm:$0xff]  }
 0x56c   :  { %19042 = vmatpush1.bf16.msra.mxu0 %v26928_v10  ;;  %v26972_v10 = vld [vmem:[%s37686_s3 + $0x3fc] ss:$28 sps:$4 sm:$0xff]  }
 0x56d   :  { %18595 = vmatpush1.bf16.msra.mxu1 %v26925_v15  ;;  %19043 = vmatprep.subr.bf16.mxu0 %v26936_v33  ;;  %v26969_v15 = vld [vmem:[%s37686_s3 + $0xb64] ss:$28 sps:$4 sm:$0xff]  }
 0x56e   :  { %18596 = vmatprep.subr.bf16.mxu1 %v26933_v28  ;;  %v26967_v33 = vld [vmem:[%s37686_s3 + $0xb60] ss:$28 sps:$4 sm:$0xff]  }
 0x570   :  { %19044 = vmatpush1.bf16.msra.mxu0 %v26934_v36  ;;  %v26970_v36 = vld [vmem:[%s37686_s3 + $0x3f8] ss:$28 sps:$4 sm:$0xff]  }
 0x571   :  { %18597 = vmatpush1.bf16.msra.mxu1 %v26931_v35  ;;  %19045 = vmatprep.subr.bf16.mxu0 %v26942_v13  ;;  %v26978_v13 = vld [vmem:[%s37686_s3 + $0x434] ss:$28 sps:$4 sm:$0xff]  }
 0x572   :  { %18598 = vmatprep.subr.bf16.mxu1 %v26939_v38  ;;  %v26975_v38 = vld [vmem:[%s37686_s3 + $0xb9c] ss:$28 sps:$4 sm:$0xff]  }
 0x574   :  { %19046 = vmatpush1.bf16.msra.mxu0 %v26940_v21  ;;  %v26981_v21 = vld [vmem:[%s37686_s3 + $0xbd4] ss:$28 sps:$4 sm:$0xff]  }
 0x575   :  { %18599 = vmatpush1.bf16.msra.mxu1 %v26937_v41  ;;  %19047 = vmatprep.subr.bf16.mxu0 %v26948_v57  ;;  %v26976_v41 = vld [vmem:[%s37686_s3 + $0x430] ss:$28 sps:$4 sm:$0xff]  }
 0x576   :  { %18609 = vmatprep.subr.bf16.mxu1 %v26945_v2 }
 0x578   :  { %18601 = vmatmul.mubr.bf16.vlgmr.msra.gmra.mrb[36].mxu1 %v33294_v25  ;;  %19048 = vmatpush1.bf16.msra.mxu0 %v26946_v4  ;;  %v26982_v4 = vld [vmem:[%s37686_s3 + $0x468] ss:$28 sps:$4 sm:$0xff]  }
 0x579   :  { %18610 = vmatpush1.bf16.msra.mxu1 %v26943_v14  ;;  %18641 = vmatprep.mubr.bf16.mxu1 %v33299_v16 }
 0x57a   :  { %18611 = vmatprep.subr.bf16.mxu1 %v26951_v50  ;;  %19049 = vmatprep.subr.bf16.mxu0 %v26954_v55  ;;  %v26987_v55 = vld [vmem:[%s37686_s3 + $0xc0c] ss:$28 sps:$4 sm:$0xff]  }
 0x57c   :  { %19050 = vmatpush1.bf16.msra.mxu0 %v26952_v61  ;;  %v26985_v61 = vld [vmem:[%s37686_s3 + $0xc08] ss:$28 sps:$4 sm:$0xff]  }
 0x57d   :  { %18612 = vmatpush1.bf16.msra.mxu1 %v26949_v58  ;;  %19060 = vmatprep.subr.bf16.mxu0 %v26960_v19  ;;  %v26990_v58 = vld [vmem:[%s37686_s3 + $0x4a4] ss:$28 sps:$4 sm:$0xff]  }
 0x57e   :  { %18613 = vmatprep.subr.bf16.mxu1 %v26957_v62  ;;  %v26988_v62 = vld [vmem:[%s37686_s3 + $0x4a0] ss:$28 sps:$4 sm:$0xff]  }
 0x57f   :  { %19052 = vmatmul.mubr.bf16.vlgmr.msra.gmra.mrb[36].mxu0 %v32867_v54  ;;  %v26993_v19 = vld [vmem:[%s37686_s3 + $0xc44] ss:$28 sps:$4 sm:$0xff]  }
 0x580   :  { %19061 = vmatpush1.bf16.msra.mxu0 %v26958_v23  ;;  %19092 = vmatprep.mubr.bf16.mxu0 %v32872_v49  ;;  %v26991_v23 = vld [vmem:[%s37686_s3 + $0xc40] ss:$28 sps:$4 sm:$0xff]  }
 0x581   :  { %18614 = vmatpush1.bf16.msra.mxu1 %v26955_v51  ;;  %19062 = vmatprep.subr.bf16.mxu0 %v26966_v5  ;;  %v26996_v51 = vld [vmem:[%s37686_s3 + $0x4dc] ss:$28 sps:$4 sm:$0xff]  }
 0x582   :  { %18615 = vmatprep.subr.bf16.mxu1 %v26963_v0  ;;  %v26994_v0 = vld [vmem:[%s37686_s3 + $0x4d8] ss:$28 sps:$4 sm:$0xff]  }
 0x583   :  { %v24289_v18 = vpop.f32.mrb[28].mxu1  ;;  %v26999_v5 = vld [vmem:[%s37686_s3 + $0xc7c] ss:$28 sps:$4 sm:$0xff]  }
 0x584   :  { %v24290_v28 = vpop.f32.mrb[29].mxu1  ;;  %19063 = vmatpush1.bf16.msra.mxu0 %v26964_v45  ;;  %v26997_v45 = vld [vmem:[%s37686_s3 + $0xc78] ss:$28 sps:$4 sm:$0xff]  }
 0x585   :  { %v33347_v34 = vadd.f32 %v24290_v28, %v24289_v18  ;;  %18616 = vmatpush1.bf16.msra.mxu1 %v26961_v26  ;;  %v24292_v35 = vpop.f32.mrb[30].mxu1  ;;  %19064 = vmatprep.subr.bf16.mxu0 %v26972_v10  ;;  %v27002_v26 = vld [vmem:[%s37686_s3 + $0x514] ss:$28 sps:$4 sm:$0xff]   ;;  %v27008_v18 = vld [vmem:[%s37686_s3 + $0x54c] ss:$28 sps:$4 sm:$0xff]  }
 0x586   :  { %v24293_v37 = vpop.f32.mrb[31].mxu1  ;;  %18617 = vmatprep.subr.bf16.mxu1 %v26969_v15  ;;  %v27000_v15 = vld [vmem:[%s37686_s3 + $0x510] ss:$28 sps:$4 sm:$0xff]  }
 0x587   :  { %v27005_v10 = vld [vmem:[%s37686_s3 + $0xcb4] ss:$28 sps:$4 sm:$0xff]   ;;  %v27011_v35 = vld [vmem:[%s37686_s3 + $0xcec] ss:$28 sps:$4 sm:$0xff]  }
 0x588   :  { %19065 = vmatpush1.bf16.msra.mxu0 %v26970_v36  ;;  %v27003_v28 = vld [vmem:[%s37686_s3 + $0xcb0] ss:$28 sps:$4 sm:$0xff]   ;;  %v27014_v36 = vld [vmem:[%s37686_s3 + $0x584] ss:$28 sps:$4 sm:$0xff]  }
 0x589   :  { %18618 = vmatpush1.bf16.msra.mxu1 %v26967_v33  ;;  %19066 = vmatprep.subr.bf16.mxu0 %v26978_v13  ;;  %v27006_v33 = vld [vmem:[%s37686_s3 + $0x548] ss:$28 sps:$4 sm:$0xff]  }
 0x58a   :  { %18619 = vmatprep.subr.bf16.mxu1 %v26975_v38  ;;  %v27009_v37 = vld [vmem:[%s37686_s3 + $0xce8] ss:$28 sps:$4 sm:$0xff]   ;;  %v27012_v38 = vld [vmem:[%s37686_s3 + $0x580] ss:$28 sps:$4 sm:$0xff]  }
 0x58b   :  { %v33370_v2 = vpop.f32.mrb[32].mxu1  ;;  %v27017_v13 = vld [vmem:[%s37686_s3 + $0xd24] ss:$28 sps:$4 sm:$0xff]  }
 0x58c   :  { %v24592_v57 = vpop.f32.mrb[33].mxu1  ;;  %19067 = vmatpush1.bf16.msra.mxu0 %v26976_v41  ;;  %v27015_v41 = vld [vmem:[%s37686_s3 + $0xd20] ss:$28 sps:$4 sm:$0xff]  }
 0x58d   :  { %18620 = vmatpush1.bf16.msra.mxu1 %v26973_v24  ;;  %v9768_v14 = vpop.f32.mrb[34].mxu1  ;;  %19068 = vmatprep.subr.bf16.mxu0 %v26984_v43  ;;  %v27020_v24 = vld [vmem:[%s37686_s3 + $0x5bc] ss:$28 sps:$4 sm:$0xff]   ;;  %v33451_v43 = vsub.s32 6, %v30181_v8 }
 0x58e   :  { %v24593_v50 = vpop.f32.mrb[35].mxu1  ;;  %18621 = vmatprep.subr.bf16.mxu1 %v26981_v21  ;;  %v27018_v21 = vld [vmem:[%s37686_s3 + $0x5b8] ss:$28 sps:$4 sm:$0xff]   ;;  %v33462_v14 = vld [vmem:[%s37685_s2 + $0x8] sm:$0xff] }
 0x58f   :  { %v27023_v57 = vld [vmem:[%s37686_s3 + $0xd5c] ss:$28 sps:$4 sm:$0xff]   ;;  %v28881_v50 = vld [vmem:[%s37685_s2] sm:$0xff] }
 0x590   :  { %19069 = vmatpush1.bf16.msra.mxu0 %v26982_v4  ;;  %v27021_v8 = vld [vmem:[%s37686_s3 + $0xd58] ss:$28 sps:$4 sm:$0xff]   ;;  %v27024_v4 = vld [vmem:[%s37686_s3 + $0x5f0] ss:$28 sps:$4 sm:$0xff]  }
 0x591   :  { %18622 = vmatpush1.bf16.msra.mxu1 %v26979_v47  ;;  %19070 = vmatprep.subr.bf16.mxu0 %v26990_v58  ;;  %v27026_v47 = vld [vmem:[%s37686_s3 + $0x5f4] ss:$28 sps:$4 sm:$0xff]  }
 0x592   :  { %18623 = vmatprep.subr.bf16.mxu1 %v26987_v55  ;;  %v1343_v55 = vrot.slane %v28881_v50, %v33451_v43  ;;  %v27029_v58 = vld [vmem:[%s37686_s3 + $0xd94] ss:$28 sps:$4 sm:$0xff]   ;;  %v27057_v50 = vld [vmem:[%s37686_s3 + $0xea8] ss:$28 sps:$4 sm:$0xff]  }
 0x594   :  { %19071 = vmatpush1.bf16.msra.mxu0 %v26988_v62  ;;  %v1355_v62 = vrot.slane %v33462_v14, %v30210_v20 }
 0x595   :  { %18624 = vmatpush1.bf16.msra.mxu1 %v26985_v61  ;;  %19072 = vmatprep.subr.bf16.mxu0 %v26996_v51  ;;  %v27032_v61 = vld [vmem:[%s37686_s3 + $0x62c] ss:$28 sps:$4 sm:$0xff]  }
 0x596   :  { %18625 = vmatprep.subr.bf16.mxu1 %v26993_v19  ;;  %v27027_v19 = vld [vmem:[%s37686_s3 + $0xd90] ss:$28 sps:$4 sm:$0xff]   ;;  %v27030_v51 = vld [vmem:[%s37686_s3 + $0x628] ss:$28 sps:$4 sm:$0xff]  }
 0x598   :  { %19073 = vmatpush1.bf16.msra.mxu0 %v26994_v0  ;;  %v27035_v0 = vld [vmem:[%s37686_s3 + $0xdcc] ss:$28 sps:$4 sm:$0xff]  }
 0x599   :  { %18626 = vmatpush1.bf16.msra.mxu1 %v26991_v23  ;;  %19074 = vmatprep.subr.bf16.mxu0 %v27002_v26  ;;  %v24616_v23 = vadd.f32 %v30721_v56, %v1343_v55  ;;  %v24619_v26 = vadd.f32 %v31679_v7, %v1355_v62  ;;  %v27036_v56 = vld [vmem:[%s37686_s3 + $0x660] ss:$28 sps:$4 sm:$0xff]  }
 0x59a   :  { %18627 = vmatprep.subr.bf16.mxu1 %v26999_v5  ;;  %v27038_v5 = vld [vmem:[%s37686_s3 + $0x664] ss:$28 sps:$4 sm:$0xff]   ;;  %v27044_v7 = vld [vmem:[%s37686_s3 + $0x69c] ss:$28 sps:$4 sm:$0xff]  }
 0x59b   :  { %v27060_v55 = vld [vmem:[%s37686_s3 + $0x740] ss:$28 sps:$4 sm:$0xff]  }
 0x59c   :  { %19075 = vmatpush1.bf16.msra.mxu0 %v27000_v15  ;;  %v9777_v15 = vmax.f32 %v24616_v23, 0.0  ;;  %v27063_v62 = vld [vmem:[%s37686_s3 + $0xee0] ss:$28 sps:$4 sm:$0xff]   ;;  %v27074_v23 = vld [vmem:[%s37686_s3 + $0x7b4] ss:$28 sps:$4 sm:$0xff]  }
 0x59d   :  { %18628 = vmatpush1.bf16.msra.mxu1 %v26997_v45  ;;  %19076 = vmatprep.subr.bf16.mxu0 %v27008_v18  ;;  %v27033_v45 = vld [vmem:[%s37686_s3 + $0xdc8] ss:$28 sps:$4 sm:$0xff]   ;;  %v9780_v18 = vmax.f32 %v24619_v26, 0.0  ;;  %v27077_v26 = vld [vmem:[%s37686_s3 + $0xf54] ss:$28 sps:$4 sm:$0xff]  }
 0x59e   :  { %18629 = vmatprep.subr.bf16.mxu1 %v27005_v10  ;;  %v27041_v10 = vld [vmem:[%s37686_s3 + $0xe04] ss:$28 sps:$4 sm:$0xff]  }
 0x5a0   :  { %19077 = vmatpush1.bf16.msra.mxu0 %v27006_v33  ;;  %v27042_v33 = vld [vmem:[%s37686_s3 + $0x698] ss:$28 sps:$4 sm:$0xff]  }
 0x5a1   :  { %18630 = vmatpush1.bf16.msra.mxu1 %v27003_v28  ;;  %19078 = vmatprep.subr.bf16.mxu0 %v27014_v36  ;;  %v27039_v28 = vld [vmem:[%s37686_s3 + $0xe00] ss:$28 sps:$4 sm:$0xff]  }
 0x5a2   :  { %18631 = vmatprep.subr.bf16.mxu1 %v27011_v35  ;;  %v33514_v35 = vpack.c.bf16 %v9777_v15, %v9777_v15  ;;  %v27047_v36 = vld [vmem:[%s37686_s3 + $0xe3c] ss:$28 sps:$4 sm:$0xff]   ;;  %v27078_v15 = vld [vmem:[%s37686_s3 + $0x7e8] ss:$28 sps:$4 sm:$0xff]  }
 0x5a4   :  { %19079 = vmatpush1.bf16.msra.mxu0 %v27012_v38  ;;  %v27050_v38 = vld [vmem:[%s37686_s3 + $0x6d4] ss:$28 sps:$4 sm:$0xff]  }
 0x5a5   :  { %18632 = vmatpush1.bf16.msra.mxu1 %v27009_v37  ;;  %19080 = vmatprep.subr.bf16.mxu0 %v27020_v24  ;;  %v33519_v37 = vpack.c.bf16 %v9780_v18, %v9780_v18  ;;  %v27048_v24 = vld [vmem:[%s37686_s3 + $0x6d0] ss:$28 sps:$4 sm:$0xff]   ;;  %v27081_v18 = vld [vmem:[%s37686_s3 + $0xf88] ss:$28 sps:$4 sm:$0xff]  }
 0x5a6   :  { %18633 = vmatprep.subr.bf16.mxu1 %v27017_v13  ;;  %v27045_v13 = vld [vmem:[%s37686_s3 + $0xe38] ss:$28 sps:$4 sm:$0xff]  }
 0x5a8   :  { %19081 = vmatpush1.bf16.msra.mxu0 %v27018_v21  ;;  %v27056_v21 = vld [vmem:[%s37686_s3 + $0x70c] ss:$28 sps:$4 sm:$0xff]  }
 0x5a9   :  { %18634 = vmatpush1.bf16.msra.mxu1 %v27015_v41  ;;  %19082 = vmatprep.subr.bf16.mxu0 %v27026_v47  ;;  %v27053_v41 = vld [vmem:[%s37686_s3 + $0xe74] ss:$28 sps:$4 sm:$0xff]   ;;  %v27054_v47 = vld [vmem:[%s37686_s3 + $0x708] ss:$28 sps:$4 sm:$0xff]  }
 0x5aa   :  { %18635 = vmatprep.subr.bf16.mxu1 %v27023_v57  ;;  %v27051_v57 = vld [vmem:[%s37686_s3 + $0xe70] ss:$28 sps:$4 sm:$0xff]  }
 0x5ac   :  { %19083 = vmatpush1.bf16.msra.mxu0 %v27024_v4  ;;  %v27062_v4 = vld [vmem:[%s37686_s3 + $0x744] ss:$28 sps:$4 sm:$0xff]  }
 0x5ad   :  { %18636 = vmatpush1.bf16.msra.mxu1 %v27021_v8  ;;  %19084 = vmatprep.subr.bf16.mxu0 %v27032_v61  ;;  %v27059_v8 = vld [vmem:[%s37686_s3 + $0xeac] ss:$28 sps:$4 sm:$0xff]   ;;  %v27068_v61 = vld [vmem:[%s37686_s3 + $0x77c] ss:$28 sps:$4 sm:$0xff]  }
 0x5ae   :  { %18637 = vmatprep.subr.bf16.mxu1 %v27029_v58  ;;  %v27065_v58 = vld [vmem:[%s37686_s3 + $0xee4] ss:$28 sps:$4 sm:$0xff]  }
 0x5b0   :  { %19085 = vmatpush1.bf16.msra.mxu0 %v27030_v51  ;;  %v27071_v51 = vld [vmem:[%s37686_s3 + $0xf1c] ss:$28 sps:$4 sm:$0xff]  }
 0x5b1   :  { %18638 = vmatpush1.bf16.msra.mxu1 %v27027_v19  ;;  %19086 = vmatprep.subr.bf16.mxu0 %v27038_v5  ;;  %v27066_v19 = vld [vmem:[%s37686_s3 + $0x778] ss:$28 sps:$4 sm:$0xff]   ;;  %v27072_v5 = vld [vmem:[%s37686_s3 + $0x7b0] ss:$28 sps:$4 sm:$0xff]  }
 0x5b2   :  { %18639 = vmatprep.subr.bf16.mxu1 %v27035_v0  ;;  %v27069_v0 = vld [vmem:[%s37686_s3 + $0xf18] ss:$28 sps:$4 sm:$0xff]  }
 0x5b4   :  { %19087 = vmatpush1.bf16.msra.mxu0 %v27036_v56  ;;  %v27075_v56 = vld [vmem:[%s37686_s3 + $0xf50] ss:$28 sps:$4 sm:$0xff]  }
 0x5b5   :  { %18640 = vmatpush1.bf16.msra.mxu1 %v27033_v45  ;;  %19088 = vmatprep.subr.bf16.mxu0 %v27044_v7  ;;  %v27080_v45 = vld [vmem:[%s37686_s3 + $0x7ec] ss:$28 sps:$4 sm:$0xff]   ;;  %v27086_v7 = vld [vmem:[%s37686_s3 + $0x824] ss:$28 sps:$4 sm:$0xff]  }
 0x5b6   :  { %18650 = vmatprep.subr.bf16.mxu1 %v27041_v10  ;;  %v27083_v10 = vld [vmem:[%s37686_s3 + $0xf8c] ss:$28 sps:$4 sm:$0xff]  }
 0x5b8   :  { %18642 = vmatmul.mubr.bf16.vlgmr.msra.gmra.mrb[36].mxu1 %v33514_v35  ;;  %19089 = vmatpush1.bf16.msra.mxu0 %v27042_v33  ;;  %v27089_v33 = vld [vmem:[%s37686_s3 + $0xfc4] ss:$28 sps:$4 sm:$0xff]  }
 0x5b9   :  { %18651 = vmatpush1.bf16.msra.mxu1 %v27039_v28  ;;  %18682 = vmatprep.mubr.bf16.mxu1 %v33519_v37  ;;  %v27084_v28 = vld [vmem:[%s37686_s3 + $0x820] ss:$28 sps:$4 sm:$0xff]  }
 0x5ba   :  { %18652 = vmatprep.subr.bf16.mxu1 %v27047_v36  ;;  %19090 = vmatprep.subr.bf16.mxu0 %v27050_v38  ;;  %v27092_v36 = vld [vmem:[%s37686_s3 + $0x85c] ss:$28 sps:$4 sm:$0xff]  }
 0x5bb   :  { %v27087_v38 = vld [vmem:[%s37686_s3 + $0xfc0] ss:$28 sps:$4 sm:$0xff]  }
 0x5bc   :  { %19091 = vmatpush1.bf16.msra.mxu0 %v27048_v24  ;;  %v27090_v24 = vld [vmem:[%s37686_s3 + $0x858] ss:$28 sps:$4 sm:$0xff]  }
 0x5bd   :  { %18653 = vmatpush1.bf16.msra.mxu1 %v27045_v13  ;;  %19101 = vmatprep.subr.bf16.mxu0 %v27056_v21  ;;  %v27095_v21 = vld [vmem:[%s37686_s3 + $0xffc] ss:$28 sps:$4 sm:$0xff]  }
 0x5be   :  { %18654 = vmatprep.subr.bf16.mxu1 %v27053_v41 }
 0x5bf   :  { %19093 = vmatmul.mubr.bf16.vlgmr.msra.gmra.mrb[36].mxu0 %v33078_v53 }
 0x5c0   :  { %19102 = vmatpush1.bf16.msra.mxu0 %v27054_v47  ;;  %19133 = vmatprep.mubr.bf16.mxu0 %v33083_v39 }
 0x5c1   :  { %18655 = vmatpush1.bf16.msra.mxu1 %v27051_v57  ;;  %19103 = vmatprep.subr.bf16.mxu0 %v27062_v4  ;;  %v27098_v57 = vld [vmem:[%s37686_s3 + $0x894] ss:$28 sps:$4 sm:$0xff]  }
 0x5c2   :  { %18656 = vmatprep.subr.bf16.mxu1 %v27059_v8  ;;  %v27093_v4 = vld [vmem:[%s37686_s3 + $0xff8] ss:$28 sps:$4 sm:$0xff]  }
 0x5c4   :  { %19104 = vmatpush1.bf16.msra.mxu0 %v27060_v55  ;;  %v27101_v55 = vld [vmem:[%s37686_s3 + $0x1034] ss:$28 sps:$4 sm:$0xff]  }
 0x5c5   :  { %18657 = vmatpush1.bf16.msra.mxu1 %v27057_v50  ;;  %19105 = vmatprep.subr.bf16.mxu0 %v27068_v61  ;;  %v27096_v50 = vld [vmem:[%s37686_s3 + $0x890] ss:$28 sps:$4 sm:$0xff]  }
 0x5c6   :  { %18658 = vmatprep.subr.bf16.mxu1 %v27065_v58  ;;  %v27104_v58 = vld [vmem:[%s37686_s3 + $0x8cc] ss:$28 sps:$4 sm:$0xff]  }
 0x5c7   :  { %v27099_v61 = vld [vmem:[%s37686_s3 + $0x1030] ss:$28 sps:$4 sm:$0xff]  }
 0x5c8   :  { %19106 = vmatpush1.bf16.msra.mxu0 %v27066_v19  ;;  %v27107_v19 = vld [vmem:[%s37686_s3 + $0x106c] ss:$28 sps:$4 sm:$0xff]  }
 0x5c9   :  { %18659 = vmatpush1.bf16.msra.mxu1 %v27063_v62  ;;  %19107 = vmatprep.subr.bf16.mxu0 %v27074_v23  ;;  %v27102_v62 = vld [vmem:[%s37686_s3 + $0x8c8] ss:$28 sps:$4 sm:$0xff]  }
 0x5ca   :  { %18660 = vmatprep.subr.bf16.mxu1 %v27071_v51  ;;  %v27110_v51 = vld [vmem:[%s37686_s3 + $0x904] ss:$28 sps:$4 sm:$0xff]  }
 0x5cb   :  { %v27105_v23 = vld [vmem:[%s37686_s3 + $0x1068] ss:$28 sps:$4 sm:$0xff]  }
 0x5cc   :  { %19108 = vmatpush1.bf16.msra.mxu0 %v27072_v5  ;;  %v27113_v5 = vld [vmem:[%s37686_s3 + $0x10a4] ss:$28 sps:$4 sm:$0xff]  }
 0x5cd   :  { %18661 = vmatpush1.bf16.msra.mxu1 %v27069_v0  ;;  %19109 = vmatprep.subr.bf16.mxu0 %v27080_v45  ;;  %v27108_v0 = vld [vmem:[%s37686_s3 + $0x900] ss:$28 sps:$4 sm:$0xff]  }
 0x5ce   :  { %18662 = vmatprep.subr.bf16.mxu1 %v27077_v26  ;;  %v27116_v26 = vld [vmem:[%s37686_s3 + $0x93c] ss:$28 sps:$4 sm:$0xff]  }
 0x5cf   :  { %v27111_v45 = vld [vmem:[%s37686_s3 + $0x10a0] ss:$28 sps:$4 sm:$0xff]  }
 0x5d0   :  { %19110 = vmatpush1.bf16.msra.mxu0 %v27078_v15  ;;  %v27119_v15 = vld [vmem:[%s37686_s3 + $0x10dc] ss:$28 sps:$4 sm:$0xff]  }
 0x5d1   :  { %18663 = vmatpush1.bf16.msra.mxu1 %v27075_v56  ;;  %19111 = vmatprep.subr.bf16.mxu0 %v27086_v7  ;;  %v27114_v56 = vld [vmem:[%s37686_s3 + $0x938] ss:$28 sps:$4 sm:$0xff]  }
 0x5d2   :  { %18664 = vmatprep.subr.bf16.mxu1 %v27083_v10  ;;  %v33615_v13 = vpop.f32.mrb[24].mxu0  ;;  %v27122_v10 = vld [vmem:[%s37686_s3 + $0x974] ss:$28 sps:$4 sm:$0xff]  }
 0x5d3   :  { %v33620_v41 = vpop.f32.mrb[25].mxu0  ;;  %v27117_v7 = vld [vmem:[%s37686_s3 + $0x10d8] ss:$28 sps:$4 sm:$0xff]  }
 0x5d4   :  { %19112 = vmatpush1.bf16.msra.mxu0 %v27084_v28  ;;  %v9444_v47 = vpop.f32.mrb[26].mxu0  ;;  %v27120_v28 = vld [vmem:[%s37686_s3 + $0x970] ss:$28 sps:$4 sm:$0xff]  }
 0x5d5   :  { %18665 = vmatpush1.bf16.msra.mxu1 %v27081_v18  ;;  %19113 = vmatprep.subr.bf16.mxu0 %v27092_v36  ;;  %v9445_v8 = vpop.f32.mrb[27].mxu0  ;;  %v1351_v18 = vrot.slane %v33462_v14, %v30199_v17  ;;  %v27128_v36 = vld [vmem:[%s37686_s3 + $0x9ac] ss:$28 sps:$4 sm:$0xff]  }
 0x5d6   :  { %18666 = vmatprep.subr.bf16.mxu1 %v27089_v33  ;;  %v27125_v33 = vld [vmem:[%s37686_s3 + $0x1114] ss:$28 sps:$4 sm:$0xff]   ;;  %v27131_v47 = vld [vmem:[%s37686_s3 + $0x114c] ss:$28 sps:$4 sm:$0xff]  }
 0x5d8   :  { %19114 = vmatpush1.bf16.msra.mxu0 %v27090_v24  ;;  %v27123_v24 = vld [vmem:[%s37686_s3 + $0x1110] ss:$28 sps:$4 sm:$0xff]  }
 0x5d9   :  { %18667 = vmatpush1.bf16.msra.mxu1 %v27087_v38  ;;  %19115 = vmatprep.subr.bf16.mxu0 %v27098_v57  ;;  %v1363_v38 = vrot.slane %v33462_v14, %v30418_v48  ;;  %v27126_v57 = vld [vmem:[%s37686_s3 + $0x9a8] ss:$28 sps:$4 sm:$0xff]  }
 0x5da   :  { %18668 = vmatprep.subr.bf16.mxu1 %v27095_v21  ;;  %v24618_v21 = vadd.f32 %v31677_v6, %v1351_v18  ;;  %v27134_v14 = vld [vmem:[%s37686_s3 + $0x9e4] ss:$28 sps:$4 sm:$0xff]   ;;  %v27141_v18 = vld [vmem:[%s37686_s3 + $0x11b8] ss:$28 sps:$4 sm:$0xff]  }
 0x5db   :  { %v24621_v8 = vadd.f32 %v31342_v30, %v1363_v38  ;;  %v27129_v6 = vld [vmem:[%s37686_s3 + $0x1148] ss:$28 sps:$4 sm:$0xff]   ;;  %v27140_v30 = vld [vmem:[%s37686_s3 + $0xa1c] ss:$28 sps:$4 sm:$0xff]  }
 0x5dc   :  { %19116 = vmatpush1.bf16.msra.mxu0 %v27096_v50  ;;  %v27132_v50 = vld [vmem:[%s37686_s3 + $0x9e0] ss:$28 sps:$4 sm:$0xff]  }
 0x5dd   :  { %18669 = vmatpush1.bf16.msra.mxu1 %v27093_v4  ;;  %19117 = vmatprep.subr.bf16.mxu0 %v27104_v58  ;;  %v9779_v4 = vmax.f32 %v24618_v21, 0.0  ;;  %v9782_v58 = vmax.f32 %v24621_v8, 0.0  ;;  %v27150_v21 = vld [vmem:[%s37686_s3 + $0xa88] ss:$28 sps:$4 sm:$0xff]  }
 0x5de   :  { %18670 = vmatprep.subr.bf16.mxu1 %v27101_v55  ;;  %v27137_v55 = vld [vmem:[%s37686_s3 + $0x1184] ss:$28 sps:$4 sm:$0xff]  }
 0x5df   :  { %v27161_v8 = vld [vmem:[%s37686_s3 + $0x1264] ss:$28 sps:$4 sm:$0xff]  }
 0x5e0   :  { %19118 = vmatpush1.bf16.msra.mxu0 %v27102_v62 }
 0x5e1   :  { %18671 = vmatpush1.bf16.msra.mxu1 %v27099_v61  ;;  %19119 = vmatprep.subr.bf16.mxu0 %v27110_v51  ;;  %v21519_v61 = vld [vmem:[%s37685_s2 + $0x18] ss:$0 sm:$0xff] }
 0x5e2   :  { %18672 = vmatprep.subr.bf16.mxu1 %v27107_v19  ;;  %v27135_v19 = vld [vmem:[%s37686_s3 + $0x1180] ss:$28 sps:$4 sm:$0xff]  }
 0x5e4   :  { %19120 = vmatpush1.bf16.msra.mxu0 %v27108_v0  ;;  %v33727_v0 = vpack.c.bf16 %v9779_v4, %v9779_v4  ;;  %v27159_v4 = vld [vmem:[%s37686_s3 + $0x1260] ss:$28 sps:$4 sm:$0xff]  }
 0x5e5   :  { %18673 = vmatpush1.bf16.msra.mxu1 %v27105_v23  ;;  %19121 = vmatprep.subr.bf16.mxu0 %v27116_v26  ;;  %v27138_v23 = vld [vmem:[%s37686_s3 + $0xa18] ss:$28 sps:$4 sm:$0xff]  }
 0x5e6   :  { %18674 = vmatprep.subr.bf16.mxu1 %v27113_v5  ;;  %v27143_v26 = vld [vmem:[%s37686_s3 + $0x11bc] ss:$28 sps:$4 sm:$0xff]  }
 0x5e8   :  { %19122 = vmatpush1.bf16.msra.mxu0 %v27114_v56  ;;  %v33732_v56 = vpack.c.bf16 %v9782_v58, %v9782_v58  ;;  %v27165_v58 = vld [vmem:[%s37686_s3 + $0x1298] ss:$28 sps:$4 sm:$0xff]  }
 0x5e9   :  { %18675 = vmatpush1.bf16.msra.mxu1 %v27111_v45  ;;  %19123 = vmatprep.subr.bf16.mxu0 %v27122_v10 }
 0x5ea   :  { %18676 = vmatprep.subr.bf16.mxu1 %v27119_v15  ;;  %v27146_v15 = vld [vmem:[%s37686_s3 + $0xa54] ss:$28 sps:$4 sm:$0xff]  }
 0x5ec   :  { %19124 = vmatpush1.bf16.msra.mxu0 %v27120_v28  ;;  %v27144_v28 = vld [vmem:[%s37686_s3 + $0xa50] ss:$28 sps:$4 sm:$0xff]  }
 0x5ed   :  { %18677 = vmatpush1.bf16.msra.mxu1 %v27117_v7  ;;  %19125 = vmatprep.subr.bf16.mxu0 %v27128_v36  ;;  %v27152_v36 = vld [vmem:[%s37686_s3 + $0xa8c] ss:$28 sps:$4 sm:$0xff]  }
 0x5ee   :  { %18678 = vmatprep.subr.bf16.mxu1 %v27125_v33  ;;  %v27149_v33 = vld [vmem:[%s37686_s3 + $0x11f4] ss:$28 sps:$4 sm:$0xff]  }
 0x5f0   :  { %19126 = vmatpush1.bf16.msra.mxu0 %v27126_v57  ;;  %v27155_v57 = vld [vmem:[%s37686_s3 + $0x122c] ss:$28 sps:$4 sm:$0xff]  }
 0x5f1   :  { %18679 = vmatpush1.bf16.msra.mxu1 %v27123_v24  ;;  %19127 = vmatprep.subr.bf16.mxu0 %v27134_v14  ;;  %v27147_v24 = vld [vmem:[%s37686_s3 + $0x11f0] ss:$28 sps:$4 sm:$0xff]   ;;  %v27156_v14 = vld [vmem:[%s37686_s3 + $0xac0] ss:$28 sps:$4 sm:$0xff]  }
 0x5f2   :  { %18680 = vmatprep.subr.bf16.mxu1 %v27131_v47  ;;  %v24267_v62 = vpop.f32.mrb[28].mxu0  ;;  %v27153_v47 = vld [vmem:[%s37686_s3 + $0x1228] ss:$28 sps:$4 sm:$0xff]  }
 0x5f3   :  { %v24268_v51 = vpop.f32.mrb[29].mxu0 }
 0x5f4   :  { %v24269_v5 = vadd.f32 %v24268_v51, %v24267_v62  ;;  %19128 = vmatpush1.bf16.msra.mxu0 %v27132_v50  ;;  %v24270_v45 = vpop.f32.mrb[30].mxu0  ;;  %v27162_v50 = vld [vmem:[%s37686_s3 + $0xaf8] ss:$28 sps:$4 sm:$0xff]   ;;  %v27171_v51 = vld [vmem:[%s37686_s3 + $0x12d0] ss:$28 sps:$4 sm:$0xff]  }
 0x5f5   :  { %18681 = vmatpush1.bf16.msra.mxu1 %v27129_v6  ;;  %19129 = vmatprep.subr.bf16.mxu0 %v27140_v30  ;;  %v24271_v10 = vpop.f32.mrb[31].mxu0  ;;  %v27164_v6 = vld [vmem:[%s37686_s3 + $0xafc] ss:$28 sps:$4 sm:$0xff]   ;;  %v27170_v30 = vld [vmem:[%s37686_s3 + $0xb34] ss:$28 sps:$4 sm:$0xff]  }
 0x5f6   :  { %18691 = vmatprep.subr.bf16.mxu1 %v27137_v55  ;;  %v9646_v7 = vadd.f32 %v24269_v5, %v21519_v61  ;;  %v27167_v55 = vld [vmem:[%s37686_s3 + $0x129c] ss:$28 sps:$4 sm:$0xff]   ;;  %v27168_v61 = vld [vmem:[%s37686_s3 + $0xb30] ss:$28 sps:$4 sm:$0xff]   ;;  %v27177_v45 = vld [vmem:[%s37686_s3 + $0x1308] ss:$28 sps:$4 sm:$0xff]  }
 0x5f7   :  { %v27173_v62 = vld [vmem:[%s37686_s3 + $0x12d4] ss:$28 sps:$4 sm:$0xff]   ;;  %v27179_v5 = vld [vmem:[%s37686_s3 + $0x130c] ss:$28 sps:$4 sm:$0xff]   ;;  %v27185_v10 = vld [vmem:[%s37686_s3 + $0x1344] ss:$28 sps:$4 sm:$0xff]  }
 0x5f8   :  { %18683 = vmatmul.mubr.bf16.vlgmr.msra.gmra.mrb[36].mxu1 %v33727_v0  ;;  %19130 = vmatpush1.bf16.msra.mxu0 %v27138_v23  ;;  %v33752_v38 = vadd.f32 %v33347_v34, %v9646_v7  ;;  %v27158_v34 = vld [vmem:[%s37686_s3 + $0xac4] ss:$28 sps:$4 sm:$0xff]   ;;  %v27188_v7 = vld [vmem:[%s37686_s3 + $0xbdc] ss:$28 sps:$4 sm:$0xff]  }
 0x5f9   :  { %18692 = vmatpush1.bf16.msra.mxu1 %v27135_v19  ;;  %18723 = vmatprep.mubr.bf16.mxu1 %v33732_v56  ;;  %v27176_v19 = vld [vmem:[%s37686_s3 + $0xb6c] ss:$28 sps:$4 sm:$0xff]  }
 0x5fa   :  { %18693 = vmatprep.subr.bf16.mxu1 %v27143_v26  ;;  %19131 = vmatprep.subr.bf16.mxu0 %v27146_v15  ;;  %v27174_v23 = vld [vmem:[%s37686_s3 + $0xb68] ss:$28 sps:$4 sm:$0xff]   ;;  %v27180_v15 = vld [vmem:[%s37686_s3 + $0xba0] ss:$28 sps:$4 sm:$0xff]  }
 0x5fb   :  { %v27182_v26 = vld [vmem:[%s37686_s3 + $0xba4] ss:$28 sps:$4 sm:$0xff]  }
 0x5fc   :  { %19132 = vmatpush1.bf16.msra.mxu0 %v27144_v28  ;;  %v27183_v28 = vld [vmem:[%s37686_s3 + $0x1340] ss:$28 sps:$4 sm:$0xff]  }
 0x5fd   :  { %18694 = vmatpush1.bf16.msra.mxu1 %v27141_v18  ;;  %19142 = vmatprep.subr.bf16.mxu0 %v27152_v36  ;;  %v27186_v36 = vld [vmem:[%s37686_s3 + $0xbd8] ss:$28 sps:$4 sm:$0xff]  }
 0x5fe   :  { %18695 = vmatprep.subr.bf16.mxu1 %v27149_v33 }
 0x5ff   :  { %19134 = vmatmul.mubr.bf16.vlgmr.msra.gmra.mrb[36].mxu0 %v33294_v25 }
 0x600   :  { %19143 = vmatpush1.bf16.msra.mxu0 %v27150_v21  ;;  %19174 = vmatprep.mubr.bf16.mxu0 %v33299_v16  ;;  %v27191_v21 = vld [vmem:[%s37686_s3 + $0x137c] ss:$28 sps:$4 sm:$0xff]  }
 0x601   :  { %18696 = vmatpush1.bf16.msra.mxu1 %v27147_v24  ;;  %19144 = vmatprep.subr.bf16.mxu0 %v27158_v34 }
 0x602   :  { %18697 = vmatprep.subr.bf16.mxu1 %v27155_v57  ;;  %v27194_v57 = vld [vmem:[%s37686_s3 + $0xc14] ss:$28 sps:$4 sm:$0xff]  }
 0x604   :  { %19145 = vmatpush1.bf16.msra.mxu0 %v27156_v14 }
 0x605   :  { %18698 = vmatpush1.bf16.msra.mxu1 %v27153_v47  ;;  %19146 = vmatprep.subr.bf16.mxu0 %v27164_v6  ;;  %v27192_v6 = vld [vmem:[%s37686_s3 + $0xc10] ss:$28 sps:$4 sm:$0xff]  }
 0x606   :  { %18699 = vmatprep.subr.bf16.mxu1 %v27161_v8  ;;  %v27189_v8 = vld [vmem:[%s37686_s3 + $0x1378] ss:$28 sps:$4 sm:$0xff]  }
 0x608   :  { %19147 = vmatpush1.bf16.msra.mxu0 %v27162_v50  ;;  %v27197_v50 = vld [vmem:[%s37686_s3 + $0x13b4] ss:$28 sps:$4 sm:$0xff]  }
 0x609   :  { %18700 = vmatpush1.bf16.msra.mxu1 %v27159_v4  ;;  %19148 = vmatprep.subr.bf16.mxu0 %v27170_v30  ;;  %v27203_v30 = vld [vmem:[%s37686_s3 + $0x13ec] ss:$28 sps:$4 sm:$0xff]  }
 0x60a   :  { %18701 = vmatprep.subr.bf16.mxu1 %v27167_v55  ;;  %v27195_v55 = vld [vmem:[%s37686_s3 + $0x13b0] ss:$28 sps:$4 sm:$0xff]  }
 0x60c   :  { %19149 = vmatpush1.bf16.msra.mxu0 %v27168_v61  ;;  %v27201_v61 = vld [vmem:[%s37686_s3 + $0x13e8] ss:$28 sps:$4 sm:$0xff]  }
 0x60d   :  { %18702 = vmatpush1.bf16.msra.mxu1 %v27165_v58  ;;  %19150 = vmatprep.subr.bf16.mxu0 %v27176_v19  ;;  %v27206_v58 = vld [vmem:[%s37686_s3 + $0xc84] ss:$28 sps:$4 sm:$0xff]  }
 0x60e   :  { %18703 = vmatprep.subr.bf16.mxu1 %v27173_v62  ;;  %v27204_v62 = vld [vmem:[%s37686_s3 + $0xc80] ss:$28 sps:$4 sm:$0xff]  }
 0x60f   :  { %v27209_v19 = vld [vmem:[%s37686_s3 + $0x1424] ss:$28 sps:$4 sm:$0xff]  }
 0x610   :  { %19151 = vmatpush1.bf16.msra.mxu0 %v27174_v23  ;;  %v27207_v23 = vld [vmem:[%s37686_s3 + $0x1420] ss:$28 sps:$4 sm:$0xff]  }
 0x611   :  { %18704 = vmatpush1.bf16.msra.mxu1 %v27171_v51  ;;  %19152 = vmatprep.subr.bf16.mxu0 %v27182_v26  ;;  %v27212_v51 = vld [vmem:[%s37686_s3 + $0xcbc] ss:$28 sps:$4 sm:$0xff]  }
 0x612   :  { %18705 = vmatprep.subr.bf16.mxu1 %v27179_v5  ;;  %v24311_v18 = vpop.f32.mrb[32].mxu0  ;;  %v27210_v5 = vld [vmem:[%s37686_s3 + $0xcb8] ss:$28 sps:$4 sm:$0xff]  }
 0x613   :  { %v24312_v33 = vpop.f32.mrb[33].mxu0  ;;  %v27215_v26 = vld [vmem:[%s37686_s3 + $0x145c] ss:$28 sps:$4 sm:$0xff]  }
 0x614   :  { %v24313_v24 = vadd.f32 %v24312_v33, %v24311_v18  ;;  %19153 = vmatpush1.bf16.msra.mxu0 %v27180_v15  ;;  %v24314_v34 = vpop.f32.mrb[34].mxu0  ;;  %v33895_v15 = vld [vmem:[%s37685_s2 + $0x8] sm:$0xff] }
 0x615   :  { %18706 = vmatpush1.bf16.msra.mxu1 %v27177_v45  ;;  %19154 = vmatprep.subr.bf16.mxu0 %v27188_v7  ;;  %v24315_v47 = vpop.f32.mrb[35].mxu0  ;;  %v27218_v45 = vld [vmem:[%s37686_s3 + $0xcf4] ss:$28 sps:$4 sm:$0xff]   ;;  %v27224_v33 = vld [vmem:[%s37686_s3 + $0xd2c] ss:$28 sps:$4 sm:$0xff]  }
 0x616   :  { %18707 = vmatprep.subr.bf16.mxu1 %v27185_v10  ;;  %v9726_v14 = vadd.f32 %v24313_v24, %v33752_v38  ;;  %v27200_v38 = vld [vmem:[%s37686_s3 + $0xc4c] ss:$28 sps:$4 sm:$0xff]   ;;  %v1359_v10 = vrot.slane %v33895_v15, %v30409_v46  ;;  %v27213_v7 = vld [vmem:[%s37686_s3 + $0x1458] ss:$28 sps:$4 sm:$0xff]   ;;  %v27230_v47 = vld [vmem:[%s37686_s3 + $0xd64] ss:$28 sps:$4 sm:$0xff]  }
 0x617   :  { %v27216_v18 = vld [vmem:[%s37686_s3 + $0xcf0] ss:$28 sps:$4 sm:$0xff]  }
 0x618   :  { %v33848_v4 = vadd.f32 %v33370_v2, %v9726_v14  ;;  %19155 = vmatpush1.bf16.msra.mxu0 %v27186_v36  ;;  %v27198_v2 = vld [vmem:[%s37686_s3 + $0xc48] ss:$28 sps:$4 sm:$0xff]   ;;  %v1371_v36 = vrot.slane %v33895_v15, %v33025_v40  ;;  %v24620_v24 = vadd.f32 %v31340_v29, %v1359_v10 }
 0x619   :  { %18708 = vmatpush1.bf16.msra.mxu1 %v27183_v28  ;;  %19156 = vmatprep.subr.bf16.mxu0 %v27194_v57  ;;  %v27221_v28 = vld [vmem:[%s37686_s3 + $0x1494] ss:$28 sps:$4 sm:$0xff]   ;;  %v27222_v57 = vld [vmem:[%s37686_s3 + $0xd28] ss:$28 sps:$4 sm:$0xff]  }
 0x61a   :  { %18709 = vmatprep.subr.bf16.mxu1 %v27191_v21  ;;  %v27219_v21 = vld [vmem:[%s37686_s3 + $0x1490] ss:$28 sps:$4 sm:$0xff]   ;;  %v24623_v29 = vadd.f32 %v32298_v27, %v1371_v36  ;;  %v9781_v14 = vmax.f32 %v24620_v24, 0.0  ;;  %v27236_v27 = vld [vmem:[%s37686_s3 + $0xd9c] ss:$28 sps:$4 sm:$0xff]  }
 0x61b   :  { %v27227_v34 = vld [vmem:[%s37686_s3 + $0x14cc] ss:$28 sps:$4 sm:$0xff]   ;;  %v27260_v36 = vld [vmem:[%s37686_s3 + $0xe7c] ss:$28 sps:$4 sm:$0xff]  }
 0x61c   :  { %19157 = vmatpush1.bf16.msra.mxu0 %v27192_v6  ;;  %v27228_v6 = vld [vmem:[%s37686_s3 + $0xd60] ss:$28 sps:$4 sm:$0xff]   ;;  %v27251_v10 = vld [vmem:[%s37686_s3 + $0x15ac] ss:$28 sps:$4 sm:$0xff]  }
 0x61d   :  { %18710 = vmatpush1.bf16.msra.mxu1 %v27189_v8  ;;  %19158 = vmatprep.subr.bf16.mxu0 %v27200_v38  ;;  %v27225_v8 = vld [vmem:[%s37686_s3 + $0x14c8] ss:$28 sps:$4 sm:$0xff]   ;;  %v9784_v38 = vmax.f32 %v24623_v29, 0.0  ;;  %v27255_v24 = vld [vmem:[%s37686_s3 + $0x15e0] ss:$28 sps:$4 sm:$0xff]  }
 0x61e   :  { %18711 = vmatprep.subr.bf16.mxu1 %v27197_v50  ;;  %v27233_v50 = vld [vmem:[%s37686_s3 + $0x1504] ss:$28 sps:$4 sm:$0xff]   ;;  %v27264_v29 = vld [vmem:[%s37686_s3 + $0xeb0] ss:$28 sps:$4 sm:$0xff]  }
 0x620   :  { %19159 = vmatpush1.bf16.msra.mxu0 %v27198_v2  ;;  %v27234_v2 = vld [vmem:[%s37686_s3 + $0xd98] ss:$28 sps:$4 sm:$0xff]  }
 0x621   :  { %18712 = vmatpush1.bf16.msra.mxu1 %v27195_v55  ;;  %19160 = vmatprep.subr.bf16.mxu0 %v27206_v58  ;;  %v27231_v55 = vld [vmem:[%s37686_s3 + $0x1500] ss:$28 sps:$4 sm:$0xff]  }
 0x622   :  { %18713 = vmatprep.subr.bf16.mxu1 %v27203_v30  ;;  %v33945_v30 = vpack.c.bf16 %v9781_v14, %v9781_v14  ;;  %v27239_v58 = vld [vmem:[%s37686_s3 + $0x153c] ss:$28 sps:$4 sm:$0xff]   ;;  %v27269_v14 = vld [vmem:[%s37686_s3 + $0x1654] ss:$28 sps:$4 sm:$0xff]  }
 0x624   :  { %19161 = vmatpush1.bf16.msra.mxu0 %v27204_v62  ;;  %v27242_v62 = vld [vmem:[%s37686_s3 + $0xdd4] ss:$28 sps:$4 sm:$0xff]  }
 0x625   :  { %18714 = vmatpush1.bf16.msra.mxu1 %v27201_v61  ;;  %19162 = vmatprep.subr.bf16.mxu0 %v27212_v51  ;;  %v33950_v61 = vpack.c.bf16 %v9784_v38, %v9784_v38  ;;  %v27240_v51 = vld [vmem:[%s37686_s3 + $0xdd0] ss:$28 sps:$4 sm:$0xff]   ;;  %v27278_v38 = vld [vmem:[%s37686_s3 + $0xf24] ss:$28 sps:$4 sm:$0xff]  }
 0x626   :  { %18715 = vmatprep.subr.bf16.mxu1 %v27209_v19  ;;  %v27237_v19 = vld [vmem:[%s37686_s3 + $0x1538] ss:$28 sps:$4 sm:$0xff]  }
 0x628   :  { %19163 = vmatpush1.bf16.msra.mxu0 %v27210_v5  ;;  %v27248_v5 = vld [vmem:[%s37686_s3 + $0xe0c] ss:$28 sps:$4 sm:$0xff]  }
 0x629   :  { %18716 = vmatpush1.bf16.msra.mxu1 %v27207_v23  ;;  %19164 = vmatprep.subr.bf16.mxu0 %v27218_v45  ;;  %v27245_v23 = vld [vmem:[%s37686_s3 + $0x1574] ss:$28 sps:$4 sm:$0xff]   ;;  %v27246_v45 = vld [vmem:[%s37686_s3 + $0xe08] ss:$28 sps:$4 sm:$0xff]  }
 0x62a   :  { %18717 = vmatprep.subr.bf16.mxu1 %v27215_v26  ;;  %v27243_v26 = vld [vmem:[%s37686_s3 + $0x1570] ss:$28 sps:$4 sm:$0xff]  }
 0x62c   :  { %19165 = vmatpush1.bf16.msra.mxu0 %v27216_v18  ;;  %v27249_v18 = vld [vmem:[%s37686_s3 + $0x15a8] ss:$28 sps:$4 sm:$0xff]  }
 0x62d   :  { %18718 = vmatpush1.bf16.msra.mxu1 %v27213_v7  ;;  %19166 = vmatprep.subr.bf16.mxu0 %v27224_v33  ;;  %v27254_v7 = vld [vmem:[%s37686_s3 + $0xe44] ss:$28 sps:$4 sm:$0xff]  }
 0x62e   :  { %18719 = vmatprep.subr.bf16.mxu1 %v27221_v28  ;;  %v27252_v28 = vld [vmem:[%s37686_s3 + $0xe40] ss:$28 sps:$4 sm:$0xff]  }
 0x62f   :  { %v27257_v33 = vld [vmem:[%s37686_s3 + $0x15e4] ss:$28 sps:$4 sm:$0xff]  }
 0x630   :  { %19167 = vmatpush1.bf16.msra.mxu0 %v27222_v57  ;;  %v27263_v57 = vld [vmem:[%s37686_s3 + $0x161c] ss:$28 sps:$4 sm:$0xff]  }
 0x631   :  { %18720 = vmatpush1.bf16.msra.mxu1 %v27219_v21  ;;  %19168 = vmatprep.subr.bf16.mxu0 %v27230_v47  ;;  %v27258_v21 = vld [vmem:[%s37686_s3 + $0xe78] ss:$28 sps:$4 sm:$0xff]  }
 0x632   :  { %18721 = vmatprep.subr.bf16.mxu1 %v27227_v34  ;;  %v27266_v34 = vld [vmem:[%s37686_s3 + $0xeb4] ss:$28 sps:$4 sm:$0xff]  }
 0x633   :  { %v27261_v47 = vld [vmem:[%s37686_s3 + $0x1618] ss:$28 sps:$4 sm:$0xff]  }
 0x634   :  { %19169 = vmatpush1.bf16.msra.mxu0 %v27228_v6  ;;  %v27267_v6 = vld [vmem:[%s37686_s3 + $0x1650] ss:$28 sps:$4 sm:$0xff]  }
 0x635   :  { %18722 = vmatpush1.bf16.msra.mxu1 %v27225_v8  ;;  %19170 = vmatprep.subr.bf16.mxu0 %v27236_v27  ;;  %v27272_v8 = vld [vmem:[%s37686_s3 + $0xeec] ss:$28 sps:$4 sm:$0xff]  }
 0x636   :  { %18732 = vmatprep.subr.bf16.mxu1 %v27233_v50  ;;  %v27270_v50 = vld [vmem:[%s37686_s3 + $0xee8] ss:$28 sps:$4 sm:$0xff]  }
 0x637   :  { %v27275_v27 = vld [vmem:[%s37686_s3 + $0x168c] ss:$28 sps:$4 sm:$0xff]  }
 0x638   :  { %18724 = vmatmul.mubr.bf16.vlgmr.msra.gmra.mrb[36].mxu1 %v33945_v30  ;;  %19171 = vmatpush1.bf16.msra.mxu0 %v27234_v2  ;;  %v27276_v2 = vld [vmem:[%s37686_s3 + $0xf20] ss:$28 sps:$4 sm:$0xff]  }
 0x639   :  { %18733 = vmatpush1.bf16.msra.mxu1 %v27231_v55  ;;  %18764 = vmatprep.mubr.bf16.mxu1 %v33950_v61  ;;  %v27273_v55 = vld [vmem:[%s37686_s3 + $0x1688] ss:$28 sps:$4 sm:$0xff]  }
 0x63a   :  { %18734 = vmatprep.subr.bf16.mxu1 %v27239_v58  ;;  %19172 = vmatprep.subr.bf16.mxu0 %v27242_v62  ;;  %v27281_v58 = vld [vmem:[%s37686_s3 + $0x16c4] ss:$28 sps:$4 sm:$0xff]   ;;  %v27284_v62 = vld [vmem:[%s37686_s3 + $0xf5c] ss:$28 sps:$4 sm:$0xff]  }
 0x63c   :  { %19173 = vmatpush1.bf16.msra.mxu0 %v27240_v51  ;;  %v27282_v51 = vld [vmem:[%s37686_s3 + $0xf58] ss:$28 sps:$4 sm:$0xff]  }
 0x63d   :  { %18735 = vmatpush1.bf16.msra.mxu1 %v27237_v19  ;;  %19183 = vmatprep.subr.bf16.mxu0 %v27248_v5  ;;  %v27279_v19 = vld [vmem:[%s37686_s3 + $0x16c0] ss:$28 sps:$4 sm:$0xff]   ;;  %v27290_v5 = vld [vmem:[%s37686_s3 + $0xf94] ss:$28 sps:$4 sm:$0xff]  }
 0x63e   :  { %18736 = vmatprep.subr.bf16.mxu1 %v27245_v23  ;;  %v27287_v23 = vld [vmem:[%s37686_s3 + $0x16fc] ss:$28 sps:$4 sm:$0xff]  }
 0x63f   :  { %19175 = vmatmul.mubr.bf16.vlgmr.msra.gmra.mrb[36].mxu0 %v33514_v35 }
 0x640   :  { %19184 = vmatpush1.bf16.msra.mxu0 %v27246_v45  ;;  %19215 = vmatprep.mubr.bf16.mxu0 %v33519_v37  ;;  %v27288_v45 = vld [vmem:[%s37686_s3 + $0xf90] ss:$28 sps:$4 sm:$0xff]  }
 0x641   :  { %18737 = vmatpush1.bf16.msra.mxu1 %v27243_v26  ;;  %19185 = vmatprep.subr.bf16.mxu0 %v27254_v7  ;;  %v27285_v26 = vld [vmem:[%s37686_s3 + $0x16f8] ss:$28 sps:$4 sm:$0xff]   ;;  %v27296_v7 = vld [vmem:[%s37686_s3 + $0xfcc] ss:$28 sps:$4 sm:$0xff]  }
 0x642   :  { %18738 = vmatprep.subr.bf16.mxu1 %v27251_v10  ;;  %v27293_v10 = vld [vmem:[%s37686_s3 + $0x1734] ss:$28 sps:$4 sm:$0xff]  }
 0x644   :  { %19186 = vmatpush1.bf16.msra.mxu0 %v27252_v28  ;;  %v27294_v28 = vld [vmem:[%s37686_s3 + $0xfc8] ss:$28 sps:$4 sm:$0xff]  }
 0x645   :  { %18739 = vmatpush1.bf16.msra.mxu1 %v27249_v18  ;;  %19187 = vmatprep.subr.bf16.mxu0 %v27260_v36  ;;  %v27291_v18 = vld [vmem:[%s37686_s3 + $0x1730] ss:$28 sps:$4 sm:$0xff]   ;;  %v27302_v36 = vld [vmem:[%s37686_s3 + $0x1004] ss:$28 sps:$4 sm:$0xff]  }
 0x646   :  { %18740 = vmatprep.subr.bf16.mxu1 %v27257_v33  ;;  %v27299_v33 = vld [vmem:[%s37686_s3 + $0x176c] ss:$28 sps:$4 sm:$0xff]  }
 0x648   :  { %19188 = vmatpush1.bf16.msra.mxu0 %v27258_v21  ;;  %v27300_v21 = vld [vmem:[%s37686_s3 + $0x1000] ss:$28 sps:$4 sm:$0xff]  }
 0x649   :  { %18741 = vmatpush1.bf16.msra.mxu1 %v27255_v24  ;;  %19189 = vmatprep.subr.bf16.mxu0 %v27266_v34  ;;  %v27297_v24 = vld [vmem:[%s37686_s3 + $0x1768] ss:$28 sps:$4 sm:$0xff]   ;;  %v27308_v34 = vld [vmem:[%s37686_s3 + $0x103c] ss:$28 sps:$4 sm:$0xff]  }
 0x64a   :  { %18742 = vmatprep.subr.bf16.mxu1 %v27263_v57  ;;  %v27305_v57 = vld [vmem:[%s37686_s3 + $0x17a4] ss:$28 sps:$4 sm:$0xff]  }
 0x64c   :  { %19190 = vmatpush1.bf16.msra.mxu0 %v27264_v29  ;;  %v27306_v29 = vld [vmem:[%s37686_s3 + $0x1038] ss:$28 sps:$4 sm:$0xff]  }
 0x64d   :  { %18743 = vmatpush1.bf16.msra.mxu1 %v27261_v47  ;;  %19191 = vmatprep.subr.bf16.mxu0 %v27272_v8  ;;  %v27303_v47 = vld [vmem:[%s37686_s3 + $0x17a0] ss:$28 sps:$4 sm:$0xff]   ;;  %v27314_v8 = vld [vmem:[%s37686_s3 + $0x1074] ss:$28 sps:$4 sm:$0xff]  }
 0x64e   :  { %18744 = vmatprep.subr.bf16.mxu1 %v27269_v14  ;;  %v27311_v14 = vld [vmem:[%s37686_s3 + $0x17dc] ss:$28 sps:$4 sm:$0xff]  }
 0x650   :  { %19192 = vmatpush1.bf16.msra.mxu0 %v27270_v50  ;;  %v1379_v50 = vrot.slane %v33895_v15, %v33244_v12 }
 0x651   :  { %18745 = vmatpush1.bf16.msra.mxu1 %v27267_v6  ;;  %19193 = vmatprep.subr.bf16.mxu0 %v27278_v38  ;;  %v27309_v6 = vld [vmem:[%s37686_s3 + $0x17d8] ss:$28 sps:$4 sm:$0xff]   ;;  %v1367_v38 = vrot.slane %v33895_v15, %v33235_v3  ;;  %v27318_v15 = vld [vmem:[%s37686_s3 + $0x10a8] ss:$28 sps:$4 sm:$0xff]  }
 0x652   :  { %18746 = vmatprep.subr.bf16.mxu1 %v27275_v27  ;;  %v27312_v27 = vld [vmem:[%s37686_s3 + $0x1070] ss:$28 sps:$4 sm:$0xff]  }
 0x654   :  { %19194 = vmatpush1.bf16.msra.mxu0 %v27276_v2  ;;  %v27320_v2 = vld [vmem:[%s37686_s3 + $0x10ac] ss:$28 sps:$4 sm:$0xff]  }
 0x655   :  { %18747 = vmatpush1.bf16.msra.mxu1 %v27273_v55  ;;  %19195 = vmatprep.subr.bf16.mxu0 %v27284_v62  ;;  %v27317_v55 = vld [vmem:[%s37686_s3 + $0x1814] ss:$28 sps:$4 sm:$0xff]   ;;  %v24625_v62 = vadd.f32 %v31956_v32, %v1379_v50  ;;  %v27321_v32 = vld [vmem:[%s37686_s3 + $0x1848] ss:$28 sps:$4 sm:$0xff]  }
 0x656   :  { %18748 = vmatprep.subr.bf16.mxu1 %v27281_v58  ;;  %v27315_v58 = vld [vmem:[%s37686_s3 + $0x1810] ss:$28 sps:$4 sm:$0xff]   ;;  %v27345_v50 = vld [vmem:[%s37686_s3 + $0x1928] ss:$28 sps:$4 sm:$0xff]  }
 0x658   :  { %19196 = vmatpush1.bf16.msra.mxu0 %v27282_v51  ;;  %v27323_v51 = vld [vmem:[%s37686_s3 + $0x184c] ss:$28 sps:$4 sm:$0xff]  }
 0x659   :  { %18749 = vmatpush1.bf16.msra.mxu1 %v27279_v19  ;;  %19197 = vmatprep.subr.bf16.mxu0 %v27290_v5  ;;  %v24622_v19 = vadd.f32 %v32296_v22, %v1367_v38  ;;  %v9786_v5 = vmax.f32 %v24625_v62, 0.0  ;;  %v27324_v22 = vld [vmem:[%s37686_s3 + $0x10e0] ss:$28 sps:$4 sm:$0xff]  }
 0x65a   :  { %18750 = vmatprep.subr.bf16.mxu1 %v27287_v23  ;;  %v27326_v23 = vld [vmem:[%s37686_s3 + $0x10e4] ss:$28 sps:$4 sm:$0xff]   ;;  %v27359_v62 = vld [vmem:[%s37686_s3 + $0x199c] ss:$28 sps:$4 sm:$0xff]  }
 0x65b   :  { %v27353_v38 = vld [vmem:[%s37686_s3 + $0x1964] ss:$28 sps:$4 sm:$0xff]  }
 0x65c   :  { %19198 = vmatpush1.bf16.msra.mxu0 %v27288_v45  ;;  %v27329_v45 = vld [vmem:[%s37686_s3 + $0x1884] ss:$28 sps:$4 sm:$0xff]  }
 0x65d   :  { %18751 = vmatpush1.bf16.msra.mxu1 %v27285_v26  ;;  %19199 = vmatprep.subr.bf16.mxu0 %v27296_v7  ;;  %v9783_v26 = vmax.f32 %v24622_v19, 0.0  ;;  %v27327_v7 = vld [vmem:[%s37686_s3 + $0x1880] ss:$28 sps:$4 sm:$0xff]   ;;  %v27357_v19 = vld [vmem:[%s37686_s3 + $0x1998] ss:$28 sps:$4 sm:$0xff]  }
 0x65e   :  { %18752 = vmatprep.subr.bf16.mxu1 %v27293_v10  ;;  %v27332_v10 = vld [vmem:[%s37686_s3 + $0x111c] ss:$28 sps:$4 sm:$0xff]  }
 0x660   :  { %19200 = vmatpush1.bf16.msra.mxu0 %v27294_v28  ;;  %v34151_v28 = vpack.c.bf16 %v9783_v26, %v9783_v26  ;;  %v27371_v26 = vld [vmem:[%s37686_s3 + $0x1a0c] ss:$28 sps:$4 sm:$0xff]  }
 0x661   :  { %18753 = vmatpush1.bf16.msra.mxu1 %v27291_v18  ;;  %19201 = vmatprep.subr.bf16.mxu0 %v27302_v36  ;;  %v27330_v18 = vld [vmem:[%s37686_s3 + $0x1118] ss:$28 sps:$4 sm:$0xff]   ;;  %v34156_v36 = vpack.c.bf16 %v9786_v5, %v9786_v5  ;;  %v27363_v5 = vld [vmem:[%s37686_s3 + $0x19d0] ss:$28 sps:$4 sm:$0xff]  }
 0x662   :  { %18754 = vmatprep.subr.bf16.mxu1 %v27299_v33  ;;  %v27335_v33 = vld [vmem:[%s37686_s3 + $0x18bc] ss:$28 sps:$4 sm:$0xff]  }
 0x664   :  { %19202 = vmatpush1.bf16.msra.mxu0 %v27300_v21  ;;  %v27333_v21 = vld [vmem:[%s37686_s3 + $0x18b8] ss:$28 sps:$4 sm:$0xff]  }
 0x665   :  { %18755 = vmatpush1.bf16.msra.mxu1 %v27297_v24  ;;  %19203 = vmatprep.subr.bf16.mxu0 %v27308_v34  ;;  %v27338_v24 = vld [vmem:[%s37686_s3 + $0x1154] ss:$28 sps:$4 sm:$0xff]  }
 0x666   :  { %18756 = vmatprep.subr.bf16.mxu1 %v27305_v57  ;;  %v27336_v57 = vld [vmem:[%s37686_s3 + $0x1150] ss:$28 sps:$4 sm:$0xff]  }
 0x667   :  { %v27341_v34 = vld [vmem:[%s37686_s3 + $0x18f4] ss:$28 sps:$4 sm:$0xff]  }
 0x668   :  { %19204 = vmatpush1.bf16.msra.mxu0 %v27306_v29  ;;  %v27339_v29 = vld [vmem:[%s37686_s3 + $0x18f0] ss:$28 sps:$4 sm:$0xff]  }
 0x669   :  { %18757 = vmatpush1.bf16.msra.mxu1 %v27303_v47  ;;  %19205 = vmatprep.subr.bf16.mxu0 %v27314_v8  ;;  %v27344_v47 = vld [vmem:[%s37686_s3 + $0x118c] ss:$28 sps:$4 sm:$0xff]  }
 0x66a   :  { %18758 = vmatprep.subr.bf16.mxu1 %v27311_v14  ;;  %v27342_v14 = vld [vmem:[%s37686_s3 + $0x1188] ss:$28 sps:$4 sm:$0xff]  }
 0x66b   :  { %v27347_v8 = vld [vmem:[%s37686_s3 + $0x192c] ss:$28 sps:$4 sm:$0xff]  }
 0x66c   :  { %19206 = vmatpush1.bf16.msra.mxu0 %v27312_v27  ;;  %v27348_v27 = vld [vmem:[%s37686_s3 + $0x11c0] ss:$28 sps:$4 sm:$0xff]  }
 0x66d   :  { %18759 = vmatpush1.bf16.msra.mxu1 %v27309_v6  ;;  %19207 = vmatprep.subr.bf16.mxu0 %v27320_v2  ;;  %v27350_v6 = vld [vmem:[%s37686_s3 + $0x11c4] ss:$28 sps:$4 sm:$0xff]  }
 0x66e   :  { %18760 = vmatprep.subr.bf16.mxu1 %v27317_v55  ;;  %v27356_v55 = vld [vmem:[%s37686_s3 + $0x11fc] ss:$28 sps:$4 sm:$0xff]  }
 0x66f   :  { %v27351_v2 = vld [vmem:[%s37686_s3 + $0x1960] ss:$28 sps:$4 sm:$0xff]  }
 0x670   :  { %19208 = vmatpush1.bf16.msra.mxu0 %v27318_v15  ;;  %v27362_v15 = vld [vmem:[%s37686_s3 + $0x1234] ss:$28 sps:$4 sm:$0xff]  }
 0x671   :  { %18761 = vmatpush1.bf16.msra.mxu1 %v27315_v58  ;;  %19209 = vmatprep.subr.bf16.mxu0 %v27326_v23  ;;  %v27354_v58 = vld [vmem:[%s37686_s3 + $0x11f8] ss:$28 sps:$4 sm:$0xff]  }
 0x672   :  { %18762 = vmatprep.subr.bf16.mxu1 %v27323_v51  ;;  %v27360_v51 = vld [vmem:[%s37686_s3 + $0x1230] ss:$28 sps:$4 sm:$0xff]  }
 0x673   :  { %v27365_v23 = vld [vmem:[%s37686_s3 + $0x19d4] ss:$28 sps:$4 sm:$0xff]  }
 0x674   :  { %19210 = vmatpush1.bf16.msra.mxu0 %v27324_v22  ;;  %v27366_v22 = vld [vmem:[%s37686_s3 + $0x1268] ss:$28 sps:$4 sm:$0xff]  }
 0x675   :  { %18763 = vmatpush1.bf16.msra.mxu1 %v27321_v32  ;;  %19211 = vmatprep.subr.bf16.mxu0 %v27332_v10  ;;  %v27368_v32 = vld [vmem:[%s37686_s3 + $0x126c] ss:$28 sps:$4 sm:$0xff]  }
 0x676   :  { %18773 = vmatprep.subr.bf16.mxu1 %v27329_v45  ;;  %v27374_v45 = vld [vmem:[%s37686_s3 + $0x12a4] ss:$28 sps:$4 sm:$0xff]  }
 0x677   :  { %v27369_v10 = vld [vmem:[%s37686_s3 + $0x1a08] ss:$28 sps:$4 sm:$0xff]  }
 0x678   :  { %18765 = vmatmul.mubr.bf16.vlgmr.msra.gmra.mrb[36].mxu1 %v34151_v28  ;;  %19212 = vmatpush1.bf16.msra.mxu0 %v27330_v18  ;;  %v27377_v18 = vld [vmem:[%s37686_s3 + $0x1a44] ss:$28 sps:$4 sm:$0xff]  }
 0x679   :  { %18774 = vmatpush1.bf16.msra.mxu1 %v27327_v7  ;;  %18805 = vmatprep.mubr.bf16.mxu1 %v34156_v36  ;;  %v27372_v7 = vld [vmem:[%s37686_s3 + $0x12a0] ss:$28 sps:$4 sm:$0xff]  }
 0x67a   :  { %18775 = vmatprep.subr.bf16.mxu1 %v27335_v33  ;;  %19213 = vmatprep.subr.bf16.mxu0 %v27338_v24  ;;  %v27380_v33 = vld [vmem:[%s37686_s3 + $0x12dc] ss:$28 sps:$4 sm:$0xff]  }
 0x67b   :  { %v27375_v24 = vld [vmem:[%s37686_s3 + $0x1a40] ss:$28 sps:$4 sm:$0xff]  }
 0x67c   :  { %19214 = vmatpush1.bf16.msra.mxu0 %v27336_v57  ;;  %v27383_v57 = vld [vmem:[%s37686_s3 + $0x1a7c] ss:$28 sps:$4 sm:$0xff]  }
 0x67d   :  { %18776 = vmatpush1.bf16.msra.mxu1 %v27333_v21  ;;  %19224 = vmatprep.subr.bf16.mxu0 %v27344_v47  ;;  %v27378_v21 = vld [vmem:[%s37686_s3 + $0x12d8] ss:$28 sps:$4 sm:$0xff]  }
 0x67e   :  { %18777 = vmatprep.subr.bf16.mxu1 %v27341_v34  ;;  %v27386_v34 = vld [vmem:[%s37686_s3 + $0x1314] ss:$28 sps:$4 sm:$0xff]  }
 0x67f   :  { %19216 = vmatmul.mubr.bf16.vlgmr.msra.gmra.mrb[36].mxu0 %v33727_v0  ;;  %v27381_v47 = vld [vmem:[%s37686_s3 + $0x1a78] ss:$28 sps:$4 sm:$0xff]  }
 0x680   :  { %19225 = vmatpush1.bf16.msra.mxu0 %v27342_v14  ;;  %19256 = vmatprep.mubr.bf16.mxu0 %v33732_v56  ;;  %v27389_v14 = vld [vmem:[%s37686_s3 + $0x1ab4] ss:$28 sps:$4 sm:$0xff]  }
 0x681   :  { %18778 = vmatpush1.bf16.msra.mxu1 %v27339_v29  ;;  %19226 = vmatprep.subr.bf16.mxu0 %v27350_v6  ;;  %v27384_v29 = vld [vmem:[%s37686_s3 + $0x1310] ss:$28 sps:$4 sm:$0xff]  }
 0x682   :  { %18779 = vmatprep.subr.bf16.mxu1 %v27347_v8  ;;  %v27392_v8 = vld [vmem:[%s37686_s3 + $0x134c] ss:$28 sps:$4 sm:$0xff]  }
 0x683   :  { %v27387_v6 = vld [vmem:[%s37686_s3 + $0x1ab0] ss:$28 sps:$4 sm:$0xff]  }
 0x684   :  { %19227 = vmatpush1.bf16.msra.mxu0 %v27348_v27  ;;  %v27395_v27 = vld [vmem:[%s37686_s3 + $0x1aec] ss:$28 sps:$4 sm:$0xff]  }
 0x685   :  { %18780 = vmatpush1.bf16.msra.mxu1 %v27345_v50  ;;  %19228 = vmatprep.subr.bf16.mxu0 %v27356_v55  ;;  %v27390_v50 = vld [vmem:[%s37686_s3 + $0x1348] ss:$28 sps:$4 sm:$0xff]  }
 0x686   :  { %18781 = vmatprep.subr.bf16.mxu1 %v27353_v38  ;;  %v27398_v38 = vld [vmem:[%s37686_s3 + $0x1384] ss:$28 sps:$4 sm:$0xff]  }
 0x687   :  { %v27393_v55 = vld [vmem:[%s37686_s3 + $0x1ae8] ss:$28 sps:$4 sm:$0xff]  }
 0x688   :  { %19229 = vmatpush1.bf16.msra.mxu0 %v27354_v58  ;;  %v27401_v58 = vld [vmem:[%s37686_s3 + $0x1b24] ss:$28 sps:$4 sm:$0xff]  }
 0x689   :  { %18782 = vmatpush1.bf16.msra.mxu1 %v27351_v2  ;;  %19230 = vmatprep.subr.bf16.mxu0 %v27362_v15  ;;  %v27396_v2 = vld [vmem:[%s37686_s3 + $0x1380] ss:$28 sps:$4 sm:$0xff]  }
 0x68a   :  { %18783 = vmatprep.subr.bf16.mxu1 %v27359_v62  ;;  %v27404_v62 = vld [vmem:[%s37686_s3 + $0x13bc] ss:$28 sps:$4 sm:$0xff]  }
 0x68b   :  { %v27399_v15 = vld [vmem:[%s37686_s3 + $0x1b20] ss:$28 sps:$4 sm:$0xff]  }
 0x68c   :  { %19231 = vmatpush1.bf16.msra.mxu0 %v27360_v51  ;;  %v27407_v51 = vld [vmem:[%s37686_s3 + $0x1b5c] ss:$28 sps:$4 sm:$0xff]  }
 0x68d   :  { %18784 = vmatpush1.bf16.msra.mxu1 %v27357_v19  ;;  %19232 = vmatprep.subr.bf16.mxu0 %v27368_v32  ;;  %v27402_v19 = vld [vmem:[%s37686_s3 + $0x13b8] ss:$28 sps:$4 sm:$0xff]  }
 0x68e   :  { %18785 = vmatprep.subr.bf16.mxu1 %v27365_v23  ;;  %v27410_v23 = vld [vmem:[%s37686_s3 + $0x13f4] ss:$28 sps:$4 sm:$0xff]  }
 0x68f   :  { %v34312_v32 = vld [vmem:[%s37685_s2 + $0x10] sm:$0xff] }
 0x690   :  { %19233 = vmatpush1.bf16.msra.mxu0 %v27366_v22  ;;  %v28883_v22 = vld [vmem:[%s37685_s2 + $0x8] sm:$0xff] }
 0x691   :  { %18786 = vmatpush1.bf16.msra.mxu1 %v27363_v5  ;;  %19234 = vmatprep.subr.bf16.mxu0 %v27374_v45  ;;  %v27405_v5 = vld [vmem:[%s37686_s3 + $0x1b58] ss:$28 sps:$4 sm:$0xff]   ;;  %v27408_v45 = vld [vmem:[%s37686_s3 + $0x13f0] ss:$28 sps:$4 sm:$0xff]  }
 0x692   :  { %18787 = vmatprep.subr.bf16.mxu1 %v27371_v26  ;;  %v1375_v26 = vrot.slane %v28883_v22, %v33451_v43  ;;  %v27443_v22 = vld [vmem:[%s37686_s3 + $0x1cac] ss:$28 sps:$4 sm:$0xff]  }
 0x694   :  { %19235 = vmatpush1.bf16.msra.mxu0 %v27372_v7  ;;  %v27416_v7 = vld [vmem:[%s37686_s3 + $0x142c] ss:$28 sps:$4 sm:$0xff]  }
 0x695   :  { %18788 = vmatpush1.bf16.msra.mxu1 %v27369_v10  ;;  %19236 = vmatprep.subr.bf16.mxu0 %v27380_v33  ;;  %v27413_v10 = vld [vmem:[%s37686_s3 + $0x1b94] ss:$28 sps:$4 sm:$0xff]  }
 0x696   :  { %18789 = vmatprep.subr.bf16.mxu1 %v27377_v18  ;;  %v1387_v18 = vrot.slane %v34312_v32, %v30210_v20  ;;  %v27411_v33 = vld [vmem:[%s37686_s3 + $0x1b90] ss:$28 sps:$4 sm:$0xff]  }
 0x698   :  { %19237 = vmatpush1.bf16.msra.mxu0 %v27378_v21  ;;  %v27414_v21 = vld [vmem:[%s37686_s3 + $0x1428] ss:$28 sps:$4 sm:$0xff]  }
 0x699   :  { %18790 = vmatpush1.bf16.msra.mxu1 %v27375_v24  ;;  %19238 = vmatprep.subr.bf16.mxu0 %v27386_v34  ;;  %v24624_v24 = vadd.f32 %v31954_v31, %v1375_v26  ;;  %v27422_v34 = vld [vmem:[%s37686_s3 + $0x1464] ss:$28 sps:$4 sm:$0xff]  }
 0x69a   :  { %18791 = vmatprep.subr.bf16.mxu1 %v27383_v57  ;;  %v27419_v57 = vld [vmem:[%s37686_s3 + $0x1bcc] ss:$28 sps:$4 sm:$0xff]   ;;  %v27446_v26 = vld [vmem:[%s37686_s3 + $0x1544] ss:$28 sps:$4 sm:$0xff]  }
 0x69b   :  { %v27417_v31 = vld [vmem:[%s37686_s3 + $0x1bc8] ss:$28 sps:$4 sm:$0xff]  }
 0x69c   :  { %19239 = vmatpush1.bf16.msra.mxu0 %v27384_v29  ;;  %v9785_v29 = vmax.f32 %v24624_v24, 0.0  ;;  %v27450_v24 = vld [vmem:[%s37686_s3 + $0x1578] ss:$28 sps:$4 sm:$0xff]  }
 0x69d   :  { %18792 = vmatpush1.bf16.msra.mxu1 %v27381_v47  ;;  %19240 = vmatprep.subr.bf16.mxu0 %v27392_v8  ;;  %v24627_v47 = vadd.f32 %v32927_v9, %v1387_v18  ;;  %v27425_v8 = vld [vmem:[%s37686_s3 + $0x1c04] ss:$28 sps:$4 sm:$0xff]   ;;  %v27428_v9 = vld [vmem:[%s37686_s3 + $0x149c] ss:$28 sps:$4 sm:$0xff]  }
 0x69e   :  { %18793 = vmatprep.subr.bf16.mxu1 %v27389_v14  ;;  %v27420_v14 = vld [vmem:[%s37686_s3 + $0x1460] ss:$28 sps:$4 sm:$0xff]  }
 0x69f   :  { %v27452_v18 = vld [vmem:[%s37686_s3 + $0x157c] ss:$28 sps:$4 sm:$0xff]  }
 0x6a0   :  { %19241 = vmatpush1.bf16.msra.mxu0 %v27390_v50  ;;  %v27423_v50 = vld [vmem:[%s37686_s3 + $0x1c00] ss:$28 sps:$4 sm:$0xff]  }
 0x6a1   :  { %18794 = vmatpush1.bf16.msra.mxu1 %v27387_v6  ;;  %19242 = vmatprep.subr.bf16.mxu0 %v27398_v38  ;;  %v9788_v6 = vmax.f32 %v24627_v47, 0.0  ;;  %v34364_v38 = vpack.c.bf16 %v9785_v29, %v9785_v29  ;;  %v27456_v47 = vld [vmem:[%s37686_s3 + $0x15b0] ss:$28 sps:$4 sm:$0xff]  }
 0x6a2   :  { %18795 = vmatprep.subr.bf16.mxu1 %v27395_v27  ;;  %v27426_v27 = vld [vmem:[%s37686_s3 + $0x1498] ss:$28 sps:$4 sm:$0xff]   ;;  %v27464_v29 = vld [vmem:[%s37686_s3 + $0x15ec] ss:$28 sps:$4 sm:$0xff]  }
 0x6a4   :  { %19243 = vmatpush1.bf16.msra.mxu0 %v27396_v2  ;;  %v34369_v2 = vpack.c.bf16 %v9788_v6, %v9788_v6  ;;  %v27470_v6 = vld [vmem:[%s37686_s3 + $0x1624] ss:$28 sps:$4 sm:$0xff]  }
 0x6a5   :  { %18796 = vmatpush1.bf16.msra.mxu1 %v27393_v55  ;;  %19244 = vmatprep.subr.bf16.mxu0 %v27404_v62  ;;  %v27431_v55 = vld [vmem:[%s37686_s3 + $0x1c3c] ss:$28 sps:$4 sm:$0xff]  }
 0x6a6   :  { %18797 = vmatprep.subr.bf16.mxu1 %v27401_v58  ;;  %v27434_v58 = vld [vmem:[%s37686_s3 + $0x14d4] ss:$28 sps:$4 sm:$0xff]  }
 0x6a7   :  { %v27429_v62 = vld [vmem:[%s37686_s3 + $0x1c38] ss:$28 sps:$4 sm:$0xff]  }
 0x6a8   :  { %19245 = vmatpush1.bf16.msra.mxu0 %v27402_v19  ;;  %v27437_v19 = vld [vmem:[%s37686_s3 + $0x1c74] ss:$28 sps:$4 sm:$0xff]  }
 0x6a9   :  { %18798 = vmatpush1.bf16.msra.mxu1 %v27399_v15  ;;  %19246 = vmatprep.subr.bf16.mxu0 %v27410_v23  ;;  %v27432_v15 = vld [vmem:[%s37686_s3 + $0x14d0] ss:$28 sps:$4 sm:$0xff]  }
 0x6aa   :  { %18799 = vmatprep.subr.bf16.mxu1 %v27407_v51  ;;  %v27440_v51 = vld [vmem:[%s37686_s3 + $0x150c] ss:$28 sps:$4 sm:$0xff]  }
 0x6ab   :  { %v27435_v23 = vld [vmem:[%s37686_s3 + $0x1c70] ss:$28 sps:$4 sm:$0xff]  }
 0x6ac   :  { %19247 = vmatpush1.bf16.msra.mxu0 %v27408_v45  ;;  %v27441_v45 = vld [vmem:[%s37686_s3 + $0x1ca8] ss:$28 sps:$4 sm:$0xff]  }
 0x6ad   :  { %18800 = vmatpush1.bf16.msra.mxu1 %v27405_v5  ;;  %19248 = vmatprep.subr.bf16.mxu0 %v27416_v7  ;;  %v27438_v5 = vld [vmem:[%s37686_s3 + $0x1508] ss:$28 sps:$4 sm:$0xff]  }
 0x6ae   :  { %18801 = vmatprep.subr.bf16.mxu1 %v27413_v10  ;;  %v27444_v10 = vld [vmem:[%s37686_s3 + $0x1540] ss:$28 sps:$4 sm:$0xff]  }
 0x6af   :  { %v27449_v7 = vld [vmem:[%s37686_s3 + $0x1ce4] ss:$28 sps:$4 sm:$0xff]  }
 0x6b0   :  { %19249 = vmatpush1.bf16.msra.mxu0 %v27414_v21  ;;  %v27455_v21 = vld [vmem:[%s37686_s3 + $0x1d1c] ss:$28 sps:$4 sm:$0xff]  }
 0x6b1   :  { %18802 = vmatpush1.bf16.msra.mxu1 %v27411_v33  ;;  %19250 = vmatprep.subr.bf16.mxu0 %v27422_v34  ;;  %v27447_v33 = vld [vmem:[%s37686_s3 + $0x1ce0] ss:$28 sps:$4 sm:$0xff]   ;;  %v27453_v34 = vld [vmem:[%s37686_s3 + $0x1d18] ss:$28 sps:$4 sm:$0xff]  }
 0x6b2   :  { %18803 = vmatprep.subr.bf16.mxu1 %v27419_v57  ;;  %v27458_v57 = vld [vmem:[%s37686_s3 + $0x15b4] ss:$28 sps:$4 sm:$0xff]  }
 0x6b4   :  { %19251 = vmatpush1.bf16.msra.mxu0 %v27420_v14  ;;  %v27459_v14 = vld [vmem:[%s37686_s3 + $0x1d50] ss:$28 sps:$4 sm:$0xff]  }
 0x6b5   :  { %18804 = vmatpush1.bf16.msra.mxu1 %v27417_v31  ;;  %19252 = vmatprep.subr.bf16.mxu0 %v27428_v9  ;;  %v27461_v31 = vld [vmem:[%s37686_s3 + $0x1d54] ss:$28 sps:$4 sm:$0xff]   ;;  %v27467_v9 = vld [vmem:[%s37686_s3 + $0x1d8c] ss:$28 sps:$4 sm:$0xff]  }
 0x6b6   :  { %18814 = vmatprep.subr.bf16.mxu1 %v27425_v8  ;;  %v27462_v8 = vld [vmem:[%s37686_s3 + $0x15e8] ss:$28 sps:$4 sm:$0xff]  }
 0x6b8   :  { %18806 = vmatmul.mubr.bf16.vlgmr.msra.gmra.mrb[36].mxu1 %v34364_v38  ;;  %19253 = vmatpush1.bf16.msra.mxu0 %v27426_v27  ;;  %v27468_v27 = vld [vmem:[%s37686_s3 + $0x1620] ss:$28 sps:$4 sm:$0xff]  }
 0x6b9   :  { %18815 = vmatpush1.bf16.msra.mxu1 %v27423_v50  ;;  %18846 = vmatprep.mubr.bf16.mxu1 %v34369_v2  ;;  %v27465_v50 = vld [vmem:[%s37686_s3 + $0x1d88] ss:$28 sps:$4 sm:$0xff]  }
 0x6ba   :  { %18816 = vmatprep.subr.bf16.mxu1 %v27431_v55  ;;  %19254 = vmatprep.subr.bf16.mxu0 %v27434_v58  ;;  %v27473_v55 = vld [vmem:[%s37686_s3 + $0x1dc4] ss:$28 sps:$4 sm:$0xff]   ;;  %v27476_v58 = vld [vmem:[%s37686_s3 + $0x165c] ss:$28 sps:$4 sm:$0xff]  }
 0x6bc   :  { %19255 = vmatpush1.bf16.msra.mxu0 %v27432_v15  ;;  %v27474_v15 = vld [vmem:[%s37686_s3 + $0x1658] ss:$28 sps:$4 sm:$0xff]  }
 0x6bd   :  { %18817 = vmatpush1.bf16.msra.mxu1 %v27429_v62  ;;  %19265 = vmatprep.subr.bf16.mxu0 %v27440_v51  ;;  %v27471_v62 = vld [vmem:[%s37686_s3 + $0x1dc0] ss:$28 sps:$4 sm:$0xff]   ;;  %v27482_v51 = vld [vmem:[%s37686_s3 + $0x1694] ss:$28 sps:$4 sm:$0xff]  }
 0x6be   :  { %18818 = vmatprep.subr.bf16.mxu1 %v27437_v19  ;;  %v27479_v19 = vld [vmem:[%s37686_s3 + $0x1dfc] ss:$28 sps:$4 sm:$0xff]  }
 0x6bf   :  { %19257 = vmatmul.mubr.bf16.vlgmr.msra.gmra.mrb[36].mxu0 %v33945_v30 }
 0x6c0   :  { %19266 = vmatpush1.bf16.msra.mxu0 %v27438_v5  ;;  %19297 = vmatprep.mubr.bf16.mxu0 %v33950_v61  ;;  %v27480_v5 = vld [vmem:[%s37686_s3 + $0x1690] ss:$28 sps:$4 sm:$0xff]  }
 0x6c1   :  { %18819 = vmatpush1.bf16.msra.mxu1 %v27435_v23  ;;  %19267 = vmatprep.subr.bf16.mxu0 %v27446_v26  ;;  %v27477_v23 = vld [vmem:[%s37686_s3 + $0x1df8] ss:$28 sps:$4 sm:$0xff]   ;;  %v27488_v26 = vld [vmem:[%s37686_s3 + $0x16cc] ss:$28 sps:$4 sm:$0xff]  }
 0x6c2   :  { %18820 = vmatprep.subr.bf16.mxu1 %v27443_v22  ;;  %v27485_v22 = vld [vmem:[%s37686_s3 + $0x1e34] ss:$28 sps:$4 sm:$0xff]  }
 0x6c4   :  { %19268 = vmatpush1.bf16.msra.mxu0 %v27444_v10  ;;  %v27486_v10 = vld [vmem:[%s37686_s3 + $0x16c8] ss:$28 sps:$4 sm:$0xff]  }
 0x6c5   :  { %18821 = vmatpush1.bf16.msra.mxu1 %v27441_v45  ;;  %19269 = vmatprep.subr.bf16.mxu0 %v27452_v18  ;;  %v27483_v45 = vld [vmem:[%s37686_s3 + $0x1e30] ss:$28 sps:$4 sm:$0xff]   ;;  %v27494_v18 = vld [vmem:[%s37686_s3 + $0x1704] ss:$28 sps:$4 sm:$0xff]  }
 0x6c6   :  { %18822 = vmatprep.subr.bf16.mxu1 %v27449_v7  ;;  %v27491_v7 = vld [vmem:[%s37686_s3 + $0x1e6c] ss:$28 sps:$4 sm:$0xff]  }
 0x6c8   :  { %19270 = vmatpush1.bf16.msra.mxu0 %v27450_v24  ;;  %v27492_v24 = vld [vmem:[%s37686_s3 + $0x1700] ss:$28 sps:$4 sm:$0xff]  }
 0x6c9   :  { %18823 = vmatpush1.bf16.msra.mxu1 %v27447_v33  ;;  %19271 = vmatprep.subr.bf16.mxu0 %v27458_v57  ;;  %v27489_v33 = vld [vmem:[%s37686_s3 + $0x1e68] ss:$28 sps:$4 sm:$0xff]   ;;  %v27500_v57 = vld [vmem:[%s37686_s3 + $0x173c] ss:$28 sps:$4 sm:$0xff]  }
 0x6ca   :  { %18824 = vmatprep.subr.bf16.mxu1 %v27455_v21  ;;  %v27497_v21 = vld [vmem:[%s37686_s3 + $0x1ea4] ss:$28 sps:$4 sm:$0xff]  }
 0x6cc   :  { %19272 = vmatpush1.bf16.msra.mxu0 %v27456_v47  ;;  %v27498_v47 = vld [vmem:[%s37686_s3 + $0x1738] ss:$28 sps:$4 sm:$0xff]  }
 0x6cd   :  { %18825 = vmatpush1.bf16.msra.mxu1 %v27453_v34  ;;  %19273 = vmatprep.subr.bf16.mxu0 %v27464_v29  ;;  %v27495_v34 = vld [vmem:[%s37686_s3 + $0x1ea0] ss:$28 sps:$4 sm:$0xff]   ;;  %v27506_v29 = vld [vmem:[%s37686_s3 + $0x1774] ss:$28 sps:$4 sm:$0xff]  }
 0x6ce   :  { %18826 = vmatprep.subr.bf16.mxu1 %v27461_v31  ;;  %v27503_v31 = vld [vmem:[%s37686_s3 + $0x1edc] ss:$28 sps:$4 sm:$0xff]  }
 0x6d0   :  { %19274 = vmatpush1.bf16.msra.mxu0 %v27462_v8  ;;  %v27501_v8 = vld [vmem:[%s37686_s3 + $0x1ed8] ss:$28 sps:$4 sm:$0xff]  }
 0x6d1   :  { %18827 = vmatpush1.bf16.msra.mxu1 %v27459_v14  ;;  %19275 = vmatprep.subr.bf16.mxu0 %v27470_v6  ;;  %v1383_v14 = vrot.slane %v34312_v32, %v30199_v17  ;;  %v27509_v6 = vld [vmem:[%s37686_s3 + $0x1f14] ss:$28 sps:$4 sm:$0xff]  }
 0x6d2   :  { %18828 = vmatprep.subr.bf16.mxu1 %v27467_v9  ;;  %v27504_v9 = vld [vmem:[%s37686_s3 + $0x1770] ss:$28 sps:$4 sm:$0xff]  }
 0x6d4   :  { %19276 = vmatpush1.bf16.msra.mxu0 %v27468_v27  ;;  %v1395_v27 = vrot.slane %v34312_v32, %v30418_v48  ;;  %v27518_v32 = vld [vmem:[%s37686_s3 + $0x17e4] ss:$28 sps:$4 sm:$0xff]  }
 0x6d5   :  { %18829 = vmatpush1.bf16.msra.mxu1 %v27465_v50  ;;  %19277 = vmatprep.subr.bf16.mxu0 %v27476_v58  ;;  %v27512_v50 = vld [vmem:[%s37686_s3 + $0x17ac] ss:$28 sps:$4 sm:$0xff]  }
 0x6d6   :  { %18830 = vmatprep.subr.bf16.mxu1 %v27473_v55  ;;  %v24626_v55 = vadd.f32 %v32922_v52, %v1383_v14  ;;  %v27507_v58 = vld [vmem:[%s37686_s3 + $0x1f10] ss:$28 sps:$4 sm:$0xff]   ;;  %v24629_v52 = vadd.f32 %v32575_v60, %v1395_v27  ;;  %v27524_v60 = vld [vmem:[%s37686_s3 + $0x181c] ss:$28 sps:$4 sm:$0xff]   ;;  %v27542_v14 = vld [vmem:[%s37686_s3 + $0x18c4] ss:$28 sps:$4 sm:$0xff]  }
 0x6d7   :  { %v27543_v27 = vld [vmem:[%s37686_s3 + $0x2060] ss:$28 sps:$4 sm:$0xff]  }
 0x6d8   :  { %19278 = vmatpush1.bf16.msra.mxu0 %v27474_v15  ;;  %v27515_v15 = vld [vmem:[%s37686_s3 + $0x1f4c] ss:$28 sps:$4 sm:$0xff]  }
 0x6d9   :  { %18831 = vmatpush1.bf16.msra.mxu1 %v27471_v62  ;;  %19279 = vmatprep.subr.bf16.mxu0 %v27482_v51  ;;  %v27510_v62 = vld [vmem:[%s37686_s3 + $0x17a8] ss:$28 sps:$4 sm:$0xff]  }
 0x6da   :  { %18832 = vmatprep.subr.bf16.mxu1 %v27479_v19  ;;  %v9787_v19 = vmax.f32 %v24626_v55, 0.0  ;;  %v27513_v51 = vld [vmem:[%s37686_s3 + $0x1f48] ss:$28 sps:$4 sm:$0xff]   ;;  %v27546_v55 = vld [vmem:[%s37686_s3 + $0x18f8] ss:$28 sps:$4 sm:$0xff]  }
 0x6dc   :  { %19280 = vmatpush1.bf16.msra.mxu0 %v27480_v5  ;;  %v27521_v5 = vld [vmem:[%s37686_s3 + $0x1f84] ss:$28 sps:$4 sm:$0xff]  }
 0x6dd   :  { %18833 = vmatpush1.bf16.msra.mxu1 %v27477_v23  ;;  %19281 = vmatprep.subr.bf16.mxu0 %v27488_v26  ;;  %v27516_v23 = vld [vmem:[%s37686_s3 + $0x17e0] ss:$28 sps:$4 sm:$0xff]  }
 0x6de   :  { %18834 = vmatprep.subr.bf16.mxu1 %v27485_v22  ;;  %v9790_v22 = vmax.f32 %v24629_v52, 0.0  ;;  %v27519_v26 = vld [vmem:[%s37686_s3 + $0x1f80] ss:$28 sps:$4 sm:$0xff]   ;;  %v27557_v52 = vld [vmem:[%s37686_s3 + $0x20d4] ss:$28 sps:$4 sm:$0xff]  }
 0x6e0   :  { %19282 = vmatpush1.bf16.msra.mxu0 %v27486_v10  ;;  %v34570_v10 = vpack.c.bf16 %v9787_v19, %v9787_v19  ;;  %v27560_v19 = vld [vmem:[%s37686_s3 + $0x196c] ss:$28 sps:$4 sm:$0xff]  }
 0x6e1   :  { %18835 = vmatpush1.bf16.msra.mxu1 %v27483_v45  ;;  %19283 = vmatprep.subr.bf16.mxu0 %v27494_v18  ;;  %v27522_v45 = vld [vmem:[%s37686_s3 + $0x1818] ss:$28 sps:$4 sm:$0xff]   ;;  %v34575_v18 = vpack.c.bf16 %v9790_v22, %v9790_v22  ;;  %v27561_v22 = vld [vmem:[%s37686_s3 + $0x2108] ss:$28 sps:$4 sm:$0xff]  }
 0x6e2   :  { %18836 = vmatprep.subr.bf16.mxu1 %v27491_v7  ;;  %v27527_v7 = vld [vmem:[%s37686_s3 + $0x1fbc] ss:$28 sps:$4 sm:$0xff]  }
 0x6e4   :  { %19284 = vmatpush1.bf16.msra.mxu0 %v27492_v24  ;;  %v27525_v24 = vld [vmem:[%s37686_s3 + $0x1fb8] ss:$28 sps:$4 sm:$0xff]  }
 0x6e5   :  { %18837 = vmatpush1.bf16.msra.mxu1 %v27489_v33  ;;  %19285 = vmatprep.subr.bf16.mxu0 %v27500_v57  ;;  %v27530_v33 = vld [vmem:[%s37686_s3 + $0x1854] ss:$28 sps:$4 sm:$0xff]  }
 0x6e6   :  { %18838 = vmatprep.subr.bf16.mxu1 %v27497_v21  ;;  %v27528_v21 = vld [vmem:[%s37686_s3 + $0x1850] ss:$28 sps:$4 sm:$0xff]  }
 0x6e7   :  { %v27533_v57 = vld [vmem:[%s37686_s3 + $0x1ff4] ss:$28 sps:$4 sm:$0xff]  }
 0x6e8   :  { %19286 = vmatpush1.bf16.msra.mxu0 %v27498_v47  ;;  %v27531_v47 = vld [vmem:[%s37686_s3 + $0x1ff0] ss:$28 sps:$4 sm:$0xff]  }
 0x6e9   :  { %18839 = vmatpush1.bf16.msra.mxu1 %v27495_v34  ;;  %19287 = vmatprep.subr.bf16.mxu0 %v27506_v29  ;;  %v27536_v34 = vld [vmem:[%s37686_s3 + $0x188c] ss:$28 sps:$4 sm:$0xff]  }
 0x6ea   :  { %18840 = vmatprep.subr.bf16.mxu1 %v27503_v31  ;;  %v27534_v31 = vld [vmem:[%s37686_s3 + $0x1888] ss:$28 sps:$4 sm:$0xff]  }
 0x6eb   :  { %v27539_v29 = vld [vmem:[%s37686_s3 + $0x202c] ss:$28 sps:$4 sm:$0xff]  }
 0x6ec   :  { %19288 = vmatpush1.bf16.msra.mxu0 %v27504_v9  ;;  %v27540_v9 = vld [vmem:[%s37686_s3 + $0x18c0] ss:$28 sps:$4 sm:$0xff]  }
 0x6ed   :  { %18841 = vmatpush1.bf16.msra.mxu1 %v27501_v8  ;;  %19289 = vmatprep.subr.bf16.mxu0 %v27512_v50  ;;  %v27537_v8 = vld [vmem:[%s37686_s3 + $0x2028] ss:$28 sps:$4 sm:$0xff]   ;;  %v27548_v50 = vld [vmem:[%s37686_s3 + $0x18fc] ss:$28 sps:$4 sm:$0xff]  }
 0x6ee   :  { %18842 = vmatprep.subr.bf16.mxu1 %v27509_v6  ;;  %v27545_v6 = vld [vmem:[%s37686_s3 + $0x2064] ss:$28 sps:$4 sm:$0xff]  }
 0x6f0   :  { %19290 = vmatpush1.bf16.msra.mxu0 %v27510_v62  ;;  %v27554_v62 = vld [vmem:[%s37686_s3 + $0x1934] ss:$28 sps:$4 sm:$0xff]  }
 0x6f1   :  { %18843 = vmatpush1.bf16.msra.mxu1 %v27507_v58  ;;  %19291 = vmatprep.subr.bf16.mxu0 %v27518_v32  ;;  %v27551_v58 = vld [vmem:[%s37686_s3 + $0x209c] ss:$28 sps:$4 sm:$0xff]   ;;  %v27552_v32 = vld [vmem:[%s37686_s3 + $0x1930] ss:$28 sps:$4 sm:$0xff]  }
 0x6f2   :  { %18844 = vmatprep.subr.bf16.mxu1 %v27515_v15  ;;  %v27549_v15 = vld [vmem:[%s37686_s3 + $0x2098] ss:$28 sps:$4 sm:$0xff]  }
 0x6f4   :  { %19292 = vmatpush1.bf16.msra.mxu0 %v27516_v23  ;;  %v27558_v23 = vld [vmem:[%s37686_s3 + $0x1968] ss:$28 sps:$4 sm:$0xff]  }
 0x6f5   :  { %18845 = vmatpush1.bf16.msra.mxu1 %v27513_v51  ;;  %19293 = vmatprep.subr.bf16.mxu0 %v27524_v60  ;;  %v27555_v51 = vld [vmem:[%s37686_s3 + $0x20d0] ss:$28 sps:$4 sm:$0xff]   ;;  %v27566_v60 = vld [vmem:[%s37686_s3 + $0x19a4] ss:$28 sps:$4 sm:$0xff]  }
 0x6f6   :  { %18855 = vmatprep.subr.bf16.mxu1 %v27521_v5  ;;  %v27563_v5 = vld [vmem:[%s37686_s3 + $0x210c] ss:$28 sps:$4 sm:$0xff]  }
 0x6f8   :  { %18847 = vmatmul.mubr.bf16.vlgmr.msra.gmra.mrb[36].mxu1 %v34570_v10  ;;  %19294 = vmatpush1.bf16.msra.mxu0 %v27522_v45  ;;  %v27569_v45 = vld [vmem:[%s37686_s3 + $0x2144] ss:$28 sps:$4 sm:$0xff]  }
 0x6f9   :  { %18856 = vmatpush1.bf16.msra.mxu1 %v27519_v26  ;;  %18887 = vmatprep.mubr.bf16.mxu1 %v34575_v18  ;;  %v27564_v26 = vld [vmem:[%s37686_s3 + $0x19a0] ss:$28 sps:$4 sm:$0xff]  }
 0x6fa   :  { %18857 = vmatprep.subr.bf16.mxu1 %v27527_v7  ;;  %19295 = vmatprep.subr.bf16.mxu0 %v27530_v33  ;;  %v27572_v7 = vld [vmem:[%s37686_s3 + $0x19dc] ss:$28 sps:$4 sm:$0xff]  }
 0x6fb   :  { %v27567_v33 = vld [vmem:[%s37686_s3 + $0x2140] ss:$28 sps:$4 sm:$0xff]  }
 0x6fc   :  { %19296 = vmatpush1.bf16.msra.mxu0 %v27528_v21  ;;  %v27575_v21 = vld [vmem:[%s37686_s3 + $0x217c] ss:$28 sps:$4 sm:$0xff]  }
 0x6fd   :  { %18858 = vmatpush1.bf16.msra.mxu1 %v27525_v24  ;;  %19306 = vmatprep.subr.bf16.mxu0 %v27536_v34  ;;  %v27570_v24 = vld [vmem:[%s37686_s3 + $0x19d8] ss:$28 sps:$4 sm:$0xff]  }
 0x6fe   :  { %18859 = vmatprep.subr.bf16.mxu1 %v27533_v57  ;;  %v27578_v57 = vld [vmem:[%s37686_s3 + $0x1a14] ss:$28 sps:$4 sm:$0xff]  }
 0x6ff   :  { %19298 = vmatmul.mubr.bf16.vlgmr.msra.gmra.mrb[36].mxu0 %v34151_v28  ;;  %v27573_v34 = vld [vmem:[%s37686_s3 + $0x2178] ss:$28 sps:$4 sm:$0xff]  }
 0x700   :  { %19307 = vmatpush1.bf16.msra.mxu0 %v27534_v31  ;;  %19338 = vmatprep.mubr.bf16.mxu0 %v34156_v36  ;;  %v27581_v31 = vld [vmem:[%s37686_s3 + $0x21b4] ss:$28 sps:$4 sm:$0xff]  }
 0x701   :  { %18860 = vmatpush1.bf16.msra.mxu1 %v27531_v47  ;;  %19308 = vmatprep.subr.bf16.mxu0 %v27542_v14  ;;  %v27576_v47 = vld [vmem:[%s37686_s3 + $0x1a10] ss:$28 sps:$4 sm:$0xff]  }
 0x702   :  { %18861 = vmatprep.subr.bf16.mxu1 %v27539_v29  ;;  %v27584_v29 = vld [vmem:[%s37686_s3 + $0x1a4c] ss:$28 sps:$4 sm:$0xff]  }
 0x703   :  { %v27579_v14 = vld [vmem:[%s37686_s3 + $0x21b0] ss:$28 sps:$4 sm:$0xff]  }
 0x704   :  { %19309 = vmatpush1.bf16.msra.mxu0 %v27540_v9  ;;  %v27587_v9 = vld [vmem:[%s37686_s3 + $0x21ec] ss:$28 sps:$4 sm:$0xff]  }
 0x705   :  { %18862 = vmatpush1.bf16.msra.mxu1 %v27537_v8  ;;  %19310 = vmatprep.subr.bf16.mxu0 %v27548_v50  ;;  %v27582_v8 = vld [vmem:[%s37686_s3 + $0x1a48] ss:$28 sps:$4 sm:$0xff]  }
 0x706   :  { %18863 = vmatprep.subr.bf16.mxu1 %v27545_v6  ;;  %v27590_v6 = vld [vmem:[%s37686_s3 + $0x1a84] ss:$28 sps:$4 sm:$0xff]  }
 0x707   :  { %v27585_v50 = vld [vmem:[%s37686_s3 + $0x21e8] ss:$28 sps:$4 sm:$0xff]  }
 0x708   :  { %19311 = vmatpush1.bf16.msra.mxu0 %v27546_v55  ;;  %v27593_v55 = vld [vmem:[%s37686_s3 + $0x2224] ss:$28 sps:$4 sm:$0xff]  }
 0x709   :  { %18864 = vmatpush1.bf16.msra.mxu1 %v27543_v27  ;;  %19312 = vmatprep.subr.bf16.mxu0 %v27554_v62  ;;  %v27588_v27 = vld [vmem:[%s37686_s3 + $0x1a80] ss:$28 sps:$4 sm:$0xff]  }
 0x70a   :  { %18865 = vmatprep.subr.bf16.mxu1 %v27551_v58  ;;  %v27596_v58 = vld [vmem:[%s37686_s3 + $0x1abc] ss:$28 sps:$4 sm:$0xff]  }
 0x70b   :  { %v27591_v62 = vld [vmem:[%s37686_s3 + $0x2220] ss:$28 sps:$4 sm:$0xff]  }
 0x70c   :  { %19313 = vmatpush1.bf16.msra.mxu0 %v27552_v32  ;;  %v27599_v32 = vld [vmem:[%s37686_s3 + $0x225c] ss:$28 sps:$4 sm:$0xff]  }
 0x70d   :  { %18866 = vmatpush1.bf16.msra.mxu1 %v27549_v15  ;;  %19314 = vmatprep.subr.bf16.mxu0 %v27560_v19  ;;  %v27594_v15 = vld [vmem:[%s37686_s3 + $0x1ab8] ss:$28 sps:$4 sm:$0xff]  }
 0x70e   :  { %18867 = vmatprep.subr.bf16.mxu1 %v27557_v52  ;;  %v27602_v52 = vld [vmem:[%s37686_s3 + $0x1af4] ss:$28 sps:$4 sm:$0xff]  }
 0x70f   :  { %v27597_v19 = vld [vmem:[%s37686_s3 + $0x2258] ss:$28 sps:$4 sm:$0xff]  }
 0x710   :  { %19315 = vmatpush1.bf16.msra.mxu0 %v27558_v23  ;;  %v34737_v23 = vld [vmem:[%s37685_s2 + $0x10] sm:$0xff] }
 0x711   :  { %18868 = vmatpush1.bf16.msra.mxu1 %v27555_v51  ;;  %19316 = vmatprep.subr.bf16.mxu0 %v27566_v60  ;;  %v27600_v51 = vld [vmem:[%s37686_s3 + $0x1af0] ss:$28 sps:$4 sm:$0xff]  }
 0x712   :  { %18869 = vmatprep.subr.bf16.mxu1 %v27563_v5  ;;  %v1391_v5 = vrot.slane %v34737_v23, %v30409_v46  ;;  %v27605_v60 = vld [vmem:[%s37686_s3 + $0x2294] ss:$28 sps:$4 sm:$0xff]  }
 0x714   :  { %19317 = vmatpush1.bf16.msra.mxu0 %v27564_v26  ;;  %v1403_v26 = vrot.slane %v34737_v23, %v33025_v40 }
 0x715   :  { %18870 = vmatpush1.bf16.msra.mxu1 %v27561_v22  ;;  %19318 = vmatprep.subr.bf16.mxu0 %v27572_v7  ;;  %v27608_v22 = vld [vmem:[%s37686_s3 + $0x1b2c] ss:$28 sps:$4 sm:$0xff]  }
 0x716   :  { %18871 = vmatprep.subr.bf16.mxu1 %v27569_v45  ;;  %v27603_v45 = vld [vmem:[%s37686_s3 + $0x2290] ss:$28 sps:$4 sm:$0xff]   ;;  %v27606_v7 = vld [vmem:[%s37686_s3 + $0x1b28] ss:$28 sps:$4 sm:$0xff]  }
 0x718   :  { %19319 = vmatpush1.bf16.msra.mxu0 %v27570_v24  ;;  %v27611_v24 = vld [vmem:[%s37686_s3 + $0x22cc] ss:$28 sps:$4 sm:$0xff]  }
 0x719   :  { %18872 = vmatpush1.bf16.msra.mxu1 %v27567_v33  ;;  %19320 = vmatprep.subr.bf16.mxu0 %v27578_v57  ;;  %v24628_v33 = vadd.f32 %v32573_v59, %v1391_v5  ;;  %v24631_v57 = vadd.f32 %v33620_v41, %v1403_v26  ;;  %v27612_v59 = vld [vmem:[%s37686_s3 + $0x1b60] ss:$28 sps:$4 sm:$0xff]   ;;  %v27633_v5 = vld [vmem:[%s37686_s3 + $0x23a8] ss:$28 sps:$4 sm:$0xff]  }
 0x71a   :  { %18873 = vmatprep.subr.bf16.mxu1 %v27575_v21  ;;  %v27614_v21 = vld [vmem:[%s37686_s3 + $0x1b64] ss:$28 sps:$4 sm:$0xff]   ;;  %v27620_v41 = vld [vmem:[%s37686_s3 + $0x1b9c] ss:$28 sps:$4 sm:$0xff]  }
 0x71b   :  { %v27644_v26 = vld [vmem:[%s37686_s3 + $0x1c7c] ss:$28 sps:$4 sm:$0xff]  }
 0x71c   :  { %19321 = vmatpush1.bf16.msra.mxu0 %v27576_v47  ;;  %v9789_v47 = vmax.f32 %v24628_v33, 0.0  ;;  %v27647_v33 = vld [vmem:[%s37686_s3 + $0x241c] ss:$28 sps:$4 sm:$0xff]  }
 0x71d   :  { %18874 = vmatpush1.bf16.msra.mxu1 %v27573_v34  ;;  %19322 = vmatprep.subr.bf16.mxu0 %v27584_v29  ;;  %v27609_v34 = vld [vmem:[%s37686_s3 + $0x22c8] ss:$28 sps:$4 sm:$0xff]   ;;  %v9792_v29 = vmax.f32 %v24631_v57, 0.0  ;;  %v27648_v57 = vld [vmem:[%s37686_s3 + $0x1cb0] ss:$28 sps:$4 sm:$0xff]  }
 0x71e   :  { %18875 = vmatprep.subr.bf16.mxu1 %v27581_v31  ;;  %v27617_v31 = vld [vmem:[%s37686_s3 + $0x2304] ss:$28 sps:$4 sm:$0xff]  }
 0x720   :  { %19323 = vmatpush1.bf16.msra.mxu0 %v27582_v8  ;;  %v27618_v8 = vld [vmem:[%s37686_s3 + $0x1b98] ss:$28 sps:$4 sm:$0xff]  }
 0x721   :  { %18876 = vmatpush1.bf16.msra.mxu1 %v27579_v14  ;;  %19324 = vmatprep.subr.bf16.mxu0 %v27590_v6  ;;  %v27615_v14 = vld [vmem:[%s37686_s3 + $0x2300] ss:$28 sps:$4 sm:$0xff]  }
 0x722   :  { %18877 = vmatprep.subr.bf16.mxu1 %v27587_v9  ;;  %v34781_v9 = vpack.c.bf16 %v9789_v47, %v9789_v47  ;;  %v27623_v6 = vld [vmem:[%s37686_s3 + $0x233c] ss:$28 sps:$4 sm:$0xff]   ;;  %v27651_v47 = vld [vmem:[%s37686_s3 + $0x2450] ss:$28 sps:$4 sm:$0xff]  }
 0x724   :  { %19325 = vmatpush1.bf16.msra.mxu0 %v27588_v27  ;;  %v27626_v27 = vld [vmem:[%s37686_s3 + $0x1bd4] ss:$28 sps:$4 sm:$0xff]  }
 0x725   :  { %18878 = vmatpush1.bf16.msra.mxu1 %v27585_v50  ;;  %19326 = vmatprep.subr.bf16.mxu0 %v27596_v58  ;;  %v34786_v50 = vpack.c.bf16 %v9792_v29, %v9792_v29  ;;  %v27624_v58 = vld [vmem:[%s37686_s3 + $0x1bd0] ss:$28 sps:$4 sm:$0xff]   ;;  %v27662_v29 = vld [vmem:[%s37686_s3 + $0x1d24] ss:$28 sps:$4 sm:$0xff]  }
 0x726   :  { %18879 = vmatprep.subr.bf16.mxu1 %v27593_v55  ;;  %v27621_v55 = vld [vmem:[%s37686_s3 + $0x2338] ss:$28 sps:$4 sm:$0xff]  }
 0x728   :  { %19327 = vmatpush1.bf16.msra.mxu0 %v27594_v15  ;;  %v27632_v15 = vld [vmem:[%s37686_s3 + $0x1c0c] ss:$28 sps:$4 sm:$0xff]  }
 0x729   :  { %18880 = vmatpush1.bf16.msra.mxu1 %v27591_v62  ;;  %19328 = vmatprep.subr.bf16.mxu0 %v27602_v52  ;;  %v27629_v62 = vld [vmem:[%s37686_s3 + $0x2374] ss:$28 sps:$4 sm:$0xff]   ;;  %v27630_v52 = vld [vmem:[%s37686_s3 + $0x1c08] ss:$28 sps:$4 sm:$0xff]  }
 0x72a   :  { %18881 = vmatprep.subr.bf16.mxu1 %v27599_v32  ;;  %v27627_v32 = vld [vmem:[%s37686_s3 + $0x2370] ss:$28 sps:$4 sm:$0xff]  }
 0x72c   :  { %19329 = vmatpush1.bf16.msra.mxu0 %v27600_v51  ;;  %v27638_v51 = vld [vmem:[%s37686_s3 + $0x1c44] ss:$28 sps:$4 sm:$0xff]  }
 0x72d   :  { %18882 = vmatpush1.bf16.msra.mxu1 %v27597_v19  ;;  %19330 = vmatprep.subr.bf16.mxu0 %v27608_v22  ;;  %v27635_v19 = vld [vmem:[%s37686_s3 + $0x23ac] ss:$28 sps:$4 sm:$0xff]   ;;  %v27641_v22 = vld [vmem:[%s37686_s3 + $0x23e4] ss:$28 sps:$4 sm:$0xff]  }
 0x72e   :  { %18883 = vmatprep.subr.bf16.mxu1 %v27605_v60  ;;  %v27636_v60 = vld [vmem:[%s37686_s3 + $0x1c40] ss:$28 sps:$4 sm:$0xff]  }
 0x730   :  { %19331 = vmatpush1.bf16.msra.mxu0 %v27606_v7  ;;  %v27642_v7 = vld [vmem:[%s37686_s3 + $0x1c78] ss:$28 sps:$4 sm:$0xff]  }
 0x731   :  { %18884 = vmatpush1.bf16.msra.mxu1 %v27603_v45  ;;  %19332 = vmatprep.subr.bf16.mxu0 %v27614_v21  ;;  %v27639_v45 = vld [vmem:[%s37686_s3 + $0x23e0] ss:$28 sps:$4 sm:$0xff]   ;;  %v27645_v21 = vld [vmem:[%s37686_s3 + $0x2418] ss:$28 sps:$4 sm:$0xff]  }
 0x732   :  { %18885 = vmatprep.subr.bf16.mxu1 %v27611_v24  ;;  %v27650_v24 = vld [vmem:[%s37686_s3 + $0x1cb4] ss:$28 sps:$4 sm:$0xff]  }
 0x734   :  { %19333 = vmatpush1.bf16.msra.mxu0 %v27612_v59  ;;  %v27656_v59 = vld [vmem:[%s37686_s3 + $0x1cec] ss:$28 sps:$4 sm:$0xff]  }
 0x735   :  { %18886 = vmatpush1.bf16.msra.mxu1 %v27609_v34  ;;  %19334 = vmatprep.subr.bf16.mxu0 %v27620_v41  ;;  %v27653_v34 = vld [vmem:[%s37686_s3 + $0x2454] ss:$28 sps:$4 sm:$0xff]   ;;  %v27659_v41 = vld [vmem:[%s37686_s3 + $0x248c] ss:$28 sps:$4 sm:$0xff]  }
 0x736   :  { %18896 = vmatprep.subr.bf16.mxu1 %v27617_v31  ;;  %v27654_v31 = vld [vmem:[%s37686_s3 + $0x1ce8] ss:$28 sps:$4 sm:$0xff]  }
 0x738   :  { %18888 = vmatmul.mubr.bf16.vlgmr.msra.gmra.mrb[36].mxu1 %v34781_v9  ;;  %19335 = vmatpush1.bf16.msra.mxu0 %v27618_v8  ;;  %v27660_v8 = vld [vmem:[%s37686_s3 + $0x1d20] ss:$28 sps:$4 sm:$0xff]  }
 0x739   :  { %18897 = vmatpush1.bf16.msra.mxu1 %v27615_v14  ;;  %18928 = vmatprep.mubr.bf16.mxu1 %v34786_v50  ;;  %v27657_v14 = vld [vmem:[%s37686_s3 + $0x2488] ss:$28 sps:$4 sm:$0xff]  }
 0x73a   :  { %18898 = vmatprep.subr.bf16.mxu1 %v27623_v6  ;;  %19336 = vmatprep.subr.bf16.mxu0 %v27626_v27  ;;  %v27665_v6 = vld [vmem:[%s37686_s3 + $0x24c4] ss:$28 sps:$4 sm:$0xff]   ;;  %v27668_v27 = vld [vmem:[%s37686_s3 + $0x1d5c] ss:$28 sps:$4 sm:$0xff]  }
 0x73c   :  { %19337 = vmatpush1.bf16.msra.mxu0 %v27624_v58  ;;  %v27666_v58 = vld [vmem:[%s37686_s3 + $0x1d58] ss:$28 sps:$4 sm:$0xff]  }
 0x73d   :  { %18899 = vmatpush1.bf16.msra.mxu1 %v27621_v55  ;;  %19347 = vmatprep.subr.bf16.mxu0 %v27632_v15  ;;  %v27663_v55 = vld [vmem:[%s37686_s3 + $0x24c0] ss:$28 sps:$4 sm:$0xff]   ;;  %v27674_v15 = vld [vmem:[%s37686_s3 + $0x1d94] ss:$28 sps:$4 sm:$0xff]  }
 0x73e   :  { %18900 = vmatprep.subr.bf16.mxu1 %v27629_v62  ;;  %v27671_v62 = vld [vmem:[%s37686_s3 + $0x24fc] ss:$28 sps:$4 sm:$0xff]  }
 0x73f   :  { %19339 = vmatmul.mubr.bf16.vlgmr.msra.gmra.mrb[36].mxu0 %v34364_v38 }
 0x740   :  { %19348 = vmatpush1.bf16.msra.mxu0 %v27630_v52  ;;  %19379 = vmatprep.mubr.bf16.mxu0 %v34369_v2  ;;  %v27672_v52 = vld [vmem:[%s37686_s3 + $0x1d90] ss:$28 sps:$4 sm:$0xff]  }
 0x741   :  { %18901 = vmatpush1.bf16.msra.mxu1 %v27627_v32  ;;  %19349 = vmatprep.subr.bf16.mxu0 %v27638_v51  ;;  %v27669_v32 = vld [vmem:[%s37686_s3 + $0x24f8] ss:$28 sps:$4 sm:$0xff]   ;;  %v27680_v51 = vld [vmem:[%s37686_s3 + $0x1dcc] ss:$28 sps:$4 sm:$0xff]  }
 0x742   :  { %18902 = vmatprep.subr.bf16.mxu1 %v27635_v19  ;;  %v27677_v19 = vld [vmem:[%s37686_s3 + $0x2534] ss:$28 sps:$4 sm:$0xff]  }
 0x744   :  { %19350 = vmatpush1.bf16.msra.mxu0 %v27636_v60  ;;  %v27678_v60 = vld [vmem:[%s37686_s3 + $0x1dc8] ss:$28 sps:$4 sm:$0xff]  }
 0x745   :  { %18903 = vmatpush1.bf16.msra.mxu1 %v27633_v5  ;;  %19351 = vmatprep.subr.bf16.mxu0 %v27644_v26  ;;  %v27675_v5 = vld [vmem:[%s37686_s3 + $0x2530] ss:$28 sps:$4 sm:$0xff]   ;;  %v27686_v26 = vld [vmem:[%s37686_s3 + $0x1e04] ss:$28 sps:$4 sm:$0xff]  }
 0x746   :  { %18904 = vmatprep.subr.bf16.mxu1 %v27641_v22  ;;  %v27683_v22 = vld [vmem:[%s37686_s3 + $0x256c] ss:$28 sps:$4 sm:$0xff]  }
 0x748   :  { %19352 = vmatpush1.bf16.msra.mxu0 %v27642_v7  ;;  %v27684_v7 = vld [vmem:[%s37686_s3 + $0x1e00] ss:$28 sps:$4 sm:$0xff]  }
 0x749   :  { %18905 = vmatpush1.bf16.msra.mxu1 %v27639_v45  ;;  %19353 = vmatprep.subr.bf16.mxu0 %v27650_v24  ;;  %v27681_v45 = vld [vmem:[%s37686_s3 + $0x2568] ss:$28 sps:$4 sm:$0xff]   ;;  %v27692_v24 = vld [vmem:[%s37686_s3 + $0x1e3c] ss:$28 sps:$4 sm:$0xff]  }
 0x74a   :  { %18906 = vmatprep.subr.bf16.mxu1 %v27647_v33  ;;  %v27689_v33 = vld [vmem:[%s37686_s3 + $0x25a4] ss:$28 sps:$4 sm:$0xff]  }
 0x74c   :  { %19354 = vmatpush1.bf16.msra.mxu0 %v27648_v57  ;;  %v27690_v57 = vld [vmem:[%s37686_s3 + $0x1e38] ss:$28 sps:$4 sm:$0xff]  }
 0x74d   :  { %18907 = vmatpush1.bf16.msra.mxu1 %v27645_v21  ;;  %19355 = vmatprep.subr.bf16.mxu0 %v27656_v59  ;;  %v27687_v21 = vld [vmem:[%s37686_s3 + $0x25a0] ss:$28 sps:$4 sm:$0xff]   ;;  %v27698_v59 = vld [vmem:[%s37686_s3 + $0x1e74] ss:$28 sps:$4 sm:$0xff]  }
 0x74e   :  { %18908 = vmatprep.subr.bf16.mxu1 %v27653_v34  ;;  %v27695_v34 = vld [vmem:[%s37686_s3 + $0x25dc] ss:$28 sps:$4 sm:$0xff]  }
 0x750   :  { %19356 = vmatpush1.bf16.msra.mxu0 %v27654_v31  ;;  %v1399_v31 = vrot.slane %v34737_v23, %v33235_v3 }
 0x751   :  { %18909 = vmatpush1.bf16.msra.mxu1 %v27651_v47  ;;  %19357 = vmatprep.subr.bf16.mxu0 %v27662_v29  ;;  %v27693_v47 = vld [vmem:[%s37686_s3 + $0x25d8] ss:$28 sps:$4 sm:$0xff]  }
 0x752   :  { %18910 = vmatprep.subr.bf16.mxu1 %v27659_v41  ;;  %v27696_v41 = vld [vmem:[%s37686_s3 + $0x1e70] ss:$28 sps:$4 sm:$0xff]  }
 0x753   :  { %v27701_v29 = vld [vmem:[%s37686_s3 + $0x2614] ss:$28 sps:$4 sm:$0xff]  }
 0x754   :  { %19358 = vmatpush1.bf16.msra.mxu0 %v27660_v8  ;;  %v27704_v8 = vld [vmem:[%s37686_s3 + $0x1eac] ss:$28 sps:$4 sm:$0xff]  }
 0x755   :  { %18911 = vmatpush1.bf16.msra.mxu1 %v27657_v14  ;;  %19359 = vmatprep.subr.bf16.mxu0 %v27668_v27  ;;  %v1411_v14 = vrot.slane %v34737_v23, %v33244_v12  ;;  %v24630_v27 = vadd.f32 %v33615_v13, %v1399_v31  ;;  %v27707_v12 = vld [vmem:[%s37686_s3 + $0x264c] ss:$28 sps:$4 sm:$0xff]  }
 0x756   :  { %18912 = vmatprep.subr.bf16.mxu1 %v27665_v6  ;;  %v27699_v6 = vld [vmem:[%s37686_s3 + $0x2610] ss:$28 sps:$4 sm:$0xff]   ;;  %v27705_v13 = vld [vmem:[%s37686_s3 + $0x2648] ss:$28 sps:$4 sm:$0xff]  }
 0x757   :  { %v27729_v31 = vld [vmem:[%s37686_s3 + $0x2728] ss:$28 sps:$4 sm:$0xff]  }
 0x758   :  { %19360 = vmatpush1.bf16.msra.mxu0 %v27666_v58  ;;  %v24633_v58 = vadd.f32 %v33226_v11, %v1411_v14  ;;  %v27713_v11 = vld [vmem:[%s37686_s3 + $0x2684] ss:$28 sps:$4 sm:$0xff]   ;;  %v27740_v14 = vld [vmem:[%s37686_s3 + $0x1ffc] ss:$28 sps:$4 sm:$0xff]  }
 0x759   :  { %18913 = vmatpush1.bf16.msra.mxu1 %v27663_v55  ;;  %19361 = vmatprep.subr.bf16.mxu0 %v27674_v15  ;;  %v27702_v55 = vld [vmem:[%s37686_s3 + $0x1ea8] ss:$28 sps:$4 sm:$0xff]   ;;  %v9791_v15 = vmax.f32 %v24630_v27, 0.0  ;;  %v27743_v27 = vld [vmem:[%s37686_s3 + $0x279c] ss:$28 sps:$4 sm:$0xff]  }
 0x75a   :  { %18914 = vmatprep.subr.bf16.mxu1 %v27671_v62  ;;  %v27710_v62 = vld [vmem:[%s37686_s3 + $0x1ee4] ss:$28 sps:$4 sm:$0xff]  }
 0x75c   :  { %19362 = vmatpush1.bf16.msra.mxu0 %v27672_v52  ;;  %v9794_v52 = vmax.f32 %v24633_v58, 0.0  ;;  %v27744_v58 = vld [vmem:[%s37686_s3 + $0x2030] ss:$28 sps:$4 sm:$0xff]  }
 0x75d   :  { %18915 = vmatpush1.bf16.msra.mxu1 %v27669_v32  ;;  %19363 = vmatprep.subr.bf16.mxu0 %v27680_v51  ;;  %v27708_v32 = vld [vmem:[%s37686_s3 + $0x1ee0] ss:$28 sps:$4 sm:$0xff]  }
 0x75e   :  { %18916 = vmatprep.subr.bf16.mxu1 %v27677_v19  ;;  %v27716_v19 = vld [vmem:[%s37686_s3 + $0x1f1c] ss:$28 sps:$4 sm:$0xff]  }
 0x75f   :  { %v27711_v51 = vld [vmem:[%s37686_s3 + $0x2680] ss:$28 sps:$4 sm:$0xff]  }
 0x760   :  { %19364 = vmatpush1.bf16.msra.mxu0 %v27678_v60  ;;  %v27714_v60 = vld [vmem:[%s37686_s3 + $0x1f18] ss:$28 sps:$4 sm:$0xff]  }
 0x761   :  { %18917 = vmatpush1.bf16.msra.mxu1 %v27675_v5  ;;  %19365 = vmatprep.subr.bf16.mxu0 %v27686_v26  ;;  %v34984_v5 = vpack.c.bf16 %v9791_v15, %v9791_v15  ;;  %v34992_v26 = vpack.c.bf16 %v9794_v52, %v9794_v52  ;;  %v27747_v15 = vld [vmem:[%s37686_s3 + $0x27d0] ss:$28 sps:$4 sm:$0xff]   ;;  %v27758_v52 = vld [vmem:[%s37686_s3 + $0x20a4] ss:$28 sps:$4 sm:$0xff]  }
 0x762   :  { %18918 = vmatprep.subr.bf16.mxu1 %v27683_v22  ;;  %v27719_v22 = vld [vmem:[%s37686_s3 + $0x26bc] ss:$28 sps:$4 sm:$0xff]  }
 0x764   :  { %19366 = vmatpush1.bf16.msra.mxu0 %v27684_v7  ;;  %v27717_v7 = vld [vmem:[%s37686_s3 + $0x26b8] ss:$28 sps:$4 sm:$0xff]  }
 0x765   :  { %18919 = vmatpush1.bf16.msra.mxu1 %v27681_v45  ;;  %19367 = vmatprep.subr.bf16.mxu0 %v27692_v24  ;;  %v27722_v45 = vld [vmem:[%s37686_s3 + $0x1f54] ss:$28 sps:$4 sm:$0xff]  }
 0x766   :  { %18920 = vmatprep.subr.bf16.mxu1 %v27689_v33  ;;  %v27720_v33 = vld [vmem:[%s37686_s3 + $0x1f50] ss:$28 sps:$4 sm:$0xff]  }
 0x767   :  { %v27725_v24 = vld [vmem:[%s37686_s3 + $0x26f4] ss:$28 sps:$4 sm:$0xff]  }
 0x768   :  { %19368 = vmatpush1.bf16.msra.mxu0 %v27690_v57  ;;  %v27723_v57 = vld [vmem:[%s37686_s3 + $0x26f0] ss:$28 sps:$4 sm:$0xff]  }
 0x769   :  { %18921 = vmatpush1.bf16.msra.mxu1 %v27687_v21  ;;  %19369 = vmatprep.subr.bf16.mxu0 %v27698_v59  ;;  %v27728_v21 = vld [vmem:[%s37686_s3 + $0x1f8c] ss:$28 sps:$4 sm:$0xff]  }
 0x76a   :  { %18922 = vmatprep.subr.bf16.mxu1 %v27695_v34  ;;  %v27726_v34 = vld [vmem:[%s37686_s3 + $0x1f88] ss:$28 sps:$4 sm:$0xff]  }
 0x76b   :  { %v27731_v59 = vld [vmem:[%s37686_s3 + $0x272c] ss:$28 sps:$4 sm:$0xff]  }
 0x76c   :  { %19370 = vmatpush1.bf16.msra.mxu0 %v27696_v41  ;;  %v27732_v41 = vld [vmem:[%s37686_s3 + $0x1fc0] ss:$28 sps:$4 sm:$0xff]  }
 0x76d   :  { %18923 = vmatpush1.bf16.msra.mxu1 %v27693_v47  ;;  %19371 = vmatprep.subr.bf16.mxu0 %v27704_v8  ;;  %v27734_v47 = vld [vmem:[%s37686_s3 + $0x1fc4] ss:$28 sps:$4 sm:$0xff]  }
 0x76e   :  { %18924 = vmatprep.subr.bf16.mxu1 %v27701_v29  ;;  %v27737_v29 = vld [vmem:[%s37686_s3 + $0x2764] ss:$28 sps:$4 sm:$0xff]  }
 0x76f   :  { %v27735_v8 = vld [vmem:[%s37686_s3 + $0x2760] ss:$28 sps:$4 sm:$0xff]  }
 0x770   :  { %19372 = vmatpush1.bf16.msra.mxu0 %v27702_v55  ;;  %v27746_v55 = vld [vmem:[%s37686_s3 + $0x2034] ss:$28 sps:$4 sm:$0xff]  }
 0x771   :  { %18925 = vmatpush1.bf16.msra.mxu1 %v27699_v6  ;;  %19373 = vmatprep.subr.bf16.mxu0 %v27710_v62  ;;  %v27738_v6 = vld [vmem:[%s37686_s3 + $0x1ff8] ss:$28 sps:$4 sm:$0xff]  }
 0x772   :  { %18926 = vmatprep.subr.bf16.mxu1 %v27707_v12  ;;  %v27741_v12 = vld [vmem:[%s37686_s3 + $0x2798] ss:$28 sps:$4 sm:$0xff]  }
 0x773   :  { %v27749_v62 = vld [vmem:[%s37686_s3 + $0x27d4] ss:$28 sps:$4 sm:$0xff]  }
 0x774   :  { %19374 = vmatpush1.bf16.msra.mxu0 %v27708_v32  ;;  %v27750_v32 = vld [vmem:[%s37686_s3 + $0x2068] ss:$28 sps:$4 sm:$0xff]  }
 0x775   :  { %18927 = vmatpush1.bf16.msra.mxu1 %v27705_v13  ;;  %19375 = vmatprep.subr.bf16.mxu0 %v27716_v19  ;;  %v27752_v13 = vld [vmem:[%s37686_s3 + $0x206c] ss:$28 sps:$4 sm:$0xff]  }
 0x776   :  { %18937 = vmatprep.subr.bf16.mxu1 %v27713_v11  ;;  %v27755_v11 = vld [vmem:[%s37686_s3 + $0x280c] ss:$28 sps:$4 sm:$0xff]  }
 0x777   :  { %v27753_v19 = vld [vmem:[%s37686_s3 + $0x2808] ss:$28 sps:$4 sm:$0xff]  }
 0x778   :  { %18929 = vmatmul.mubr.bf16.vlgmr.msra.gmra.mrb[36].mxu1 %v34984_v5  ;;  %19376 = vmatpush1.bf16.msra.mxu0 %v27714_v60  ;;  %v27761_v60 = vld [vmem:[%s37686_s3 + $0x2844] ss:$28 sps:$4 sm:$0xff]  }
 0x779   :  { %18938 = vmatpush1.bf16.msra.mxu1 %v27711_v51  ;;  %18969 = vmatprep.mubr.bf16.mxu1 %v34992_v26  ;;  %v27756_v51 = vld [vmem:[%s37686_s3 + $0x20a0] ss:$28 sps:$4 sm:$0xff]  }
 0x77a   :  { %18939 = vmatprep.subr.bf16.mxu1 %v27719_v22  ;;  %19377 = vmatprep.subr.bf16.mxu0 %v27722_v45  ;;  %v27764_v22 = vld [vmem:[%s37686_s3 + $0x20dc] ss:$28 sps:$4 sm:$0xff]  }
 0x77b   :  { %v27759_v45 = vld [vmem:[%s37686_s3 + $0x2840] ss:$28 sps:$4 sm:$0xff]  }
 0x77c   :  { %19378 = vmatpush1.bf16.msra.mxu0 %v27720_v33  ;;  %v27767_v33 = vld [vmem:[%s37686_s3 + $0x287c] ss:$28 sps:$4 sm:$0xff]  }
 0x77d   :  { %18940 = vmatpush1.bf16.msra.mxu1 %v27717_v7  ;;  %19388 = vmatprep.subr.bf16.mxu0 %v27728_v21  ;;  %v27762_v7 = vld [vmem:[%s37686_s3 + $0x20d8] ss:$28 sps:$4 sm:$0xff]  }
 0x77e   :  { %18941 = vmatprep.subr.bf16.mxu1 %v27725_v24  ;;  %v27770_v24 = vld [vmem:[%s37686_s3 + $0x2114] ss:$28 sps:$4 sm:$0xff]  }
 0x77f   :  { %19380 = vmatmul.mubr.bf16.vlgmr.msra.gmra.mrb[36].mxu0 %v34570_v10  ;;  %v27765_v21 = vld [vmem:[%s37686_s3 + $0x2878] ss:$28 sps:$4 sm:$0xff]  }
 0x780   :  { %19389 = vmatpush1.bf16.msra.mxu0 %v27726_v34  ;;  %19420 = vmatprep.mubr.bf16.mxu0 %v34575_v18  ;;  %v27773_v34 = vld [vmem:[%s37686_s3 + $0x28b4] ss:$28 sps:$4 sm:$0xff]  }
 0x781   :  { %18942 = vmatpush1.bf16.msra.mxu1 %v27723_v57  ;;  %19390 = vmatprep.subr.bf16.mxu0 %v27734_v47  ;;  %v27768_v57 = vld [vmem:[%s37686_s3 + $0x2110] ss:$28 sps:$4 sm:$0xff]  }
 0x782   :  { %18943 = vmatprep.subr.bf16.mxu1 %v27731_v59  ;;  %v27776_v59 = vld [vmem:[%s37686_s3 + $0x214c] ss:$28 sps:$4 sm:$0xff]  }
 0x783   :  { %v27771_v47 = vld [vmem:[%s37686_s3 + $0x28b0] ss:$28 sps:$4 sm:$0xff]  }
 0x784   :  { %19391 = vmatpush1.bf16.msra.mxu0 %v27732_v41  ;;  %v27779_v41 = vld [vmem:[%s37686_s3 + $0x28ec] ss:$28 sps:$4 sm:$0xff]  }
 0x785   :  { %18944 = vmatpush1.bf16.msra.mxu1 %v27729_v31  ;;  %19392 = vmatprep.subr.bf16.mxu0 %v27740_v14  ;;  %v27774_v31 = vld [vmem:[%s37686_s3 + $0x2148] ss:$28 sps:$4 sm:$0xff]  }
 0x786   :  { %18945 = vmatprep.subr.bf16.mxu1 %v27737_v29  ;;  %v27782_v29 = vld [vmem:[%s37686_s3 + $0x2184] ss:$28 sps:$4 sm:$0xff]  }
 0x787   :  { %v27777_v14 = vld [vmem:[%s37686_s3 + $0x28e8] ss:$28 sps:$4 sm:$0xff]  }
 0x788   :  { %19393 = vmatpush1.bf16.msra.mxu0 %v27738_v6  ;;  %v27785_v6 = vld [vmem:[%s37686_s3 + $0x2924] ss:$28 sps:$4 sm:$0xff]  }
 0x789   :  { %18946 = vmatpush1.bf16.msra.mxu1 %v27735_v8  ;;  %19394 = vmatprep.subr.bf16.mxu0 %v27746_v55  ;;  %v27780_v8 = vld [vmem:[%s37686_s3 + $0x2180] ss:$28 sps:$4 sm:$0xff]  }
 0x78a   :  { %18947 = vmatprep.subr.bf16.mxu1 %v27743_v27  ;;  %v27788_v27 = vld [vmem:[%s37686_s3 + $0x21bc] ss:$28 sps:$4 sm:$0xff]  }
 0x78b   :  { %v27783_v55 = vld [vmem:[%s37686_s3 + $0x2920] ss:$28 sps:$4 sm:$0xff]  }
 0x78c   :  { %19395 = vmatpush1.bf16.msra.mxu0 %v27744_v58  ;;  %v27791_v58 = vld [vmem:[%s37686_s3 + $0x295c] ss:$28 sps:$4 sm:$0xff]  }
 0x78d   :  { %18948 = vmatpush1.bf16.msra.mxu1 %v27741_v12  ;;  %19396 = vmatprep.subr.bf16.mxu0 %v27752_v13  ;;  %v27786_v12 = vld [vmem:[%s37686_s3 + $0x21b8] ss:$28 sps:$4 sm:$0xff]  }
 0x78e   :  { %18949 = vmatprep.subr.bf16.mxu1 %v27749_v62  ;;  %v27794_v62 = vld [vmem:[%s37686_s3 + $0x21f4] ss:$28 sps:$4 sm:$0xff]  }
 0x78f   :  { %v27789_v13 = vld [vmem:[%s37686_s3 + $0x2958] ss:$28 sps:$4 sm:$0xff]  }
 0x790   :  { %19397 = vmatpush1.bf16.msra.mxu0 %v27750_v32  ;;  %v27792_v32 = vld [vmem:[%s37686_s3 + $0x21f0] ss:$28 sps:$4 sm:$0xff]  }
 0x791   :  { %18950 = vmatpush1.bf16.msra.mxu1 %v27747_v15  ;;  %19398 = vmatprep.subr.bf16.mxu0 %v27758_v52  ;;  %v1407_v15 = vrot.slane %v34737_v23, %v33451_v43  ;;  %v27800_v52 = vld [vmem:[%s37686_s3 + $0x222c] ss:$28 sps:$4 sm:$0xff]  }
 0x792   :  { %18951 = vmatprep.subr.bf16.mxu1 %v27755_v11  ;;  %v27797_v11 = vld [vmem:[%s37686_s3 + $0x2994] ss:$28 sps:$4 sm:$0xff]  }
 0x793   :  { %v27795_v23 = vld [vmem:[%s37686_s3 + $0x2990] ss:$28 sps:$4 sm:$0xff]  }
 0x794   :  { %19399 = vmatpush1.bf16.msra.mxu0 %v27756_v51  ;;  %v27798_v51 = vld [vmem:[%s37686_s3 + $0x2228] ss:$28 sps:$4 sm:$0xff]  }
 0x795   :  { %18952 = vmatpush1.bf16.msra.mxu1 %v27753_v19  ;;  %19400 = vmatprep.subr.bf16.mxu0 %v27764_v22  ;;  %v24632_v19 = vadd.f32 %v33224_v63, %v1407_v15  ;;  %v27806_v22 = vld [vmem:[%s37686_s3 + $0x2264] ss:$28 sps:$4 sm:$0xff]   ;;  %v27836_v15 = vld [vmem:[%s37686_s3 + $0x237c] ss:$28 sps:$4 sm:$0xff]  }
 0x796   :  { %18953 = vmatprep.subr.bf16.mxu1 %v27761_v60  ;;  %v27803_v60 = vld [vmem:[%s37686_s3 + $0x29cc] ss:$28 sps:$4 sm:$0xff]  }
 0x797   :  { %v27801_v63 = vld [vmem:[%s37686_s3 + $0x29c8] ss:$28 sps:$4 sm:$0xff]  }
 0x798   :  { %19401 = vmatpush1.bf16.msra.mxu0 %v27762_v7  ;;  %v27804_v7 = vld [vmem:[%s37686_s3 + $0x2260] ss:$28 sps:$4 sm:$0xff]  }
 0x799   :  { %18954 = vmatpush1.bf16.msra.mxu1 %v27759_v45  ;;  %19402 = vmatprep.subr.bf16.mxu0 %v27770_v24  ;;  %v9793_v45 = vmax.f32 %v24632_v19, 0.0  ;;  %v27812_v24 = vld [vmem:[%s37686_s3 + $0x229c] ss:$28 sps:$4 sm:$0xff]   ;;  %v27837_v19 = vld [vmem:[%s37686_s3 + $0x48] ss:$28 sps:$4 sm:$0xff]  }
 0x79a   :  { %18955 = vmatprep.subr.bf16.mxu1 %v27767_v33  ;;  %v27809_v33 = vld [vmem:[%s37686_s3 + $0x2a04] ss:$28 sps:$4 sm:$0xff]  }
 0x79c   :  { %19403 = vmatpush1.bf16.msra.mxu0 %v27768_v57  ;;  %v35187_v57 = vpack.c.bf16 %v9793_v45, %v9793_v45  ;;  %v27846_v45 = vld [vmem:[%s37686_s3 + $0x23e8] ss:$28 sps:$4 sm:$0xff]  }
 0x79d   :  { %18956 = vmatpush1.bf16.msra.mxu1 %v27765_v21  ;;  %19404 = vmatprep.subr.bf16.mxu0 %v27776_v59  ;;  %v27807_v21 = vld [vmem:[%s37686_s3 + $0x2a00] ss:$28 sps:$4 sm:$0xff]  }
 0x79e   :  { %18957 = vmatprep.subr.bf16.mxu1 %v27773_v34  ;;  %v27810_v34 = vld [vmem:[%s37686_s3 + $0x2298] ss:$28 sps:$4 sm:$0xff]  }
 0x79f   :  { %v27815_v59 = vld [vmem:[%s37686_s3 + $0x2a3c] ss:$28 sps:$4 sm:$0xff]  }
 0x7a0   :  { %19405 = vmatpush1.bf16.msra.mxu0 %v27774_v31  ;;  %v27813_v31 = vld [vmem:[%s37686_s3 + $0x2a38] ss:$28 sps:$4 sm:$0xff]  }
 0x7a1   :  { %18958 = vmatpush1.bf16.msra.mxu1 %v27771_v47  ;;  %19406 = vmatprep.subr.bf16.mxu0 %v27782_v29  ;;  %v27818_v47 = vld [vmem:[%s37686_s3 + $0x22d4] ss:$28 sps:$4 sm:$0xff]  }
 0x7a2   :  { %18959 = vmatprep.subr.bf16.mxu1 %v27779_v41  ;;  %v27816_v41 = vld [vmem:[%s37686_s3 + $0x22d0] ss:$28 sps:$4 sm:$0xff]  }
 0x7a3   :  { %v27821_v29 = vld [vmem:[%s37686_s3 + $0x2a74] ss:$28 sps:$4 sm:$0xff]  }
 0x7a4   :  { %19407 = vmatpush1.bf16.msra.mxu0 %v27780_v8  ;;  %v27819_v8 = vld [vmem:[%s37686_s3 + $0x2a70] ss:$28 sps:$4 sm:$0xff]  }
 0x7a5   :  { %18960 = vmatpush1.bf16.msra.mxu1 %v27777_v14  ;;  %19408 = vmatprep.subr.bf16.mxu0 %v27788_v27  ;;  %v27824_v14 = vld [vmem:[%s37686_s3 + $0x230c] ss:$28 sps:$4 sm:$0xff]  }
 0x7a6   :  { %18961 = vmatprep.subr.bf16.mxu1 %v27785_v6  ;;  %v27822_v6 = vld [vmem:[%s37686_s3 + $0x2308] ss:$28 sps:$4 sm:$0xff]  }
 0x7a7   :  { %v27827_v27 = vld [vmem:[%s37686_s3 + $0x2aac] ss:$28 sps:$4 sm:$0xff]  }
 0x7a8   :  { %19409 = vmatpush1.bf16.msra.mxu0 %v27786_v12  ;;  %v27825_v12 = vld [vmem:[%s37686_s3 + $0x2aa8] ss:$28 sps:$4 sm:$0xff]  }
 0x7a9   :  { %18962 = vmatpush1.bf16.msra.mxu1 %v27783_v55  ;;  %19410 = vmatprep.subr.bf16.mxu0 %v27794_v62  ;;  %v27830_v55 = vld [vmem:[%s37686_s3 + $0x2344] ss:$28 sps:$4 sm:$0xff]  }
 0x7aa   :  { %18963 = vmatprep.subr.bf16.mxu1 %v27791_v58  ;;  %v9795_v58 = vmax.f32 %v33848_v4, 0.0  ;;  %v27828_v62 = vld [vmem:[%s37686_s3 + $0x2340] ss:$28 sps:$4 sm:$0xff]   ;;  %v27831_v4 = vld [vmem:[%s37686_s3 + $0x10] ss:$28 sps:$4 sm:$0xff]  }
 0x7ac   :  { %19411 = vmatpush1.bf16.msra.mxu0 %v27792_v32  ;;  %v35242_v32 = vpack.c.bf16 %v9795_v58, %v9795_v58  ;;  %v27875_v58 = vld [vmem:[%s37686_s3 + $0x19c] ss:$28 sps:$4 sm:$0xff]  }
 0x7ad   :  { %18964 = vmatpush1.bf16.msra.mxu1 %v27789_v13  ;;  %19412 = vmatprep.subr.bf16.mxu0 %v27800_v52  ;;  %v27833_v13 = vld [vmem:[%s37686_s3 + $0x14] ss:$28 sps:$4 sm:$0xff]   ;;  %v27839_v52 = vld [vmem:[%s37686_s3 + $0x4c] ss:$28 sps:$4 sm:$0xff]  }
 0x7ae   :  { %18965 = vmatprep.subr.bf16.mxu1 %v27797_v11  ;;  %v27834_v11 = vld [vmem:[%s37686_s3 + $0x2378] ss:$28 sps:$4 sm:$0xff]  }
 0x7b0   :  { %19413 = vmatpush1.bf16.msra.mxu0 %v27798_v51  ;;  %v27840_v51 = vld [vmem:[%s37686_s3 + $0x23b0] ss:$28 sps:$4 sm:$0xff]  }
 0x7b1   :  { %18966 = vmatpush1.bf16.msra.mxu1 %v27795_v23  ;;  %19414 = vmatprep.subr.bf16.mxu0 %v27806_v22  ;;  %v27842_v23 = vld [vmem:[%s37686_s3 + $0x23b4] ss:$28 sps:$4 sm:$0xff]   ;;  %v27848_v22 = vld [vmem:[%s37686_s3 + $0x23ec] ss:$28 sps:$4 sm:$0xff]  }
 0x7b2   :  { %18967 = vmatprep.subr.bf16.mxu1 %v27803_v60  ;;  %v27845_v60 = vld [vmem:[%s37686_s3 + $0x84] ss:$28 sps:$4 sm:$0xff]  }
 0x7b4   :  { %19415 = vmatpush1.bf16.msra.mxu0 %v27804_v7  ;;  %v27851_v7 = vld [vmem:[%s37686_s3 + $0xbc] ss:$28 sps:$4 sm:$0xff]  }
 0x7b5   :  { %18968 = vmatpush1.bf16.msra.mxu1 %v27801_v63  ;;  %19416 = vmatprep.subr.bf16.mxu0 %v27812_v24  ;;  %v27843_v63 = vld [vmem:[%s37686_s3 + $0x80] ss:$28 sps:$4 sm:$0xff]   ;;  %v27849_v24 = vld [vmem:[%s37686_s3 + $0xb8] ss:$28 sps:$4 sm:$0xff]  }
 0x7b6   :  { %18978 = vmatprep.subr.bf16.mxu1 %v27809_v33  ;;  %v27854_v33 = vld [vmem:[%s37686_s3 + $0x2424] ss:$28 sps:$4 sm:$0xff]  }
 0x7b8   :  { %18970 = vmatmul.mubr.bf16.vlgmr.msra.gmra.mrb[36].mxu1 %v35187_v57  ;;  %19417 = vmatpush1.bf16.msra.mxu0 %v27810_v34  ;;  %v27857_v34 = vld [vmem:[%s37686_s3 + $0xf4] ss:$28 sps:$4 sm:$0xff]  }
 0x7b9   :  { %18979 = vmatpush1.bf16.msra.mxu1 %v27807_v21  ;;  %19010 = vmatprep.mubr.bf16.mxu1 %v28886_v1  ;;  %v27852_v21 = vld [vmem:[%s37686_s3 + $0x2420] ss:$28 sps:$4 sm:$0xff]  }
 0x7ba   :  { %18980 = vmatprep.subr.bf16.mxu1 %v27815_v59  ;;  %19418 = vmatprep.subr.bf16.mxu0 %v27818_v47  ;;  %v27860_v59 = vld [vmem:[%s37686_s3 + $0x245c] ss:$28 sps:$4 sm:$0xff]   ;;  %v27855_v47 = vld [vmem:[%s37686_s3 + $0xf0] ss:$28 sps:$4 sm:$0xff]  }
 0x7bc   :  { %19419 = vmatpush1.bf16.msra.mxu0 %v27816_v41  ;;  %v27863_v41 = vld [vmem:[%s37686_s3 + $0x12c] ss:$28 sps:$4 sm:$0xff]  }
 0x7bd   :  { %18981 = vmatpush1.bf16.msra.mxu1 %v27813_v31  ;;  %19429 = vmatprep.subr.bf16.mxu0 %v27824_v14  ;;  %v27858_v31 = vld [vmem:[%s37686_s3 + $0x2458] ss:$28 sps:$4 sm:$0xff]   ;;  %v27861_v14 = vld [vmem:[%s37686_s3 + $0x128] ss:$28 sps:$4 sm:$0xff]  }
 0x7be   :  { %18982 = vmatprep.subr.bf16.mxu1 %v27821_v29  ;;  %v27866_v29 = vld [vmem:[%s37686_s3 + $0x2494] ss:$28 sps:$4 sm:$0xff]  }
 0x7bf   :  { %19421 = vmatmul.mubr.bf16.vlgmr.msra.gmra.mrb[36].mxu0 %v34781_v9 }
 0x7c0   :  { %19430 = vmatpush1.bf16.msra.mxu0 %v27822_v6  ;;  %19461 = vmatprep.mubr.bf16.mxu0 %v34786_v50  ;;  %v27869_v6 = vld [vmem:[%s37686_s3 + $0x164] ss:$28 sps:$4 sm:$0xff]  }
 0x7c1   :  { %18983 = vmatpush1.bf16.msra.mxu1 %v27819_v8  ;;  %19431 = vmatprep.subr.bf16.mxu0 %v27830_v55  ;;  %v27864_v8 = vld [vmem:[%s37686_s3 + $0x2490] ss:$28 sps:$4 sm:$0xff]   ;;  %v27867_v55 = vld [vmem:[%s37686_s3 + $0x160] ss:$28 sps:$4 sm:$0xff]  }
 0x7c2   :  { %18984 = vmatprep.subr.bf16.mxu1 %v27827_v27  ;;  %v27872_v27 = vld [vmem:[%s37686_s3 + $0x24cc] ss:$28 sps:$4 sm:$0xff]  }
 0x7c4   :  { %19432 = vmatpush1.bf16.msra.mxu0 %v27828_v62  ;;  %v27878_v62 = vld [vmem:[%s37686_s3 + $0x2504] ss:$28 sps:$4 sm:$0xff]  }
 0x7c5   :  { %18985 = vmatpush1.bf16.msra.mxu1 %v27825_v12  ;;  %19433 = vmatprep.subr.bf16.mxu0 %v27836_v15  ;;  %v27870_v12 = vld [vmem:[%s37686_s3 + $0x24c8] ss:$28 sps:$4 sm:$0xff]   ;;  %v27876_v15 = vld [vmem:[%s37686_s3 + $0x2500] ss:$28 sps:$4 sm:$0xff]  }
 0x7c6   :  { %19552 = vmatprep.subr.bf16.mxu1 %v27833_v13  ;;  %v27873_v13 = vld [vmem:[%s37686_s3 + $0x198] ss:$28 sps:$4 sm:$0xff]  }
 0x7c8   :  { %24137 = vmatmul.mubr.msk.bf16.vlgmr.msra.gmra.mrb[36].mxu1 %vm18482_vm2, %v35242_v32  ;;  %19434 = vmatpush1.bf16.msra.mxu0 %v27834_v11  ;;  %v27884_v11 = vld [vmem:[%s37686_s3 + $0x253c] ss:$28 sps:$4 sm:$0xff]  }
 0x7c9   :  { %19553 = vmatpush1.bf16.msra.mxu1 %v27831_v4  ;;  %19584 = vmatprep.mubr.bf16.mxu1 %v32668_v44  ;;  %v27881_v4 = vld [vmem:[%s37686_s3 + $0x1d4] ss:$28 sps:$4 sm:$0xff]  }
 0x7ca   :  { %19554 = vmatprep.subr.bf16.mxu1 %v27839_v52  ;;  %19435 = vmatprep.subr.bf16.mxu0 %v27842_v23  ;;  %v27879_v52 = vld [vmem:[%s37686_s3 + $0x1d0] ss:$28 sps:$4 sm:$0xff]   ;;  %v27882_v23 = vld [vmem:[%s37686_s3 + $0x2538] ss:$28 sps:$4 sm:$0xff]  }
 0x7cc   :  { %19436 = vmatpush1.bf16.msra.mxu0 %v27840_v51  ;;  %v27890_v51 = vld [vmem:[%s37686_s3 + $0x2574] ss:$28 sps:$4 sm:$0xff]  }
 0x7cd   :  { %19555 = vmatpush1.bf16.msra.mxu1 %v27837_v19  ;;  %19437 = vmatprep.subr.bf16.mxu0 %v27848_v22  ;;  %v27887_v19 = vld [vmem:[%s37686_s3 + $0x20c] ss:$28 sps:$4 sm:$0xff]  }
 0x7ce   :  { %19556 = vmatprep.subr.bf16.mxu1 %v27845_v60  ;;  %v27885_v60 = vld [vmem:[%s37686_s3 + $0x208] ss:$28 sps:$4 sm:$0xff]   ;;  %v27888_v22 = vld [vmem:[%s37686_s3 + $0x2570] ss:$28 sps:$4 sm:$0xff]  }
 0x7d0   :  { %19438 = vmatpush1.bf16.msra.mxu0 %v27846_v45  ;;  %v27896_v45 = vld [vmem:[%s37686_s3 + $0x25ac] ss:$28 sps:$4 sm:$0xff]  }
 0x7d1   :  { %19557 = vmatpush1.bf16.msra.mxu1 %v27843_v63  ;;  %19439 = vmatprep.subr.bf16.mxu0 %v27854_v33  ;;  %v27893_v63 = vld [vmem:[%s37686_s3 + $0x244] ss:$28 sps:$4 sm:$0xff]  }
 0x7d2   :  { %19558 = vmatprep.subr.bf16.mxu1 %v27851_v7  ;;  %v27891_v7 = vld [vmem:[%s37686_s3 + $0x240] ss:$28 sps:$4 sm:$0xff]   ;;  %v27894_v33 = vld [vmem:[%s37686_s3 + $0x25a8] ss:$28 sps:$4 sm:$0xff]  }
 0x7d4   :  { %19440 = vmatpush1.bf16.msra.mxu0 %v27852_v21  ;;  %v27902_v21 = vld [vmem:[%s37686_s3 + $0x25e4] ss:$28 sps:$4 sm:$0xff]  }
 0x7d5   :  { %19559 = vmatpush1.bf16.msra.mxu1 %v27849_v24  ;;  %19441 = vmatprep.subr.bf16.mxu0 %v27860_v59  ;;  %v27899_v24 = vld [vmem:[%s37686_s3 + $0x27c] ss:$28 sps:$4 sm:$0xff]  }
 0x7d6   :  { %19560 = vmatprep.subr.bf16.mxu1 %v27857_v34  ;;  %v27897_v34 = vld [vmem:[%s37686_s3 + $0x278] ss:$28 sps:$4 sm:$0xff]   ;;  %v27900_v59 = vld [vmem:[%s37686_s3 + $0x25e0] ss:$28 sps:$4 sm:$0xff]  }
 0x7d8   :  { %19442 = vmatpush1.bf16.msra.mxu0 %v27858_v31  ;;  %v27908_v31 = vld [vmem:[%s37686_s3 + $0x261c] ss:$28 sps:$4 sm:$0xff]  }
 0x7d9   :  { %19561 = vmatpush1.bf16.msra.mxu1 %v27855_v47  ;;  %19443 = vmatprep.subr.bf16.mxu0 %v27866_v29  ;;  %v27905_v47 = vld [vmem:[%s37686_s3 + $0x2b4] ss:$28 sps:$4 sm:$0xff]  }
 0x7da   :  { %19562 = vmatprep.subr.bf16.mxu1 %v27863_v41  ;;  %v27903_v41 = vld [vmem:[%s37686_s3 + $0x2b0] ss:$28 sps:$4 sm:$0xff]   ;;  %v27906_v29 = vld [vmem:[%s37686_s3 + $0x2618] ss:$28 sps:$4 sm:$0xff]  }
 0x7dc   :  { %19444 = vmatpush1.bf16.msra.mxu0 %v27864_v8  ;;  %v27914_v8 = vld [vmem:[%s37686_s3 + $0x2654] ss:$28 sps:$4 sm:$0xff]  }
 0x7dd   :  { %19563 = vmatpush1.bf16.msra.mxu1 %v27861_v14  ;;  %19445 = vmatprep.subr.bf16.mxu0 %v27872_v27  ;;  %v27911_v14 = vld [vmem:[%s37686_s3 + $0x2ec] ss:$28 sps:$4 sm:$0xff]  }
 0x7de   :  { %19564 = vmatprep.subr.bf16.mxu1 %v27869_v6  ;;  %v27909_v6 = vld [vmem:[%s37686_s3 + $0x2e8] ss:$28 sps:$4 sm:$0xff]   ;;  %v27912_v27 = vld [vmem:[%s37686_s3 + $0x2650] ss:$28 sps:$4 sm:$0xff]  }
 0x7e0   :  { %19446 = vmatpush1.bf16.msra.mxu0 %v27870_v12  ;;  %v27920_v12 = vld [vmem:[%s37686_s3 + $0x268c] ss:$28 sps:$4 sm:$0xff]  }
 0x7e1   :  { %19565 = vmatpush1.bf16.msra.mxu1 %v27867_v55  ;;  %19447 = vmatprep.subr.bf16.mxu0 %v27878_v62  ;;  %v27917_v55 = vld [vmem:[%s37686_s3 + $0x324] ss:$28 sps:$4 sm:$0xff]  }
 0x7e2   :  { %19566 = vmatprep.subr.bf16.mxu1 %v27875_v58  ;;  %v27915_v58 = vld [vmem:[%s37686_s3 + $0x320] ss:$28 sps:$4 sm:$0xff]   ;;  %v27918_v62 = vld [vmem:[%s37686_s3 + $0x2688] ss:$28 sps:$4 sm:$0xff]  }
 0x7e4   :  { %19448 = vmatpush1.bf16.msra.mxu0 %v27876_v15  ;;  %v27926_v15 = vld [vmem:[%s37686_s3 + $0x26c4] ss:$28 sps:$4 sm:$0xff]  }
 0x7e5   :  { %19567 = vmatpush1.bf16.msra.mxu1 %v27873_v13  ;;  %19449 = vmatprep.subr.bf16.mxu0 %v27884_v11  ;;  %v27923_v13 = vld [vmem:[%s37686_s3 + $0x35c] ss:$28 sps:$4 sm:$0xff]  }
 0x7e6   :  { %19568 = vmatprep.subr.bf16.mxu1 %v27881_v4  ;;  %v27921_v4 = vld [vmem:[%s37686_s3 + $0x358] ss:$28 sps:$4 sm:$0xff]   ;;  %v27924_v11 = vld [vmem:[%s37686_s3 + $0x26c0] ss:$28 sps:$4 sm:$0xff]  }
 0x7e8   :  { %19450 = vmatpush1.bf16.msra.mxu0 %v27882_v23  ;;  %v27932_v23 = vld [vmem:[%s37686_s3 + $0x26fc] ss:$28 sps:$4 sm:$0xff]  }
 0x7e9   :  { %19569 = vmatpush1.bf16.msra.mxu1 %v27879_v52  ;;  %19451 = vmatprep.subr.bf16.mxu0 %v27890_v51  ;;  %v27929_v52 = vld [vmem:[%s37686_s3 + $0x394] ss:$28 sps:$4 sm:$0xff]  }
 0x7ea   :  { %19570 = vmatprep.subr.bf16.mxu1 %v27887_v19  ;;  %v27927_v19 = vld [vmem:[%s37686_s3 + $0x390] ss:$28 sps:$4 sm:$0xff]   ;;  %v27930_v51 = vld [vmem:[%s37686_s3 + $0x26f8] ss:$28 sps:$4 sm:$0xff]  }
 0x7ec   :  { %19452 = vmatpush1.bf16.msra.mxu0 %v27888_v22  ;;  %v27938_v22 = vld [vmem:[%s37686_s3 + $0x2734] ss:$28 sps:$4 sm:$0xff]  }
 0x7ed   :  { %19571 = vmatpush1.bf16.msra.mxu1 %v27885_v60  ;;  %19453 = vmatprep.subr.bf16.mxu0 %v27896_v45  ;;  %v27935_v60 = vld [vmem:[%s37686_s3 + $0x3cc] ss:$28 sps:$4 sm:$0xff]  }
 0x7ee   :  { %19572 = vmatprep.subr.bf16.mxu1 %v27893_v63  ;;  %v27933_v63 = vld [vmem:[%s37686_s3 + $0x3c8] ss:$28 sps:$4 sm:$0xff]   ;;  %v27936_v45 = vld [vmem:[%s37686_s3 + $0x2730] ss:$28 sps:$4 sm:$0xff]  }
 0x7f0   :  { %19454 = vmatpush1.bf16.msra.mxu0 %v27894_v33  ;;  %v27944_v33 = vld [vmem:[%s37686_s3 + $0x276c] ss:$28 sps:$4 sm:$0xff]  }
 0x7f1   :  { %19573 = vmatpush1.bf16.msra.mxu1 %v27891_v7  ;;  %19455 = vmatprep.subr.bf16.mxu0 %v27902_v21  ;;  %v27941_v7 = vld [vmem:[%s37686_s3 + $0x404] ss:$28 sps:$4 sm:$0xff]  }
 0x7f2   :  { %19574 = vmatprep.subr.bf16.mxu1 %v27899_v24  ;;  %v27939_v24 = vld [vmem:[%s37686_s3 + $0x400] ss:$28 sps:$4 sm:$0xff]   ;;  %v27942_v21 = vld [vmem:[%s37686_s3 + $0x2768] ss:$28 sps:$4 sm:$0xff]  }
 0x7f4   :  { %19456 = vmatpush1.bf16.msra.mxu0 %v27900_v59  ;;  %v27950_v59 = vld [vmem:[%s37686_s3 + $0x27a4] ss:$28 sps:$4 sm:$0xff]  }
 0x7f5   :  { %19575 = vmatpush1.bf16.msra.mxu1 %v27897_v34  ;;  %19457 = vmatprep.subr.bf16.mxu0 %v27908_v31  ;;  %v27947_v34 = vld [vmem:[%s37686_s3 + $0x43c] ss:$28 sps:$4 sm:$0xff]  }
 0x7f6   :  { %19576 = vmatprep.subr.bf16.mxu1 %v27905_v47  ;;  %v27945_v47 = vld [vmem:[%s37686_s3 + $0x438] ss:$28 sps:$4 sm:$0xff]   ;;  %v27948_v31 = vld [vmem:[%s37686_s3 + $0x27a0] ss:$28 sps:$4 sm:$0xff]  }
 0x7f8   :  { %19458 = vmatpush1.bf16.msra.mxu0 %v27906_v29  ;;  %v27956_v29 = vld [vmem:[%s37686_s3 + $0x27dc] ss:$28 sps:$4 sm:$0xff]  }
 0x7f9   :  { %19577 = vmatpush1.bf16.msra.mxu1 %v27903_v41  ;;  %19459 = vmatprep.subr.bf16.mxu0 %v27914_v8  ;;  %v27953_v41 = vld [vmem:[%s37686_s3 + $0x474] ss:$28 sps:$4 sm:$0xff]  }
 0x7fa   :  { %19578 = vmatprep.subr.bf16.mxu1 %v27911_v14  ;;  %v27951_v14 = vld [vmem:[%s37686_s3 + $0x470] ss:$28 sps:$4 sm:$0xff]   ;;  %v27954_v8 = vld [vmem:[%s37686_s3 + $0x27d8] ss:$28 sps:$4 sm:$0xff]  }
 0x7fc   :  { %19460 = vmatpush1.bf16.msra.mxu0 %v27912_v27  ;;  %v27962_v27 = vld [vmem:[%s37686_s3 + $0x2814] ss:$28 sps:$4 sm:$0xff]  }
 0x7fd   :  { %19579 = vmatpush1.bf16.msra.mxu1 %v27909_v6  ;;  %19470 = vmatprep.subr.bf16.mxu0 %v27920_v12  ;;  %v27959_v6 = vld [vmem:[%s37686_s3 + $0x4ac] ss:$28 sps:$4 sm:$0xff]  }
 0x7fe   :  { %19580 = vmatprep.subr.bf16.mxu1 %v27917_v55  ;;  %v27957_v55 = vld [vmem:[%s37686_s3 + $0x4a8] ss:$28 sps:$4 sm:$0xff]   ;;  %v27960_v12 = vld [vmem:[%s37686_s3 + $0x2810] ss:$28 sps:$4 sm:$0xff]  }
 0x7ff   :  { %19462 = vmatmul.mubr.bf16.vlgmr.msra.gmra.mrb[36].mxu0 %v34984_v5 }
 0x800   :  { %19471 = vmatpush1.bf16.msra.mxu0 %v27918_v62  ;;  %19502 = vmatprep.mubr.bf16.mxu0 %v34992_v26  ;;  %v27968_v62 = vld [vmem:[%s37686_s3 + $0x284c] ss:$28 sps:$4 sm:$0xff]  }
 0x801   :  { %19581 = vmatpush1.bf16.msra.mxu1 %v27915_v58  ;;  %19472 = vmatprep.subr.bf16.mxu0 %v27926_v15  ;;  %v27965_v58 = vld [vmem:[%s37686_s3 + $0x4e4] ss:$28 sps:$4 sm:$0xff]  }
 0x802   :  { %19582 = vmatprep.subr.bf16.mxu1 %v27923_v13  ;;  %v27963_v13 = vld [vmem:[%s37686_s3 + $0x4e0] ss:$28 sps:$4 sm:$0xff]   ;;  %v27966_v15 = vld [vmem:[%s37686_s3 + $0x2848] ss:$28 sps:$4 sm:$0xff]  }
 0x804   :  { %19473 = vmatpush1.bf16.msra.mxu0 %v27924_v11  ;;  %v27974_v11 = vld [vmem:[%s37686_s3 + $0x2884] ss:$28 sps:$4 sm:$0xff]  }
 0x805   :  { %19583 = vmatpush1.bf16.msra.mxu1 %v27921_v4  ;;  %19474 = vmatprep.subr.bf16.mxu0 %v27932_v23  ;;  %v27971_v4 = vld [vmem:[%s37686_s3 + $0x51c] ss:$28 sps:$4 sm:$0xff]  }
 0x806   :  { %19593 = vmatprep.subr.bf16.mxu1 %v27929_v52  ;;  %v27969_v52 = vld [vmem:[%s37686_s3 + $0x518] ss:$28 sps:$4 sm:$0xff]   ;;  %v27972_v23 = vld [vmem:[%s37686_s3 + $0x2880] ss:$28 sps:$4 sm:$0xff]  }
 0x808   :  { %19585 = vmatmul.mubr.bf16.vlgmr.msra.gmra.mrb[40].mxu1 %v32867_v54  ;;  %19475 = vmatpush1.bf16.msra.mxu0 %v27930_v51  ;;  %v27980_v51 = vld [vmem:[%s37686_s3 + $0x28bc] ss:$28 sps:$4 sm:$0xff]  }
 0x809   :  { %19594 = vmatpush1.bf16.msra.mxu1 %v27927_v19  ;;  %19625 = vmatprep.mubr.bf16.mxu1 %v32872_v49  ;;  %v27977_v19 = vld [vmem:[%s37686_s3 + $0x554] ss:$28 sps:$4 sm:$0xff]  }
 0x80a   :  { %19595 = vmatprep.subr.bf16.mxu1 %v27935_v60  ;;  %19476 = vmatprep.subr.bf16.mxu0 %v27938_v22  ;;  %v27975_v60 = vld [vmem:[%s37686_s3 + $0x550] ss:$28 sps:$4 sm:$0xff]   ;;  %v27978_v22 = vld [vmem:[%s37686_s3 + $0x28b8] ss:$28 sps:$4 sm:$0xff]  }
 0x80c   :  { %19477 = vmatpush1.bf16.msra.mxu0 %v27936_v45  ;;  %v27986_v45 = vld [vmem:[%s37686_s3 + $0x28f4] ss:$28 sps:$4 sm:$0xff]  }
 0x80d   :  { %19596 = vmatpush1.bf16.msra.mxu1 %v27933_v63  ;;  %19478 = vmatprep.subr.bf16.mxu0 %v27944_v33  ;;  %v27983_v63 = vld [vmem:[%s37686_s3 + $0x58c] ss:$28 sps:$4 sm:$0xff]  }
 0x80e   :  { %19597 = vmatprep.subr.bf16.mxu1 %v27941_v7  ;;  %v27981_v7 = vld [vmem:[%s37686_s3 + $0x588] ss:$28 sps:$4 sm:$0xff]   ;;  %v27984_v33 = vld [vmem:[%s37686_s3 + $0x28f0] ss:$28 sps:$4 sm:$0xff]  }
 0x810   :  { %19479 = vmatpush1.bf16.msra.mxu0 %v27942_v21  ;;  %v27992_v21 = vld [vmem:[%s37686_s3 + $0x292c] ss:$28 sps:$4 sm:$0xff]  }
 0x811   :  { %19598 = vmatpush1.bf16.msra.mxu1 %v27939_v24  ;;  %19480 = vmatprep.subr.bf16.mxu0 %v27950_v59  ;;  %v27989_v24 = vld [vmem:[%s37686_s3 + $0x5c4] ss:$28 sps:$4 sm:$0xff]  }
 0x812   :  { %19599 = vmatprep.subr.bf16.mxu1 %v27947_v34  ;;  %v27987_v34 = vld [vmem:[%s37686_s3 + $0x5c0] ss:$28 sps:$4 sm:$0xff]   ;;  %v27990_v59 = vld [vmem:[%s37686_s3 + $0x2928] ss:$28 sps:$4 sm:$0xff]  }
 0x814   :  { %19481 = vmatpush1.bf16.msra.mxu0 %v27948_v31  ;;  %v27998_v31 = vld [vmem:[%s37686_s3 + $0x2964] ss:$28 sps:$4 sm:$0xff]  }
 0x815   :  { %19600 = vmatpush1.bf16.msra.mxu1 %v27945_v47  ;;  %19482 = vmatprep.subr.bf16.mxu0 %v27956_v29  ;;  %v27995_v47 = vld [vmem:[%s37686_s3 + $0x5fc] ss:$28 sps:$4 sm:$0xff]  }
 0x816   :  { %19601 = vmatprep.subr.bf16.mxu1 %v27953_v41  ;;  %v27993_v41 = vld [vmem:[%s37686_s3 + $0x5f8] ss:$28 sps:$4 sm:$0xff]   ;;  %v27996_v29 = vld [vmem:[%s37686_s3 + $0x2960] ss:$28 sps:$4 sm:$0xff]  }
 0x818   :  { %19483 = vmatpush1.bf16.msra.mxu0 %v27954_v8  ;;  %v28004_v8 = vld [vmem:[%s37686_s3 + $0x299c] ss:$28 sps:$4 sm:$0xff]  }
 0x819   :  { %19602 = vmatpush1.bf16.msra.mxu1 %v27951_v14  ;;  %19484 = vmatprep.subr.bf16.mxu0 %v27962_v27  ;;  %v28001_v14 = vld [vmem:[%s37686_s3 + $0x634] ss:$28 sps:$4 sm:$0xff]  }
 0x81a   :  { %19603 = vmatprep.subr.bf16.mxu1 %v27959_v6  ;;  %v27999_v6 = vld [vmem:[%s37686_s3 + $0x630] ss:$28 sps:$4 sm:$0xff]   ;;  %v28002_v27 = vld [vmem:[%s37686_s3 + $0x2998] ss:$28 sps:$4 sm:$0xff]  }
 0x81c   :  { %19485 = vmatpush1.bf16.msra.mxu0 %v27960_v12  ;;  %v28010_v12 = vld [vmem:[%s37686_s3 + $0x29d4] ss:$28 sps:$4 sm:$0xff]  }
 0x81d   :  { %19604 = vmatpush1.bf16.msra.mxu1 %v27957_v55  ;;  %19486 = vmatprep.subr.bf16.mxu0 %v27968_v62  ;;  %v28007_v55 = vld [vmem:[%s37686_s3 + $0x66c] ss:$28 sps:$4 sm:$0xff]  }
 0x81e   :  { %19605 = vmatprep.subr.bf16.mxu1 %v27965_v58  ;;  %v28005_v58 = vld [vmem:[%s37686_s3 + $0x668] ss:$28 sps:$4 sm:$0xff]   ;;  %v28008_v62 = vld [vmem:[%s37686_s3 + $0x29d0] ss:$28 sps:$4 sm:$0xff]  }
 0x820   :  { %19487 = vmatpush1.bf16.msra.mxu0 %v27966_v15  ;;  %v28016_v15 = vld [vmem:[%s37686_s3 + $0x2a0c] ss:$28 sps:$4 sm:$0xff]  }
 0x821   :  { %19606 = vmatpush1.bf16.msra.mxu1 %v27963_v13  ;;  %19488 = vmatprep.subr.bf16.mxu0 %v27974_v11  ;;  %v28013_v13 = vld [vmem:[%s37686_s3 + $0x6a4] ss:$28 sps:$4 sm:$0xff]  }
 0x822   :  { %19607 = vmatprep.subr.bf16.mxu1 %v27971_v4  ;;  %v28011_v4 = vld [vmem:[%s37686_s3 + $0x6a0] ss:$28 sps:$4 sm:$0xff]   ;;  %v28014_v11 = vld [vmem:[%s37686_s3 + $0x2a08] ss:$28 sps:$4 sm:$0xff]  }
 0x824   :  { %19489 = vmatpush1.bf16.msra.mxu0 %v27972_v23  ;;  %v28022_v23 = vld [vmem:[%s37686_s3 + $0x2a44] ss:$28 sps:$4 sm:$0xff]  }
 0x825   :  { %19608 = vmatpush1.bf16.msra.mxu1 %v27969_v52  ;;  %19490 = vmatprep.subr.bf16.mxu0 %v27980_v51  ;;  %v28019_v52 = vld [vmem:[%s37686_s3 + $0x6dc] ss:$28 sps:$4 sm:$0xff]  }
 0x826   :  { %19609 = vmatprep.subr.bf16.mxu1 %v27977_v19  ;;  %v28017_v19 = vld [vmem:[%s37686_s3 + $0x6d8] ss:$28 sps:$4 sm:$0xff]   ;;  %v28020_v51 = vld [vmem:[%s37686_s3 + $0x2a40] ss:$28 sps:$4 sm:$0xff]  }
 0x828   :  { %19491 = vmatpush1.bf16.msra.mxu0 %v27978_v22  ;;  %v28028_v22 = vld [vmem:[%s37686_s3 + $0x2a7c] ss:$28 sps:$4 sm:$0xff]  }
 0x829   :  { %19610 = vmatpush1.bf16.msra.mxu1 %v27975_v60  ;;  %19492 = vmatprep.subr.bf16.mxu0 %v27986_v45  ;;  %v28025_v60 = vld [vmem:[%s37686_s3 + $0x714] ss:$28 sps:$4 sm:$0xff]  }
 0x82a   :  { %19611 = vmatprep.subr.bf16.mxu1 %v27983_v63  ;;  %v28023_v63 = vld [vmem:[%s37686_s3 + $0x710] ss:$28 sps:$4 sm:$0xff]   ;;  %v28026_v45 = vld [vmem:[%s37686_s3 + $0x2a78] ss:$28 sps:$4 sm:$0xff]  }
 0x82c   :  { %19493 = vmatpush1.bf16.msra.mxu0 %v27984_v33  ;;  %v28034_v33 = vld [vmem:[%s37686_s3 + $0x2ab4] ss:$28 sps:$4 sm:$0xff]  }
 0x82d   :  { %19612 = vmatpush1.bf16.msra.mxu1 %v27981_v7  ;;  %19494 = vmatprep.subr.bf16.mxu0 %v27992_v21  ;;  %v28031_v7 = vld [vmem:[%s37686_s3 + $0x74c] ss:$28 sps:$4 sm:$0xff]  }
 0x82e   :  { %19613 = vmatprep.subr.bf16.mxu1 %v27989_v24  ;;  %v28029_v24 = vld [vmem:[%s37686_s3 + $0x748] ss:$28 sps:$4 sm:$0xff]   ;;  %v28032_v21 = vld [vmem:[%s37686_s3 + $0x2ab0] ss:$28 sps:$4 sm:$0xff]  }
 0x830   :  { %19495 = vmatpush1.bf16.msra.mxu0 %v27990_v59  ;;  %v28038_v59 = vld [vmem:[%s37686_s3 + $0x1d8] ss:$28 sps:$4 sm:$0xff]  }
 0x831   :  { %19614 = vmatpush1.bf16.msra.mxu1 %v27987_v34  ;;  %19496 = vmatprep.subr.bf16.mxu0 %v27998_v31  ;;  %v28037_v34 = vld [vmem:[%s37686_s3 + $0x784] ss:$28 sps:$4 sm:$0xff]   ;;  %v28039_v31 = vld [vmem:[%s37686_s3 + $0x18] ss:$28 sps:$4 sm:$0xff]  }
 0x832   :  { %19615 = vmatprep.subr.bf16.mxu1 %v27995_v47  ;;  %v28035_v47 = vld [vmem:[%s37686_s3 + $0x780] ss:$28 sps:$4 sm:$0xff]  }
 0x834   :  { %19497 = vmatpush1.bf16.msra.mxu0 %v27996_v29  ;;  %v28043_v29 = vld [vmem:[%s37686_s3 + $0x210] ss:$28 sps:$4 sm:$0xff]  }
 0x835   :  { %19616 = vmatpush1.bf16.msra.mxu1 %v27993_v41  ;;  %19498 = vmatprep.subr.bf16.mxu0 %v28004_v8  ;;  %v28042_v41 = vld [vmem:[%s37686_s3 + $0x7bc] ss:$28 sps:$4 sm:$0xff]   ;;  %v28044_v8 = vld [vmem:[%s37686_s3 + $0x50] ss:$28 sps:$4 sm:$0xff]  }
 0x836   :  { %19617 = vmatprep.subr.bf16.mxu1 %v28001_v14  ;;  %v28040_v14 = vld [vmem:[%s37686_s3 + $0x7b8] ss:$28 sps:$4 sm:$0xff]  }
 0x838   :  { %19499 = vmatpush1.bf16.msra.mxu0 %v28002_v27  ;;  %v28048_v27 = vld [vmem:[%s37686_s3 + $0x248] ss:$28 sps:$4 sm:$0xff]  }
 0x839   :  { %19618 = vmatpush1.bf16.msra.mxu1 %v27999_v6  ;;  %19500 = vmatprep.subr.bf16.mxu0 %v28010_v12  ;;  %v28047_v6 = vld [vmem:[%s37686_s3 + $0x7f4] ss:$28 sps:$4 sm:$0xff]   ;;  %v28052_v12 = vld [vmem:[%s37686_s3 + $0x82c] ss:$28 sps:$4 sm:$0xff]  }
 0x83a   :  { %19619 = vmatprep.subr.bf16.mxu1 %v28007_v55  ;;  %v28045_v55 = vld [vmem:[%s37686_s3 + $0x7f0] ss:$28 sps:$4 sm:$0xff]  }
 0x83c   :  { %19501 = vmatpush1.bf16.msra.mxu0 %v28008_v62  ;;  %v28050_v62 = vld [vmem:[%s37686_s3 + $0x828] ss:$28 sps:$4 sm:$0xff]  }
 0x83d   :  { %19620 = vmatpush1.bf16.msra.mxu1 %v28005_v58  ;;  %19511 = vmatprep.subr.bf16.mxu0 %v28016_v15  ;;  %v28053_v58 = vld [vmem:[%s37686_s3 + $0x280] ss:$28 sps:$4 sm:$0xff]  }
 0x83e   :  { %19621 = vmatprep.subr.bf16.mxu1 %v28013_v13  ;;  %v28054_v13 = vld [vmem:[%s37686_s3 + $0xc0] ss:$28 sps:$4 sm:$0xff]  }
 0x83f   :  { %19503 = vmatmul.mubr.bf16.vlgmr.msra.gmra.mrb[36].mxu0 %v35187_v57  ;;  %v28057_v15 = vld [vmem:[%s37686_s3 + $0x864] ss:$28 sps:$4 sm:$0xff]  }
 0x840   :  { %19512 = vmatpush1.bf16.msra.mxu0 %v28014_v11  ;;  %19543 = vmatprep.mubr.bf16.mxu0 %v28886_v1  ;;  %v28055_v11 = vld [vmem:[%s37686_s3 + $0x860] ss:$28 sps:$4 sm:$0xff]  }
 0x841   :  { %19622 = vmatpush1.bf16.msra.mxu1 %v28011_v4  ;;  %19513 = vmatprep.subr.bf16.mxu0 %v28022_v23  ;;  %v28058_v4 = vld [vmem:[%s37686_s3 + $0x2b8] ss:$28 sps:$4 sm:$0xff]  }
 0x842   :  { %19623 = vmatprep.subr.bf16.mxu1 %v28019_v52  ;;  %v28059_v52 = vld [vmem:[%s37686_s3 + $0xf8] ss:$28 sps:$4 sm:$0xff]  }
 0x843   :  { %v28062_v23 = vld [vmem:[%s37686_s3 + $0x89c] ss:$28 sps:$4 sm:$0xff]  }
 0x844   :  { %19514 = vmatpush1.bf16.msra.mxu0 %v28020_v51  ;;  %v28060_v51 = vld [vmem:[%s37686_s3 + $0x898] ss:$28 sps:$4 sm:$0xff]  }
 0x845   :  { %19624 = vmatpush1.bf16.msra.mxu1 %v28017_v19  ;;  %19515 = vmatprep.subr.bf16.mxu0 %v28028_v22  ;;  %v28063_v19 = vld [vmem:[%s37686_s3 + $0x2f0] ss:$28 sps:$4 sm:$0xff]  }
 0x846   :  { %19634 = vmatprep.subr.bf16.mxu1 %v28025_v60  ;;  %v28064_v60 = vld [vmem:[%s37686_s3 + $0x130] ss:$28 sps:$4 sm:$0xff]  }
 0x847   :  { %v28067_v22 = vld [vmem:[%s37686_s3 + $0x8d4] ss:$28 sps:$4 sm:$0xff]  }
 0x848   :  { %19626 = vmatmul.mubr.bf16.vlgmr.msra.gmra.mrb[40].mxu1 %v33078_v53  ;;  %19516 = vmatpush1.bf16.msra.mxu0 %v28026_v45  ;;  %v28065_v45 = vld [vmem:[%s37686_s3 + $0x8d0] ss:$28 sps:$4 sm:$0xff]  }
 0x849   :  { %19635 = vmatpush1.bf16.msra.mxu1 %v28023_v63  ;;  %19666 = vmatprep.mubr.bf16.mxu1 %v33083_v39  ;;  %v28068_v63 = vld [vmem:[%s37686_s3 + $0x328] ss:$28 sps:$4 sm:$0xff]  }
 0x84a   :  { %19636 = vmatprep.subr.bf16.mxu1 %v28031_v7  ;;  %19517 = vmatprep.subr.bf16.mxu0 %v28034_v33  ;;  %v28069_v7 = vld [vmem:[%s37686_s3 + $0x168] ss:$28 sps:$4 sm:$0xff]  }
 0x84b   :  { %v28072_v33 = vld [vmem:[%s37686_s3 + $0x90c] ss:$28 sps:$4 sm:$0xff]  }
 0x84c   :  { %19518 = vmatpush1.bf16.msra.mxu0 %v28032_v21  ;;  %v28070_v21 = vld [vmem:[%s37686_s3 + $0x908] ss:$28 sps:$4 sm:$0xff]  }
 0x84d   :  { %19637 = vmatpush1.bf16.msra.mxu1 %v28029_v24  ;;  %24319 = vmatprep.subr.bf16.mxu0 %v28038_v59  ;;  %v28073_v24 = vld [vmem:[%s37686_s3 + $0x360] ss:$28 sps:$4 sm:$0xff]  }
 0x84e   :  { %19638 = vmatprep.subr.bf16.mxu1 %v28037_v34  ;;  %v28074_v34 = vld [vmem:[%s37686_s3 + $0x1a0] ss:$28 sps:$4 sm:$0xff]  }
 0x84f   :  { %24138 = vmatmul.mubr.msk.bf16.vlgmr.msra.gmra.mrb[36].mxu0 %vm18482_vm2, %v35242_v32  ;;  %v28077_v59 = vld [vmem:[%s37686_s3 + $0x944] ss:$28 sps:$4 sm:$0xff]  }
 0x850   :  { %24320 = vmatpush3.bf16.msra.mxu0 %v28039_v31  ;;  %20117 = vmatprep.mubr.bf16.mxu0 %v32668_v44  ;;  %v28049_v44 = vld [vmem:[%s37686_s3 + $0x88] ss:$28 sps:$4 sm:$0xff]   ;;  %v28075_v31 = vld [vmem:[%s37686_s3 + $0x940] ss:$28 sps:$4 sm:$0xff]  }
 0x851   :  { %19639 = vmatpush1.bf16.msra.mxu1 %v28035_v47  ;;  %24321 = vmatprep.subr.bf16.mxu0 %v28043_v29  ;;  %v28078_v47 = vld [vmem:[%s37686_s3 + $0x558] ss:$28 sps:$4 sm:$0xff]  }
 0x852   :  { %19640 = vmatprep.subr.bf16.mxu1 %v28042_v41  ;;  %v28079_v41 = vld [vmem:[%s37686_s3 + $0x398] ss:$28 sps:$4 sm:$0xff]  }
 0x853   :  { %v28082_v29 = vld [vmem:[%s37686_s3 + $0x97c] ss:$28 sps:$4 sm:$0xff]  }
 0x854   :  { %24322 = vmatpush3.bf16.msra.mxu0 %v28044_v8  ;;  %v28080_v8 = vld [vmem:[%s37686_s3 + $0x978] ss:$28 sps:$4 sm:$0xff]  }
 0x855   :  { %19641 = vmatpush1.bf16.msra.mxu1 %v28040_v14  ;;  %24323 = vmatprep.subr.bf16.mxu0 %v28048_v27  ;;  %v28083_v14 = vld [vmem:[%s37686_s3 + $0x590] ss:$28 sps:$4 sm:$0xff]  }
 0x856   :  { %19642 = vmatprep.subr.bf16.mxu1 %v28047_v6  ;;  %v28084_v6 = vld [vmem:[%s37686_s3 + $0x3d0] ss:$28 sps:$4 sm:$0xff]  }
 0x857   :  { %v28087_v27 = vld [vmem:[%s37686_s3 + $0x9b4] ss:$28 sps:$4 sm:$0xff]  }
 0x858   :  { %24324 = vmatpush3.bf16.msra.mxu0 %v28049_v44  ;;  %v28092_v44 = vld [vmem:[%s37686_s3 + $0x9ec] ss:$28 sps:$4 sm:$0xff]  }
 0x859   :  { %19643 = vmatpush1.bf16.msra.mxu1 %v28045_v55  ;;  %24325 = vmatprep.subr.bf16.mxu0 %v28053_v58  ;;  %v28085_v55 = vld [vmem:[%s37686_s3 + $0x9b0] ss:$28 sps:$4 sm:$0xff]   ;;  %v28090_v58 = vld [vmem:[%s37686_s3 + $0x9e8] ss:$28 sps:$4 sm:$0xff]  }
 0x85a   :  { %19644 = vmatprep.subr.bf16.mxu1 %v28052_v12  ;;  %v28093_v12 = vld [vmem:[%s37686_s3 + $0x600] ss:$28 sps:$4 sm:$0xff]  }
 0x85c   :  { %24326 = vmatpush3.bf16.msra.mxu0 %v28054_v13  ;;  %v28097_v13 = vld [vmem:[%s37686_s3 + $0xa24] ss:$28 sps:$4 sm:$0xff]  }
 0x85d   :  { %19645 = vmatpush1.bf16.msra.mxu1 %v28050_v62  ;;  %24327 = vmatprep.subr.bf16.mxu0 %v28058_v4  ;;  %v28094_v62 = vld [vmem:[%s37686_s3 + $0x440] ss:$28 sps:$4 sm:$0xff]  }
 0x85e   :  { %19646 = vmatprep.subr.bf16.mxu1 %v28057_v15  ;;  %v28098_v15 = vld [vmem:[%s37686_s3 + $0x638] ss:$28 sps:$4 sm:$0xff]   ;;  %v28095_v4 = vld [vmem:[%s37686_s3 + $0xa20] ss:$28 sps:$4 sm:$0xff]  }
 0x860   :  { %24328 = vmatpush3.bf16.msra.mxu0 %v28059_v52  ;;  %v28102_v52 = vld [vmem:[%s37686_s3 + $0xa5c] ss:$28 sps:$4 sm:$0xff]  }
 0x861   :  { %19647 = vmatpush1.bf16.msra.mxu1 %v28055_v11  ;;  %24329 = vmatprep.subr.bf16.mxu0 %v28063_v19  ;;  %v28099_v11 = vld [vmem:[%s37686_s3 + $0x478] ss:$28 sps:$4 sm:$0xff]  }
 0x862   :  { %19648 = vmatprep.subr.bf16.mxu1 %v28062_v23  ;;  %v28103_v23 = vld [vmem:[%s37686_s3 + $0x670] ss:$28 sps:$4 sm:$0xff]   ;;  %v28100_v19 = vld [vmem:[%s37686_s3 + $0xa58] ss:$28 sps:$4 sm:$0xff]  }
 0x864   :  { %24330 = vmatpush3.bf16.msra.mxu0 %v28064_v60  ;;  %v28107_v60 = vld [vmem:[%s37686_s3 + $0xa94] ss:$28 sps:$4 sm:$0xff]  }
 0x865   :  { %19649 = vmatpush1.bf16.msra.mxu1 %v28060_v51  ;;  %24331 = vmatprep.subr.bf16.mxu0 %v28068_v63  ;;  %v28104_v51 = vld [vmem:[%s37686_s3 + $0x4b0] ss:$28 sps:$4 sm:$0xff]  }
 0x866   :  { %19650 = vmatprep.subr.bf16.mxu1 %v28067_v22  ;;  %v28108_v22 = vld [vmem:[%s37686_s3 + $0x6a8] ss:$28 sps:$4 sm:$0xff]   ;;  %v28105_v63 = vld [vmem:[%s37686_s3 + $0xa90] ss:$28 sps:$4 sm:$0xff]  }
 0x868   :  { %24332 = vmatpush3.bf16.msra.mxu0 %v28069_v7  ;;  %v28112_v7 = vld [vmem:[%s37686_s3 + $0xacc] ss:$28 sps:$4 sm:$0xff]  }
 0x869   :  { %19651 = vmatpush1.bf16.msra.mxu1 %v28065_v45  ;;  %24333 = vmatprep.subr.bf16.mxu0 %v28073_v24  ;;  %v28109_v45 = vld [vmem:[%s37686_s3 + $0x4e8] ss:$28 sps:$4 sm:$0xff]  }
 0x86a   :  { %19652 = vmatprep.subr.bf16.mxu1 %v28072_v33  ;;  %v28113_v33 = vld [vmem:[%s37686_s3 + $0x6e0] ss:$28 sps:$4 sm:$0xff]   ;;  %v28110_v24 = vld [vmem:[%s37686_s3 + $0xac8] ss:$28 sps:$4 sm:$0xff]  }
 0x86c   :  { %24334 = vmatpush3.bf16.msra.mxu0 %v28074_v34  ;;  %v28117_v34 = vld [vmem:[%s37686_s3 + $0xb04] ss:$28 sps:$4 sm:$0xff]  }
 0x86d   :  { %19653 = vmatpush1.bf16.msra.mxu1 %v28070_v21  ;;  %24341 = vmatprep.subr.bf16.mxu0 %v28078_v47  ;;  %v28114_v21 = vld [vmem:[%s37686_s3 + $0x520] ss:$28 sps:$4 sm:$0xff]  }
 0x86e   :  { %19654 = vmatprep.subr.bf16.mxu1 %v28077_v59  ;;  %v28118_v59 = vld [vmem:[%s37686_s3 + $0x8d8] ss:$28 sps:$4 sm:$0xff]   ;;  %v28115_v47 = vld [vmem:[%s37686_s3 + $0xb00] ss:$28 sps:$4 sm:$0xff]  }
 0x86f   :  { %20118 = vmatmul.mubr.bf16.vlgmr.msra.gmra.mrb[40].mxu0 %v32867_v54  ;;  %v28088_v54 = vld [vmem:[%s37686_s3 + $0x5c8] ss:$28 sps:$4 sm:$0xff]  }
 0x870   :  { %24342 = vmatpush3.bf16.msra.mxu0 %v28079_v41  ;;  %20157 = vmatprep.mubr.bf16.mxu0 %v32872_v49  ;;  %v28089_v49 = vld [vmem:[%s37686_s3 + $0x408] ss:$28 sps:$4 sm:$0xff]   ;;  %v28122_v41 = vld [vmem:[%s37686_s3 + $0xb3c] ss:$28 sps:$4 sm:$0xff]  }
 0x871   :  { %19655 = vmatpush1.bf16.msra.mxu1 %v28075_v31  ;;  %24343 = vmatprep.subr.bf16.mxu0 %v28083_v14  ;;  %v28119_v31 = vld [vmem:[%s37686_s3 + $0x718] ss:$28 sps:$4 sm:$0xff]  }
 0x872   :  { %19656 = vmatprep.subr.bf16.mxu1 %v28082_v29  ;;  %v28123_v29 = vld [vmem:[%s37686_s3 + $0x910] ss:$28 sps:$4 sm:$0xff]   ;;  %v28120_v14 = vld [vmem:[%s37686_s3 + $0xb38] ss:$28 sps:$4 sm:$0xff]  }
 0x874   :  { %24344 = vmatpush3.bf16.msra.mxu0 %v28084_v6  ;;  %v28127_v6 = vld [vmem:[%s37686_s3 + $0xb74] ss:$28 sps:$4 sm:$0xff]  }
 0x875   :  { %19657 = vmatpush1.bf16.msra.mxu1 %v28080_v8  ;;  %24345 = vmatprep.subr.bf16.mxu0 %v28088_v54  ;;  %v28124_v8 = vld [vmem:[%s37686_s3 + $0x750] ss:$28 sps:$4 sm:$0xff]  }
 0x876   :  { %19658 = vmatprep.subr.bf16.mxu1 %v28087_v27  ;;  %v28125_v27 = vld [vmem:[%s37686_s3 + $0xb70] ss:$28 sps:$4 sm:$0xff]  }
 0x877   :  { %v28132_v54 = vld [vmem:[%s37686_s3 + $0xbac] ss:$28 sps:$4 sm:$0xff]  }
 0x878   :  { %24346 = vmatpush3.bf16.msra.mxu0 %v28089_v49  ;;  %v28130_v49 = vld [vmem:[%s37686_s3 + $0xba8] ss:$28 sps:$4 sm:$0xff]  }
 0x879   :  { %19659 = vmatpush1.bf16.msra.mxu1 %v28085_v55  ;;  %24347 = vmatprep.subr.bf16.mxu0 %v28093_v12  ;;  %v28133_v55 = vld [vmem:[%s37686_s3 + $0x980] ss:$28 sps:$4 sm:$0xff]  }
 0x87a   :  { %19660 = vmatprep.subr.bf16.mxu1 %v28092_v44  ;;  %v28134_v44 = vld [vmem:[%s37686_s3 + $0x7c0] ss:$28 sps:$4 sm:$0xff]  }
 0x87b   :  { %v28137_v12 = vld [vmem:[%s37686_s3 + $0xbe4] ss:$28 sps:$4 sm:$0xff]  }
 0x87c   :  { %24348 = vmatpush3.bf16.msra.mxu0 %v28094_v62  ;;  %v28138_v62 = vld [vmem:[%s37686_s3 + $0x9b8] ss:$28 sps:$4 sm:$0xff]  }
 0x87d   :  { %19661 = vmatpush1.bf16.msra.mxu1 %v28090_v58  ;;  %24349 = vmatprep.subr.bf16.mxu0 %v28098_v15 }
 0x87e   :  { %19662 = vmatprep.subr.bf16.mxu1 %v28097_v13 }
 0x880   :  { %24350 = vmatpush3.bf16.msra.mxu0 %v28099_v11 }
 0x881   :  { %19663 = vmatpush1.bf16.msra.mxu1 %v28095_v4  ;;  %24351 = vmatprep.subr.bf16.mxu0 %v28103_v23  ;;  %v28135_v4 = vld [vmem:[%s37686_s3 + $0xbe0] ss:$28 sps:$4 sm:$0xff]  }
 0x882   :  { %19664 = vmatprep.subr.bf16.mxu1 %v28102_v52  ;;  %v28139_v52 = vld [vmem:[%s37686_s3 + $0x7f8] ss:$28 sps:$4 sm:$0xff]  }
 0x883   :  { %v28142_v23 = vld [vmem:[%s37686_s3 + $0xc1c] ss:$28 sps:$4 sm:$0xff]  }
 0x884   :  { %24352 = vmatpush3.bf16.msra.mxu0 %v28104_v51  ;;  %v28140_v51 = vld [vmem:[%s37686_s3 + $0xc18] ss:$28 sps:$4 sm:$0xff]  }
 0x885   :  { %19665 = vmatpush1.bf16.msra.mxu1 %v28100_v19  ;;  %24353 = vmatprep.subr.bf16.mxu0 %v28108_v22  ;;  %v28143_v19 = vld [vmem:[%s37686_s3 + $0x9f0] ss:$28 sps:$4 sm:$0xff]  }
 0x886   :  { %19675 = vmatprep.subr.bf16.mxu1 %v28107_v60  ;;  %v28144_v60 = vld [vmem:[%s37686_s3 + $0x830] ss:$28 sps:$4 sm:$0xff]  }
 0x887   :  { %v28147_v22 = vld [vmem:[%s37686_s3 + $0xc54] ss:$28 sps:$4 sm:$0xff]  }
 0x888   :  { %19667 = vmatmul.mubr.bf16.vlgmr.msra.gmra.mrb[40].mxu1 %v33294_v25  ;;  %24354 = vmatpush3.bf16.msra.mxu0 %v28109_v45  ;;  %v28145_v45 = vld [vmem:[%s37686_s3 + $0xc50] ss:$28 sps:$4 sm:$0xff]  }
 0x889   :  { %19676 = vmatpush1.bf16.msra.mxu1 %v28105_v63  ;;  %19707 = vmatprep.mubr.bf16.mxu1 %v33299_v16  ;;  %v28148_v63 = vld [vmem:[%s37686_s3 + $0xa28] ss:$28 sps:$4 sm:$0xff]  }
 0x88a   :  { %19677 = vmatprep.subr.bf16.mxu1 %v28112_v7  ;;  %24355 = vmatprep.subr.bf16.mxu0 %v28113_v33  ;;  %v28149_v7 = vld [vmem:[%s37686_s3 + $0x868] ss:$28 sps:$4 sm:$0xff]  }
 0x88b   :  { %v28152_v33 = vld [vmem:[%s37686_s3 + $0xc8c] ss:$28 sps:$4 sm:$0xff]  }
 0x88c   :  { %24356 = vmatpush3.bf16.msra.mxu0 %v28114_v21  ;;  %v28150_v21 = vld [vmem:[%s37686_s3 + $0xc88] ss:$28 sps:$4 sm:$0xff]  }
 0x88d   :  { %19678 = vmatpush1.bf16.msra.mxu1 %v28110_v24  ;;  %24363 = vmatprep.subr.bf16.mxu0 %v28118_v59  ;;  %v28153_v24 = vld [vmem:[%s37686_s3 + $0xa60] ss:$28 sps:$4 sm:$0xff]  }
 0x88e   :  { %19679 = vmatprep.subr.bf16.mxu1 %v28117_v34  ;;  %v28154_v34 = vld [vmem:[%s37686_s3 + $0x8a0] ss:$28 sps:$4 sm:$0xff]  }
 0x88f   :  { %20158 = vmatmul.mubr.bf16.vlgmr.msra.gmra.mrb[44].mxu0 %v33078_v53  ;;  %v28128_v53 = vld [vmem:[%s37686_s3 + $0x948] ss:$28 sps:$4 sm:$0xff]  }
 0x890   :  { %24364 = vmatpush3.bf16.msra.mxu0 %v28119_v31  ;;  %20197 = vmatprep.mubr.bf16.mxu0 %v33083_v39  ;;  %v28129_v39 = vld [vmem:[%s37686_s3 + $0x788] ss:$28 sps:$4 sm:$0xff]   ;;  %v28155_v31 = vld [vmem:[%s37686_s3 + $0xcc0] ss:$28 sps:$4 sm:$0xff]  }
 0x891   :  { %19680 = vmatpush1.bf16.msra.mxu1 %v28115_v47  ;;  %24365 = vmatprep.subr.bf16.mxu0 %v28123_v29  ;;  %v28157_v59 = vld [vmem:[%s37686_s3 + $0xcc4] ss:$28 sps:$4 sm:$0xff]   ;;  %v28158_v47 = vld [vmem:[%s37686_s3 + $0xc58] ss:$28 sps:$4 sm:$0xff]  }
 0x892   :  { %19681 = vmatprep.subr.bf16.mxu1 %v28122_v41  ;;  %v28159_v41 = vld [vmem:[%s37686_s3 + $0xa98] ss:$28 sps:$4 sm:$0xff]  }
 0x893   :  { %v28162_v29 = vld [vmem:[%s37686_s3 + $0xcfc] ss:$28 sps:$4 sm:$0xff]  }
 0x894   :  { %24366 = vmatpush3.bf16.msra.mxu0 %v28124_v8  ;;  %v28160_v8 = vld [vmem:[%s37686_s3 + $0xcf8] ss:$28 sps:$4 sm:$0xff]  }
 0x895   :  { %19682 = vmatpush1.bf16.msra.mxu1 %v28120_v14  ;;  %24367 = vmatprep.subr.bf16.mxu0 %v28128_v53  ;;  %v28163_v14 = vld [vmem:[%s37686_s3 + $0xc90] ss:$28 sps:$4 sm:$0xff]  }
 0x896   :  { %19683 = vmatprep.subr.bf16.mxu1 %v28127_v6  ;;  %v28164_v6 = vld [vmem:[%s37686_s3 + $0xad0] ss:$28 sps:$4 sm:$0xff]  }
 0x897   :  { %v28167_v53 = vld [vmem:[%s37686_s3 + $0xd34] ss:$28 sps:$4 sm:$0xff]  }
 0x898   :  { %24368 = vmatpush3.bf16.msra.mxu0 %v28129_v39  ;;  %v28172_v39 = vld [vmem:[%s37686_s3 + $0xd6c] ss:$28 sps:$4 sm:$0xff]  }
 0x899   :  { %19684 = vmatpush1.bf16.msra.mxu1 %v28125_v27  ;;  %24369 = vmatprep.subr.bf16.mxu0 %v28133_v55  ;;  %v28165_v27 = vld [vmem:[%s37686_s3 + $0xd30] ss:$28 sps:$4 sm:$0xff]   ;;  %v28170_v55 = vld [vmem:[%s37686_s3 + $0xd68] ss:$28 sps:$4 sm:$0xff]  }
 0x89a   :  { %19685 = vmatprep.subr.bf16.mxu1 %v28132_v54  ;;  %v28173_v54 = vld [vmem:[%s37686_s3 + $0xd00] ss:$28 sps:$4 sm:$0xff]  }
 0x89b   :  { %v35906_v58 = vpop.f32.mrb[36].mxu1 }
 0x89c   :  { %v35911_v13 = vpop.f32.mrb[37].mxu1  ;;  %24370 = vmatpush3.bf16.msra.mxu0 %v28134_v44  ;;  %v28177_v44 = vld [vmem:[%s37686_s3 + $0xda4] ss:$28 sps:$4 sm:$0xff]  }
 0x89d   :  { %v19016_v15 = vpop.f32.mrb[38].mxu1  ;;  %19686 = vmatpush1.bf16.msra.mxu1 %v28130_v49  ;;  %24371 = vmatprep.subr.bf16.mxu0 %v28138_v62  ;;  %v28174_v49 = vld [vmem:[%s37686_s3 + $0xb40] ss:$28 sps:$4 sm:$0xff]  }
 0x89e   :  { %v19017_v11 = vpop.f32.mrb[39].mxu1  ;;  %19687 = vmatprep.subr.bf16.mxu1 %v28137_v12  ;;  %v28178_v12 = vld [vmem:[%s37686_s3 + $0xd38] ss:$28 sps:$4 sm:$0xff]   ;;  %v28175_v62 = vld [vmem:[%s37686_s3 + $0xda0] ss:$28 sps:$4 sm:$0xff]  }
 0x89f   :  { %v28179_v15 = vld [vmem:[%s37686_s3 + $0xb78] ss:$28 sps:$4 sm:$0xff]   ;;  %v28183_v11 = vld [vmem:[%s37686_s3 + $0xd70] ss:$28 sps:$4 sm:$0xff]  }
 0x8a0   :  { %24372 = vmatpush3.bf16.msra.mxu0 %v28139_v52  ;;  %v28180_v52 = vld [vmem:[%s37686_s3 + $0xdd8] ss:$28 sps:$4 sm:$0xff]  }
 0x8a1   :  { %19688 = vmatpush1.bf16.msra.mxu1 %v28135_v4  ;;  %24373 = vmatprep.subr.bf16.mxu0 %v28143_v19  ;;  %v28182_v4 = vld [vmem:[%s37686_s3 + $0xddc] ss:$28 sps:$4 sm:$0xff]   ;;  %v28187_v19 = vld [vmem:[%s37686_s3 + $0xe14] ss:$28 sps:$4 sm:$0xff]  }
 0x8a2   :  { %19689 = vmatprep.subr.bf16.mxu1 %v28142_v23  ;;  %v28184_v23 = vld [vmem:[%s37686_s3 + $0xbb0] ss:$28 sps:$4 sm:$0xff]  }
 0x8a4   :  { %24374 = vmatpush3.bf16.msra.mxu0 %v28144_v60  ;;  %v28185_v60 = vld [vmem:[%s37686_s3 + $0xe10] ss:$28 sps:$4 sm:$0xff]  }
 0x8a5   :  { %19690 = vmatpush1.bf16.msra.mxu1 %v28140_v51  ;;  %24375 = vmatprep.subr.bf16.mxu0 %v28148_v63  ;;  %v28188_v51 = vld [vmem:[%s37686_s3 + $0xda8] ss:$28 sps:$4 sm:$0xff]  }
 0x8a6   :  { %19691 = vmatprep.subr.bf16.mxu1 %v28147_v22  ;;  %v28189_v22 = vld [vmem:[%s37686_s3 + $0xbe8] ss:$28 sps:$4 sm:$0xff]  }
 0x8a7   :  { %v28192_v63 = vld [vmem:[%s37686_s3 + $0xe4c] ss:$28 sps:$4 sm:$0xff]  }
 0x8a8   :  { %24376 = vmatpush3.bf16.msra.mxu0 %v28149_v7  ;;  %v28190_v7 = vld [vmem:[%s37686_s3 + $0xe48] ss:$28 sps:$4 sm:$0xff]  }
 0x8a9   :  { %19692 = vmatpush1.bf16.msra.mxu1 %v28145_v45  ;;  %24377 = vmatprep.subr.bf16.mxu0 %v28153_v24  ;;  %v28193_v45 = vld [vmem:[%s37686_s3 + $0xde0] ss:$28 sps:$4 sm:$0xff]  }
 0x8aa   :  { %19693 = vmatprep.subr.bf16.mxu1 %v28152_v33  ;;  %v28194_v33 = vld [vmem:[%s37686_s3 + $0xc20] ss:$28 sps:$4 sm:$0xff]  }
 0x8ab   :  { %v28197_v24 = vld [vmem:[%s37686_s3 + $0xe84] ss:$28 sps:$4 sm:$0xff]  }
 0x8ac   :  { %24378 = vmatpush3.bf16.msra.mxu0 %v28154_v34  ;;  %v28195_v34 = vld [vmem:[%s37686_s3 + $0xe80] ss:$28 sps:$4 sm:$0xff]  }
 0x8ad   :  { %19694 = vmatpush1.bf16.msra.mxu1 %v28150_v21  ;;  %24385 = vmatprep.subr.bf16.mxu0 %v28158_v47  ;;  %v28198_v21 = vld [vmem:[%s37686_s3 + $0xfd8] ss:$28 sps:$4 sm:$0xff]  }
 0x8ae   :  { %19695 = vmatprep.subr.bf16.mxu1 %v28157_v59  ;;  %v28199_v59 = vld [vmem:[%s37686_s3 + $0xe18] ss:$28 sps:$4 sm:$0xff]  }
 0x8af   :  { %20198 = vmatmul.mubr.bf16.vlgmr.msra.gmra.mrb[48].mxu0 %v33294_v25  ;;  %v28168_v25 = vld [vmem:[%s37686_s3 + $0xcc8] ss:$28 sps:$4 sm:$0xff]   ;;  %v28202_v47 = vld [vmem:[%s37686_s3 + $0xebc] ss:$28 sps:$4 sm:$0xff]  }
 0x8b0   :  { %24386 = vmatpush3.bf16.msra.mxu0 %v28159_v41  ;;  %20237 = vmatprep.mubr.bf16.mxu0 %v33299_v16  ;;  %v28169_v16 = vld [vmem:[%s37686_s3 + $0xb08] ss:$28 sps:$4 sm:$0xff]   ;;  %v28200_v41 = vld [vmem:[%s37686_s3 + $0xeb8] ss:$28 sps:$4 sm:$0xff]  }
 0x8b1   :  { %19696 = vmatpush1.bf16.msra.mxu1 %v28155_v31  ;;  %24387 = vmatprep.subr.bf16.mxu0 %v28163_v14  ;;  %v28203_v31 = vld [vmem:[%s37686_s3 + $0x1010] ss:$28 sps:$4 sm:$0xff]  }
 0x8b2   :  { %19697 = vmatprep.subr.bf16.mxu1 %v28162_v29  ;;  %v28204_v29 = vld [vmem:[%s37686_s3 + $0xe50] ss:$28 sps:$4 sm:$0xff]  }
 0x8b3   :  { %v28207_v14 = vld [vmem:[%s37686_s3 + $0xef4] ss:$28 sps:$4 sm:$0xff]  }
 0x8b4   :  { %24388 = vmatpush3.bf16.msra.mxu0 %v28164_v6  ;;  %v28212_v6 = vld [vmem:[%s37686_s3 + $0xf2c] ss:$28 sps:$4 sm:$0xff]  }
 0x8b5   :  { %19698 = vmatpush1.bf16.msra.mxu1 %v28160_v8  ;;  %24389 = vmatprep.subr.bf16.mxu0 %v28168_v25  ;;  %v28205_v8 = vld [vmem:[%s37686_s3 + $0xef0] ss:$28 sps:$4 sm:$0xff]   ;;  %v28210_v25 = vld [vmem:[%s37686_s3 + $0xf28] ss:$28 sps:$4 sm:$0xff]  }
 0x8b6   :  { %19699 = vmatprep.subr.bf16.mxu1 %v28167_v53  ;;  %v28213_v53 = vld [vmem:[%s37686_s3 + $0x1080] ss:$28 sps:$4 sm:$0xff]  }
 0x8b8   :  { %24390 = vmatpush3.bf16.msra.mxu0 %v28169_v16  ;;  %v28217_v16 = vld [vmem:[%s37686_s3 + $0xf64] ss:$28 sps:$4 sm:$0xff]  }
 0x8b9   :  { %19700 = vmatpush1.bf16.msra.mxu1 %v28165_v27  ;;  %24391 = vmatprep.subr.bf16.mxu0 %v28173_v54  ;;  %v28214_v27 = vld [vmem:[%s37686_s3 + $0xec0] ss:$28 sps:$4 sm:$0xff]  }
 0x8ba   :  { %19701 = vmatprep.subr.bf16.mxu1 %v28172_v39  ;;  %v28218_v39 = vld [vmem:[%s37686_s3 + $0x10b8] ss:$28 sps:$4 sm:$0xff]   ;;  %v28215_v54 = vld [vmem:[%s37686_s3 + $0xf60] ss:$28 sps:$4 sm:$0xff]  }
 0x8bc   :  { %24392 = vmatpush3.bf16.msra.mxu0 %v28174_v49  ;;  %v28222_v49 = vld [vmem:[%s37686_s3 + $0xf9c] ss:$28 sps:$4 sm:$0xff]  }
 0x8bd   :  { %19702 = vmatpush1.bf16.msra.mxu1 %v28170_v55  ;;  %24393 = vmatprep.subr.bf16.mxu0 %v28178_v12  ;;  %v28219_v55 = vld [vmem:[%s37686_s3 + $0xef8] ss:$28 sps:$4 sm:$0xff]  }
 0x8be   :  { %19703 = vmatprep.subr.bf16.mxu1 %v28177_v44  ;;  %v28223_v44 = vld [vmem:[%s37686_s3 + $0x10f0] ss:$28 sps:$4 sm:$0xff]   ;;  %v28220_v12 = vld [vmem:[%s37686_s3 + $0xf98] ss:$28 sps:$4 sm:$0xff]  }
 0x8c0   :  { %24394 = vmatpush3.bf16.msra.mxu0 %v28179_v15  ;;  %v28227_v15 = vld [vmem:[%s37686_s3 + $0xfd4] ss:$28 sps:$4 sm:$0xff]  }
 0x8c1   :  { %19704 = vmatpush1.bf16.msra.mxu1 %v28175_v62  ;;  %24395 = vmatprep.subr.bf16.mxu0 %v28183_v11  ;;  %v28224_v62 = vld [vmem:[%s37686_s3 + $0xf30] ss:$28 sps:$4 sm:$0xff]  }
 0x8c2   :  { %19705 = vmatprep.subr.bf16.mxu1 %v28182_v4  ;;  %v28228_v4 = vld [vmem:[%s37686_s3 + $0x1128] ss:$28 sps:$4 sm:$0xff]   ;;  %v28225_v11 = vld [vmem:[%s37686_s3 + $0xfd0] ss:$28 sps:$4 sm:$0xff]  }
 0x8c4   :  { %24396 = vmatpush3.bf16.msra.mxu0 %v28184_v23  ;;  %v28232_v23 = vld [vmem:[%s37686_s3 + $0x100c] ss:$28 sps:$4 sm:$0xff]  }
 0x8c5   :  { %19706 = vmatpush1.bf16.msra.mxu1 %v28180_v52  ;;  %24397 = vmatprep.subr.bf16.mxu0 %v28188_v51  ;;  %v28229_v52 = vld [vmem:[%s37686_s3 + $0xf68] ss:$28 sps:$4 sm:$0xff]  }
 0x8c6   :  { %19716 = vmatprep.subr.bf16.mxu1 %v28187_v19  ;;  %v28233_v19 = vld [vmem:[%s37686_s3 + $0x1160] ss:$28 sps:$4 sm:$0xff]   ;;  %v28230_v51 = vld [vmem:[%s37686_s3 + $0x1008] ss:$28 sps:$4 sm:$0xff]  }
 0x8c8   :  { %19708 = vmatmul.mubr.bf16.vlgmr.msra.gmra.mrb[40].mxu1 %v33514_v35  ;;  %24398 = vmatpush3.bf16.msra.mxu0 %v28189_v22  ;;  %v28237_v22 = vld [vmem:[%s37686_s3 + $0x1044] ss:$28 sps:$4 sm:$0xff]  }
 0x8c9   :  { %19717 = vmatpush1.bf16.msra.mxu1 %v28185_v60  ;;  %19748 = vmatprep.mubr.bf16.mxu1 %v33519_v37  ;;  %v28234_v60 = vld [vmem:[%s37686_s3 + $0xfa0] ss:$28 sps:$4 sm:$0xff]  }
 0x8ca   :  { %19718 = vmatprep.subr.bf16.mxu1 %v28192_v63  ;;  %24399 = vmatprep.subr.bf16.mxu0 %v28193_v45  ;;  %v28238_v63 = vld [vmem:[%s37686_s3 + $0x1358] ss:$28 sps:$4 sm:$0xff]   ;;  %v28235_v45 = vld [vmem:[%s37686_s3 + $0x1040] ss:$28 sps:$4 sm:$0xff]  }
 0x8cc   :  { %24400 = vmatpush3.bf16.msra.mxu0 %v28194_v33  ;;  %v28242_v33 = vld [vmem:[%s37686_s3 + $0x107c] ss:$28 sps:$4 sm:$0xff]  }
 0x8cd   :  { %19719 = vmatpush1.bf16.msra.mxu1 %v28190_v7  ;;  %24407 = vmatprep.subr.bf16.mxu0 %v28198_v21  ;;  %v28239_v7 = vld [vmem:[%s37686_s3 + $0x1198] ss:$28 sps:$4 sm:$0xff]  }
 0x8ce   :  { %19720 = vmatprep.subr.bf16.mxu1 %v28197_v24  ;;  %v28243_v24 = vld [vmem:[%s37686_s3 + $0x1390] ss:$28 sps:$4 sm:$0xff]   ;;  %v28240_v21 = vld [vmem:[%s37686_s3 + $0x1078] ss:$28 sps:$4 sm:$0xff]  }
 0x8cf   :  { %20238 = vmatmul.mubr.bf16.vlgmr.msra.gmra.mrb[52].mxu0 %v33514_v35  ;;  %v28208_v35 = vld [vmem:[%s37686_s3 + $0x1048] ss:$28 sps:$4 sm:$0xff]  }
 0x8d0   :  { %24408 = vmatpush3.bf16.msra.mxu0 %v28199_v59  ;;  %20277 = vmatprep.mubr.bf16.mxu0 %v33519_v37  ;;  %v28209_v37 = vld [vmem:[%s37686_s3 + $0xe88] ss:$28 sps:$4 sm:$0xff]   ;;  %v28247_v59 = vld [vmem:[%s37686_s3 + $0x10b4] ss:$28 sps:$4 sm:$0xff]  }
 0x8d1   :  { %19721 = vmatpush1.bf16.msra.mxu1 %v28195_v34  ;;  %24409 = vmatprep.subr.bf16.mxu0 %v28203_v31  ;;  %v28244_v34 = vld [vmem:[%s37686_s3 + $0x11d0] ss:$28 sps:$4 sm:$0xff]  }
 0x8d2   :  { %19722 = vmatprep.subr.bf16.mxu1 %v28202_v47  ;;  %v28248_v47 = vld [vmem:[%s37686_s3 + $0x13c8] ss:$28 sps:$4 sm:$0xff]   ;;  %v28245_v31 = vld [vmem:[%s37686_s3 + $0x10b0] ss:$28 sps:$4 sm:$0xff]  }
 0x8d4   :  { %24410 = vmatpush3.bf16.msra.mxu0 %v28204_v29  ;;  %v28252_v29 = vld [vmem:[%s37686_s3 + $0x10ec] ss:$28 sps:$4 sm:$0xff]  }
 0x8d5   :  { %19723 = vmatpush1.bf16.msra.mxu1 %v28200_v41  ;;  %24411 = vmatprep.subr.bf16.mxu0 %v28208_v35  ;;  %v28249_v41 = vld [vmem:[%s37686_s3 + $0x1208] ss:$28 sps:$4 sm:$0xff]  }
 0x8d6   :  { %19724 = vmatprep.subr.bf16.mxu1 %v28207_v14  ;;  %v28253_v14 = vld [vmem:[%s37686_s3 + $0x1400] ss:$28 sps:$4 sm:$0xff]   ;;  %v28250_v35 = vld [vmem:[%s37686_s3 + $0x10e8] ss:$28 sps:$4 sm:$0xff]  }
 0x8d8   :  { %24412 = vmatpush3.bf16.msra.mxu0 %v28209_v37  ;;  %v28257_v37 = vld [vmem:[%s37686_s3 + $0x1124] ss:$28 sps:$4 sm:$0xff]  }
 0x8d9   :  { %19725 = vmatpush1.bf16.msra.mxu1 %v28205_v8  ;;  %24413 = vmatprep.subr.bf16.mxu0 %v28213_v53  ;;  %v28254_v8 = vld [vmem:[%s37686_s3 + $0x1240] ss:$28 sps:$4 sm:$0xff]  }
 0x8da   :  { %19726 = vmatprep.subr.bf16.mxu1 %v28212_v6  ;;  %v28258_v6 = vld [vmem:[%s37686_s3 + $0x1438] ss:$28 sps:$4 sm:$0xff]   ;;  %v28255_v53 = vld [vmem:[%s37686_s3 + $0x1120] ss:$28 sps:$4 sm:$0xff]  }
 0x8dc   :  { %24414 = vmatpush3.bf16.msra.mxu0 %v28214_v27  ;;  %v28262_v27 = vld [vmem:[%s37686_s3 + $0x115c] ss:$28 sps:$4 sm:$0xff]  }
 0x8dd   :  { %19727 = vmatpush1.bf16.msra.mxu1 %v28210_v25  ;;  %24415 = vmatprep.subr.bf16.mxu0 %v28218_v39  ;;  %v28259_v25 = vld [vmem:[%s37686_s3 + $0x1278] ss:$28 sps:$4 sm:$0xff]  }
 0x8de   :  { %19728 = vmatprep.subr.bf16.mxu1 %v28217_v16  ;;  %v28263_v16 = vld [vmem:[%s37686_s3 + $0x1470] ss:$28 sps:$4 sm:$0xff]   ;;  %v28260_v39 = vld [vmem:[%s37686_s3 + $0x1158] ss:$28 sps:$4 sm:$0xff]  }
 0x8e0   :  { %24416 = vmatpush3.bf16.msra.mxu0 %v28219_v55  ;;  %v28267_v55 = vld [vmem:[%s37686_s3 + $0x1194] ss:$28 sps:$4 sm:$0xff]  }
 0x8e1   :  { %19729 = vmatpush1.bf16.msra.mxu1 %v28215_v54  ;;  %24417 = vmatprep.subr.bf16.mxu0 %v28223_v44  ;;  %v28264_v54 = vld [vmem:[%s37686_s3 + $0x12b0] ss:$28 sps:$4 sm:$0xff]  }
 0x8e2   :  { %19730 = vmatprep.subr.bf16.mxu1 %v28222_v49  ;;  %v28268_v49 = vld [vmem:[%s37686_s3 + $0x14a8] ss:$28 sps:$4 sm:$0xff]   ;;  %v28265_v44 = vld [vmem:[%s37686_s3 + $0x1190] ss:$28 sps:$4 sm:$0xff]  }
 0x8e4   :  { %24418 = vmatpush3.bf16.msra.mxu0 %v28224_v62  ;;  %v28272_v62 = vld [vmem:[%s37686_s3 + $0x11cc] ss:$28 sps:$4 sm:$0xff]  }
 0x8e5   :  { %19731 = vmatpush1.bf16.msra.mxu1 %v28220_v12  ;;  %24419 = vmatprep.subr.bf16.mxu0 %v28228_v4  ;;  %v28269_v12 = vld [vmem:[%s37686_s3 + $0x12e8] ss:$28 sps:$4 sm:$0xff]  }
 0x8e6   :  { %19732 = vmatprep.subr.bf16.mxu1 %v28227_v15  ;;  %v28273_v15 = vld [vmem:[%s37686_s3 + $0x14e0] ss:$28 sps:$4 sm:$0xff]   ;;  %v28270_v4 = vld [vmem:[%s37686_s3 + $0x11c8] ss:$28 sps:$4 sm:$0xff]  }
 0x8e8   :  { %24420 = vmatpush3.bf16.msra.mxu0 %v28229_v52  ;;  %v28277_v52 = vld [vmem:[%s37686_s3 + $0x1204] ss:$28 sps:$4 sm:$0xff]  }
 0x8e9   :  { %19733 = vmatpush1.bf16.msra.mxu1 %v28225_v11  ;;  %24421 = vmatprep.subr.bf16.mxu0 %v28233_v19  ;;  %v28274_v11 = vld [vmem:[%s37686_s3 + $0x1320] ss:$28 sps:$4 sm:$0xff]  }
 0x8ea   :  { %19734 = vmatprep.subr.bf16.mxu1 %v28232_v23  ;;  %v28279_v23 = vld [vmem:[%s37686_s3 + $0x1518] ss:$28 sps:$4 sm:$0xff]  }
 0x8eb   :  { %v28282_v19 = vld [vmem:[%s37686_s3 + $0x123c] ss:$28 sps:$4 sm:$0xff]  }
 0x8ec   :  { %24422 = vmatpush3.bf16.msra.mxu0 %v28234_v60  ;;  %v28280_v60 = vld [vmem:[%s37686_s3 + $0x1238] ss:$28 sps:$4 sm:$0xff]  }
 0x8ed   :  { %19735 = vmatpush1.bf16.msra.mxu1 %v28230_v51  ;;  %24429 = vmatprep.subr.bf16.mxu0 %v28238_v63  ;;  %v28283_v51 = vld [vmem:[%s37686_s3 + $0x1710] ss:$28 sps:$4 sm:$0xff]  }
 0x8ee   :  { %19736 = vmatprep.subr.bf16.mxu1 %v28237_v22  ;;  %v28284_v22 = vld [vmem:[%s37686_s3 + $0x1550] ss:$28 sps:$4 sm:$0xff]  }
 0x8ef   :  { %20278 = vmatmul.mubr.bf16.vlgmr.msra.gmra.mrb[56].mxu0 %v33727_v0  ;;  %v28287_v63 = vld [vmem:[%s37686_s3 + $0x1274] ss:$28 sps:$4 sm:$0xff]  }
 0x8f0   :  { %24430 = vmatpush3.bf16.msra.mxu0 %v28239_v7  ;;  %20317 = vmatprep.mubr.bf16.mxu0 %v33732_v56  ;;  %v28285_v7 = vld [vmem:[%s37686_s3 + $0x1270] ss:$28 sps:$4 sm:$0xff]  }
 0x8f1   :  { %19737 = vmatpush1.bf16.msra.mxu1 %v28235_v45  ;;  %24431 = vmatprep.subr.bf16.mxu0 %v28243_v24  ;;  %v28288_v45 = vld [vmem:[%s37686_s3 + $0x1748] ss:$28 sps:$4 sm:$0xff]  }
 0x8f2   :  { %19738 = vmatprep.subr.bf16.mxu1 %v28242_v33  ;;  %v28289_v33 = vld [vmem:[%s37686_s3 + $0x1588] ss:$28 sps:$4 sm:$0xff]  }
 0x8f3   :  { %v28292_v24 = vld [vmem:[%s37686_s3 + $0x12ac] ss:$28 sps:$4 sm:$0xff]  }
 0x8f4   :  { %24432 = vmatpush3.bf16.msra.mxu0 %v28244_v34  ;;  %v28290_v34 = vld [vmem:[%s37686_s3 + $0x12a8] ss:$28 sps:$4 sm:$0xff]  }
 0x8f5   :  { %19739 = vmatpush1.bf16.msra.mxu1 %v28240_v21  ;;  %24433 = vmatprep.subr.bf16.mxu0 %v28248_v47  ;;  %v28293_v21 = vld [vmem:[%s37686_s3 + $0x1780] ss:$28 sps:$4 sm:$0xff]  }
 0x8f6   :  { %19740 = vmatprep.subr.bf16.mxu1 %v28247_v59  ;;  %v28294_v59 = vld [vmem:[%s37686_s3 + $0x15c0] ss:$28 sps:$4 sm:$0xff]  }
 0x8f7   :  { %v28297_v47 = vld [vmem:[%s37686_s3 + $0x12e4] ss:$28 sps:$4 sm:$0xff]  }
 0x8f8   :  { %24434 = vmatpush3.bf16.msra.mxu0 %v28249_v41  ;;  %v28295_v41 = vld [vmem:[%s37686_s3 + $0x12e0] ss:$28 sps:$4 sm:$0xff]  }
 0x8f9   :  { %19741 = vmatpush1.bf16.msra.mxu1 %v28245_v31  ;;  %24435 = vmatprep.subr.bf16.mxu0 %v28253_v14  ;;  %v28298_v31 = vld [vmem:[%s37686_s3 + $0x17b8] ss:$28 sps:$4 sm:$0xff]  }
 0x8fa   :  { %19742 = vmatprep.subr.bf16.mxu1 %v28252_v29  ;;  %v28299_v29 = vld [vmem:[%s37686_s3 + $0x15f8] ss:$28 sps:$4 sm:$0xff]  }
 0x8fb   :  { %v28302_v14 = vld [vmem:[%s37686_s3 + $0x131c] ss:$28 sps:$4 sm:$0xff]  }
 0x8fc   :  { %24436 = vmatpush3.bf16.msra.mxu0 %v28254_v8  ;;  %v28300_v8 = vld [vmem:[%s37686_s3 + $0x1318] ss:$28 sps:$4 sm:$0xff]  }
 0x8fd   :  { %19743 = vmatpush1.bf16.msra.mxu1 %v28250_v35  ;;  %24437 = vmatprep.subr.bf16.mxu0 %v28258_v6  ;;  %v28303_v35 = vld [vmem:[%s37686_s3 + $0x17f0] ss:$28 sps:$4 sm:$0xff]  }
 0x8fe   :  { %19744 = vmatprep.subr.bf16.mxu1 %v28257_v37  ;;  %v28304_v37 = vld [vmem:[%s37686_s3 + $0x1630] ss:$28 sps:$4 sm:$0xff]  }
 0x8ff   :  { %v28307_v6 = vld [vmem:[%s37686_s3 + $0x1354] ss:$28 sps:$4 sm:$0xff]  }
 0x900   :  { %24438 = vmatpush3.bf16.msra.mxu0 %v28259_v25 }
 0x901   :  { %19745 = vmatpush1.bf16.msra.mxu1 %v28255_v53  ;;  %24439 = vmatprep.subr.bf16.mxu0 %v28263_v16  ;;  %v28308_v53 = vld [vmem:[%s37686_s3 + $0x1828] ss:$28 sps:$4 sm:$0xff]   ;;  %v28305_v16 = vld [vmem:[%s37686_s3 + $0x1350] ss:$28 sps:$4 sm:$0xff]  }
 0x902   :  { %19746 = vmatprep.subr.bf16.mxu1 %v28262_v27 }
 0x904   :  { %24440 = vmatpush3.bf16.msra.mxu0 %v28264_v54  ;;  %v28309_v54 = vld [vmem:[%s37686_s3 + $0x1668] ss:$28 sps:$4 sm:$0xff]  }
 0x905   :  { %19747 = vmatpush1.bf16.msra.mxu1 %v28260_v39  ;;  %24441 = vmatprep.subr.bf16.mxu0 %v28268_v49 }
 0x906   :  { %19757 = vmatprep.subr.bf16.mxu1 %v28267_v55  ;;  %v28312_v55 = vld [vmem:[%s37686_s3 + $0x138c] ss:$28 sps:$4 sm:$0xff]  }
 0x908   :  { %19749 = vmatmul.mubr.bf16.vlgmr.msra.gmra.mrb[40].mxu1 %v33727_v0  ;;  %24442 = vmatpush3.bf16.msra.mxu0 %v28269_v12  ;;  %v28278_v0 = vld [vmem:[%s37686_s3 + $0x16d8] ss:$28 sps:$4 sm:$0xff]   ;;  %v28310_v12 = vld [vmem:[%s37686_s3 + $0x1388] ss:$28 sps:$4 sm:$0xff]  }
 0x909   :  { %19758 = vmatpush1.bf16.msra.mxu1 %v28265_v44  ;;  %19789 = vmatprep.mubr.bf16.mxu1 %v33732_v56  ;;  %v28275_v56 = vld [vmem:[%s37686_s3 + $0x1200] ss:$28 sps:$4 sm:$0xff]  }
 0x90a   :  { %19759 = vmatprep.subr.bf16.mxu1 %v28272_v62  ;;  %24443 = vmatprep.subr.bf16.mxu0 %v28273_v15  ;;  %v28313_v44 = vld [vmem:[%s37686_s3 + $0x1860] ss:$28 sps:$4 sm:$0xff]  }
 0x90b   :  { %v28314_v62 = vld [vmem:[%s37686_s3 + $0x16a0] ss:$28 sps:$4 sm:$0xff]  }
 0x90c   :  { %24444 = vmatpush3.bf16.msra.mxu0 %v28274_v11  ;;  %v28317_v15 = vld [vmem:[%s37686_s3 + $0x13c4] ss:$28 sps:$4 sm:$0xff]  }
 0x90d   :  { %19760 = vmatpush1.bf16.msra.mxu1 %v28270_v4  ;;  %24451 = vmatprep.subr.bf16.mxu0 %v28278_v0  ;;  %v28318_v4 = vld [vmem:[%s37686_s3 + $0x1a58] ss:$28 sps:$4 sm:$0xff]   ;;  %v28315_v11 = vld [vmem:[%s37686_s3 + $0x13c0] ss:$28 sps:$4 sm:$0xff]  }
 0x90e   :  { %19761 = vmatprep.subr.bf16.mxu1 %v28277_v52  ;;  %v28319_v52 = vld [vmem:[%s37686_s3 + $0x1898] ss:$28 sps:$4 sm:$0xff]  }
 0x90f   :  { %20318 = vmatmul.mubr.bf16.vlgmr.msra.gmra.mrb[60].mxu0 %v33945_v30  ;;  %v28322_v0 = vld [vmem:[%s37686_s3 + $0x13fc] ss:$28 sps:$4 sm:$0xff]  }
 0x910   :  { %24452 = vmatpush3.bf16.msra.mxu0 %v28279_v23  ;;  %20357 = vmatprep.mubr.bf16.mxu0 %v33950_v61  ;;  %v28320_v23 = vld [vmem:[%s37686_s3 + $0x13f8] ss:$28 sps:$4 sm:$0xff]  }
 0x911   :  { %19762 = vmatpush1.bf16.msra.mxu1 %v28275_v56  ;;  %24453 = vmatprep.subr.bf16.mxu0 %v28283_v51  ;;  %v28323_v56 = vld [vmem:[%s37686_s3 + $0x1a90] ss:$28 sps:$4 sm:$0xff]  }
 0x912   :  { %19763 = vmatprep.subr.bf16.mxu1 %v28282_v19  ;;  %v28324_v19 = vld [vmem:[%s37686_s3 + $0x18d0] ss:$28 sps:$4 sm:$0xff]  }
 0x913   :  { %v28327_v51 = vld [vmem:[%s37686_s3 + $0x1434] ss:$28 sps:$4 sm:$0xff]  }
 0x914   :  { %24454 = vmatpush3.bf16.msra.mxu0 %v28284_v22  ;;  %v28325_v22 = vld [vmem:[%s37686_s3 + $0x1430] ss:$28 sps:$4 sm:$0xff]  }
 0x915   :  { %19764 = vmatpush1.bf16.msra.mxu1 %v28280_v60  ;;  %24455 = vmatprep.subr.bf16.mxu0 %v28288_v45  ;;  %v28328_v60 = vld [vmem:[%s37686_s3 + $0x1ac8] ss:$28 sps:$4 sm:$0xff]  }
 0x916   :  { %19765 = vmatprep.subr.bf16.mxu1 %v28287_v63  ;;  %v28329_v63 = vld [vmem:[%s37686_s3 + $0x1908] ss:$28 sps:$4 sm:$0xff]  }
 0x917   :  { %v28332_v45 = vld [vmem:[%s37686_s3 + $0x146c] ss:$28 sps:$4 sm:$0xff]  }
 0x918   :  { %24456 = vmatpush3.bf16.msra.mxu0 %v28289_v33  ;;  %v28330_v33 = vld [vmem:[%s37686_s3 + $0x1468] ss:$28 sps:$4 sm:$0xff]  }
 0x919   :  { %19766 = vmatpush1.bf16.msra.mxu1 %v28285_v7  ;;  %24457 = vmatprep.subr.bf16.mxu0 %v28293_v21  ;;  %v28333_v7 = vld [vmem:[%s37686_s3 + $0x1b00] ss:$28 sps:$4 sm:$0xff]  }
 0x91a   :  { %19767 = vmatprep.subr.bf16.mxu1 %v28292_v24  ;;  %v28334_v24 = vld [vmem:[%s37686_s3 + $0x1940] ss:$28 sps:$4 sm:$0xff]  }
 0x91b   :  { %v28337_v21 = vld [vmem:[%s37686_s3 + $0x14a4] ss:$28 sps:$4 sm:$0xff]  }
 0x91c   :  { %24458 = vmatpush3.bf16.msra.mxu0 %v28294_v59  ;;  %v28335_v59 = vld [vmem:[%s37686_s3 + $0x14a0] ss:$28 sps:$4 sm:$0xff]  }
 0x91d   :  { %19768 = vmatpush1.bf16.msra.mxu1 %v28290_v34  ;;  %24459 = vmatprep.subr.bf16.mxu0 %v28298_v31  ;;  %v28338_v34 = vld [vmem:[%s37686_s3 + $0x1b38] ss:$28 sps:$4 sm:$0xff]  }
 0x91e   :  { %19769 = vmatprep.subr.bf16.mxu1 %v28297_v47  ;;  %v28339_v47 = vld [vmem:[%s37686_s3 + $0x1978] ss:$28 sps:$4 sm:$0xff]  }
 0x91f   :  { %v28342_v31 = vld [vmem:[%s37686_s3 + $0x14dc] ss:$28 sps:$4 sm:$0xff]  }
 0x920   :  { %24460 = vmatpush3.bf16.msra.mxu0 %v28299_v29  ;;  %v28340_v29 = vld [vmem:[%s37686_s3 + $0x14d8] ss:$28 sps:$4 sm:$0xff]  }
 0x921   :  { %19770 = vmatpush1.bf16.msra.mxu1 %v28295_v41  ;;  %24461 = vmatprep.subr.bf16.mxu0 %v28303_v35  ;;  %v28343_v41 = vld [vmem:[%s37686_s3 + $0x1b70] ss:$28 sps:$4 sm:$0xff]  }
 0x922   :  { %19771 = vmatprep.subr.bf16.mxu1 %v28302_v14  ;;  %v36333_v25 = vpop.f32.mrb[36].mxu0  ;;  %v28344_v14 = vld [vmem:[%s37686_s3 + $0x19b0] ss:$28 sps:$4 sm:$0xff]  }
 0x923   :  { %v36335_v27 = vpop.f32.mrb[37].mxu0  ;;  %v28347_v35 = vld [vmem:[%s37686_s3 + $0x1514] ss:$28 sps:$4 sm:$0xff]  }
 0x924   :  { %v19549_v39 = vpop.f32.mrb[38].mxu0  ;;  %24462 = vmatpush3.bf16.msra.mxu0 %v28304_v37 }
 0x925   :  { %19772 = vmatpush1.bf16.msra.mxu1 %v28300_v8  ;;  %v19550_v49 = vpop.f32.mrb[39].mxu0  ;;  %24463 = vmatprep.subr.bf16.mxu0 %v28308_v53  ;;  %v28348_v8 = vld [vmem:[%s37686_s3 + $0x1ba8] ss:$28 sps:$4 sm:$0xff]   ;;  %v28345_v53 = vld [vmem:[%s37686_s3 + $0x1510] ss:$28 sps:$4 sm:$0xff]  }
 0x926   :  { %19773 = vmatprep.subr.bf16.mxu1 %v28307_v6 }
 0x928   :  { %24464 = vmatpush3.bf16.msra.mxu0 %v28309_v54  ;;  %v28349_v54 = vld [vmem:[%s37686_s3 + $0x19e8] ss:$28 sps:$4 sm:$0xff]  }
 0x929   :  { %19774 = vmatpush1.bf16.msra.mxu1 %v28305_v16  ;;  %24465 = vmatprep.subr.bf16.mxu0 %v28313_v44  ;;  %v28353_v44 = vld [vmem:[%s37686_s3 + $0x1be0] ss:$28 sps:$4 sm:$0xff]  }
 0x92a   :  { %19775 = vmatprep.subr.bf16.mxu1 %v28312_v55  ;;  %v28352_v55 = vld [vmem:[%s37686_s3 + $0x154c] ss:$28 sps:$4 sm:$0xff]  }
 0x92c   :  { %24466 = vmatpush3.bf16.msra.mxu0 %v28314_v62  ;;  %v28354_v62 = vld [vmem:[%s37686_s3 + $0x1a20] ss:$28 sps:$4 sm:$0xff]  }
 0x92d   :  { %19776 = vmatpush1.bf16.msra.mxu1 %v28310_v12  ;;  %24473 = vmatprep.subr.bf16.mxu0 %v28318_v4  ;;  %v28350_v12 = vld [vmem:[%s37686_s3 + $0x1548] ss:$28 sps:$4 sm:$0xff]   ;;  %v28359_v4 = vld [vmem:[%s37686_s3 + $0x1c18] ss:$28 sps:$4 sm:$0xff]  }
 0x92e   :  { %19777 = vmatprep.subr.bf16.mxu1 %v28317_v15  ;;  %v28357_v15 = vld [vmem:[%s37686_s3 + $0x1584] ss:$28 sps:$4 sm:$0xff]  }
 0x92f   :  { %20358 = vmatmul.mubr.bf16.vlgmr.msra.gmra.mrb[64].mxu0 %v34151_v28 }
 0x930   :  { %24474 = vmatpush3.bf16.msra.mxu0 %v28319_v52  ;;  %20397 = vmatprep.mubr.bf16.mxu0 %v34156_v36  ;;  %v28363_v52 = vld [vmem:[%s37686_s3 + $0x1e10] ss:$28 sps:$4 sm:$0xff]  }
 0x931   :  { %19778 = vmatpush1.bf16.msra.mxu1 %v28315_v11  ;;  %24475 = vmatprep.subr.bf16.mxu0 %v28323_v56  ;;  %v28362_v11 = vld [vmem:[%s37686_s3 + $0x15bc] ss:$28 sps:$4 sm:$0xff]   ;;  %v28364_v56 = vld [vmem:[%s37686_s3 + $0x1c50] ss:$28 sps:$4 sm:$0xff]  }
 0x932   :  { %19779 = vmatprep.subr.bf16.mxu1 %v28322_v0  ;;  %v28360_v0 = vld [vmem:[%s37686_s3 + $0x15b8] ss:$28 sps:$4 sm:$0xff]  }
 0x934   :  { %24476 = vmatpush3.bf16.msra.mxu0 %v28324_v19  ;;  %v28368_v19 = vld [vmem:[%s37686_s3 + $0x1e48] ss:$28 sps:$4 sm:$0xff]  }
 0x935   :  { %19780 = vmatpush1.bf16.msra.mxu1 %v28320_v23  ;;  %24477 = vmatprep.subr.bf16.mxu0 %v28328_v60  ;;  %v28367_v23 = vld [vmem:[%s37686_s3 + $0x15f4] ss:$28 sps:$4 sm:$0xff]   ;;  %v28369_v60 = vld [vmem:[%s37686_s3 + $0x1c88] ss:$28 sps:$4 sm:$0xff]  }
 0x936   :  { %19781 = vmatprep.subr.bf16.mxu1 %v28327_v51  ;;  %v28365_v51 = vld [vmem:[%s37686_s3 + $0x15f0] ss:$28 sps:$4 sm:$0xff]  }
 0x938   :  { %24478 = vmatpush3.bf16.msra.mxu0 %v28329_v63  ;;  %v28373_v63 = vld [vmem:[%s37686_s3 + $0x1e80] ss:$28 sps:$4 sm:$0xff]  }
 0x939   :  { %19782 = vmatpush1.bf16.msra.mxu1 %v28325_v22  ;;  %24479 = vmatprep.subr.bf16.mxu0 %v28333_v7  ;;  %v28372_v22 = vld [vmem:[%s37686_s3 + $0x162c] ss:$28 sps:$4 sm:$0xff]   ;;  %v28374_v7 = vld [vmem:[%s37686_s3 + $0x1cc0] ss:$28 sps:$4 sm:$0xff]  }
 0x93a   :  { %19783 = vmatprep.subr.bf16.mxu1 %v28332_v45  ;;  %v28370_v45 = vld [vmem:[%s37686_s3 + $0x1628] ss:$28 sps:$4 sm:$0xff]  }
 0x93c   :  { %24480 = vmatpush3.bf16.msra.mxu0 %v28334_v24  ;;  %v28378_v24 = vld [vmem:[%s37686_s3 + $0x1eb8] ss:$28 sps:$4 sm:$0xff]  }
 0x93d   :  { %19784 = vmatpush1.bf16.msra.mxu1 %v28330_v33  ;;  %24481 = vmatprep.subr.bf16.mxu0 %v28338_v34  ;;  %v28377_v33 = vld [vmem:[%s37686_s3 + $0x1664] ss:$28 sps:$4 sm:$0xff]   ;;  %v28379_v34 = vld [vmem:[%s37686_s3 + $0x1cf8] ss:$28 sps:$4 sm:$0xff]  }
 0x93e   :  { %19785 = vmatprep.subr.bf16.mxu1 %v28337_v21  ;;  %v28375_v21 = vld [vmem:[%s37686_s3 + $0x1660] ss:$28 sps:$4 sm:$0xff]  }
 0x940   :  { %24482 = vmatpush3.bf16.msra.mxu0 %v28339_v47  ;;  %v36525_v47 = vld [vmem:[%s37687_s4] sm:$0x7f] }
 0x941   :  { %19786 = vmatpush1.bf16.msra.mxu1 %v28335_v59  ;;  %24483 = vmatprep.subr.bf16.mxu0 %v28343_v41  ;;  %v28382_v59 = vld [vmem:[%s37686_s3 + $0x169c] ss:$28 sps:$4 sm:$0xff]  }
 0x942   :  { %19787 = vmatprep.subr.bf16.mxu1 %v28342_v31  ;;  %v24335_v37 = vpop.f32.mrb[40].mxu0  ;;  %v28383_v31 = vld [vmem:[%s37686_s3 + $0x1ef0] ss:$28 sps:$4 sm:$0xff]   ;;  %v28380_v41 = vld [vmem:[%s37686_s3 + $0x1698] ss:$28 sps:$4 sm:$0xff]  }
 0x943   :  { %v24336_v6 = vpop.f32.mrb[41].mxu0 }
 0x944   :  { %v36438_v16 = vadd.f32 %v24336_v6, %v24335_v37  ;;  %v24338_v39 = vpop.f32.mrb[42].mxu0  ;;  %24484 = vmatpush3.bf16.msra.mxu0 %v28344_v14  ;;  %v11418_v14 = vrot.slane %v36525_v47, %v33451_v43  ;;  %v28385_v6 = vld [vmem:[%s37686_s3 + $0x16d0] ss:$28 sps:$4 sm:$0xff]   ;;  %v28389_v43 = vld [vmem:[%s37686_s3 + $0x1d68] ss:$28 sps:$4 sm:$0xff]  }
 0x945   :  { %19788 = vmatpush1.bf16.msra.mxu1 %v28340_v29  ;;  %v24339_v49 = vpop.f32.mrb[43].mxu0  ;;  %24485 = vmatprep.subr.bf16.mxu0 %v28348_v8  ;;  %v28384_v29 = vld [vmem:[%s37686_s3 + $0x1d30] ss:$28 sps:$4 sm:$0xff]   ;;  %v28388_v8 = vld [vmem:[%s37686_s3 + $0x1f28] ss:$28 sps:$4 sm:$0xff]  }
 0x946   :  { %19798 = vmatprep.subr.bf16.mxu1 %v28347_v35  ;;  %v28387_v35 = vld [vmem:[%s37686_s3 + $0x16d4] ss:$28 sps:$4 sm:$0xff]   ;;  %v20120_v39 = vadd.f32 %v36438_v16, %v11418_v14  ;;  %v28392_v49 = vld [vmem:[%s37686_s3 + $0x170c] ss:$28 sps:$4 sm:$0xff]  }
 0x947   :  { %v28390_v16 = vld [vmem:[%s37686_s3 + $0x1708] ss:$28 sps:$4 sm:$0xff]   ;;  %v28424_v14 = vld [vmem:[%s37686_s3 + $0x20b0] ss:$28 sps:$4 sm:$0xff]  }
 0x948   :  { %19790 = vmatmul.mubr.bf16.vlgmr.msra.gmra.mrb[40].mxu1 %v33945_v30  ;;  %24486 = vmatpush3.bf16.msra.mxu0 %v28349_v54  ;;  %v28358_v30 = vld [vmem:[%s37686_s3 + $0x1dd8] ss:$28 sps:$4 sm:$0xff]  }
 0x949   :  { %19799 = vmatpush1.bf16.msra.mxu1 %v28345_v53  ;;  %19830 = vmatprep.mubr.bf16.mxu1 %v33950_v61  ;;  %v28355_v61 = vld [vmem:[%s37686_s3 + $0x1580] ss:$28 sps:$4 sm:$0xff]  }
 0x94a   :  { %19800 = vmatprep.subr.bf16.mxu1 %v28352_v55  ;;  %24487 = vmatprep.subr.bf16.mxu0 %v28353_v44 }
 0x94c   :  { %24488 = vmatpush3.bf16.msra.mxu0 %v28354_v62 }
 0x94d   :  { %19801 = vmatpush1.bf16.msra.mxu1 %v28350_v12  ;;  %24495 = vmatprep.subr.bf16.mxu0 %v28358_v30  ;;  %v28393_v12 = vld [vmem:[%s37686_s3 + $0x1f60] ss:$28 sps:$4 sm:$0xff]  }
 0x94e   :  { %19802 = vmatprep.subr.bf16.mxu1 %v28357_v15  ;;  %v28394_v15 = vld [vmem:[%s37686_s3 + $0x1da0] ss:$28 sps:$4 sm:$0xff]  }
 0x94f   :  { %20398 = vmatmul.mubr.bf16.vlgmr.msra.gmra.mrb[68].mxu0 %v34364_v38  ;;  %v28397_v30 = vld [vmem:[%s37686_s3 + $0x1744] ss:$28 sps:$4 sm:$0xff]  }
 0x950   :  { %24496 = vmatpush3.bf16.msra.mxu0 %v28359_v4  ;;  %20437 = vmatprep.mubr.bf16.mxu0 %v34369_v2  ;;  %v28395_v4 = vld [vmem:[%s37686_s3 + $0x1740] ss:$28 sps:$4 sm:$0xff]  }
 0x951   :  { %19803 = vmatpush1.bf16.msra.mxu1 %v28355_v61  ;;  %24497 = vmatprep.subr.bf16.mxu0 %v28363_v52  ;;  %v28398_v61 = vld [vmem:[%s37686_s3 + $0x2158] ss:$28 sps:$4 sm:$0xff]  }
 0x952   :  { %19804 = vmatprep.subr.bf16.mxu1 %v28362_v11  ;;  %v28399_v11 = vld [vmem:[%s37686_s3 + $0x1f98] ss:$28 sps:$4 sm:$0xff]  }
 0x953   :  { %v28402_v52 = vld [vmem:[%s37686_s3 + $0x177c] ss:$28 sps:$4 sm:$0xff]  }
 0x954   :  { %24498 = vmatpush3.bf16.msra.mxu0 %v28364_v56  ;;  %v28400_v56 = vld [vmem:[%s37686_s3 + $0x1778] ss:$28 sps:$4 sm:$0xff]  }
 0x955   :  { %19805 = vmatpush1.bf16.msra.mxu1 %v28360_v0  ;;  %24499 = vmatprep.subr.bf16.mxu0 %v28368_v19  ;;  %v28403_v0 = vld [vmem:[%s37686_s3 + $0x2190] ss:$28 sps:$4 sm:$0xff]  }
 0x956   :  { %19806 = vmatprep.subr.bf16.mxu1 %v28367_v23  ;;  %v28404_v23 = vld [vmem:[%s37686_s3 + $0x1fd0] ss:$28 sps:$4 sm:$0xff]  }
 0x957   :  { %v28407_v19 = vld [vmem:[%s37686_s3 + $0x17b4] ss:$28 sps:$4 sm:$0xff]  }
 0x958   :  { %24500 = vmatpush3.bf16.msra.mxu0 %v28369_v60  ;;  %v28405_v60 = vld [vmem:[%s37686_s3 + $0x17b0] ss:$28 sps:$4 sm:$0xff]  }
 0x959   :  { %19807 = vmatpush1.bf16.msra.mxu1 %v28365_v51  ;;  %24501 = vmatprep.subr.bf16.mxu0 %v28373_v63  ;;  %v28408_v51 = vld [vmem:[%s37686_s3 + $0x21c8] ss:$28 sps:$4 sm:$0xff]  }
 0x95a   :  { %19808 = vmatprep.subr.bf16.mxu1 %v28372_v22  ;;  %v28409_v22 = vld [vmem:[%s37686_s3 + $0x2008] ss:$28 sps:$4 sm:$0xff]  }
 0x95b   :  { %v28412_v63 = vld [vmem:[%s37686_s3 + $0x17ec] ss:$28 sps:$4 sm:$0xff]  }
 0x95c   :  { %24502 = vmatpush3.bf16.msra.mxu0 %v28374_v7  ;;  %v28410_v7 = vld [vmem:[%s37686_s3 + $0x17e8] ss:$28 sps:$4 sm:$0xff]  }
 0x95d   :  { %19809 = vmatpush1.bf16.msra.mxu1 %v28370_v45  ;;  %24503 = vmatprep.subr.bf16.mxu0 %v28378_v24  ;;  %v28413_v45 = vld [vmem:[%s37686_s3 + $0x2200] ss:$28 sps:$4 sm:$0xff]  }
 0x95e   :  { %19810 = vmatprep.subr.bf16.mxu1 %v28377_v33  ;;  %v28414_v33 = vld [vmem:[%s37686_s3 + $0x2040] ss:$28 sps:$4 sm:$0xff]  }
 0x95f   :  { %v28417_v24 = vld [vmem:[%s37686_s3 + $0x1824] ss:$28 sps:$4 sm:$0xff]  }
 0x960   :  { %24504 = vmatpush3.bf16.msra.mxu0 %v28379_v34  ;;  %v28415_v34 = vld [vmem:[%s37686_s3 + $0x1820] ss:$28 sps:$4 sm:$0xff]  }
 0x961   :  { %19811 = vmatpush1.bf16.msra.mxu1 %v28375_v21  ;;  %24505 = vmatprep.subr.bf16.mxu0 %v28383_v31  ;;  %v28418_v21 = vld [vmem:[%s37686_s3 + $0x2238] ss:$28 sps:$4 sm:$0xff]  }
 0x962   :  { %19812 = vmatprep.subr.bf16.mxu1 %v28382_v59  ;;  %v24357_v37 = vpop.f32.mrb[44].mxu0  ;;  %v28419_v59 = vld [vmem:[%s37686_s3 + $0x2078] ss:$28 sps:$4 sm:$0xff]  }
 0x963   :  { %v24358_v53 = vpop.f32.mrb[45].mxu0  ;;  %v28422_v31 = vld [vmem:[%s37686_s3 + $0x185c] ss:$28 sps:$4 sm:$0xff]  }
 0x964   :  { %v24359_v54 = vadd.f32 %v24358_v53, %v24357_v37  ;;  %v24360_v55 = vpop.f32.mrb[46].mxu0  ;;  %24506 = vmatpush3.bf16.msra.mxu0 %v28384_v29  ;;  %v28420_v29 = vld [vmem:[%s37686_s3 + $0x1858] ss:$28 sps:$4 sm:$0xff]  }
 0x965   :  { %19813 = vmatpush1.bf16.msra.mxu1 %v28380_v41  ;;  %v24361_v44 = vpop.f32.mrb[47].mxu0  ;;  %24507 = vmatprep.subr.bf16.mxu0 %v28388_v8  ;;  %v28423_v41 = vld [vmem:[%s37686_s3 + $0x2270] ss:$28 sps:$4 sm:$0xff]   ;;  %v28428_v8 = vld [vmem:[%s37686_s3 + $0x22a8] ss:$28 sps:$4 sm:$0xff]  }
 0x966   :  { %19814 = vmatprep.subr.bf16.mxu1 %v28387_v35  ;;  %v36557_v62 = vadd.f32 %v24359_v54, %v20120_v39  ;;  %v28427_v35 = vld [vmem:[%s37686_s3 + $0x1894] ss:$28 sps:$4 sm:$0xff]   ;;  %v28432_v55 = vld [vmem:[%s37686_s3 + $0x18cc] ss:$28 sps:$4 sm:$0xff]   ;;  %v28433_v44 = vld [vmem:[%s37686_s3 + $0x22e0] ss:$28 sps:$4 sm:$0xff]  }
 0x968   :  { %24508 = vmatpush3.bf16.msra.mxu0 %v28389_v43  ;;  %v28429_v43 = vld [vmem:[%s37686_s3 + $0x20e8] ss:$28 sps:$4 sm:$0xff]  }
 0x969   :  { %19815 = vmatpush1.bf16.msra.mxu1 %v28385_v6  ;;  %24509 = vmatprep.subr.bf16.mxu0 %v28393_v12  ;;  %v28425_v6 = vld [vmem:[%s37686_s3 + $0x1890] ss:$28 sps:$4 sm:$0xff]  }
 0x96a   :  { %19816 = vmatprep.subr.bf16.mxu1 %v28392_v49 }
 0x96c   :  { %24510 = vmatpush3.bf16.msra.mxu0 %v28394_v15  ;;  %v28434_v15 = vld [vmem:[%s37686_s3 + $0x2120] ss:$28 sps:$4 sm:$0xff]  }
 0x96d   :  { %19817 = vmatpush1.bf16.msra.mxu1 %v28390_v16  ;;  %24517 = vmatprep.subr.bf16.mxu0 %v28398_v61  ;;  %v28430_v16 = vld [vmem:[%s37686_s3 + $0x18c8] ss:$28 sps:$4 sm:$0xff]   ;;  %v28442_v61 = vld [vmem:[%s37686_s3 + $0x193c] ss:$28 sps:$4 sm:$0xff]  }
 0x96e   :  { %19818 = vmatprep.subr.bf16.mxu1 %v28397_v30  ;;  %v28435_v30 = vld [vmem:[%s37686_s3 + $0x1900] ss:$28 sps:$4 sm:$0xff]  }
 0x96f   :  { %20438 = vmatmul.mubr.bf16.vlgmr.msra.gmra.mrb[72].mxu0 %v34570_v10 }
 0x970   :  { %24518 = vmatpush3.bf16.msra.mxu0 %v28399_v11  ;;  %20477 = vmatprep.mubr.bf16.mxu0 %v34575_v18  ;;  %v28440_v11 = vld [vmem:[%s37686_s3 + $0x1938] ss:$28 sps:$4 sm:$0xff]  }
 0x971   :  { %19819 = vmatpush1.bf16.msra.mxu1 %v28395_v4  ;;  %24519 = vmatprep.subr.bf16.mxu0 %v28403_v0  ;;  %v28443_v4 = vld [vmem:[%s37686_s3 + $0x2510] ss:$28 sps:$4 sm:$0xff]  }
 0x972   :  { %19820 = vmatprep.subr.bf16.mxu1 %v28402_v52  ;;  %v28444_v52 = vld [vmem:[%s37686_s3 + $0x2350] ss:$28 sps:$4 sm:$0xff]  }
 0x973   :  { %v28447_v0 = vld [vmem:[%s37686_s3 + $0x1974] ss:$28 sps:$4 sm:$0xff]  }
 0x974   :  { %24520 = vmatpush3.bf16.msra.mxu0 %v28404_v23  ;;  %v28445_v23 = vld [vmem:[%s37686_s3 + $0x1970] ss:$28 sps:$4 sm:$0xff]  }
 0x975   :  { %19821 = vmatpush1.bf16.msra.mxu1 %v28400_v56  ;;  %24521 = vmatprep.subr.bf16.mxu0 %v28408_v51  ;;  %v28448_v56 = vld [vmem:[%s37686_s3 + $0x2548] ss:$28 sps:$4 sm:$0xff]  }
 0x976   :  { %19822 = vmatprep.subr.bf16.mxu1 %v28407_v19  ;;  %v28449_v19 = vld [vmem:[%s37686_s3 + $0x2388] ss:$28 sps:$4 sm:$0xff]  }
 0x977   :  { %v28452_v51 = vld [vmem:[%s37686_s3 + $0x19ac] ss:$28 sps:$4 sm:$0xff]  }
 0x978   :  { %24522 = vmatpush3.bf16.msra.mxu0 %v28409_v22  ;;  %v28450_v22 = vld [vmem:[%s37686_s3 + $0x19a8] ss:$28 sps:$4 sm:$0xff]  }
 0x979   :  { %19823 = vmatpush1.bf16.msra.mxu1 %v28405_v60  ;;  %24523 = vmatprep.subr.bf16.mxu0 %v28413_v45  ;;  %v28453_v60 = vld [vmem:[%s37686_s3 + $0x2580] ss:$28 sps:$4 sm:$0xff]  }
 0x97a   :  { %19824 = vmatprep.subr.bf16.mxu1 %v28412_v63  ;;  %v28454_v63 = vld [vmem:[%s37686_s3 + $0x23c0] ss:$28 sps:$4 sm:$0xff]  }
 0x97b   :  { %v28457_v45 = vld [vmem:[%s37686_s3 + $0x19e4] ss:$28 sps:$4 sm:$0xff]  }
 0x97c   :  { %24524 = vmatpush3.bf16.msra.mxu0 %v28414_v33  ;;  %v28455_v33 = vld [vmem:[%s37686_s3 + $0x19e0] ss:$28 sps:$4 sm:$0xff]  }
 0x97d   :  { %19825 = vmatpush1.bf16.msra.mxu1 %v28410_v7  ;;  %24525 = vmatprep.subr.bf16.mxu0 %v28418_v21  ;;  %v28458_v7 = vld [vmem:[%s37686_s3 + $0x25b8] ss:$28 sps:$4 sm:$0xff]  }
 0x97e   :  { %19826 = vmatprep.subr.bf16.mxu1 %v28417_v24  ;;  %v28459_v24 = vld [vmem:[%s37686_s3 + $0x23f8] ss:$28 sps:$4 sm:$0xff]  }
 0x97f   :  { %v28462_v21 = vld [vmem:[%s37686_s3 + $0x1a1c] ss:$28 sps:$4 sm:$0xff]  }
 0x980   :  { %24526 = vmatpush3.bf16.msra.mxu0 %v28419_v59  ;;  %v28460_v59 = vld [vmem:[%s37686_s3 + $0x1a18] ss:$28 sps:$4 sm:$0xff]  }
 0x981   :  { %19827 = vmatpush1.bf16.msra.mxu1 %v28415_v34  ;;  %24527 = vmatprep.subr.bf16.mxu0 %v28423_v41  ;;  %v28463_v34 = vld [vmem:[%s37686_s3 + $0x25f0] ss:$28 sps:$4 sm:$0xff]  }
 0x982   :  { %19828 = vmatprep.subr.bf16.mxu1 %v28422_v31  ;;  %v24379_v37 = vpop.f32.mrb[48].mxu0  ;;  %v28464_v31 = vld [vmem:[%s37686_s3 + $0x2430] ss:$28 sps:$4 sm:$0xff]  }
 0x983   :  { %v24380_v53 = vpop.f32.mrb[49].mxu0  ;;  %v28467_v41 = vld [vmem:[%s37686_s3 + $0x1a54] ss:$28 sps:$4 sm:$0xff]  }
 0x984   :  { %v24381_v39 = vadd.f32 %v24380_v53, %v24379_v37  ;;  %v24382_v54 = vpop.f32.mrb[50].mxu0  ;;  %24528 = vmatpush3.bf16.msra.mxu0 %v28424_v14  ;;  %v28469_v53 = vld [vmem:[%s37686_s3 + $0x2468] ss:$28 sps:$4 sm:$0xff]  }
 0x985   :  { %19829 = vmatpush1.bf16.msra.mxu1 %v28420_v29  ;;  %v24383_v49 = vpop.f32.mrb[51].mxu0  ;;  %24529 = vmatprep.subr.bf16.mxu0 %v28428_v8  ;;  %v28468_v29 = vld [vmem:[%s37686_s3 + $0x2628] ss:$28 sps:$4 sm:$0xff]   ;;  %v28465_v8 = vld [vmem:[%s37686_s3 + $0x1a50] ss:$28 sps:$4 sm:$0xff]  }
 0x986   :  { %19839 = vmatprep.subr.bf16.mxu1 %v28427_v35  ;;  %v36658_v12 = vadd.f32 %v24381_v39, %v36557_v62  ;;  %v28437_v62 = vld [vmem:[%s37686_s3 + $0x1904] ss:$28 sps:$4 sm:$0xff]  }
 0x987   :  { %v28473_v54 = vld [vmem:[%s37686_s3 + $0x2660] ss:$28 sps:$4 sm:$0xff]   ;;  %v28470_v49 = vld [vmem:[%s37686_s3 + $0x1a88] ss:$28 sps:$4 sm:$0xff]  }
 0x988   :  { %19831 = vmatmul.mubr.bf16.vlgmr.msra.gmra.mrb[40].mxu1 %v34151_v28  ;;  %24530 = vmatpush3.bf16.msra.mxu0 %v28429_v43  ;;  %v28438_v28 = vld [vmem:[%s37686_s3 + $0x24d8] ss:$28 sps:$4 sm:$0xff]   ;;  %v28472_v43 = vld [vmem:[%s37686_s3 + $0x1a8c] ss:$28 sps:$4 sm:$0xff]  }
 0x989   :  { %19840 = vmatpush1.bf16.msra.mxu1 %v28425_v6  ;;  %19871 = vmatprep.mubr.bf16.mxu1 %v34156_v36  ;;  %v28439_v36 = vld [vmem:[%s37686_s3 + $0x2318] ss:$28 sps:$4 sm:$0xff]  }
 0x98a   :  { %19841 = vmatprep.subr.bf16.mxu1 %v28432_v55  ;;  %24531 = vmatprep.subr.bf16.mxu0 %v28433_v44  ;;  %v28474_v44 = vld [vmem:[%s37686_s3 + $0x24a0] ss:$28 sps:$4 sm:$0xff]  }
 0x98c   :  { %24532 = vmatpush3.bf16.msra.mxu0 %v28434_v15  ;;  %v28475_v15 = vld [vmem:[%s37686_s3 + $0x1ac0] ss:$28 sps:$4 sm:$0xff]  }
 0x98d   :  { %19842 = vmatpush1.bf16.msra.mxu1 %v28430_v16  ;;  %24539 = vmatprep.subr.bf16.mxu0 %v28438_v28  ;;  %v28477_v16 = vld [vmem:[%s37686_s3 + $0x1ac4] ss:$28 sps:$4 sm:$0xff]   ;;  %v28482_v28 = vld [vmem:[%s37686_s3 + $0x1afc] ss:$28 sps:$4 sm:$0xff]  }
 0x98e   :  { %19843 = vmatprep.subr.bf16.mxu1 %v28437_v62  ;;  %v28479_v62 = vld [vmem:[%s37686_s3 + $0x2698] ss:$28 sps:$4 sm:$0xff]  }
 0x98f   :  { %20478 = vmatmul.mubr.bf16.vlgmr.msra.gmra.mrb[76].mxu0 %v34781_v9 }
 0x990   :  { %24540 = vmatpush3.bf16.msra.mxu0 %v28439_v36  ;;  %20517 = vmatprep.mubr.bf16.mxu0 %v34786_v50  ;;  %v28480_v36 = vld [vmem:[%s37686_s3 + $0x1af8] ss:$28 sps:$4 sm:$0xff]  }
 0x991   :  { %19844 = vmatpush1.bf16.msra.mxu1 %v28435_v30  ;;  %24541 = vmatprep.subr.bf16.mxu0 %v28443_v4  ;;  %v28483_v30 = vld [vmem:[%s37686_s3 + $0x2890] ss:$28 sps:$4 sm:$0xff]  }
 0x992   :  { %19845 = vmatprep.subr.bf16.mxu1 %v28442_v61  ;;  %v28484_v61 = vld [vmem:[%s37686_s3 + $0x26d0] ss:$28 sps:$4 sm:$0xff]  }
 0x993   :  { %v28487_v4 = vld [vmem:[%s37686_s3 + $0x1b34] ss:$28 sps:$4 sm:$0xff]  }
 0x994   :  { %24542 = vmatpush3.bf16.msra.mxu0 %v28444_v52  ;;  %v28485_v52 = vld [vmem:[%s37686_s3 + $0x1b30] ss:$28 sps:$4 sm:$0xff]  }
 0x995   :  { %19846 = vmatpush1.bf16.msra.mxu1 %v28440_v11  ;;  %24543 = vmatprep.subr.bf16.mxu0 %v28448_v56  ;;  %v28488_v11 = vld [vmem:[%s37686_s3 + $0x28c8] ss:$28 sps:$4 sm:$0xff]  }
 0x996   :  { %19847 = vmatprep.subr.bf16.mxu1 %v28447_v0  ;;  %v28489_v0 = vld [vmem:[%s37686_s3 + $0x2708] ss:$28 sps:$4 sm:$0xff]  }
 0x997   :  { %v28492_v56 = vld [vmem:[%s37686_s3 + $0x1b6c] ss:$28 sps:$4 sm:$0xff]  }
 0x998   :  { %24544 = vmatpush3.bf16.msra.mxu0 %v28449_v19  ;;  %v28490_v19 = vld [vmem:[%s37686_s3 + $0x1b68] ss:$28 sps:$4 sm:$0xff]  }
 0x999   :  { %19848 = vmatpush1.bf16.msra.mxu1 %v28445_v23  ;;  %24545 = vmatprep.subr.bf16.mxu0 %v28453_v60  ;;  %v28493_v23 = vld [vmem:[%s37686_s3 + $0x2900] ss:$28 sps:$4 sm:$0xff]  }
 0x99a   :  { %19849 = vmatprep.subr.bf16.mxu1 %v28452_v51  ;;  %v28494_v51 = vld [vmem:[%s37686_s3 + $0x2740] ss:$28 sps:$4 sm:$0xff]  }
 0x99b   :  { %v28497_v60 = vld [vmem:[%s37686_s3 + $0x1ba4] ss:$28 sps:$4 sm:$0xff]  }
 0x99c   :  { %24546 = vmatpush3.bf16.msra.mxu0 %v28454_v63  ;;  %v28495_v63 = vld [vmem:[%s37686_s3 + $0x1ba0] ss:$28 sps:$4 sm:$0xff]  }
 0x99d   :  { %19850 = vmatpush1.bf16.msra.mxu1 %v28450_v22  ;;  %24547 = vmatprep.subr.bf16.mxu0 %v28458_v7  ;;  %v28498_v22 = vld [vmem:[%s37686_s3 + $0x2938] ss:$28 sps:$4 sm:$0xff]  }
 0x99e   :  { %19851 = vmatprep.subr.bf16.mxu1 %v28457_v45  ;;  %v28499_v45 = vld [vmem:[%s37686_s3 + $0x2778] ss:$28 sps:$4 sm:$0xff]  }
 0x99f   :  { %v28502_v7 = vld [vmem:[%s37686_s3 + $0x1bdc] ss:$28 sps:$4 sm:$0xff]  }
 0x9a0   :  { %24548 = vmatpush3.bf16.msra.mxu0 %v28459_v24  ;;  %v28500_v24 = vld [vmem:[%s37686_s3 + $0x1bd8] ss:$28 sps:$4 sm:$0xff]  }
 0x9a1   :  { %19852 = vmatpush1.bf16.msra.mxu1 %v28455_v33  ;;  %24549 = vmatprep.subr.bf16.mxu0 %v28463_v34  ;;  %v28503_v33 = vld [vmem:[%s37686_s3 + $0x2970] ss:$28 sps:$4 sm:$0xff]  }
 0x9a2   :  { %19853 = vmatprep.subr.bf16.mxu1 %v28462_v21  ;;  %v24401_v14 = vpop.f32.mrb[52].mxu0  ;;  %v28504_v21 = vld [vmem:[%s37686_s3 + $0x27b0] ss:$28 sps:$4 sm:$0xff]  }
 0x9a3   :  { %v24402_v35 = vpop.f32.mrb[53].mxu0  ;;  %v28507_v34 = vld [vmem:[%s37686_s3 + $0x1c14] ss:$28 sps:$4 sm:$0xff]  }
 0x9a4   :  { %v24403_v37 = vadd.f32 %v24402_v35, %v24401_v14  ;;  %v24404_v6 = vpop.f32.mrb[54].mxu0  ;;  %24550 = vmatpush3.bf16.msra.mxu0 %v28464_v31 }
 0x9a5   :  { %19854 = vmatpush1.bf16.msra.mxu1 %v28460_v59  ;;  %v24405_v39 = vpop.f32.mrb[55].mxu0  ;;  %24551 = vmatprep.subr.bf16.mxu0 %v28468_v29  ;;  %v28508_v59 = vld [vmem:[%s37686_s3 + $0x29a8] ss:$28 sps:$4 sm:$0xff]   ;;  %v28505_v29 = vld [vmem:[%s37686_s3 + $0x1c10] ss:$28 sps:$4 sm:$0xff]  }
 0x9a6   :  { %19855 = vmatprep.subr.bf16.mxu1 %v28467_v41  ;;  %v36761_v55 = vadd.f32 %v24403_v37, %v36658_v12  ;;  %v28478_v12 = vld [vmem:[%s37686_s3 + $0x2858] ss:$28 sps:$4 sm:$0xff]   ;;  %v28512_v37 = vld [vmem:[%s37686_s3 + $0x1c4c] ss:$28 sps:$4 sm:$0xff]  }
 0x9a7   :  { %v28510_v39 = vld [vmem:[%s37686_s3 + $0x1c48] ss:$28 sps:$4 sm:$0xff]  }
 0x9a8   :  { %24552 = vmatpush3.bf16.msra.mxu0 %v28469_v53  ;;  %v28513_v53 = vld [vmem:[%s37686_s3 + $0x29e0] ss:$28 sps:$4 sm:$0xff]  }
 0x9a9   :  { %19856 = vmatpush1.bf16.msra.mxu1 %v28465_v8  ;;  %24553 = vmatprep.subr.bf16.mxu0 %v28473_v54  ;;  %v28509_v8 = vld [vmem:[%s37686_s3 + $0x27e8] ss:$28 sps:$4 sm:$0xff]   ;;  %v28514_v54 = vld [vmem:[%s37686_s3 + $0x2820] ss:$28 sps:$4 sm:$0xff]  }
 0x9aa   :  { %19857 = vmatprep.subr.bf16.mxu1 %v28472_v43 }
 0x9ac   :  { %24554 = vmatpush3.bf16.msra.mxu0 %v28474_v44  ;;  %v28519_v44 = vld [vmem:[%s37686_s3 + $0x1cb8] ss:$28 sps:$4 sm:$0xff]  }
 0x9ad   :  { %19858 = vmatpush1.bf16.msra.mxu1 %v28470_v49  ;;  %24561 = vmatprep.subr.bf16.mxu0 %v28478_v12  ;;  %v28521_v49 = vld [vmem:[%s37686_s3 + $0x1cbc] ss:$28 sps:$4 sm:$0xff]   ;;  %v28525_v12 = vld [vmem:[%s37686_s3 + $0x1cf4] ss:$28 sps:$4 sm:$0xff]  }
 0x9ae   :  { %19859 = vmatprep.subr.bf16.mxu1 %v28477_v16  ;;  %v28522_v16 = vld [vmem:[%s37686_s3 + $0x2a50] ss:$28 sps:$4 sm:$0xff]  }
 0x9af   :  { %20518 = vmatmul.mubr.bf16.vlgmr.msra.gmra.mrb[80].mxu0 %v34984_v5 }
 0x9b0   :  { %24562 = vmatpush3.bf16.msra.mxu0 %v28479_v62  ;;  %20557 = vmatprep.mubr.bf16.mxu0 %v34992_v26  ;;  %v28523_v62 = vld [vmem:[%s37686_s3 + $0x1cf0] ss:$28 sps:$4 sm:$0xff]  }
 0x9b1   :  { %19860 = vmatpush1.bf16.msra.mxu1 %v28475_v15  ;;  %24563 = vmatprep.subr.bf16.mxu0 %v28483_v30  ;;  %v11398_v15 = vrot.slane %v36525_v47, %v30210_v20  ;;  %v28529_v30 = vld [vmem:[%s37686_s3 + $0x1d2c] ss:$28 sps:$4 sm:$0xff]  }
 0x9b2   :  { %19861 = vmatprep.subr.bf16.mxu1 %v28482_v28  ;;  %v28526_v28 = vld [vmem:[%s37686_s3 + $0x2a88] ss:$28 sps:$4 sm:$0xff]  }
 0x9b3   :  { %v28527_v47 = vld [vmem:[%s37686_s3 + $0x1d28] ss:$28 sps:$4 sm:$0xff]  }
 0x9b4   :  { %24564 = vmatpush3.bf16.msra.mxu0 %v28484_v61  ;;  %v28530_v61 = vld [vmem:[%s37686_s3 + $0x2ac0] ss:$28 sps:$4 sm:$0xff]  }
 0x9b5   :  { %19862 = vmatpush1.bf16.msra.mxu1 %v28480_v36  ;;  %24565 = vmatprep.subr.bf16.mxu0 %v28488_v11  ;;  %v24635_v36 = vadd.f32 %v35911_v13, %v11398_v15  ;;  %v28536_v13 = vld [vmem:[%s37688_s5 + $0x4] ss:$8 sps:$4 sm:$0xff]   ;;  %v28576_v15 = vld [vmem:[%s37688_s5 + $0x70] ss:$8 sps:$4 sm:$0xff]  }
 0x9b6   :  { %19863 = vmatprep.subr.bf16.mxu1 %v28487_v4  ;;  %v28533_v4 = vld [vmem:[%s37686_s3 + $0x1d64] ss:$28 sps:$4 sm:$0xff]  }
 0x9b7   :  { %v20606_v11 = vmax.f32 %v24635_v36, 0.0  ;;  %v28582_v36 = vld [vmem:[%s37688_s5 + $0x80] ss:$8 sps:$4 sm:$0xff]  }
 0x9b8   :  { %24566 = vmatpush3.bf16.msra.mxu0 %v28489_v0  ;;  %v28534_v0 = vld [vmem:[%s37688_s5] ss:$8 sps:$4 sm:$0xff]  }
 0x9b9   :  { %19864 = vmatpush1.bf16.msra.mxu1 %v28485_v52  ;;  %24567 = vmatprep.subr.bf16.mxu0 %v28493_v23  ;;  %v28531_v52 = vld [vmem:[%s37686_s3 + $0x1d60] ss:$28 sps:$4 sm:$0xff]   ;;  %v20613_v23 = vpack.c.bf16 %v20606_v11, %v20606_v11  ;;  %v28593_v11 = vld [vmem:[%s37686_s3 + $0x1f94] ss:$28 sps:$4 sm:$0xff]  }
 0x9ba   :  { %19865 = vmatprep.subr.bf16.mxu1 %v28492_v56  ;;  %v28542_v56 = vld [vmem:[%s37688_s5 + $0x14] ss:$8 sps:$4 sm:$0xff]  }
 0x9bc   :  { %24568 = vmatpush3.bf16.msra.mxu0 %v28494_v51  ;;  %v28540_v51 = vld [vmem:[%s37688_s5 + $0x10] ss:$8 sps:$4 sm:$0xff]  }
 0x9bd   :  { %19866 = vmatpush1.bf16.msra.mxu1 %v28490_v19  ;;  %24569 = vmatprep.subr.bf16.mxu0 %v28498_v22  ;;  %v28537_v19 = vld [vmem:[%s37686_s3 + $0x1d98] ss:$28 sps:$4 sm:$0xff]   ;;  %v28548_v22 = vld [vmem:[%s37688_s5 + $0x24] ss:$8 sps:$4 sm:$0xff]  }
 0x9be   :  { %19867 = vmatprep.subr.bf16.mxu1 %v28497_v60  ;;  %v28545_v60 = vld [vmem:[%s37686_s3 + $0x1dd4] ss:$28 sps:$4 sm:$0xff]  }
 0x9c0   :  { %24570 = vmatpush3.bf16.msra.mxu0 %v28499_v45 }
 0x9c1   :  { %19868 = vmatpush1.bf16.msra.mxu1 %v28495_v63  ;;  %24571 = vmatprep.subr.bf16.mxu0 %v28503_v33 }
 0x9c2   :  { %19869 = vmatprep.subr.bf16.mxu1 %v28502_v7  ;;  %v24423_v31 = vpop.f32.mrb[56].mxu0  ;;  %v28543_v7 = vld [vmem:[%s37686_s3 + $0x1dd0] ss:$28 sps:$4 sm:$0xff]  }
 0x9c3   :  { %v24424_v41 = vpop.f32.mrb[57].mxu0 }
 0x9c4   :  { %v24425_v14 = vadd.f32 %v24424_v41, %v24423_v31  ;;  %v24426_v35 = vpop.f32.mrb[58].mxu0  ;;  %24572 = vmatpush3.bf16.msra.mxu0 %v28504_v21  ;;  %v28546_v21 = vld [vmem:[%s37688_s5 + $0x20] ss:$8 sps:$4 sm:$0xff]   ;;  %v28554_v31 = vld [vmem:[%s37688_s5 + $0x34] ss:$8 sps:$4 sm:$0xff]  }
 0x9c5   :  { %19870 = vmatpush1.bf16.msra.mxu1 %v28500_v24  ;;  %v24427_v6 = vpop.f32.mrb[59].mxu0  ;;  %24573 = vmatprep.subr.bf16.mxu0 %v28508_v59  ;;  %v28557_v35 = vld [vmem:[%s37686_s3 + $0x1e44] ss:$28 sps:$4 sm:$0xff]  }
 0x9c6   :  { %19880 = vmatprep.subr.bf16.mxu1 %v28507_v34  ;;  %v36862_v43 = vadd.f32 %v24425_v14, %v36761_v55  ;;  %v28517_v55 = vld [vmem:[%s37686_s3 + $0x1c84] ss:$28 sps:$4 sm:$0xff]   ;;  %v28551_v34 = vld [vmem:[%s37686_s3 + $0x1e0c] ss:$28 sps:$4 sm:$0xff]   ;;  %v28552_v14 = vld [vmem:[%s37688_s5 + $0x30] ss:$8 sps:$4 sm:$0xff]  }
 0x9c7   :  { %v28558_v6 = vld [vmem:[%s37688_s5 + $0x40] ss:$8 sps:$4 sm:$0xff]  }
 0x9c8   :  { %19872 = vmatmul.mubr.bf16.vlgmr.msra.gmra.mrb[40].mxu1 %v34364_v38  ;;  %24574 = vmatpush3.bf16.msra.mxu0 %v28509_v8  ;;  %v28515_v38 = vld [vmem:[%s37686_s3 + $0x1c80] ss:$28 sps:$4 sm:$0xff]   ;;  %v28560_v8 = vld [vmem:[%s37688_s5 + $0x44] ss:$8 sps:$4 sm:$0xff]  }
 0x9c9   :  { %19881 = vmatpush1.bf16.msra.mxu1 %v28505_v29  ;;  %19912 = vmatprep.mubr.bf16.mxu1 %v34369_v2  ;;  %v28518_v2 = vld [vmem:[%s37686_s3 + $0x2a18] ss:$28 sps:$4 sm:$0xff]   ;;  %v28549_v29 = vld [vmem:[%s37686_s3 + $0x1e08] ss:$28 sps:$4 sm:$0xff]  }
 0x9ca   :  { %19882 = vmatprep.subr.bf16.mxu1 %v28512_v37  ;;  %24575 = vmatprep.subr.bf16.mxu0 %v28513_v53  ;;  %v28555_v37 = vld [vmem:[%s37686_s3 + $0x1e40] ss:$28 sps:$4 sm:$0xff]  }
 0x9cb   :  { %v28563_v53 = vld [vmem:[%s37686_s3 + $0x1e7c] ss:$28 sps:$4 sm:$0xff]  }
 0x9cc   :  { %24576 = vmatpush3.bf16.msra.mxu0 %v28514_v54  ;;  %v28564_v54 = vld [vmem:[%s37688_s5 + $0x50] ss:$8 sps:$4 sm:$0xff]  }
 0x9cd   :  { %19883 = vmatpush1.bf16.msra.mxu1 %v28510_v39  ;;  %24594 = vmatprep.subr.bf16.mxu0 %v28887_v42  ;;  %v28561_v39 = vld [vmem:[%s37686_s3 + $0x1e78] ss:$28 sps:$4 sm:$0xff]  }
 0x9ce   :  { %19884 = vmatprep.subr.bf16.mxu1 %v28517_v55  ;;  %v28569_v55 = vld [vmem:[%s37686_s3 + $0x1eb4] ss:$28 sps:$4 sm:$0xff]  }
 0x9cf   :  { %20558 = vmatmul.mubr.bf16.vlgmr.msra.gmra.mrb[84].mxu0 %v35187_v57 }
 0x9d0   :  { %24595 = vmatpush3.bf16.msra.mxu0 %v28518_v2  ;;  %24602 = vmatprep.mubr.msk.bf16.mxu0 %vm28888_vm1, %v28887_v42  ;;  %v28567_v2 = vld [vmem:[%s37686_s3 + $0x1eb0] ss:$28 sps:$4 sm:$0xff]  }
 0x9d1   :  { %19885 = vmatpush1.bf16.msra.mxu1 %v28515_v38  ;;  %24596 = vmatprep.subr.bf16.mxu0 %v28887_v42  ;;  %v28572_v38 = vld [vmem:[%s37688_s5 + $0x64] ss:$8 sps:$4 sm:$0xff]  }
 0x9d2   :  { %19886 = vmatprep.subr.bf16.mxu1 %v28521_v49  ;;  %v28570_v49 = vld [vmem:[%s37688_s5 + $0x60] ss:$8 sps:$4 sm:$0xff]  }
 0x9d4   :  { %24597 = vmatpush3.bf16.msra.mxu0 %v28522_v16  ;;  %v28578_v16 = vld [vmem:[%s37688_s5 + $0x74] ss:$8 sps:$4 sm:$0xff]  }
 0x9d5   :  { %19887 = vmatpush1.bf16.msra.mxu1 %v28519_v44  ;;  %24598 = vmatprep.subr.bf16.mxu0 %v28887_v42  ;;  %v28575_v44 = vld [vmem:[%s37686_s3 + $0x1eec] ss:$28 sps:$4 sm:$0xff]  }
 0x9d6   :  { %19888 = vmatprep.subr.bf16.mxu1 %v28525_v12  ;;  %v28573_v12 = vld [vmem:[%s37686_s3 + $0x1ee8] ss:$28 sps:$4 sm:$0xff]  }
 0x9d8   :  { %24599 = vmatpush3.bf16.msra.mxu0 %v28526_v28  ;;  %v28584_v28 = vld [vmem:[%s37688_s5 + $0x84] ss:$8 sps:$4 sm:$0xff]  }
 0x9d9   :  { %19889 = vmatpush1.bf16.msra.mxu1 %v28523_v62  ;;  %24600 = vmatprep.subr.bf16.mxu0 %v28887_v42  ;;  %v28539_v42 = vld [vmem:[%s37686_s3 + $0x1d9c] ss:$28 sps:$4 sm:$0xff]   ;;  %v28581_v62 = vld [vmem:[%s37686_s3 + $0x1f24] ss:$28 sps:$4 sm:$0xff]  }
 0x9da   :  { %19890 = vmatprep.subr.bf16.mxu1 %v28529_v30  ;;  %v28579_v30 = vld [vmem:[%s37686_s3 + $0x1f20] ss:$28 sps:$4 sm:$0xff]  }
 0x9dc   :  { %24601 = vmatpush3.bf16.msra.mxu0 %v28530_v61  ;;  %v28590_v61 = vld [vmem:[%s37688_s5 + $0x94] ss:$8 sps:$4 sm:$0xff]  }
 0x9dd   :  { %19891 = vmatpush1.bf16.msra.mxu1 %v28527_v47  ;;  %21222 = vmatprep.subr.bf16.mxu0 %v28536_v13  ;;  %v28587_v47 = vld [vmem:[%s37686_s3 + $0x1f5c] ss:$28 sps:$4 sm:$0xff]  }
 0x9de   :  { %19892 = vmatprep.subr.bf16.mxu1 %v28533_v4  ;;  %v28585_v4 = vld [vmem:[%s37686_s3 + $0x1f58] ss:$28 sps:$4 sm:$0xff]  }
 0x9df   :  { %24603 = vmatmul.mubr.msk.bf16.vlgmr.msra.gmra.mrb[88].mxu0 %vm18482_vm2, %v35242_v32  ;;  %v28588_v13 = vld [vmem:[%s37688_s5 + $0x90] ss:$8 sps:$4 sm:$0xff]  }
 0x9e0   :  { %21223 = vmatpush1.bf16.msra.mxu0 %v28534_v0  ;;  %21254 = vmatprep.mubr.bf16.mxu0 %v20613_v23 }
 0x9e1   :  { %19893 = vmatpush1.bf16.msra.mxu1 %v28531_v52  ;;  %21224 = vmatprep.subr.bf16.mxu0 %v28542_v56  ;;  %v28596_v52 = vld [vmem:[%s37688_s5 + $0xa4] ss:$8 sps:$4 sm:$0xff]  }
 0x9e2   :  { %19894 = vmatprep.subr.bf16.mxu1 %v28539_v42  ;;  %v24445_v63 = vpop.f32.mrb[60].mxu0  ;;  %v28591_v56 = vld [vmem:[%s37686_s3 + $0x1f90] ss:$28 sps:$4 sm:$0xff]  }
 0x9e3   :  { %v24446_v45 = vpop.f32.mrb[61].mxu0 }
 0x9e4   :  { %v24447_v33 = vadd.f32 %v24446_v45, %v24445_v63  ;;  %v24448_v24 = vpop.f32.mrb[62].mxu0  ;;  %21225 = vmatpush1.bf16.msra.mxu0 %v28540_v51  ;;  %v28594_v51 = vld [vmem:[%s37688_s5 + $0xa0] ss:$8 sps:$4 sm:$0xff]   ;;  %v28602_v63 = vld [vmem:[%s37688_s5 + $0xb4] ss:$8 sps:$4 sm:$0xff]  }
 0x9e5   :  { %19895 = vmatpush1.bf16.msra.mxu1 %v28537_v19  ;;  %v24449_v59 = vpop.f32.mrb[63].mxu0  ;;  %21226 = vmatprep.subr.bf16.mxu0 %v28548_v22  ;;  %v28605_v24 = vld [vmem:[%s37686_s3 + $0x2004] ss:$28 sps:$4 sm:$0xff]  }
 0x9e6   :  { %19896 = vmatprep.subr.bf16.mxu1 %v28545_v60  ;;  %v36963_v41 = vadd.f32 %v24447_v33, %v36862_v43  ;;  %v28566_v43 = vld [vmem:[%s37688_s5 + $0x54] ss:$8 sps:$4 sm:$0xff]   ;;  %v28599_v60 = vld [vmem:[%s37686_s3 + $0x1fcc] ss:$28 sps:$4 sm:$0xff]   ;;  %v28600_v33 = vld [vmem:[%s37688_s5 + $0xb0] ss:$8 sps:$4 sm:$0xff]  }
 0x9e7   :  { %v28614_v59 = vld [vmem:[%s37688_s5 + $0xd4] ss:$8 sps:$4 sm:$0xff]  }
 0x9e8   :  { %21227 = vmatpush1.bf16.msra.mxu0 %v28546_v21  ;;  %v28606_v21 = vld [vmem:[%s37688_s5 + $0xc0] ss:$8 sps:$4 sm:$0xff]  }
 0x9e9   :  { %19897 = vmatpush1.bf16.msra.mxu1 %v28543_v7  ;;  %21228 = vmatprep.subr.bf16.mxu0 %v28554_v31  ;;  %v28597_v7 = vld [vmem:[%s37686_s3 + $0x1fc8] ss:$28 sps:$4 sm:$0xff]   ;;  %v28609_v31 = vld [vmem:[%s37686_s3 + $0x2038] ss:$28 sps:$4 sm:$0xff]  }
 0x9ea   :  { %19898 = vmatprep.subr.bf16.mxu1 %v28551_v34  ;;  %v28611_v34 = vld [vmem:[%s37686_s3 + $0x203c] ss:$28 sps:$4 sm:$0xff]  }
 0x9ec   :  { %21229 = vmatpush1.bf16.msra.mxu0 %v28552_v14  ;;  %v37102_v14 = vld [vmem:[%s37687_s4] sm:$0x7f] }
 0x9ed   :  { %19899 = vmatpush1.bf16.msra.mxu1 %v28549_v29  ;;  %21230 = vmatprep.subr.bf16.mxu0 %v28560_v8  ;;  %v28617_v29 = vld [vmem:[%s37686_s3 + $0x2074] ss:$28 sps:$4 sm:$0xff]   ;;  %v28620_v8 = vld [vmem:[%s37688_s5 + $0xe4] ss:$8 sps:$4 sm:$0xff]  }
 0x9ee   :  { %19900 = vmatprep.subr.bf16.mxu1 %v28557_v35  ;;  %v11394_v35 = vrot.slane %v37102_v14, %v30199_v17 }
 0x9f0   :  { %21231 = vmatpush1.bf16.msra.mxu0 %v28558_v6  ;;  %v28615_v6 = vld [vmem:[%s37686_s3 + $0x2070] ss:$28 sps:$4 sm:$0xff]  }
 0x9f1   :  { %19901 = vmatpush1.bf16.msra.mxu1 %v28555_v37  ;;  %21232 = vmatprep.subr.bf16.mxu0 %v28566_v43  ;;  %v11406_v37 = vrot.slane %v37102_v14, %v30418_v48  ;;  %v28623_v43 = vld [vmem:[%s37686_s3 + $0x20ac] ss:$28 sps:$4 sm:$0xff]   ;;  %v28626_v48 = vld [vmem:[%s37688_s5 + $0xf4] ss:$8 sps:$4 sm:$0xff]  }
 0x9f2   :  { %19902 = vmatprep.subr.bf16.mxu1 %v28563_v53  ;;  %v28618_v53 = vld [vmem:[%s37688_s5 + $0xe0] ss:$8 sps:$4 sm:$0xff]  }
 0x9f4   :  { %21233 = vmatpush1.bf16.msra.mxu0 %v28564_v54  ;;  %v24637_v54 = vadd.f32 %v36335_v27, %v11406_v37  ;;  %v28632_v27 = vld [vmem:[%s37688_s5 + $0x104] ss:$8 sps:$4 sm:$0xff]   ;;  %v28672_v37 = vld [vmem:[%s37688_s5 + $0x170] ss:$8 sps:$4 sm:$0xff]  }
 0x9f5   :  { %19903 = vmatpush1.bf16.msra.mxu1 %v28561_v39  ;;  %21234 = vmatprep.subr.bf16.mxu0 %v28572_v38  ;;  %v24634_v39 = vadd.f32 %v35906_v58, %v11394_v35  ;;  %v28624_v38 = vld [vmem:[%s37688_s5 + $0xf0] ss:$8 sps:$4 sm:$0xff]   ;;  %v28629_v58 = vld [vmem:[%s37686_s3 + $0x20e4] ss:$28 sps:$4 sm:$0xff]   ;;  %v28674_v35 = vld [vmem:[%s37688_s5 + $0x174] ss:$8 sps:$4 sm:$0xff]  }
 0x9f6   :  { %19904 = vmatprep.subr.bf16.mxu1 %v28569_v55  ;;  %v28621_v55 = vld [vmem:[%s37686_s3 + $0x20a8] ss:$28 sps:$4 sm:$0xff]  }
 0x9f8   :  { %21235 = vmatpush1.bf16.msra.mxu0 %v28570_v49  ;;  %v20608_v49 = vmax.f32 %v24637_v54, 0.0  ;;  %v28686_v54 = vld [vmem:[%s37688_s5 + $0x194] ss:$8 sps:$4 sm:$0xff]  }
 0x9f9   :  { %19905 = vmatpush1.bf16.msra.mxu1 %v28567_v2  ;;  %21236 = vmatprep.subr.bf16.mxu0 %v28578_v16  ;;  %v20605_v2 = vmax.f32 %v24634_v39, 0.0  ;;  %v28630_v16 = vld [vmem:[%s37688_s5 + $0x100] ss:$8 sps:$4 sm:$0xff]  }
 0x9fa   :  { %19906 = vmatprep.subr.bf16.mxu1 %v28575_v44  ;;  %v28627_v44 = vld [vmem:[%s37686_s3 + $0x20e0] ss:$28 sps:$4 sm:$0xff]  }
 0x9fb   :  { %v28678_v39 = vld [vmem:[%s37688_s5 + $0x180] ss:$8 sps:$4 sm:$0xff]  }
 0x9fc   :  { %21237 = vmatpush1.bf16.msra.mxu0 %v28576_v15  ;;  %v28635_v15 = vld [vmem:[%s37686_s3 + $0x211c] ss:$28 sps:$4 sm:$0xff]  }
 0x9fd   :  { %19907 = vmatpush1.bf16.msra.mxu1 %v28573_v12  ;;  %21238 = vmatprep.subr.bf16.mxu0 %v28584_v28  ;;  %v20612_v12 = vpack.c.bf16 %v20605_v2, %v20605_v2  ;;  %v20615_v28 = vpack.c.bf16 %v20608_v49, %v20608_v49  ;;  %v28692_v2 = vld [vmem:[%s37688_s5 + $0x1a4] ss:$8 sps:$4 sm:$0xff]  }
 0x9fe   :  { %19908 = vmatprep.subr.bf16.mxu1 %v28581_v62  ;;  %v28638_v62 = vld [vmem:[%s37688_s5 + $0x114] ss:$8 sps:$4 sm:$0xff]  }
 0xa00   :  { %21239 = vmatpush1.bf16.msra.mxu0 %v28582_v36  ;;  %v28636_v36 = vld [vmem:[%s37688_s5 + $0x110] ss:$8 sps:$4 sm:$0xff]  }
 0xa01   :  { %19909 = vmatpush1.bf16.msra.mxu1 %v28579_v30  ;;  %21240 = vmatprep.subr.bf16.mxu0 %v28590_v61  ;;  %v28633_v30 = vld [vmem:[%s37686_s3 + $0x2118] ss:$28 sps:$4 sm:$0xff]   ;;  %v28644_v61 = vld [vmem:[%s37688_s5 + $0x124] ss:$8 sps:$4 sm:$0xff]  }
 0xa02   :  { %19910 = vmatprep.subr.bf16.mxu1 %v28587_v47  ;;  %v24467_v0 = vpop.f32.mrb[64].mxu0  ;;  %v28641_v47 = vld [vmem:[%s37686_s3 + $0x2154] ss:$28 sps:$4 sm:$0xff]  }
 0xa03   :  { %v24468_v42 = vpop.f32.mrb[65].mxu0 }
 0xa04   :  { %v24469_v23 = vadd.f32 %v24468_v42, %v24467_v0  ;;  %v24470_v19 = vpop.f32.mrb[66].mxu0  ;;  %21241 = vmatpush1.bf16.msra.mxu0 %v28588_v13  ;;  %v28642_v42 = vld [vmem:[%s37688_s5 + $0x120] ss:$8 sps:$4 sm:$0xff]  }
 0xa05   :  { %19911 = vmatpush1.bf16.msra.mxu1 %v28585_v4  ;;  %v24471_v22 = vpop.f32.mrb[67].mxu0  ;;  %21242 = vmatprep.subr.bf16.mxu0 %v28596_v52  ;;  %v28650_v19 = vld [vmem:[%s37688_s5 + $0x134] ss:$8 sps:$4 sm:$0xff]  }
 0xa06   :  { %19921 = vmatprep.subr.bf16.mxu1 %v28593_v11  ;;  %v37062_v45 = vadd.f32 %v24469_v23, %v36963_v41  ;;  %v28612_v41 = vld [vmem:[%s37688_s5 + $0xd0] ss:$8 sps:$4 sm:$0xff]  }
 0xa07   :  { %v28639_v11 = vld [vmem:[%s37686_s3 + $0x2150] ss:$28 sps:$4 sm:$0xff]  }
 0xa08   :  { %19913 = vmatmul.mubr.bf16.vlgmr.msra.gmra.mrb[40].mxu1 %v34570_v10  ;;  %21243 = vmatpush1.bf16.msra.mxu0 %v28594_v51  ;;  %v28608_v10 = vld [vmem:[%s37688_s5 + $0xc4] ss:$8 sps:$4 sm:$0xff]   ;;  %v28648_v22 = vld [vmem:[%s37688_s5 + $0x130] ss:$8 sps:$4 sm:$0xff]  }
 0xa09   :  { %19922 = vmatpush1.bf16.msra.mxu1 %v28591_v56  ;;  %19953 = vmatprep.mubr.bf16.mxu1 %v34575_v18  ;;  %v28603_v18 = vld [vmem:[%s37686_s3 + $0x2000] ss:$28 sps:$4 sm:$0xff]   ;;  %v28647_v56 = vld [vmem:[%s37686_s3 + $0x218c] ss:$28 sps:$4 sm:$0xff]  }
 0xa0a   :  { %19923 = vmatprep.subr.bf16.mxu1 %v28599_v60  ;;  %21244 = vmatprep.subr.bf16.mxu0 %v28602_v63  ;;  %v28645_v60 = vld [vmem:[%s37686_s3 + $0x2188] ss:$28 sps:$4 sm:$0xff]  }
 0xa0b   :  { %v28653_v63 = vld [vmem:[%s37686_s3 + $0x21c4] ss:$28 sps:$4 sm:$0xff]  }
 0xa0c   :  { %21245 = vmatpush1.bf16.msra.mxu0 %v28600_v33  ;;  %v28654_v33 = vld [vmem:[%s37688_s5 + $0x140] ss:$8 sps:$4 sm:$0xff]  }
 0xa0d   :  { %19924 = vmatpush1.bf16.msra.mxu1 %v28597_v7  ;;  %21246 = vmatprep.subr.bf16.mxu0 %v28608_v10  ;;  %v28651_v7 = vld [vmem:[%s37686_s3 + $0x21c0] ss:$28 sps:$4 sm:$0xff]  }
 0xa0e   :  { %19925 = vmatprep.subr.bf16.mxu1 %v28605_v24  ;;  %v28659_v24 = vld [vmem:[%s37686_s3 + $0x21fc] ss:$28 sps:$4 sm:$0xff]  }
 0xa0f   :  { %v28662_v10 = vld [vmem:[%s37688_s5 + $0x154] ss:$8 sps:$4 sm:$0xff]  }
 0xa10   :  { %21247 = vmatpush1.bf16.msra.mxu0 %v28606_v21  ;;  %v28660_v21 = vld [vmem:[%s37688_s5 + $0x150] ss:$8 sps:$4 sm:$0xff]  }
 0xa11   :  { %19926 = vmatpush1.bf16.msra.mxu1 %v28603_v18  ;;  %21248 = vmatprep.subr.bf16.mxu0 %v28614_v59  ;;  %v28657_v18 = vld [vmem:[%s37686_s3 + $0x21f8] ss:$28 sps:$4 sm:$0xff]   ;;  %v28668_v59 = vld [vmem:[%s37688_s5 + $0x164] ss:$8 sps:$4 sm:$0xff]  }
 0xa12   :  { %19927 = vmatprep.subr.bf16.mxu1 %v28611_v34  ;;  %v28665_v34 = vld [vmem:[%s37686_s3 + $0x2234] ss:$28 sps:$4 sm:$0xff]  }
 0xa14   :  { %21249 = vmatpush1.bf16.msra.mxu0 %v28612_v41  ;;  %v28666_v41 = vld [vmem:[%s37688_s5 + $0x160] ss:$8 sps:$4 sm:$0xff]  }
 0xa15   :  { %19928 = vmatpush1.bf16.msra.mxu1 %v28609_v31  ;;  %21250 = vmatprep.subr.bf16.mxu0 %v28620_v8  ;;  %v28663_v31 = vld [vmem:[%s37686_s3 + $0x2230] ss:$28 sps:$4 sm:$0xff]   ;;  %v28669_v8 = vld [vmem:[%s37686_s3 + $0x2268] ss:$28 sps:$4 sm:$0xff]  }
 0xa16   :  { %19929 = vmatprep.subr.bf16.mxu1 %v28617_v29  ;;  %v28671_v29 = vld [vmem:[%s37686_s3 + $0x226c] ss:$28 sps:$4 sm:$0xff]  }
 0xa18   :  { %21251 = vmatpush1.bf16.msra.mxu0 %v28618_v53  ;;  %v28680_v53 = vld [vmem:[%s37688_s5 + $0x184] ss:$8 sps:$4 sm:$0xff]  }
 0xa19   :  { %19930 = vmatpush1.bf16.msra.mxu1 %v28615_v6  ;;  %21252 = vmatprep.subr.bf16.mxu0 %v28626_v48  ;;  %v28677_v6 = vld [vmem:[%s37686_s3 + $0x22a4] ss:$28 sps:$4 sm:$0xff]   ;;  %v28683_v48 = vld [vmem:[%s37686_s3 + $0x22dc] ss:$28 sps:$4 sm:$0xff]  }
 0xa1a   :  { %19931 = vmatprep.subr.bf16.mxu1 %v28623_v43  ;;  %v28675_v43 = vld [vmem:[%s37686_s3 + $0x22a0] ss:$28 sps:$4 sm:$0xff]  }
 0xa1c   :  { %21253 = vmatpush1.bf16.msra.mxu0 %v28624_v38  ;;  %v28684_v38 = vld [vmem:[%s37688_s5 + $0x190] ss:$8 sps:$4 sm:$0xff]  }
 0xa1d   :  { %19932 = vmatpush1.bf16.msra.mxu1 %v28621_v55  ;;  %21263 = vmatprep.subr.bf16.mxu0 %v28632_v27  ;;  %v28681_v55 = vld [vmem:[%s37686_s3 + $0x22d8] ss:$28 sps:$4 sm:$0xff]  }
 0xa1e   :  { %19933 = vmatprep.subr.bf16.mxu1 %v28629_v58  ;;  %v28689_v58 = vld [vmem:[%s37686_s3 + $0x2314] ss:$28 sps:$4 sm:$0xff]  }
 0xa1f   :  { %21255 = vmatmul.mubr.bf16.vlgmr.msra.gmra.mrb[92].mxu0 %v20612_v12 }
 0xa20   :  { %21264 = vmatpush1.bf16.msra.mxu0 %v28630_v16  ;;  %21295 = vmatprep.mubr.bf16.mxu0 %v20615_v28 }
 0xa21   :  { %19934 = vmatpush1.bf16.msra.mxu1 %v28627_v44  ;;  %21265 = vmatprep.subr.bf16.mxu0 %v28638_v62  ;;  %v28687_v44 = vld [vmem:[%s37686_s3 + $0x2310] ss:$28 sps:$4 sm:$0xff]  }
 0xa22   :  { %19935 = vmatprep.subr.bf16.mxu1 %v28635_v15  ;;  %v24489_v4 = vpop.f32.mrb[68].mxu0  ;;  %v28690_v15 = vld [vmem:[%s37688_s5 + $0x1a0] ss:$8 sps:$4 sm:$0xff]  }
 0xa23   :  { %v24490_v13 = vpop.f32.mrb[69].mxu0  ;;  %v28695_v62 = vld [vmem:[%s37686_s3 + $0x234c] ss:$28 sps:$4 sm:$0xff]  }
 0xa24   :  { %v24491_v52 = vadd.f32 %v24490_v13, %v24489_v4  ;;  %v24492_v0 = vpop.f32.mrb[70].mxu0  ;;  %21266 = vmatpush1.bf16.msra.mxu0 %v28636_v36  ;;  %v28701_v4 = vld [vmem:[%s37686_s3 + $0x2384] ss:$28 sps:$4 sm:$0xff]  }
 0xa25   :  { %19936 = vmatpush1.bf16.msra.mxu1 %v28633_v30  ;;  %v24493_v23 = vpop.f32.mrb[71].mxu0  ;;  %21267 = vmatprep.subr.bf16.mxu0 %v28644_v61  ;;  %v28698_v30 = vld [vmem:[%s37688_s5 + $0x1b4] ss:$8 sps:$4 sm:$0xff]   ;;  %v28696_v61 = vld [vmem:[%s37688_s5 + $0x1b0] ss:$8 sps:$4 sm:$0xff]  }
 0xa26   :  { %19937 = vmatprep.subr.bf16.mxu1 %v28641_v47  ;;  %v37174_v51 = vadd.f32 %v24491_v52, %v37062_v45  ;;  %v28656_v45 = vld [vmem:[%s37688_s5 + $0x144] ss:$8 sps:$4 sm:$0xff]   ;;  %v28702_v13 = vld [vmem:[%s37688_s5 + $0x1c0] ss:$8 sps:$4 sm:$0xff]   ;;  %v28710_v52 = vld [vmem:[%s37688_s5 + $0x1d4] ss:$8 sps:$4 sm:$0xff]   ;;  %v11402_v23 = vrot.slane %v37102_v14, %v30409_v46 }
 0xa27   :  { %v28693_v47 = vld [vmem:[%s37686_s3 + $0x2348] ss:$28 sps:$4 sm:$0xff]   ;;  %v28705_v0 = vld [vmem:[%s37686_s3 + $0x23b8] ss:$28 sps:$4 sm:$0xff]  }
 0xa28   :  { %21268 = vmatpush1.bf16.msra.mxu0 %v28642_v42  ;;  %v28708_v42 = vld [vmem:[%s37688_s5 + $0x1d0] ss:$8 sps:$4 sm:$0xff]   ;;  %v28719_v46 = vld [vmem:[%s37686_s3 + $0x242c] ss:$28 sps:$4 sm:$0xff]  }
 0xa29   :  { %19938 = vmatpush1.bf16.msra.mxu1 %v28639_v11  ;;  %21269 = vmatprep.subr.bf16.mxu0 %v28650_v19  ;;  %v28707_v11 = vld [vmem:[%s37686_s3 + $0x23bc] ss:$28 sps:$4 sm:$0xff]   ;;  %v28716_v19 = vld [vmem:[%s37688_s5 + $0x1e4] ss:$8 sps:$4 sm:$0xff]  }
 0xa2a   :  { %19939 = vmatprep.subr.bf16.mxu1 %v28647_v56  ;;  %v28713_v56 = vld [vmem:[%s37686_s3 + $0x23f4] ss:$28 sps:$4 sm:$0xff]  }
 0xa2c   :  { %21270 = vmatpush1.bf16.msra.mxu0 %v28648_v22  ;;  %v24636_v22 = vadd.f32 %v36333_v25, %v11402_v23  ;;  %v28725_v25 = vld [vmem:[%s37686_s3 + $0x2464] ss:$28 sps:$4 sm:$0xff]   ;;  %v28842_v23 = vld [vmem:[%s37688_s5 + $0x294] ss:$8 sps:$4 sm:$0xff]  }
 0xa2d   :  { %19940 = vmatpush1.bf16.msra.mxu1 %v28645_v60  ;;  %21271 = vmatprep.subr.bf16.mxu0 %v28656_v45  ;;  %v28714_v60 = vld [vmem:[%s37688_s5 + $0x1e0] ss:$8 sps:$4 sm:$0xff]  }
 0xa2e   :  { %19941 = vmatprep.subr.bf16.mxu1 %v28653_v63  ;;  %v28722_v63 = vld [vmem:[%s37688_s5 + $0x1f4] ss:$8 sps:$4 sm:$0xff]   ;;  %v28717_v45 = vld [vmem:[%s37686_s3 + $0x2428] ss:$28 sps:$4 sm:$0xff]  }
 0xa30   :  { %21272 = vmatpush1.bf16.msra.mxu0 %v28654_v33  ;;  %v20607_v33 = vmax.f32 %v24636_v22, 0.0 }
 0xa31   :  { %19942 = vmatpush1.bf16.msra.mxu1 %v28651_v7  ;;  %21273 = vmatprep.subr.bf16.mxu0 %v28662_v10  ;;  %v28720_v7 = vld [vmem:[%s37688_s5 + $0x1f0] ss:$8 sps:$4 sm:$0xff]   ;;  %v28723_v10 = vld [vmem:[%s37686_s3 + $0x2460] ss:$28 sps:$4 sm:$0xff]  }
 0xa32   :  { %19943 = vmatprep.subr.bf16.mxu1 %v28659_v24  ;;  %v28815_v24 = vld [vmem:[%s37688_s5 + $0x204] ss:$8 sps:$4 sm:$0xff]  }
 0xa34   :  { %21274 = vmatpush1.bf16.msra.mxu0 %v28660_v21  ;;  %v28813_v21 = vld [vmem:[%s37688_s5 + $0x200] ss:$8 sps:$4 sm:$0xff]  }
 0xa35   :  { %19944 = vmatpush1.bf16.msra.mxu1 %v28657_v18  ;;  %21275 = vmatprep.subr.bf16.mxu0 %v28668_v59  ;;  %v28728_v18 = vld [vmem:[%s37686_s3 + $0x249c] ss:$28 sps:$4 sm:$0xff]  }
 0xa36   :  { %19945 = vmatprep.subr.bf16.mxu1 %v28665_v34  ;;  %v20614_v34 = vpack.c.bf16 %v20607_v33, %v20607_v33  ;;  %v28818_v59 = vld [vmem:[%s37688_s5 + $0x214] ss:$8 sps:$4 sm:$0xff]   ;;  %v28758_v33 = vld [vmem:[%s37686_s3 + $0x26cc] ss:$28 sps:$4 sm:$0xff]  }
 0xa38   :  { %21276 = vmatpush1.bf16.msra.mxu0 %v28666_v41  ;;  %v28731_v41 = vld [vmem:[%s37686_s3 + $0x24d4] ss:$28 sps:$4 sm:$0xff]  }
 0xa39   :  { %19946 = vmatpush1.bf16.msra.mxu1 %v28663_v31  ;;  %21277 = vmatprep.subr.bf16.mxu0 %v28674_v35  ;;  %v28726_v31 = vld [vmem:[%s37686_s3 + $0x2498] ss:$28 sps:$4 sm:$0xff]   ;;  %v28821_v35 = vld [vmem:[%s37688_s5 + $0x224] ss:$8 sps:$4 sm:$0xff]  }
 0xa3a   :  { %19947 = vmatprep.subr.bf16.mxu1 %v28671_v29  ;;  %v28816_v29 = vld [vmem:[%s37688_s5 + $0x210] ss:$8 sps:$4 sm:$0xff]  }
 0xa3c   :  { %21278 = vmatpush1.bf16.msra.mxu0 %v28672_v37 }
 0xa3d   :  { %19948 = vmatpush1.bf16.msra.mxu1 %v28669_v8  ;;  %21279 = vmatprep.subr.bf16.mxu0 %v28680_v53 }
 0xa3e   :  { %19949 = vmatprep.subr.bf16.mxu1 %v28677_v6  ;;  %v28729_v6 = vld [vmem:[%s37686_s3 + $0x24d0] ss:$28 sps:$4 sm:$0xff]  }
 0xa40   :  { %21280 = vmatpush1.bf16.msra.mxu0 %v28678_v39  ;;  %v28734_v39 = vld [vmem:[%s37686_s3 + $0x250c] ss:$28 sps:$4 sm:$0xff]  }
 0xa41   :  { %19950 = vmatpush1.bf16.msra.mxu1 %v28675_v43  ;;  %21281 = vmatprep.subr.bf16.mxu0 %v28686_v54 }
 0xa42   :  { %19951 = vmatprep.subr.bf16.mxu1 %v28683_v48  ;;  %v24511_v27 = vpop.f32.mrb[72].mxu0  ;;  %v28819_v48 = vld [vmem:[%s37688_s5 + $0x220] ss:$8 sps:$4 sm:$0xff]  }
 0xa43   :  { %v24512_v49 = vpop.f32.mrb[73].mxu0 }
 0xa44   :  { %v24513_v16 = vadd.f32 %v24512_v49, %v24511_v27  ;;  %v24514_v12 = vpop.f32.mrb[74].mxu0  ;;  %21282 = vmatpush1.bf16.msra.mxu0 %v28684_v38  ;;  %v28822_v27 = vld [vmem:[%s37688_s5 + $0x230] ss:$8 sps:$4 sm:$0xff]   ;;  %v28827_v49 = vld [vmem:[%s37688_s5 + $0x244] ss:$8 sps:$4 sm:$0xff]  }
 0xa45   :  { %19952 = vmatpush1.bf16.msra.mxu1 %v28681_v55  ;;  %v24515_v28 = vpop.f32.mrb[75].mxu0  ;;  %21283 = vmatprep.subr.bf16.mxu0 %v28692_v2  ;;  %v28824_v55 = vld [vmem:[%s37688_s5 + $0x234] ss:$8 sps:$4 sm:$0xff]   ;;  %v28737_v2 = vld [vmem:[%s37686_s3 + $0x2544] ss:$28 sps:$4 sm:$0xff]  }
 0xa46   :  { %19962 = vmatprep.subr.bf16.mxu1 %v28689_v58  ;;  %v37273_v36 = vadd.f32 %v24513_v16, %v37174_v51  ;;  %v28711_v51 = vld [vmem:[%s37686_s3 + $0x23f0] ss:$28 sps:$4 sm:$0xff]   ;;  %v28732_v58 = vld [vmem:[%s37686_s3 + $0x2508] ss:$28 sps:$4 sm:$0xff]   ;;  %v28740_v16 = vld [vmem:[%s37686_s3 + $0x257c] ss:$28 sps:$4 sm:$0xff]  }
 0xa47   :  { %v28825_v12 = vld [vmem:[%s37688_s5 + $0x240] ss:$8 sps:$4 sm:$0xff]   ;;  %v28743_v28 = vld [vmem:[%s37686_s3 + $0x25b4] ss:$28 sps:$4 sm:$0xff]  }
 0xa48   :  { %19954 = vmatmul.mubr.bf16.vlgmr.msra.gmra.mrb[40].mxu1 %v34781_v9  ;;  %21284 = vmatpush1.bf16.msra.mxu0 %v28690_v15  ;;  %v28704_v9 = vld [vmem:[%s37688_s5 + $0x1c4] ss:$8 sps:$4 sm:$0xff]   ;;  %v28830_v15 = vld [vmem:[%s37688_s5 + $0x254] ss:$8 sps:$4 sm:$0xff]  }
 0xa49   :  { %19963 = vmatpush1.bf16.msra.mxu1 %v28687_v44  ;;  %19994 = vmatprep.mubr.bf16.mxu1 %v34786_v50  ;;  %v28699_v50 = vld [vmem:[%s37686_s3 + $0x2380] ss:$28 sps:$4 sm:$0xff]  }
 0xa4a   :  { %19964 = vmatprep.subr.bf16.mxu1 %v28695_v62  ;;  %21285 = vmatprep.subr.bf16.mxu0 %v28698_v30  ;;  %v28735_v44 = vld [vmem:[%s37686_s3 + $0x2540] ss:$28 sps:$4 sm:$0xff]   ;;  %v28738_v62 = vld [vmem:[%s37686_s3 + $0x2578] ss:$28 sps:$4 sm:$0xff]  }
 0xa4b   :  { %v28828_v30 = vld [vmem:[%s37688_s5 + $0x250] ss:$8 sps:$4 sm:$0xff]  }
 0xa4c   :  { %21286 = vmatpush1.bf16.msra.mxu0 %v28696_v61  ;;  %v28746_v61 = vld [vmem:[%s37686_s3 + $0x25ec] ss:$28 sps:$4 sm:$0xff]  }
 0xa4d   :  { %19965 = vmatpush1.bf16.msra.mxu1 %v28693_v47  ;;  %21287 = vmatprep.subr.bf16.mxu0 %v28704_v9  ;;  %v28741_v47 = vld [vmem:[%s37686_s3 + $0x25b0] ss:$28 sps:$4 sm:$0xff]   ;;  %v28836_v9 = vld [vmem:[%s37688_s5 + $0x274] ss:$8 sps:$4 sm:$0xff]  }
 0xa4e   :  { %19966 = vmatprep.subr.bf16.mxu1 %v28701_v4  ;;  %v28831_v4 = vld [vmem:[%s37688_s5 + $0x260] ss:$8 sps:$4 sm:$0xff]  }
 0xa50   :  { %21288 = vmatpush1.bf16.msra.mxu0 %v28702_v13  ;;  %v28749_v13 = vld [vmem:[%s37686_s3 + $0x2624] ss:$28 sps:$4 sm:$0xff]  }
 0xa51   :  { %19967 = vmatpush1.bf16.msra.mxu1 %v28699_v50  ;;  %21289 = vmatprep.subr.bf16.mxu0 %v28710_v52  ;;  %v28744_v50 = vld [vmem:[%s37686_s3 + $0x25e8] ss:$28 sps:$4 sm:$0xff]  }
 0xa52   :  { %19968 = vmatprep.subr.bf16.mxu1 %v28707_v11  ;;  %v28834_v11 = vld [vmem:[%s37688_s5 + $0x270] ss:$8 sps:$4 sm:$0xff]   ;;  %v28839_v52 = vld [vmem:[%s37688_s5 + $0x284] ss:$8 sps:$4 sm:$0xff]  }
 0xa54   :  { %21290 = vmatpush1.bf16.msra.mxu0 %v28708_v42  ;;  %v28752_v42 = vld [vmem:[%s37686_s3 + $0x265c] ss:$28 sps:$4 sm:$0xff]  }
 0xa55   :  { %19969 = vmatpush1.bf16.msra.mxu1 %v28705_v0  ;;  %21291 = vmatprep.subr.bf16.mxu0 %v28716_v19  ;;  %v28747_v0 = vld [vmem:[%s37686_s3 + $0x2620] ss:$28 sps:$4 sm:$0xff]   ;;  %v28750_v19 = vld [vmem:[%s37686_s3 + $0x2658] ss:$28 sps:$4 sm:$0xff]  }
 0xa56   :  { %19970 = vmatprep.subr.bf16.mxu1 %v28713_v56  ;;  %v28837_v56 = vld [vmem:[%s37688_s5 + $0x280] ss:$8 sps:$4 sm:$0xff]  }
 0xa58   :  { %21292 = vmatpush1.bf16.msra.mxu0 %v28714_v60  ;;  %v28840_v60 = vld [vmem:[%s37688_s5 + $0x290] ss:$8 sps:$4 sm:$0xff]  }
 0xa59   :  { %19971 = vmatpush1.bf16.msra.mxu1 %v28711_v51  ;;  %21293 = vmatprep.subr.bf16.mxu0 %v28722_v63  ;;  %v28755_v51 = vld [vmem:[%s37686_s3 + $0x2694] ss:$28 sps:$4 sm:$0xff]  }
 0xa5a   :  { %19972 = vmatprep.subr.bf16.mxu1 %v28719_v46  ;;  %v28845_v46 = vld [vmem:[%s37688_s5 + $0x2a4] ss:$8 sps:$4 sm:$0xff]  }
 0xa5c   :  { %21294 = vmatpush1.bf16.msra.mxu0 %v28720_v7 }
 0xa5d   :  { %19973 = vmatpush1.bf16.msra.mxu1 %v28717_v45  ;;  %21304 = vmatprep.subr.bf16.mxu0 %v28815_v24  ;;  %v28753_v45 = vld [vmem:[%s37686_s3 + $0x2690] ss:$28 sps:$4 sm:$0xff]   ;;  %v28843_v24 = vld [vmem:[%s37688_s5 + $0x2a0] ss:$8 sps:$4 sm:$0xff]  }
 0xa5e   :  { %19974 = vmatprep.subr.bf16.mxu1 %v28725_v25 }
 0xa5f   :  { %21296 = vmatmul.mubr.bf16.vlgmr.msra.gmra.mrb[92].mxu0 %v20614_v34  ;;  %v28756_v34 = vld [vmem:[%s37686_s3 + $0x26c8] ss:$28 sps:$4 sm:$0xff]  }
 0xa60   :  { %21305 = vmatpush1.bf16.msra.mxu0 %v28813_v21 }
 0xa61   :  { %19975 = vmatpush1.bf16.msra.mxu1 %v28723_v10  ;;  %21306 = vmatprep.subr.bf16.mxu0 %v28818_v59  ;;  %v28761_v59 = vld [vmem:[%s37686_s3 + $0x2704] ss:$28 sps:$4 sm:$0xff]  }
 0xa62   :  { %19976 = vmatprep.subr.bf16.mxu1 %v28728_v18  ;;  %v24533_v8 = vpop.f32.mrb[76].mxu0  ;;  %v28848_v18 = vld [vmem:[%s37688_s5 + $0x2b4] ss:$8 sps:$4 sm:$0xff]  }
 0xa63   :  { %v24534_v37 = vpop.f32.mrb[77].mxu0 }
 0xa64   :  { %v24535_v53 = vadd.f32 %v24534_v37, %v24533_v8  ;;  %v24536_v43 = vpop.f32.mrb[78].mxu0  ;;  %21307 = vmatpush1.bf16.msra.mxu0 %v28816_v29  ;;  %v28849_v29 = vld [vmem:[%s37688_s5 + $0x2c0] ss:$8 sps:$4 sm:$0xff]   ;;  %v28762_v8 = vld [vmem:[%s37686_s3 + $0x2738] ss:$28 sps:$4 sm:$0xff]  }
 0xa65   :  { %19977 = vmatpush1.bf16.msra.mxu1 %v28726_v31  ;;  %v24537_v54 = vpop.f32.mrb[79].mxu0  ;;  %21308 = vmatprep.subr.bf16.mxu0 %v28821_v35  ;;  %v28846_v31 = vld [vmem:[%s37688_s5 + $0x2b0] ss:$8 sps:$4 sm:$0xff]   ;;  %v28854_v35 = vld [vmem:[%s37688_s5 + $0x2d4] ss:$8 sps:$4 sm:$0xff]  }
 0xa66   :  { %19978 = vmatprep.subr.bf16.mxu1 %v28731_v41  ;;  %v37377_v38 = vadd.f32 %v24535_v53, %v37273_v36  ;;  %v28833_v36 = vld [vmem:[%s37688_s5 + $0x264] ss:$8 sps:$4 sm:$0xff]   ;;  %v28764_v41 = vld [vmem:[%s37686_s3 + $0x273c] ss:$28 sps:$4 sm:$0xff]   ;;  %v28767_v37 = vld [vmem:[%s37686_s3 + $0x2774] ss:$28 sps:$4 sm:$0xff]  }
 0xa67   :  { %v28765_v53 = vld [vmem:[%s37686_s3 + $0x2770] ss:$28 sps:$4 sm:$0xff]   ;;  %v28771_v54 = vld [vmem:[%s37686_s3 + $0x27e0] ss:$28 sps:$4 sm:$0xff]  }
 0xa68   :  { %21309 = vmatpush1.bf16.msra.mxu0 %v28819_v48  ;;  %v28770_v43 = vld [vmem:[%s37686_s3 + $0x27ac] ss:$28 sps:$4 sm:$0xff]   ;;  %v28773_v48 = vld [vmem:[%s37686_s3 + $0x27e4] ss:$28 sps:$4 sm:$0xff]  }
 0xa69   :  { %19979 = vmatpush1.bf16.msra.mxu1 %v28729_v6  ;;  %21310 = vmatprep.subr.bf16.mxu0 %v28824_v55  ;;  %v28852_v6 = vld [vmem:[%s37688_s5 + $0x2d0] ss:$8 sps:$4 sm:$0xff]  }
 0xa6a   :  { %19980 = vmatprep.subr.bf16.mxu1 %v28734_v39  ;;  %v28768_v39 = vld [vmem:[%s37686_s3 + $0x27a8] ss:$28 sps:$4 sm:$0xff]   ;;  %v28776_v55 = vld [vmem:[%s37686_s3 + $0x281c] ss:$28 sps:$4 sm:$0xff]  }
 0xa6c   :  { %21311 = vmatpush1.bf16.msra.mxu0 %v28822_v27 }
 0xa6d   :  { %19981 = vmatpush1.bf16.msra.mxu1 %v28732_v58  ;;  %21312 = vmatprep.subr.bf16.mxu0 %v28827_v49  ;;  %v28779_v58 = vld [vmem:[%s37686_s3 + $0x2854] ss:$28 sps:$4 sm:$0xff]  }
 0xa6e   :  { %19982 = vmatprep.subr.bf16.mxu1 %v28737_v2  ;;  %v28777_v49 = vld [vmem:[%s37686_s3 + $0x2850] ss:$28 sps:$4 sm:$0xff]  }
 0xa70   :  { %21313 = vmatpush1.bf16.msra.mxu0 %v28825_v12  ;;  %v28782_v12 = vld [vmem:[%s37686_s3 + $0x288c] ss:$28 sps:$4 sm:$0xff]  }
 0xa71   :  { %19983 = vmatpush1.bf16.msra.mxu1 %v28735_v44  ;;  %21314 = vmatprep.subr.bf16.mxu0 %v28830_v15 }
 0xa72   :  { %19984 = vmatprep.subr.bf16.mxu1 %v28740_v16 }
 0xa74   :  { %21315 = vmatpush1.bf16.msra.mxu0 %v28828_v30  ;;  %v28785_v30 = vld [vmem:[%s37686_s3 + $0x28c4] ss:$28 sps:$4 sm:$0xff]  }
 0xa75   :  { %19985 = vmatpush1.bf16.msra.mxu1 %v28738_v62  ;;  %21316 = vmatprep.subr.bf16.mxu0 %v28833_v36  ;;  %v28783_v36 = vld [vmem:[%s37686_s3 + $0x28c0] ss:$28 sps:$4 sm:$0xff]  }
 0xa76   :  { %19986 = vmatprep.subr.bf16.mxu1 %v28743_v28  ;;  %v28780_v28 = vld [vmem:[%s37686_s3 + $0x2888] ss:$28 sps:$4 sm:$0xff]  }
 0xa78   :  { %21317 = vmatpush1.bf16.msra.mxu0 %v28831_v4  ;;  %v28791_v4 = vld [vmem:[%s37686_s3 + $0x2934] ss:$28 sps:$4 sm:$0xff]  }
 0xa79   :  { %19987 = vmatpush1.bf16.msra.mxu1 %v28741_v47  ;;  %21318 = vmatprep.subr.bf16.mxu0 %v28836_v9  ;;  %v28788_v47 = vld [vmem:[%s37686_s3 + $0x28fc] ss:$28 sps:$4 sm:$0xff]  }
 0xa7a   :  { %19988 = vmatprep.subr.bf16.mxu1 %v28746_v61  ;;  %v28786_v61 = vld [vmem:[%s37686_s3 + $0x28f8] ss:$28 sps:$4 sm:$0xff]  }
 0xa7c   :  { %21319 = vmatpush1.bf16.msra.mxu0 %v28834_v11  ;;  %v28789_v11 = vld [vmem:[%s37686_s3 + $0x2930] ss:$28 sps:$4 sm:$0xff]  }
 0xa7d   :  { %19989 = vmatpush1.bf16.msra.mxu1 %v28744_v50  ;;  %21320 = vmatprep.subr.bf16.mxu0 %v28839_v52 }
 0xa7e   :  { %19990 = vmatprep.subr.bf16.mxu1 %v28749_v13 }
 0xa80   :  { %21321 = vmatpush1.bf16.msra.mxu0 %v28837_v56  ;;  %v28792_v56 = vld [vmem:[%s37686_s3 + $0x2968] ss:$28 sps:$4 sm:$0xff]  }
 0xa81   :  { %19991 = vmatpush1.bf16.msra.mxu1 %v28747_v0  ;;  %21322 = vmatprep.subr.bf16.mxu0 %v28842_v23  ;;  %v28794_v0 = vld [vmem:[%s37686_s3 + $0x296c] ss:$28 sps:$4 sm:$0xff]   ;;  %v28797_v23 = vld [vmem:[%s37686_s3 + $0x29a4] ss:$28 sps:$4 sm:$0xff]  }
 0xa82   :  { %19992 = vmatprep.subr.bf16.mxu1 %v28752_v42  ;;  %v24555_v22 = vpop.f32.mrb[80].mxu0 }
 0xa83   :  { %v24556_v63 = vpop.f32.mrb[81].mxu0 }
 0xa84   :  { %v24557_v7 = vadd.f32 %v24556_v63, %v24555_v22  ;;  %v24558_v25 = vpop.f32.mrb[82].mxu0  ;;  %21323 = vmatpush1.bf16.msra.mxu0 %v28840_v60  ;;  %v28798_v60 = vld [vmem:[%s37686_s3 + $0x29d8] ss:$28 sps:$4 sm:$0xff]   ;;  %v28801_v22 = vld [vmem:[%s37686_s3 + $0x2a10] ss:$28 sps:$4 sm:$0xff]  }
 0xa85   :  { %19993 = vmatpush1.bf16.msra.mxu1 %v28750_v19  ;;  %v24559_v10 = vpop.f32.mrb[83].mxu0  ;;  %21324 = vmatprep.subr.bf16.mxu0 %v28845_v46  ;;  %v28795_v19 = vld [vmem:[%s37686_s3 + $0x29a0] ss:$28 sps:$4 sm:$0xff]   ;;  %v28803_v46 = vld [vmem:[%s37686_s3 + $0x2a14] ss:$28 sps:$4 sm:$0xff]  }
 0xa86   :  { %20003 = vmatprep.subr.bf16.mxu1 %v28755_v51  ;;  %v20520_v21 = vadd.f32 %v24557_v7, %v37377_v38  ;;  %v28774_v38 = vld [vmem:[%s37686_s3 + $0x2818] ss:$28 sps:$4 sm:$0xff]   ;;  %v28806_v63 = vld [vmem:[%s37686_s3 + $0x2a4c] ss:$28 sps:$4 sm:$0xff]   ;;  %v28809_v7 = vld [vmem:[%s37686_s3 + $0x2a84] ss:$28 sps:$4 sm:$0xff]  }
 0xa87   :  { %v28800_v51 = vld [vmem:[%s37686_s3 + $0x29dc] ss:$28 sps:$4 sm:$0xff]   ;;  %v28855_v10 = vld [vmem:[%s37688_s5 + $0x2e0] ss:$8 sps:$4 sm:$0xff]  }
 0xa88   :  { %19995 = vmatmul.mubr.bf16.vlgmr.msra.gmra.mrb[40].mxu1 %v34984_v5  ;;  %21325 = vmatpush1.bf16.msra.mxu0 %v28843_v24  ;;  %v28851_v5 = vld [vmem:[%s37688_s5 + $0x2c4] ss:$8 sps:$4 sm:$0xff]   ;;  %v28807_v25 = vld [vmem:[%s37686_s3 + $0x2a80] ss:$28 sps:$4 sm:$0xff]  }
 0xa89   :  { %20004 = vmatpush1.bf16.msra.mxu1 %v28753_v45  ;;  %20035 = vmatprep.mubr.bf16.mxu1 %v34992_v26  ;;  %v28759_v26 = vld [vmem:[%s37686_s3 + $0x2700] ss:$28 sps:$4 sm:$0xff]   ;;  %v28804_v45 = vld [vmem:[%s37686_s3 + $0x2a48] ss:$28 sps:$4 sm:$0xff]  }
 0xa8a   :  { %20005 = vmatprep.subr.bf16.mxu1 %v28758_v33  ;;  %21326 = vmatprep.subr.bf16.mxu0 %v28848_v18  ;;  %v28810_v33 = vld [vmem:[%s37686_s3 + $0x2ab8] ss:$28 sps:$4 sm:$0xff]   ;;  %v28857_v24 = vld [vmem:[%s37688_s5 + $0x2e4] ss:$8 sps:$4 sm:$0xff]  }
 0xa8b   :  { %v28860_v18 = vld [vmem:[%s37688_s5 + $0x2f4] ss:$8 sps:$4 sm:$0xff]  }
 0xa8c   :  { %21327 = vmatpush1.bf16.msra.mxu0 %v28846_v31 }
 0xa8d   :  { %20006 = vmatpush1.bf16.msra.mxu1 %v28756_v34  ;;  %21328 = vmatprep.subr.bf16.mxu0 %v28851_v5  ;;  %v11410_v34 = vrot.slane %v37102_v14, %v33235_v3  ;;  %v28864_v3 = vld [vmem:[%s37689_s7] sm:$0xff]  }
 0xa8e   :  { %20007 = vmatprep.subr.bf16.mxu1 %v28761_v59  ;;  %v11414_v59 = vrot.slane %v37102_v14, %v33025_v40 }
 0xa90   :  { %21329 = vmatpush1.bf16.msra.mxu0 %v28849_v29 }
 0xa91   :  { %20008 = vmatpush1.bf16.msra.mxu1 %v28759_v26  ;;  %21330 = vmatprep.subr.bf16.mxu0 %v28854_v35 }
 0xa92   :  { %20009 = vmatprep.subr.bf16.mxu1 %v28764_v41 }
 0xa94   :  { %21331 = vmatpush1.bf16.msra.mxu0 %v28852_v6 }
 0xa95   :  { %20010 = vmatpush1.bf16.msra.mxu1 %v28762_v8  ;;  %21332 = vmatprep.subr.bf16.mxu0 %v28857_v24 }
 0xa96   :  { %20011 = vmatprep.subr.bf16.mxu1 %v28767_v37 }
 0xa98   :  { %21333 = vmatpush1.bf16.msra.mxu0 %v28855_v10 }
 0xa99   :  { %20012 = vmatpush1.bf16.msra.mxu1 %v28765_v53  ;;  %21334 = vmatprep.subr.bf16.mxu0 %v28860_v18  ;;  %v28861_v53 = vld [vmem:[%s37688_s5 + $0x300] ss:$8 sps:$4 sm:$0xff]  }
 0xa9a   :  { %20013 = vmatprep.subr.bf16.mxu1 %v28770_v43 }
 0xa9d   :  { %20014 = vmatpush1.bf16.msra.mxu1 %v28768_v39  ;;  %v28865_v39 = vld [vmem:[%s37689_s7 + $0x8] sm:$0xff]  }
 0xa9e   :  { %20015 = vmatprep.subr.bf16.mxu1 %v28773_v48  ;;  %v28866_v48 = vld [vmem:[%s37689_s7 + $0x10] sm:$0xff]  }
 0xaa1   :  { %20016 = vmatpush1.bf16.msra.mxu1 %v28771_v54  ;;  %v28867_v54 = vld [vmem:[%s37689_s7 + $0x18] sm:$0xff]  }
 0xaa2   :  { %20017 = vmatprep.subr.bf16.mxu1 %v28776_v55  ;;  %v24577_v2 = vpop.f32.mrb[84].mxu0  ;;  %v28868_v55 = vld [vmem:[%s37689_s7 + $0x20] sm:$0xff]  }
 0xaa3   :  { %v24578_v27 = vpop.f32.mrb[85].mxu0 }
 0xaa4   :  { %v24579_v44 = vadd.f32 %v24578_v27, %v24577_v2  ;;  %v24580_v16 = vpop.f32.mrb[86].mxu0  ;;  %v28871_v2 = vld [vmem:[%s37689_s7 + $0x38] sm:$0xff]   ;;  %v28872_v27 = vld [vmem:[%s37689_s7 + $0x40] sm:$0xff]  }
 0xaa5   :  { %20018 = vmatpush1.bf16.msra.mxu1 %v28774_v38  ;;  %v24581_v15 = vpop.f32.mrb[87].mxu0  ;;  %v28869_v38 = vld [vmem:[%s37689_s7 + $0x28] sm:$0xff]  }
 0xaa6   :  { %20019 = vmatprep.subr.bf16.mxu1 %v28779_v58  ;;  %v20560_v62 = vadd.f32 %v24579_v44, %v20520_v21  ;;  %v28858_v21 = vld [vmem:[%s37688_s5 + $0x2f0] ss:$8 sps:$4 sm:$0xff]   ;;  %v20717_v44 = vld [vmem:[%s37690_s6] sm:$0x3] }
 0xaa7   :  { %21335 = vmatpush1.bf16.msra.mxu0 %v28858_v21  ;;  %v28870_v58 = vld [vmem:[%s37689_s7 + $0x30] sm:$0xff]   ;;  %v20722_v16 = vrot.slane %v20717_v44, %v30199_v17 }
 0xaa9   :  { %20020 = vmatpush1.bf16.msra.mxu1 %v28777_v49  ;;  %v28873_v49 = vld [vmem:[%s37689_s7 + $0x48] sm:$0xff]  }
 0xaaa   :  { %20021 = vmatprep.subr.bf16.mxu1 %v28782_v12  ;;  %v20726_v12 = vrot.slane %v20717_v44, %v30210_v20 }
 0xaad   :  { %20022 = vmatpush1.bf16.msra.mxu1 %v28780_v28 }
 0xaae   :  { %20023 = vmatprep.subr.bf16.mxu1 %v28785_v30 }
 0xab1   :  { %20024 = vmatpush1.bf16.msra.mxu1 %v28783_v36 }
 0xab2   :  { %20025 = vmatprep.subr.bf16.mxu1 %v28788_v47  ;;  %v20599_v9 = vpop.f32.mrb[88].mxu0 }
 0xab3   :  { %v37559_v50 = vadd.f32 %v20599_v9, %v20560_v62  ;;  %v24604_v13 = vpop.f32.mrb[89].mxu0 }
 0xab4   :  { %v20602_v52 = vpop.f32.mrb[90].mxu0 }
 0xab5   :  { %20026 = vmatpush1.bf16.msra.mxu1 %v28786_v61  ;;  %v24605_v42 = vpop.f32.mrb[91].mxu0  ;;  %v20611_v40 = vmax.f32 %v37559_v50, 0.0 }
 0xab6   :  { %20027 = vmatprep.subr.bf16.mxu1 %v28791_v4 }
 0xab7   :  { %v20618_v14 = vpack.c.bf16 %v20611_v40, %v20611_v40 }
 0xab9   :  { %20028 = vmatpush1.bf16.msra.mxu1 %v28789_v11 }
 0xaba   :  { %20029 = vmatprep.subr.bf16.mxu1 %v28794_v0 }
 0xabd   :  { %20030 = vmatpush1.bf16.msra.mxu1 %v28792_v56 }
 0xabe   :  { %20031 = vmatprep.subr.bf16.mxu1 %v28797_v23 }
 0xac1   :  { %20032 = vmatpush1.bf16.msra.mxu1 %v28795_v19 }
 0xac2   :  { %20033 = vmatprep.subr.bf16.mxu1 %v28800_v51 }
 0xac5   :  { %20034 = vmatpush1.bf16.msra.mxu1 %v28798_v60 }
 0xac6   :  { %20044 = vmatprep.subr.bf16.mxu1 %v28803_v46 }
 0xac8   :  { %20036 = vmatmul.mubr.bf16.vlgmr.msra.gmra.mrb[40].mxu1 %v35187_v57  ;;  %v28812_v57 = vld [vmem:[%s37686_s3 + $0x2abc] ss:$28 sps:$4 sm:$0xff]  }
 0xac9   :  { %20045 = vmatpush1.bf16.msra.mxu1 %v28801_v22  ;;  %20076 = vmatprep.mubr.bf16.mxu1 %v28886_v1 }
 0xaca   :  { %20046 = vmatprep.subr.bf16.mxu1 %v28806_v63 }
 0xacd   :  { %20047 = vmatpush1.bf16.msra.mxu1 %v28804_v45 }
 0xace   :  { %20048 = vmatprep.subr.bf16.mxu1 %v28809_v7 }
 0xad1   :  { %20049 = vmatpush1.bf16.msra.mxu1 %v28807_v25 }
 0xad2   :  { %20050 = vmatprep.subr.bf16.mxu1 %v28812_v57 }
 0xad5   :  { %20051 = vmatpush1.bf16.msra.mxu1 %v28810_v33 }
 0xad8   :  { %24139 = vmatmul.mubr.msk.bf16.vlgmr.msra.gmra.mrb[40].mxu1 %vm18482_vm2, %v35242_v32  ;;  %v28863_v32 = vld [vmem:[%s37688_s5 + $0x304] ss:$8 sps:$4 sm:$0xff]  }
 0xad9   :  { %21345 = vmatprep.subr.bf16.mxu0 %v28863_v32 }
 0xbab   :  { %v20078_v31 = vpop.f32.mrb[40].mxu1 }
 0xbac   :  { %v24638_v5 = vadd.f32 %v20078_v31, %v11410_v34  ;;  %v20080_v26 = vpop.f32.mrb[41].mxu1 }
 0xbad   :  { %v24639_v41 = vadd.f32 %v20080_v26, %v11414_v59  ;;  %v20082_v29 = vpop.f32.mrb[42].mxu1 }
 0xbae   :  { %v20609_v35 = vmax.f32 %v24638_v5, 0.0  ;;  %v20083_v8 = vpop.f32.mrb[43].mxu1 }
 0xbaf   :  { %v20610_v37 = vmax.f32 %v24639_v41, 0.0 }
 0xbb0   :  { %v20616_v43 = vpack.c.bf16 %v20609_v35, %v20609_v35 }
 0xbb1   :  { %v20617_v6 = vpack.c.bf16 %v20610_v37, %v20610_v37 }
 0xbb3   :  { %21336 = vmatprep.mubr.bf16.mxu0 %v20617_v6 }
 0xbb4   :  { %21337 = vmatmul.mubr.bf16.vlgmr.msra.gmra.mrb[92].mxu0 %v20616_v43 }
 0xbb5   :  { %21346 = vmatpush1.bf16.msra.mxu0 %v28861_v53  ;;  %21377 = vmatprep.mubr.bf16.mxu0 %v28886_v1 }
 0xbb6   :  { %21474 = vmatprep.subr.bf16.mxu0 %v28886_v1 }
 0xbc0   :  { %24239 = vmatmul.mubr.msk.bf16.vlgmr.msra.gmra.mrb[92].mxu0 %vm7639_vm0, %v20618_v14 }
 0xbc1   :  { %21475 = vmatpush1.bf16.msra.mxu0 %v28864_v3 }
 0xbc2   :  { %21476 = vmatprep.subr.bf16.mxu0 %v28886_v1 }
 0xbc5   :  { %21477 = vmatpush1.bf16.msra.mxu0 %v28865_v39 }
 0xbc6   :  { %21478 = vmatprep.subr.bf16.mxu0 %v28886_v1 }
 0xbc9   :  { %21479 = vmatpush1.bf16.msra.mxu0 %v28866_v48 }
 0xbca   :  { %21480 = vmatprep.subr.bf16.mxu0 %v28886_v1 }
 0xbcd   :  { %21481 = vmatpush1.bf16.msra.mxu0 %v28867_v54 }
 0xbce   :  { %21482 = vmatprep.subr.bf16.mxu0 %v28886_v1 }
 0xbd1   :  { %21483 = vmatpush1.bf16.msra.mxu0 %v28868_v55 }
 0xbd2   :  { %21484 = vmatprep.subr.bf16.mxu0 %v28886_v1 }
 0xbd5   :  { %21485 = vmatpush1.bf16.msra.mxu0 %v28869_v38 }
 0xbd6   :  { %21486 = vmatprep.subr.bf16.mxu0 %v28886_v1 }
 0xbd9   :  { %21487 = vmatpush1.bf16.msra.mxu0 %v28870_v58 }
 0xbda   :  { %21488 = vmatprep.subr.bf16.mxu0 %v28886_v1 }
 0xbdd   :  { %21489 = vmatpush1.bf16.msra.mxu0 %v28871_v2 }
 0xbde   :  { %21490 = vmatprep.subr.bf16.mxu0 %v28886_v1 }
 0xbe1   :  { %21491 = vmatpush1.bf16.msra.mxu0 %v28872_v27 }
 0xbe2   :  { %21492 = vmatprep.subr.bf16.mxu0 %v28886_v1 }
 0xbe5   :  { %21493 = vmatpush1.bf16.msra.mxu0 %v28873_v49 }
 0xc93   :  { %v21379_v15 = vpop.f32.mrb[92].mxu0 }
 0xc94   :  { %v24640_v62 = vadd.f32 %v21379_v15, %v20722_v16  ;;  %v21381_v28 = vpop.f32.mrb[93].mxu0 }
 0xc95   :  { %v24641_v30 = vadd.f32 %v21381_v28, %v20726_v12  ;;  %v21383_v36 = vpop.f32.mrb[94].mxu0 }
 0xc96   :  { %v21386_v47 = vmax.f32 %v24640_v62, 0.0  ;;  %v21384_v1 = vpop.f32.mrb[95].mxu0 }
 0xc97   :  { %v21387_v61 = vmax.f32 %v24641_v30, 0.0 }
 0xc98   :  { %v21388_v9 = vpack.c.bf16 %v21386_v47, %v21386_v47 }
 0xc99   :  { %v21389_v4 = vpack.c.bf16 %v21387_v61, %v21387_v61 }
 0xc9b   :  { %24250 = vmatprep.mubr.msk.bf16.mxu0 %vm21470_vm3, %v21389_v4 }
 0xc9c   :  { %21507 = vmatmul.mubr.bf16.vlgmr.msra.gmra.mrb[96].mxu0 %v21388_v9 }
 0xd6f   :  { %v21508_v50 = vpop.f32.mrb[96].mxu0 }
 0xd70   :  { %21514 = vst [vmem:[%s37691_s8] sm:$0xff] %v21508_v50  ;;  %v21510_v17 = vpop.f32.mrb[97].mxu0 }
 0xd71   :  { %v21511_v20 = vpop.f32.mrb[98].mxu0 }
 0xd72   :  { %v21512_v13 = vpop.f32.mrb[99].mxu0 }

</bundles_post_ra>
